<compile_context>
chip_gen: v6e
topology: v6e:2x2x1
jax: 0.10.0
libtpu: 0.0.40
codegen_flags: <defaults>
</compile_context>

<pallas_src>
import numpy as np
import jax
import jax.numpy as jnp
from jax import lax
from jax.experimental import pallas as pl
from jax.experimental.pallas import tpu as pltpu


# --------------------------------------------------------------------------- #
# constant linear operators (built once with NumPy — glue, not compute)
# --------------------------------------------------------------------------- #
def _avgpool_matrix(in_h, in_w, k):
    """(out_h*out_w, in_h*in_w) matrix implementing AvgPool2d(k) (stride=k, floor)."""
    out_h, out_w = in_h // k, in_w // k
    P = np.zeros((out_h * out_w, in_h * in_w), np.float32)
    for ph in range(out_h):
        for pw in range(out_w):
            for i in range(k):
                for j in range(k):
                    P[ph * out_w + pw, (ph * k + i) * in_w + (pw * k + j)] = 1.0 / (k * k)
    return P


def _tap_select_matrices(in_h, in_w, k, pad):
    """(k*k, out_h*out_w, in_h*in_w) one-hot matrices: replicate-pad + im2col per tap."""
    out_h = in_h + 2 * pad - k + 1
    out_w = in_w + 2 * pad - k + 1
    S = np.zeros((k * k, out_h * out_w, in_h * in_w), np.float32)
    for ky in range(k):
        for kx in range(k):
            t = ky * k + kx
            for oh in range(out_h):
                for ow in range(out_w):
                    r = min(max(oh + ky - pad, 0), in_h - 1)
                    c = min(max(ow + kx - pad, 0), in_w - 1)
                    S[t, oh * out_w + ow, r * in_w + c] = 1.0
    return S


def _block_diag(block, n):
    """Block-diagonal repetition of `block` n times (covers the whole batch)."""
    r, c = block.shape
    out = np.zeros((n * r, n * c), np.float32)
    for i in range(n):
        out[i * r:(i + 1) * r, i * c:(i + 1) * c] = block
    return out


def _im2col(xp, k, out_h, out_w):
    """xp: (B, PH, PW, C) padded input -> (B, out_h*out_w, k*k*C); feature order (ky,kx,c)."""
    b, _, _, c = xp.shape
    slices = [xp[:, ky:ky + out_h, kx:kx + out_w, :] for ky in range(k) for kx in range(k)]
    p = jnp.stack(slices, axis=3)                           # (B, OH, OW, k*k, C)
    return p.reshape(b, out_h * out_w, k * k * c)


# --------------------------------------------------------------------------- #
# Pallas kernel: whole forward (all batch elements) in a single invocation
# --------------------------------------------------------------------------- #
def _atari_value_kernel(x_ref, w1_ref, b1_ref, p1_ref, s2_ref, w2_ref,
                        b2_ref, p2_ref, wfc_ref, bfc_ref,
                        feat_ref, out_ref):
    # normalization (state /= 127.5 ; state -= 1) — pointwise, commutes with pad/im2col
    x = x_ref[...] * (1.0 / 127.5) - 1.0                              # (B*OH1*OW1, K*K*Cin)

    # conv1 for the whole batch as ONE im2col matmul + bias + ReLU
    y1 = jnp.dot(x, w1_ref[...], preferred_element_type=jnp.float32)
    y1 = jnp.maximum(y1 + b1_ref[...], 0.0)                           # (B*OH1*OW1, hidden)

    # AvgPool2d(K) as a single block-diagonal pooling matmul over the whole batch
    pool1 = jnp.dot(p1_ref[...], y1, preferred_element_type=jnp.float32)   # (B*HP1*WP1, hidden)

    # conv2: replicate-pad + im2col expressed as per-tap block-diag one-hot selections
    n_taps = s2_ref.shape[0]
    y2 = jnp.zeros((s2_ref.shape[1], w2_ref.shape[2]), jnp.float32)   # (B*OH2*OW2, 4)
    for t in range(n_taps):
        g = jnp.dot(s2_ref[t], pool1, preferred_element_type=jnp.float32)   # (B*OH2*OW2, hidden)
        y2 = y2 + jnp.dot(g, w2_ref[t], preferred_element_type=jnp.float32)
    y2 = jnp.maximum(y2 + b2_ref[...], 0.0)                           # (B*OH2*OW2, 4)

    # second AvgPool2d(K): block-diag pooling -> per-batch (1x1) spatial, 4 channels
    pool2 = jnp.dot(p2_ref[...], y2, preferred_element_type=jnp.float32)    # (B, 4)
    feat_ref[...] = pool2

    # fc over flatten(batch, channel), then Softmax(dim=-1) over the size-1 logit
    z = jnp.sum(pool2 * wfc_ref[...]) + bfc_ref[...]                  # (1, 1)
    e = jnp.exp(z - jnp.max(z, axis=-1, keepdims=True))
    out_ref[...] = e / jnp.sum(e, axis=-1, keepdims=True)             # softmax over size-1 -> 1.0


# --------------------------------------------------------------------------- #
# wrapper
# --------------------------------------------------------------------------- #
def init_params(key, in_channels, hidden_size, fc_dim, output_size=1, k=4):
    ks = jax.random.split(key, 6)

    def u(kk, shape, fan_in):
        bound = 1.0 / np.sqrt(fan_in)
        return jax.random.uniform(kk, shape, jnp.float32, -bound, bound)

    return dict(
        w1=u(ks[0], (hidden_size, in_channels, k, k), in_channels * k * k),
        b1=u(ks[1], (hidden_size,), in_channels * k * k),
        w2=u(ks[2], (4, hidden_size, k, k), hidden_size * k * k),
        b2=u(ks[3], (4,), hidden_size * k * k),
        wfc=u(ks[4], (output_size, fc_dim), fc_dim),
        bfc=u(ks[5], (output_size,), fc_dim),
    )


def atari_value_forward(params, state, hidden_size, k=4):
    B, H, W, C = state.shape
    K = k
    # permute(0, 3, 2, 1): (B,H,W,C) -> (B,C,W,H).  Channels-last equivalent: (B, W, H, C).
    xc = jnp.transpose(state, (0, 2, 1, 3))
    sh, sw = W, H                                   # conv spatial dims
    oh1, ow1 = sh + 4 - K + 1, sw + 4 - K + 1       # conv1 out (padding=2)
    hp1, wp1 = oh1 // K, ow1 // K                   # pool1 out
    oh2, ow2 = hp1 + 4 - K + 1, wp1 + 4 - K + 1     # conv2 out
    hp2, wp2 = oh2 // K, ow2 // K                   # pool2 out
    c2 = 4                                          # conv2 out channels (fixed in the module)

    fc_dim = (H // K) * (W // K)
    flat_dim = B * c2 * hp2 * wp2
    assert flat_dim == fc_dim, (
        f"flatten() of the whole batch must match Linear(fc_dim): {flat_dim} vs {fc_dim}")
    assert hp2 * wp2 == 1, "per-batch features are packed as the 4 conv2 channels"

    n1, np1, n2 = oh1 * ow1, hp1 * wp1, oh2 * ow2
    kkc = K * K * C

    # glue: replicate pad + im2col of the raw input (normalization done in-kernel);
    # batch folded into the matmul row dimension.
    xp = jnp.pad(xc, ((0, 0), (2, 2), (2, 2), (0, 0)), mode="edge")
    patches = _im2col(xp, K, oh1, ow1).reshape(B * n1, kkc)           # (B*OH1*OW1, K*K*C)

    # constant operators, block-diagonal over the batch
    p1_bd = jnp.asarray(_block_diag(_avgpool_matrix(oh1, ow1, K), B))         # (B*np1, B*n1)
    s2_np = _tap_select_matrices(hp1, wp1, K, 2)                              # (K*K, n2, np1)
    s2_bd = jnp.asarray(np.stack([_block_diag(s2_np[t], B) for t in range(K * K)]))  # (K*K, B*n2, B*np1)
    p2_bd = jnp.asarray(_block_diag(_avgpool_matrix(oh2, ow2, K), B))         # (B, B*n2)

    # weights reshaped for the channels-last matmul formulation
    w1m = jnp.transpose(params["w1"], (2, 3, 1, 0)).reshape(kkc, hidden_size)
    b1r = params["b1"].reshape(1, hidden_size)
    w2t = jnp.transpose(params["w2"], (2, 3, 1, 0)).reshape(K * K, hidden_size, c2)
    b2r = params["b2"].reshape(1, c2)
    # flatten() order of (B, 4, 1, 1) is (b, c): view the Linear weight as (B, c2)
    wfc_r = params["wfc"][0].reshape(B, c2)
    bfc_r = params["bfc"].reshape(1, 1)

    grid_spec = pltpu.PrefetchScalarGridSpec(
        num_scalar_prefetch=0,
        grid=(1,),
        in_specs=[
            pl.BlockSpec((B * n1, kkc), lambda i: (0, 0)),                    # patches
            pl.BlockSpec((kkc, hidden_size), lambda i: (0, 0)),               # w1
            pl.BlockSpec((1, hidden_size), lambda i: (0, 0)),                 # b1
            pl.BlockSpec((B * np1, B * n1), lambda i: (0, 0)),                # block-diag pool1
            pl.BlockSpec((K * K, B * n2, B * np1), lambda i: (0, 0, 0)),      # block-diag tap selectors
            pl.BlockSpec((K * K, hidden_size, c2), lambda i: (0, 0, 0)),      # w2
            pl.BlockSpec((1, c2), lambda i: (0, 0)),                          # b2
            pl.BlockSpec((B, B * n2), lambda i: (0, 0)),                      # block-diag pool2
            pl.BlockSpec((B, c2), lambda i: (0, 0)),                          # fc weight (b, c view)
            pl.BlockSpec((1, 1), lambda i: (0, 0)),                           # fc bias
        ],
        out_specs=[
            pl.BlockSpec((B, c2), lambda i: (0, 0)),                          # conv features
            pl.BlockSpec((1, 1), lambda i: (0, 0)),                           # final output
        ],
    )

    feats, out = pl.pallas_call(
        _atari_value_kernel,
        out_shape=(jax.ShapeDtypeStruct((B, c2), jnp.float32),
                   jax.ShapeDtypeStruct((1, 1), jnp.float32)),
        grid_spec=grid_spec,
        compiler_params=pltpu.CompilerParams(dimension_semantics=("arbitrary",)),
    )(patches, w1m, b1r, p1_bd, s2_bd, w2t, b2r, p2_bd, wfc_r, bfc_r)

    # batch_size != 1 in PyTorch -> return `out` of shape (output_size,) = (1,)
    return out.reshape(-1), feats


# --------------------------------------------------------------------------- #
# pure-JAX reference (mirrors the PyTorch NCHW path exactly) for verification
# --------------------------------------------------------------------------- #
def reference_forward(params, state):
    x = state / 127.5 - 1.0
    xc = jnp.transpose(x, (0, 3, 2, 1))                      # (B, C, W, H)

    def conv_block(z, w, b):
        zp = jnp.pad(z, ((0, 0), (0, 0), (2, 2), (2, 2)), mode="edge")
        y = lax.conv_general_dilated(zp, w, (1, 1), "VALID",
                                     dimension_numbers=("NCHW", "OIHW", "NCHW"))
        y = jnp.maximum(y + b[None, :, None, None], 0.0)
        y = lax.reduce_window(y, 0.0, lax.add, (1, 1, 4, 4), (1, 1, 4, 4), "VALID") / 16.0
        return y

    y = conv_block(xc, params["w1"], params["b1"])
    y = conv_block(y, params["w2"], params["b2"])
    flat = y.reshape(-1)
    logit = flat @ params["wfc"][0] + params["bfc"][0]
    return jax.nn.softmax(logit[None]), y.reshape(y.shape[0], -1)


if __name__ == "__main__":
    # Shapes consistent with the module: fc_dim = (H//4)*(W//4) = 16 must equal
    # B*4 (flatten of the whole batch) -> B = 4.
    B, H, W, C = 4, 16, 16, 4
    hidden_size = 32

    key = jax.random.PRNGKey(0)
    k_in, k_par = jax.random.split(key)
    state = jax.random.uniform(k_in, (B, H, W, C), jnp.float32, 0.0, 255.0)
    params = init_params(k_par, C, hidden_size, (H // 4) * (W // 4))

    out, feats = atari_value_forward(params, state, hidden_size)
    out = jax.block_until_ready(out)

    ref_out, ref_feats = reference_forward(params, state)
    assert out.shape == (1,)
    np.testing.assert_allclose(np.asarray(feats), np.asarray(ref_feats), rtol=2e-2, atol=2e-2)
    np.testing.assert_allclose(np.asarray(out), np.asarray(ref_out), rtol=1e-5, atol=1e-5)
    print("KERNEL_OK")
</pallas_src>

<mosaic_0001>
module attributes {stable_mosaic.version = 11 : i64} {
  func.func @_atari_value_kernel(%arg0: i32, %arg1: memref<1156x64xf32, #tpu.memory_space<vmem>>, %arg2: memref<64x32xf32, #tpu.memory_space<vmem>>, %arg3: memref<1x32xf32, #tpu.memory_space<vmem>>, %arg4: memref<64x1156xf32, #tpu.memory_space<vmem>>, %arg5: memref<16x100x64xf32, #tpu.memory_space<vmem>>, %arg6: memref<16x32x4xf32, #tpu.memory_space<vmem>>, %arg7: memref<1x4xf32, #tpu.memory_space<vmem>>, %arg8: memref<4x100xf32, #tpu.memory_space<vmem>>, %arg9: memref<4x4xf32, #tpu.memory_space<vmem>>, %arg10: memref<1x1xf32, #tpu.memory_space<vmem>>, %arg11: memref<4x4xf32, #tpu.memory_space<vmem>>, %arg12: memref<1x1xf32, #tpu.memory_space<vmem>>) attributes {dimension_semantics = [#tpu.dimension_semantics<arbitrary>], iteration_bounds = array<i64: 1>, scalar_prefetch = 0 : i64, scratch_operands = 0 : i64, tpu.core_type = #tpu.core_type<tc>, window_params = [{pipeline_mode = #tpu.pipeline_mode<synchronous>, transform_indices = @transform_0, window_bounds = array<i64: 1156, 64>}, {pipeline_mode = #tpu.pipeline_mode<synchronous>, transform_indices = @transform_1, window_bounds = array<i64: 64, 32>}, {pipeline_mode = #tpu.pipeline_mode<synchronous>, transform_indices = @transform_2, window_bounds = array<i64: 1, 32>}, {pipeline_mode = #tpu.pipeline_mode<synchronous>, transform_indices = @transform_3, window_bounds = array<i64: 64, 1156>}, {pipeline_mode = #tpu.pipeline_mode<synchronous>, transform_indices = @transform_4, window_bounds = array<i64: 16, 100, 64>}, {pipeline_mode = #tpu.pipeline_mode<synchronous>, transform_indices = @transform_5, window_bounds = array<i64: 16, 32, 4>}, {pipeline_mode = #tpu.pipeline_mode<synchronous>, transform_indices = @transform_6, window_bounds = array<i64: 1, 4>}, {pipeline_mode = #tpu.pipeline_mode<synchronous>, transform_indices = @transform_7, window_bounds = array<i64: 4, 100>}, {pipeline_mode = #tpu.pipeline_mode<synchronous>, transform_indices = @transform_8, window_bounds = array<i64: 4, 4>}, {pipeline_mode = #tpu.pipeline_mode<synchronous>, transform_indices = @transform_9, window_bounds = array<i64: 1, 1>}, {pipeline_mode = #tpu.pipeline_mode<synchronous>, transform_indices = @transform_10, window_bounds = array<i64: 4, 4>}, {pipeline_mode = #tpu.pipeline_mode<synchronous>, transform_indices = @transform_11, window_bounds = array<i64: 1, 1>}]} {
    %c0 = arith.constant 0 : index
    %c0_0 = arith.constant 0 : index
    %0 = vector.load %arg1[%c0, %c0_0] : memref<1156x64xf32, #tpu.memory_space<vmem>>, vector<1156x64xf32>
    %cst = arith.constant 0.00784313772 : f32
    %1 = vector.broadcast %cst : f32 to vector<1156x64xf32>
    %2 = arith.mulf %0, %1 : vector<1156x64xf32>
    %cst_1 = arith.constant 1.000000e+00 : f32
    %3 = vector.broadcast %cst_1 : f32 to vector<1156x64xf32>
    %4 = arith.subf %2, %3 : vector<1156x64xf32>
    %c0_2 = arith.constant 0 : index
    %c0_3 = arith.constant 0 : index
    %5 = vector.load %arg2[%c0_2, %c0_3] : memref<64x32xf32, #tpu.memory_space<vmem>>, vector<64x32xf32>
    %cst_4 = arith.constant dense<0.000000e+00> : vector<1156x32xf32>
    %6 = tpu.matmul %4, %5, %cst_4 {dimension_numbers = #tpu.dot_dimension_numbers<[1], [0], [0], [1], [0, 0, 1, 1], [], []>} : vector<1156x64xf32>, vector<64x32xf32>, vector<1156x32xf32> -> vector<1156x32xf32>
    %c0_5 = arith.constant 0 : index
    %c0_6 = arith.constant 0 : index
    %7 = vector.load %arg3[%c0_5, %c0_6] : memref<1x32xf32, #tpu.memory_space<vmem>>, vector<1x32xf32>
    %8 = vector.broadcast %7 : vector<1x32xf32> to vector<1156x32xf32>
    %9 = arith.addf %6, %8 : vector<1156x32xf32>
    %cst_7 = arith.constant 0.000000e+00 : f32
    %10 = vector.broadcast %cst_7 : f32 to vector<1156x32xf32>
    %11 = arith.maximumf %9, %10 : vector<1156x32xf32>
    %c0_8 = arith.constant 0 : index
    %c0_9 = arith.constant 0 : index
    %12 = vector.load %arg4[%c0_8, %c0_9] : memref<64x1156xf32, #tpu.memory_space<vmem>>, vector<64x1156xf32>
    %cst_10 = arith.constant dense<0.000000e+00> : vector<64x32xf32>
    %13 = tpu.matmul %12, %11, %cst_10 {dimension_numbers = #tpu.dot_dimension_numbers<[1], [0], [0], [1], [0, 0, 1, 1], [], []>} : vector<64x1156xf32>, vector<1156x32xf32>, vector<64x32xf32> -> vector<64x32xf32>
    %cst_11 = arith.constant 0.000000e+00 : f32
    %14 = vector.broadcast %cst_11 : f32 to vector<100x4xf32>
    %c0_12 = arith.constant 0 : index
    %c0_13 = arith.constant 0 : index
    %c0_14 = arith.constant 0 : index
    %15 = vector.load %arg5[%c0_12, %c0_13, %c0_14] : memref<16x100x64xf32, #tpu.memory_space<vmem>>, vector<1x100x64xf32>
    %16 = vector.shape_cast %15 : vector<1x100x64xf32> to vector<100x64xf32>
    %cst_15 = arith.constant dense<0.000000e+00> : vector<100x32xf32>
    %17 = tpu.matmul %16, %13, %cst_15 {dimension_numbers = #tpu.dot_dimension_numbers<[1], [0], [0], [1], [0, 0, 1, 1], [], []>} : vector<100x64xf32>, vector<64x32xf32>, vector<100x32xf32> -> vector<100x32xf32>
    %c0_16 = arith.constant 0 : index
    %c0_17 = arith.constant 0 : index
    %c0_18 = arith.constant 0 : index
    %18 = vector.load %arg6[%c0_16, %c0_17, %c0_18] : memref<16x32x4xf32, #tpu.memory_space<vmem>>, vector<1x32x4xf32>
    %19 = vector.shape_cast %18 : vector<1x32x4xf32> to vector<32x4xf32>
    %cst_19 = arith.constant dense<0.000000e+00> : vector<100x4xf32>
    %20 = tpu.matmul %17, %19, %cst_19 {dimension_numbers = #tpu.dot_dimension_numbers<[1], [0], [0], [1], [0, 0, 1, 1], [], []>} : vector<100x32xf32>, vector<32x4xf32>, vector<100x4xf32> -> vector<100x4xf32>
    %21 = arith.addf %14, %20 : vector<100x4xf32>
    %c1 = arith.constant 1 : index
    %c0_20 = arith.constant 0 : index
    %c0_21 = arith.constant 0 : index
    %22 = vector.load %arg5[%c1, %c0_20, %c0_21] : memref<16x100x64xf32, #tpu.memory_space<vmem>>, vector<1x100x64xf32>
    %23 = vector.shape_cast %22 : vector<1x100x64xf32> to vector<100x64xf32>
    %cst_22 = arith.constant dense<0.000000e+00> : vector<100x32xf32>
    %24 = tpu.matmul %23, %13, %cst_22 {dimension_numbers = #tpu.dot_dimension_numbers<[1], [0], [0], [1], [0, 0, 1, 1], [], []>} : vector<100x64xf32>, vector<64x32xf32>, vector<100x32xf32> -> vector<100x32xf32>
    %c1_23 = arith.constant 1 : index
    %c0_24 = arith.constant 0 : index
    %c0_25 = arith.constant 0 : index
    %25 = vector.load %arg6[%c1_23, %c0_24, %c0_25] : memref<16x32x4xf32, #tpu.memory_space<vmem>>, vector<1x32x4xf32>
    %26 = vector.shape_cast %25 : vector<1x32x4xf32> to vector<32x4xf32>
    %cst_26 = arith.constant dense<0.000000e+00> : vector<100x4xf32>
    %27 = tpu.matmul %24, %26, %cst_26 {dimension_numbers = #tpu.dot_dimension_numbers<[1], [0], [0], [1], [0, 0, 1, 1], [], []>} : vector<100x32xf32>, vector<32x4xf32>, vector<100x4xf32> -> vector<100x4xf32>
    %28 = arith.addf %21, %27 : vector<100x4xf32>
    %c2 = arith.constant 2 : index
    %c0_27 = arith.constant 0 : index
    %c0_28 = arith.constant 0 : index
    %29 = vector.load %arg5[%c2, %c0_27, %c0_28] : memref<16x100x64xf32, #tpu.memory_space<vmem>>, vector<1x100x64xf32>
    %30 = vector.shape_cast %29 : vector<1x100x64xf32> to vector<100x64xf32>
    %cst_29 = arith.constant dense<0.000000e+00> : vector<100x32xf32>
    %31 = tpu.matmul %30, %13, %cst_29 {dimension_numbers = #tpu.dot_dimension_numbers<[1], [0], [0], [1], [0, 0, 1, 1], [], []>} : vector<100x64xf32>, vector<64x32xf32>, vector<100x32xf32> -> vector<100x32xf32>
    %c2_30 = arith.constant 2 : index
    %c0_31 = arith.constant 0 : index
    %c0_32 = arith.constant 0 : index
    %32 = vector.load %arg6[%c2_30, %c0_31, %c0_32] : memref<16x32x4xf32, #tpu.memory_space<vmem>>, vector<1x32x4xf32>
    %33 = vector.shape_cast %32 : vector<1x32x4xf32> to vector<32x4xf32>
    %cst_33 = arith.constant dense<0.000000e+00> : vector<100x4xf32>
    %34 = tpu.matmul %31, %33, %cst_33 {dimension_numbers = #tpu.dot_dimension_numbers<[1], [0], [0], [1], [0, 0, 1, 1], [], []>} : vector<100x32xf32>, vector<32x4xf32>, vector<100x4xf32> -> vector<100x4xf32>
    %35 = arith.addf %28, %34 : vector<100x4xf32>
    %c3 = arith.constant 3 : index
    %c0_34 = arith.constant 0 : index
    %c0_35 = arith.constant 0 : index
    %36 = vector.load %arg5[%c3, %c0_34, %c0_35] : memref<16x100x64xf32, #tpu.memory_space<vmem>>, vector<1x100x64xf32>
    %37 = vector.shape_cast %36 : vector<1x100x64xf32> to vector<100x64xf32>
    %cst_36 = arith.constant dense<0.000000e+00> : vector<100x32xf32>
    %38 = tpu.matmul %37, %13, %cst_36 {dimension_numbers = #tpu.dot_dimension_numbers<[1], [0], [0], [1], [0, 0, 1, 1], [], []>} : vector<100x64xf32>, vector<64x32xf32>, vector<100x32xf32> -> vector<100x32xf32>
    %c3_37 = arith.constant 3 : index
    %c0_38 = arith.constant 0 : index
    %c0_39 = arith.constant 0 : index
    %39 = vector.load %arg6[%c3_37, %c0_38, %c0_39] : memref<16x32x4xf32, #tpu.memory_space<vmem>>, vector<1x32x4xf32>
    %40 = vector.shape_cast %39 : vector<1x32x4xf32> to vector<32x4xf32>
    %cst_40 = arith.constant dense<0.000000e+00> : vector<100x4xf32>
    %41 = tpu.matmul %38, %40, %cst_40 {dimension_numbers = #tpu.dot_dimension_numbers<[1], [0], [0], [1], [0, 0, 1, 1], [], []>} : vector<100x32xf32>, vector<32x4xf32>, vector<100x4xf32> -> vector<100x4xf32>
    %42 = arith.addf %35, %41 : vector<100x4xf32>
    %c4 = arith.constant 4 : index
    %c0_41 = arith.constant 0 : index
    %c0_42 = arith.constant 0 : index
    %43 = vector.load %arg5[%c4, %c0_41, %c0_42] : memref<16x100x64xf32, #tpu.memory_space<vmem>>, vector<1x100x64xf32>
    %44 = vector.shape_cast %43 : vector<1x100x64xf32> to vector<100x64xf32>
    %cst_43 = arith.constant dense<0.000000e+00> : vector<100x32xf32>
    %45 = tpu.matmul %44, %13, %cst_43 {dimension_numbers = #tpu.dot_dimension_numbers<[1], [0], [0], [1], [0, 0, 1, 1], [], []>} : vector<100x64xf32>, vector<64x32xf32>, vector<100x32xf32> -> vector<100x32xf32>
    %c4_44 = arith.constant 4 : index
    %c0_45 = arith.constant 0 : index
    %c0_46 = arith.constant 0 : index
    %46 = vector.load %arg6[%c4_44, %c0_45, %c0_46] : memref<16x32x4xf32, #tpu.memory_space<vmem>>, vector<1x32x4xf32>
    %47 = vector.shape_cast %46 : vector<1x32x4xf32> to vector<32x4xf32>
    %cst_47 = arith.constant dense<0.000000e+00> : vector<100x4xf32>
    %48 = tpu.matmul %45, %47, %cst_47 {dimension_numbers = #tpu.dot_dimension_numbers<[1], [0], [0], [1], [0, 0, 1, 1], [], []>} : vector<100x32xf32>, vector<32x4xf32>, vector<100x4xf32> -> vector<100x4xf32>
    %49 = arith.addf %42, %48 : vector<100x4xf32>
    %c5 = arith.constant 5 : index
    %c0_48 = arith.constant 0 : index
    %c0_49 = arith.constant 0 : index
    %50 = vector.load %arg5[%c5, %c0_48, %c0_49] : memref<16x100x64xf32, #tpu.memory_space<vmem>>, vector<1x100x64xf32>
    %51 = vector.shape_cast %50 : vector<1x100x64xf32> to vector<100x64xf32>
    %cst_50 = arith.constant dense<0.000000e+00> : vector<100x32xf32>
    %52 = tpu.matmul %51, %13, %cst_50 {dimension_numbers = #tpu.dot_dimension_numbers<[1], [0], [0], [1], [0, 0, 1, 1], [], []>} : vector<100x64xf32>, vector<64x32xf32>, vector<100x32xf32> -> vector<100x32xf32>
    %c5_51 = arith.constant 5 : index
    %c0_52 = arith.constant 0 : index
    %c0_53 = arith.constant 0 : index
    %53 = vector.load %arg6[%c5_51, %c0_52, %c0_53] : memref<16x32x4xf32, #tpu.memory_space<vmem>>, vector<1x32x4xf32>
    %54 = vector.shape_cast %53 : vector<1x32x4xf32> to vector<32x4xf32>
    %cst_54 = arith.constant dense<0.000000e+00> : vector<100x4xf32>
    %55 = tpu.matmul %52, %54, %cst_54 {dimension_numbers = #tpu.dot_dimension_numbers<[1], [0], [0], [1], [0, 0, 1, 1], [], []>} : vector<100x32xf32>, vector<32x4xf32>, vector<100x4xf32> -> vector<100x4xf32>
    %56 = arith.addf %49, %55 : vector<100x4xf32>
    %c6 = arith.constant 6 : index
    %c0_55 = arith.constant 0 : index
    %c0_56 = arith.constant 0 : index
    %57 = vector.load %arg5[%c6, %c0_55, %c0_56] : memref<16x100x64xf32, #tpu.memory_space<vmem>>, vector<1x100x64xf32>
    %58 = vector.shape_cast %57 : vector<1x100x64xf32> to vector<100x64xf32>
    %cst_57 = arith.constant dense<0.000000e+00> : vector<100x32xf32>
    %59 = tpu.matmul %58, %13, %cst_57 {dimension_numbers = #tpu.dot_dimension_numbers<[1], [0], [0], [1], [0, 0, 1, 1], [], []>} : vector<100x64xf32>, vector<64x32xf32>, vector<100x32xf32> -> vector<100x32xf32>
    %c6_58 = arith.constant 6 : index
    %c0_59 = arith.constant 0 : index
    %c0_60 = arith.constant 0 : index
    %60 = vector.load %arg6[%c6_58, %c0_59, %c0_60] : memref<16x32x4xf32, #tpu.memory_space<vmem>>, vector<1x32x4xf32>
    %61 = vector.shape_cast %60 : vector<1x32x4xf32> to vector<32x4xf32>
    %cst_61 = arith.constant dense<0.000000e+00> : vector<100x4xf32>
    %62 = tpu.matmul %59, %61, %cst_61 {dimension_numbers = #tpu.dot_dimension_numbers<[1], [0], [0], [1], [0, 0, 1, 1], [], []>} : vector<100x32xf32>, vector<32x4xf32>, vector<100x4xf32> -> vector<100x4xf32>
    %63 = arith.addf %56, %62 : vector<100x4xf32>
    %c7 = arith.constant 7 : index
    %c0_62 = arith.constant 0 : index
    %c0_63 = arith.constant 0 : index
    %64 = vector.load %arg5[%c7, %c0_62, %c0_63] : memref<16x100x64xf32, #tpu.memory_space<vmem>>, vector<1x100x64xf32>
    %65 = vector.shape_cast %64 : vector<1x100x64xf32> to vector<100x64xf32>
    %cst_64 = arith.constant dense<0.000000e+00> : vector<100x32xf32>
    %66 = tpu.matmul %65, %13, %cst_64 {dimension_numbers = #tpu.dot_dimension_numbers<[1], [0], [0], [1], [0, 0, 1, 1], [], []>} : vector<100x64xf32>, vector<64x32xf32>, vector<100x32xf32> -> vector<100x32xf32>
    %c7_65 = arith.constant 7 : index
    %c0_66 = arith.constant 0 : index
    %c0_67 = arith.constant 0 : index
    %67 = vector.load %arg6[%c7_65, %c0_66, %c0_67] : memref<16x32x4xf32, #tpu.memory_space<vmem>>, vector<1x32x4xf32>
    %68 = vector.shape_cast %67 : vector<1x32x4xf32> to vector<32x4xf32>
    %cst_68 = arith.constant dense<0.000000e+00> : vector<100x4xf32>
    %69 = tpu.matmul %66, %68, %cst_68 {dimension_numbers = #tpu.dot_dimension_numbers<[1], [0], [0], [1], [0, 0, 1, 1], [], []>} : vector<100x32xf32>, vector<32x4xf32>, vector<100x4xf32> -> vector<100x4xf32>
    %70 = arith.addf %63, %69 : vector<100x4xf32>
    %c8 = arith.constant 8 : index
    %c0_69 = arith.constant 0 : index
    %c0_70 = arith.constant 0 : index
    %71 = vector.load %arg5[%c8, %c0_69, %c0_70] : memref<16x100x64xf32, #tpu.memory_space<vmem>>, vector<1x100x64xf32>
    %72 = vector.shape_cast %71 : vector<1x100x64xf32> to vector<100x64xf32>
    %cst_71 = arith.constant dense<0.000000e+00> : vector<100x32xf32>
    %73 = tpu.matmul %72, %13, %cst_71 {dimension_numbers = #tpu.dot_dimension_numbers<[1], [0], [0], [1], [0, 0, 1, 1], [], []>} : vector<100x64xf32>, vector<64x32xf32>, vector<100x32xf32> -> vector<100x32xf32>
    %c8_72 = arith.constant 8 : index
    %c0_73 = arith.constant 0 : index
    %c0_74 = arith.constant 0 : index
    %74 = vector.load %arg6[%c8_72, %c0_73, %c0_74] : memref<16x32x4xf32, #tpu.memory_space<vmem>>, vector<1x32x4xf32>
    %75 = vector.shape_cast %74 : vector<1x32x4xf32> to vector<32x4xf32>
    %cst_75 = arith.constant dense<0.000000e+00> : vector<100x4xf32>
    %76 = tpu.matmul %73, %75, %cst_75 {dimension_numbers = #tpu.dot_dimension_numbers<[1], [0], [0], [1], [0, 0, 1, 1], [], []>} : vector<100x32xf32>, vector<32x4xf32>, vector<100x4xf32> -> vector<100x4xf32>
    %77 = arith.addf %70, %76 : vector<100x4xf32>
    %c9 = arith.constant 9 : index
    %c0_76 = arith.constant 0 : index
    %c0_77 = arith.constant 0 : index
    %78 = vector.load %arg5[%c9, %c0_76, %c0_77] : memref<16x100x64xf32, #tpu.memory_space<vmem>>, vector<1x100x64xf32>
    %79 = vector.shape_cast %78 : vector<1x100x64xf32> to vector<100x64xf32>
    %cst_78 = arith.constant dense<0.000000e+00> : vector<100x32xf32>
    %80 = tpu.matmul %79, %13, %cst_78 {dimension_numbers = #tpu.dot_dimension_numbers<[1], [0], [0], [1], [0, 0, 1, 1], [], []>} : vector<100x64xf32>, vector<64x32xf32>, vector<100x32xf32> -> vector<100x32xf32>
    %c9_79 = arith.constant 9 : index
    %c0_80 = arith.constant 0 : index
    %c0_81 = arith.constant 0 : index
    %81 = vector.load %arg6[%c9_79, %c0_80, %c0_81] : memref<16x32x4xf32, #tpu.memory_space<vmem>>, vector<1x32x4xf32>
    %82 = vector.shape_cast %81 : vector<1x32x4xf32> to vector<32x4xf32>
    %cst_82 = arith.constant dense<0.000000e+00> : vector<100x4xf32>
    %83 = tpu.matmul %80, %82, %cst_82 {dimension_numbers = #tpu.dot_dimension_numbers<[1], [0], [0], [1], [0, 0, 1, 1], [], []>} : vector<100x32xf32>, vector<32x4xf32>, vector<100x4xf32> -> vector<100x4xf32>
    %84 = arith.addf %77, %83 : vector<100x4xf32>
    %c10 = arith.constant 10 : index
    %c0_83 = arith.constant 0 : index
    %c0_84 = arith.constant 0 : index
    %85 = vector.load %arg5[%c10, %c0_83, %c0_84] : memref<16x100x64xf32, #tpu.memory_space<vmem>>, vector<1x100x64xf32>
    %86 = vector.shape_cast %85 : vector<1x100x64xf32> to vector<100x64xf32>
    %cst_85 = arith.constant dense<0.000000e+00> : vector<100x32xf32>
    %87 = tpu.matmul %86, %13, %cst_85 {dimension_numbers = #tpu.dot_dimension_numbers<[1], [0], [0], [1], [0, 0, 1, 1], [], []>} : vector<100x64xf32>, vector<64x32xf32>, vector<100x32xf32> -> vector<100x32xf32>
    %c10_86 = arith.constant 10 : index
    %c0_87 = arith.constant 0 : index
    %c0_88 = arith.constant 0 : index
    %88 = vector.load %arg6[%c10_86, %c0_87, %c0_88] : memref<16x32x4xf32, #tpu.memory_space<vmem>>, vector<1x32x4xf32>
    %89 = vector.shape_cast %88 : vector<1x32x4xf32> to vector<32x4xf32>
    %cst_89 = arith.constant dense<0.000000e+00> : vector<100x4xf32>
    %90 = tpu.matmul %87, %89, %cst_89 {dimension_numbers = #tpu.dot_dimension_numbers<[1], [0], [0], [1], [0, 0, 1, 1], [], []>} : vector<100x32xf32>, vector<32x4xf32>, vector<100x4xf32> -> vector<100x4xf32>
    %91 = arith.addf %84, %90 : vector<100x4xf32>
    %c11 = arith.constant 11 : index
    %c0_90 = arith.constant 0 : index
    %c0_91 = arith.constant 0 : index
    %92 = vector.load %arg5[%c11, %c0_90, %c0_91] : memref<16x100x64xf32, #tpu.memory_space<vmem>>, vector<1x100x64xf32>
    %93 = vector.shape_cast %92 : vector<1x100x64xf32> to vector<100x64xf32>
    %cst_92 = arith.constant dense<0.000000e+00> : vector<100x32xf32>
    %94 = tpu.matmul %93, %13, %cst_92 {dimension_numbers = #tpu.dot_dimension_numbers<[1], [0], [0], [1], [0, 0, 1, 1], [], []>} : vector<100x64xf32>, vector<64x32xf32>, vector<100x32xf32> -> vector<100x32xf32>
    %c11_93 = arith.constant 11 : index
    %c0_94 = arith.constant 0 : index
    %c0_95 = arith.constant 0 : index
    %95 = vector.load %arg6[%c11_93, %c0_94, %c0_95] : memref<16x32x4xf32, #tpu.memory_space<vmem>>, vector<1x32x4xf32>
    %96 = vector.shape_cast %95 : vector<1x32x4xf32> to vector<32x4xf32>
    %cst_96 = arith.constant dense<0.000000e+00> : vector<100x4xf32>
    %97 = tpu.matmul %94, %96, %cst_96 {dimension_numbers = #tpu.dot_dimension_numbers<[1], [0], [0], [1], [0, 0, 1, 1], [], []>} : vector<100x32xf32>, vector<32x4xf32>, vector<100x4xf32> -> vector<100x4xf32>
    %98 = arith.addf %91, %97 : vector<100x4xf32>
    %c12 = arith.constant 12 : index
    %c0_97 = arith.constant 0 : index
    %c0_98 = arith.constant 0 : index
    %99 = vector.load %arg5[%c12, %c0_97, %c0_98] : memref<16x100x64xf32, #tpu.memory_space<vmem>>, vector<1x100x64xf32>
    %100 = vector.shape_cast %99 : vector<1x100x64xf32> to vector<100x64xf32>
    %cst_99 = arith.constant dense<0.000000e+00> : vector<100x32xf32>
    %101 = tpu.matmul %100, %13, %cst_99 {dimension_numbers = #tpu.dot_dimension_numbers<[1], [0], [0], [1], [0, 0, 1, 1], [], []>} : vector<100x64xf32>, vector<64x32xf32>, vector<100x32xf32> -> vector<100x32xf32>
    %c12_100 = arith.constant 12 : index
    %c0_101 = arith.constant 0 : index
    %c0_102 = arith.constant 0 : index
    %102 = vector.load %arg6[%c12_100, %c0_101, %c0_102] : memref<16x32x4xf32, #tpu.memory_space<vmem>>, vector<1x32x4xf32>
    %103 = vector.shape_cast %102 : vector<1x32x4xf32> to vector<32x4xf32>
    %cst_103 = arith.constant dense<0.000000e+00> : vector<100x4xf32>
    %104 = tpu.matmul %101, %103, %cst_103 {dimension_numbers = #tpu.dot_dimension_numbers<[1], [0], [0], [1], [0, 0, 1, 1], [], []>} : vector<100x32xf32>, vector<32x4xf32>, vector<100x4xf32> -> vector<100x4xf32>
    %105 = arith.addf %98, %104 : vector<100x4xf32>
    %c13 = arith.constant 13 : index
    %c0_104 = arith.constant 0 : index
    %c0_105 = arith.constant 0 : index
    %106 = vector.load %arg5[%c13, %c0_104, %c0_105] : memref<16x100x64xf32, #tpu.memory_space<vmem>>, vector<1x100x64xf32>
    %107 = vector.shape_cast %106 : vector<1x100x64xf32> to vector<100x64xf32>
    %cst_106 = arith.constant dense<0.000000e+00> : vector<100x32xf32>
    %108 = tpu.matmul %107, %13, %cst_106 {dimension_numbers = #tpu.dot_dimension_numbers<[1], [0], [0], [1], [0, 0, 1, 1], [], []>} : vector<100x64xf32>, vector<64x32xf32>, vector<100x32xf32> -> vector<100x32xf32>
    %c13_107 = arith.constant 13 : index
    %c0_108 = arith.constant 0 : index
    %c0_109 = arith.constant 0 : index
    %109 = vector.load %arg6[%c13_107, %c0_108, %c0_109] : memref<16x32x4xf32, #tpu.memory_space<vmem>>, vector<1x32x4xf32>
    %110 = vector.shape_cast %109 : vector<1x32x4xf32> to vector<32x4xf32>
    %cst_110 = arith.constant dense<0.000000e+00> : vector<100x4xf32>
    %111 = tpu.matmul %108, %110, %cst_110 {dimension_numbers = #tpu.dot_dimension_numbers<[1], [0], [0], [1], [0, 0, 1, 1], [], []>} : vector<100x32xf32>, vector<32x4xf32>, vector<100x4xf32> -> vector<100x4xf32>
    %112 = arith.addf %105, %111 : vector<100x4xf32>
    %c14 = arith.constant 14 : index
    %c0_111 = arith.constant 0 : index
    %c0_112 = arith.constant 0 : index
    %113 = vector.load %arg5[%c14, %c0_111, %c0_112] : memref<16x100x64xf32, #tpu.memory_space<vmem>>, vector<1x100x64xf32>
    %114 = vector.shape_cast %113 : vector<1x100x64xf32> to vector<100x64xf32>
    %cst_113 = arith.constant dense<0.000000e+00> : vector<100x32xf32>
    %115 = tpu.matmul %114, %13, %cst_113 {dimension_numbers = #tpu.dot_dimension_numbers<[1], [0], [0], [1], [0, 0, 1, 1], [], []>} : vector<100x64xf32>, vector<64x32xf32>, vector<100x32xf32> -> vector<100x32xf32>
    %c14_114 = arith.constant 14 : index
    %c0_115 = arith.constant 0 : index
    %c0_116 = arith.constant 0 : index
    %116 = vector.load %arg6[%c14_114, %c0_115, %c0_116] : memref<16x32x4xf32, #tpu.memory_space<vmem>>, vector<1x32x4xf32>
    %117 = vector.shape_cast %116 : vector<1x32x4xf32> to vector<32x4xf32>
    %cst_117 = arith.constant dense<0.000000e+00> : vector<100x4xf32>
    %118 = tpu.matmul %115, %117, %cst_117 {dimension_numbers = #tpu.dot_dimension_numbers<[1], [0], [0], [1], [0, 0, 1, 1], [], []>} : vector<100x32xf32>, vector<32x4xf32>, vector<100x4xf32> -> vector<100x4xf32>
    %119 = arith.addf %112, %118 : vector<100x4xf32>
    %c15 = arith.constant 15 : index
    %c0_118 = arith.constant 0 : index
    %c0_119 = arith.constant 0 : index
    %120 = vector.load %arg5[%c15, %c0_118, %c0_119] : memref<16x100x64xf32, #tpu.memory_space<vmem>>, vector<1x100x64xf32>
    %121 = vector.shape_cast %120 : vector<1x100x64xf32> to vector<100x64xf32>
    %cst_120 = arith.constant dense<0.000000e+00> : vector<100x32xf32>
    %122 = tpu.matmul %121, %13, %cst_120 {dimension_numbers = #tpu.dot_dimension_numbers<[1], [0], [0], [1], [0, 0, 1, 1], [], []>} : vector<100x64xf32>, vector<64x32xf32>, vector<100x32xf32> -> vector<100x32xf32>
    %c15_121 = arith.constant 15 : index
    %c0_122 = arith.constant 0 : index
    %c0_123 = arith.constant 0 : index
    %123 = vector.load %arg6[%c15_121, %c0_122, %c0_123] : memref<16x32x4xf32, #tpu.memory_space<vmem>>, vector<1x32x4xf32>
    %124 = vector.shape_cast %123 : vector<1x32x4xf32> to vector<32x4xf32>
    %cst_124 = arith.constant dense<0.000000e+00> : vector<100x4xf32>
    %125 = tpu.matmul %122, %124, %cst_124 {dimension_numbers = #tpu.dot_dimension_numbers<[1], [0], [0], [1], [0, 0, 1, 1], [], []>} : vector<100x32xf32>, vector<32x4xf32>, vector<100x4xf32> -> vector<100x4xf32>
    %126 = arith.addf %119, %125 : vector<100x4xf32>
    %c0_125 = arith.constant 0 : index
    %c0_126 = arith.constant 0 : index
    %127 = vector.load %arg7[%c0_125, %c0_126] : memref<1x4xf32, #tpu.memory_space<vmem>>, vector<1x4xf32>
    %128 = vector.broadcast %127 : vector<1x4xf32> to vector<100x4xf32>
    %129 = arith.addf %126, %128 : vector<100x4xf32>
    %cst_127 = arith.constant 0.000000e+00 : f32
    %130 = vector.broadcast %cst_127 : f32 to vector<100x4xf32>
    %131 = arith.maximumf %129, %130 : vector<100x4xf32>
    %c0_128 = arith.constant 0 : index
    %c0_129 = arith.constant 0 : index
    %132 = vector.load %arg8[%c0_128, %c0_129] : memref<4x100xf32, #tpu.memory_space<vmem>>, vector<4x100xf32>
    %cst_130 = arith.constant dense<0.000000e+00> : vector<4x4xf32>
    %133 = tpu.matmul %132, %131, %cst_130 {dimension_numbers = #tpu.dot_dimension_numbers<[1], [0], [0], [1], [0, 0, 1, 1], [], []>} : vector<4x100xf32>, vector<100x4xf32>, vector<4x4xf32> -> vector<4x4xf32>
    %c0_131 = arith.constant 0 : index
    %c0_132 = arith.constant 0 : index
    %134 = vector.load %arg11[%c0_131, %c0_132] : memref<4x4xf32, #tpu.memory_space<vmem>>, vector<4x4xf32>
    tpu.vector_store %arg11[%c0_131, %c0_132], %133 {strides = array<i32>} : memref<4x4xf32, #tpu.memory_space<vmem>>, vector<4x4xf32>,
    %c0_133 = arith.constant 0 : index
    %c0_134 = arith.constant 0 : index
    %135 = vector.load %arg9[%c0_133, %c0_134] : memref<4x4xf32, #tpu.memory_space<vmem>>, vector<4x4xf32>
    %136 = arith.mulf %133, %135 : vector<4x4xf32>
    %137 = vector.shape_cast %136 : vector<4x4xf32> to vector<1x4x4xf32>
    %cst_135 = arith.constant dense<0.000000e+00> : vector<1xf32>
    %138 = vector.multi_reduction <add>, %137, %cst_135 [1, 2] : vector<1x4x4xf32> to vector<1xf32>
    %139 = vector.shape_cast %138 : vector<1xf32> to vector<1x1x1xf32>
    %140 = vector.extract %139[0, 0, 0] : f32 from vector<1x1x1xf32>
    %c0_136 = arith.constant 0 : index
    %c0_137 = arith.constant 0 : index
    %141 = vector.load %arg10[%c0_136, %c0_137] : memref<1x1xf32, #tpu.memory_space<vmem>>, vector<1x1xf32>
    %142 = vector.broadcast %140 : f32 to vector<1x1xf32>
    %143 = arith.addf %142, %141 : vector<1x1xf32>
    %cst_138 = arith.constant dense<0xFF800000> : vector<1xf32>
    %144 = vector.multi_reduction <maximumf>, %143, %cst_138 [1] : vector<1x1xf32> to vector<1xf32>
    %145 = vector.shape_cast %144 : vector<1xf32> to vector<1x1xf32>
    %146 = arith.subf %143, %145 : vector<1x1xf32>
    %147 = math.exp %146 : vector<1x1xf32>
    %cst_139 = arith.constant dense<0.000000e+00> : vector<1xf32>
    %148 = vector.multi_reduction <add>, %147, %cst_139 [1] : vector<1x1xf32> to vector<1xf32>
    %149 = vector.shape_cast %148 : vector<1xf32> to vector<1x1xf32>
    %150 = arith.divf %147, %149 : vector<1x1xf32>
    %c0_140 = arith.constant 0 : index
    %c0_141 = arith.constant 0 : index
    %151 = vector.load %arg12[%c0_140, %c0_141] : memref<1x1xf32, #tpu.memory_space<vmem>>, vector<1x1xf32>
    tpu.vector_store %arg12[%c0_140, %c0_141], %150 {strides = array<i32>} : memref<1x1xf32, #tpu.memory_space<vmem>>, vector<1x1xf32>,
    return
  }
  func.func @transform_0(%arg0: i32) -> (i32, i32) {
    %c0_i32 = arith.constant 0 : i32
    %c0_i32_0 = arith.constant 0 : i32
    %c0_i32_1 = arith.constant 0 : i32
    return %c0_i32, %c0_i32_0 : i32, i32
  }
  func.func @transform_1(%arg0: i32) -> (i32, i32) {
    %c0_i32 = arith.constant 0 : i32
    %c0_i32_0 = arith.constant 0 : i32
    %c0_i32_1 = arith.constant 0 : i32
    return %c0_i32, %c0_i32_0 : i32, i32
  }
  func.func @transform_2(%arg0: i32) -> (i32, i32) {
    %c0_i32 = arith.constant 0 : i32
    %c0_i32_0 = arith.constant 0 : i32
    %c0_i32_1 = arith.constant 0 : i32
    return %c0_i32, %c0_i32_0 : i32, i32
  }
  func.func @transform_3(%arg0: i32) -> (i32, i32) {
    %c0_i32 = arith.constant 0 : i32
    %c0_i32_0 = arith.constant 0 : i32
    %c0_i32_1 = arith.constant 0 : i32
    return %c0_i32, %c0_i32_0 : i32, i32
  }
  func.func @transform_4(%arg0: i32) -> (i32, i32, i32) {
    %c0_i32 = arith.constant 0 : i32
    %c0_i32_0 = arith.constant 0 : i32
    %c0_i32_1 = arith.constant 0 : i32
    %c0_i32_2 = arith.constant 0 : i32
    return %c0_i32, %c0_i32_0, %c0_i32_1 : i32, i32, i32
  }
  func.func @transform_5(%arg0: i32) -> (i32, i32, i32) {
    %c0_i32 = arith.constant 0 : i32
    %c0_i32_0 = arith.constant 0 : i32
    %c0_i32_1 = arith.constant 0 : i32
    %c0_i32_2 = arith.constant 0 : i32
    return %c0_i32, %c0_i32_0, %c0_i32_1 : i32, i32, i32
  }
  func.func @transform_6(%arg0: i32) -> (i32, i32) {
    %c0_i32 = arith.constant 0 : i32
    %c0_i32_0 = arith.constant 0 : i32
    %c0_i32_1 = arith.constant 0 : i32
    return %c0_i32, %c0_i32_0 : i32, i32
  }
  func.func @transform_7(%arg0: i32) -> (i32, i32) {
    %c0_i32 = arith.constant 0 : i32
    %c0_i32_0 = arith.constant 0 : i32
    %c0_i32_1 = arith.constant 0 : i32
    return %c0_i32, %c0_i32_0 : i32, i32
  }
  func.func @transform_8(%arg0: i32) -> (i32, i32) {
    %c0_i32 = arith.constant 0 : i32
    %c0_i32_0 = arith.constant 0 : i32
    %c0_i32_1 = arith.constant 0 : i32
    return %c0_i32, %c0_i32_0 : i32, i32
  }
  func.func @transform_9(%arg0: i32) -> (i32, i32) {
    %c0_i32 = arith.constant 0 : i32
    %c0_i32_0 = arith.constant 0 : i32
    %c0_i32_1 = arith.constant 0 : i32
    return %c0_i32, %c0_i32_0 : i32, i32
  }
  func.func @transform_10(%arg0: i32) -> (i32, i32) {
    %c0_i32 = arith.constant 0 : i32
    %c0_i32_0 = arith.constant 0 : i32
    %c0_i32_1 = arith.constant 0 : i32
    return %c0_i32, %c0_i32_0 : i32, i32
  }
  func.func @transform_11(%arg0: i32) -> (i32, i32) {
    %c0_i32 = arith.constant 0 : i32
    %c0_i32_0 = arith.constant 0 : i32
    %c0_i32_1 = arith.constant 0 : i32
    return %c0_i32, %c0_i32_0 : i32, i32
  }
}

</mosaic_0001>

<bundles_post_ra>
// kernel: tpu_custom_call.1
= control target key start
LH: loop header
LB: loop body
LE: loop exit
PB: predicated region body
PF: predicated region fallthrough
CT: control target
= control target key end

     0   :  { %s17918_s0 = inlined_call_operand.vmem [shape: f32[1156,64], index: 0, kind: input, shape index: {}]   ;;  %s17919_s1 = inlined_call_operand.vmem [shape: f32[64,32], index: 1, kind: input, shape index: {}]   ;;  %s17920_s2 = inlined_call_operand.vmem [shape: f32[1,32], index: 2, kind: input, shape index: {}]   ;;  %s17921_s3 = inlined_call_operand.vmem [shape: f32[64,1156], index: 3, kind: input, shape index: {}]   ;;  %s17922_s4 = inlined_call_operand.vmem [shape: f32[16,100,64], index: 4, kind: input, shape index: {}]   ;;  %s17923_s5 = inlined_call_operand.vmem [shape: f32[16,32,4], index: 5, kind: input, shape index: {}]   ;;  %s17924_s6 = inlined_call_operand.vmem [shape: f32[1,4], index: 6, kind: input, shape index: {}]   ;;  %s17925_s7 = inlined_call_operand.vmem [shape: f32[4,100], index: 7, kind: input, shape index: {}]   ;;  %s17926_s8 = inlined_call_operand.vmem [shape: f32[4,4], index: 8, kind: input, shape index: {}]   ;;  %s17927_s9 = inlined_call_operand.<no memory space> [shape: f32[1,1], index: 9, kind: input, shape index: {}]   ;;  %s17928_s10 = inlined_call_operand.hbm [shape: f32[4,4], index: 10, kind: output, shape index: {0}]   ;;  %s17929_s11 = inlined_call_operand.hbm [shape: f32[1,1], index: 11, kind: output, shape index: {1}]  }
   0x1   :  { %v17_v0 = vstv %s17927_s9 }
   0x2   :  { %18 = vst [vmem:[#allocation2] sm:$0x1] %v17_v0 }
   0x3   :  { %19 = vsyncpa [#allocation4], 0  ;;  %v483_v1 = vld [vmem:[%s17919_s1 + $0x38] sm:$0xff]  ;;  %v12693_v2 = vmov 0.0   ;;  %v482_v3 = vld [vmem:[%s17919_s1 + $0x30] sm:$0xff]  ;;  %vm12694_vm0 = vmmov 0  }
   0x4   :  { %10526 = vmatprep.subr.mxu0 %v12693_v2  ;;  %10542 = vmatprep.mubr.msk.f32.mxu0 %vm12694_vm0, %v12693_v2  ;;  %v481_v4 = vld [vmem:[%s17919_s1 + $0x28] sm:$0xff]  ;;  %v480_v5 = vld [vmem:[%s17919_s1 + $0x20] sm:$0xff]  ;;  %v479_v7 = vld [vmem:[%s17919_s1 + $0x18] sm:$0xff]  ;;  %vm491_vm1 = vcmask 523264  }
   0x5   :  { %10527 = vmatpush3.msra.mxu0 %v483_v1  ;;  %v41_v6 = vld [vmem:[%s17918_s0] sm:$0xff]  ;;  %v478_v8 = vld [vmem:[%s17919_s1 + $0x10] sm:$0xff]  ;;  %v42_v10 = vld [vmem:[%s17918_s0 + $0x8] sm:$0xff] }
   0x6   :  { %10528 = vmatprep.subr.mxu0 %v12693_v2  ;;  %v186_v9 = vmul.f32 0.007843138, %v41_v6  ;;  %v477_v11 = vld [vmem:[%s17919_s1 + $0x8] sm:$0xff]  ;;  %v476_v12 = vld [vmem:[%s17919_s1] sm:$0xff]  ;;  %v187_v14 = vmul.f32 0.007843138, %v42_v10 }
   0x7   :  { %10529 = vmatpush3.msra.mxu0 %v482_v3  ;;  %v43_v15 = vld [vmem:[%s17918_s0 + $0x10] sm:$0xff]  ;;  %v44_v18 = vld [vmem:[%s17918_s0 + $0x18] sm:$0xff]  ;;  %v45_v21 = vld [vmem:[%s17918_s0 + $0x20] sm:$0xff] }
   0x8   :  { %10530 = vmatprep.subr.mxu0 %v12693_v2  ;;  %v8553_v13 = vadd.f32 -1.0, %v186_v9  ;;  %v8554_v16 = vadd.f32 -1.0, %v187_v14  ;;  %v188_v17 = vmul.f32 0.007843138, %v43_v15  ;;  %v189_v20 = vmul.f32 0.007843138, %v44_v18 }
   0x9   :  { %10531 = vmatpush3.msra.mxu0 %v481_v4  ;;  %v190_v23 = vmul.f32 0.007843138, %v45_v21  ;;  %v46_v24 = vld [vmem:[%s17918_s0 + $0x28] sm:$0xff] }
   0xa   :  { %10532 = vmatprep.subr.mxu0 %v12693_v2  ;;  %v8555_v19 = vadd.f32 -1.0, %v188_v17  ;;  %v8556_v22 = vadd.f32 -1.0, %v189_v20  ;;  %v191_v26 = vmul.f32 0.007843138, %v46_v24 }
   0xb   :  { %10533 = vmatpush3.msra.mxu0 %v480_v5  ;;  %v8557_v25 = vadd.f32 -1.0, %v190_v23 }
   0xc   :  { %10534 = vmatprep.subr.mxu0 %v12693_v2 }
   0xd   :  { %10535 = vmatpush3.msra.mxu0 %v479_v7 }
   0xe   :  { %10536 = vmatprep.subr.mxu0 %v12693_v2 }
   0xf   :  { %10537 = vmatpush3.msra.mxu0 %v478_v8 }
  0x10   :  { %10538 = vmatprep.subr.mxu0 %v12693_v2 }
  0x11   :  { %10539 = vmatpush3.msra.mxu0 %v477_v11 }
  0x12   :  { %10540 = vmatprep.subr.mxu0 %v12693_v2 }
  0x13   :  { %10541 = vmatpush3.msra.mxu0 %v476_v12 }
  0x14   :  { %10543 = vmatmul.mubr.msk.f32.vlgmr.msra.gmra.mxu0 %vm491_vm1, %v8553_v13  ;;  %11385 = vmatprep.subr.mxu0 %v12693_v2 }
  0x15   :  { %10545 = vmatprep.mubr.msk.f32.mxu0 %vm12694_vm0, %v12693_v2 }
  0x18   :  { %10546 = vmatmul.mubr.msk.f32.gmra.mxu0 %vm491_vm1, %v8554_v16 }
  0x19   :  { %10548 = vmatprep.mubr.msk.f32.mxu0 %vm12694_vm0, %v12693_v2 }
  0x1c   :  { %10549 = vmatmul.mubr.msk.f32.gmra.mxu0 %vm491_vm1, %v8555_v19 }
  0x1d   :  { %10551 = vmatprep.mubr.msk.f32.mxu0 %vm12694_vm0, %v12693_v2 }
  0x20   :  { %10552 = vmatmul.mubr.msk.f32.gmra.mxu0 %vm491_vm1, %v8556_v22 }
  0x21   :  { %20 = vsyncpa [#allocation6], 0  ;;  %10554 = vmatprep.mubr.msk.f32.mxu0 %vm12694_vm0, %v12693_v2  ;;  %v47_v27 = vld [vmem:[%s17918_s0 + $0x30] sm:$0xff]  ;;  %v8558_v28 = vadd.f32 -1.0, %v191_v26  ;;  %v48_v30 = vld [vmem:[%s17918_s0 + $0x38] sm:$0xff]  ;;  %vm1942_vm2 = vcmask 31744  }
  0x22   :  { %v192_v29 = vmul.f32 0.007843138, %v47_v27  ;;  %v193_v32 = vmul.f32 0.007843138, %v48_v30  ;;  %v49_v33 = vld [vmem:[%s17918_s0 + $0x40] sm:$0xff]  ;;  %v50_v36 = vld [vmem:[%s17918_s0 + $0x48] sm:$0xff] }
  0x23   :  { %v194_v35 = vmul.f32 0.007843138, %v49_v33  ;;  %v195_v38 = vmul.f32 0.007843138, %v50_v36  ;;  %v51_v39 = vld [vmem:[%s17918_s0 + $0x50] sm:$0xff]  ;;  %v52_v42 = vld [vmem:[%s17918_s0 + $0x58] sm:$0xff] }
  0x24   :  { %10555 = vmatmul.mubr.msk.f32.gmra.mxu0 %vm491_vm1, %v8557_v25  ;;  %v8559_v31 = vadd.f32 -1.0, %v192_v29  ;;  %v8560_v34 = vadd.f32 -1.0, %v193_v32  ;;  %v196_v41 = vmul.f32 0.007843138, %v51_v39  ;;  %v197_v44 = vmul.f32 0.007843138, %v52_v42 }
  0x25   :  { %10557 = vmatprep.mubr.msk.f32.mxu0 %vm12694_vm0, %v12693_v2  ;;  %v8561_v37 = vadd.f32 -1.0, %v194_v35  ;;  %v8562_v40 = vadd.f32 -1.0, %v195_v38  ;;  %v53_v45 = vld [vmem:[%s17918_s0 + $0x60] sm:$0xff]  ;;  %v54_v48 = vld [vmem:[%s17918_s0 + $0x68] sm:$0xff]  ;;  %v55_v51 = vld [vmem:[%s17918_s0 + $0x70] sm:$0xff]  ;;  %vm1967_vm3 = vcmask 1043456  }
  0x26   :  { %v8563_v43 = vadd.f32 -1.0, %v196_v41  ;;  %v8564_v46 = vadd.f32 -1.0, %v197_v44  ;;  %v198_v47 = vmul.f32 0.007843138, %v53_v45  ;;  %v199_v50 = vmul.f32 0.007843138, %v54_v48 }
  0x27   :  { %v200_v53 = vmul.f32 0.007843138, %v55_v51  ;;  %v56_v54 = vld [vmem:[%s17918_s0 + $0x78] sm:$0xff]  ;;  %v57_v57 = vld [vmem:[%s17918_s0 + $0x80] sm:$0xff]  ;;  %v58_v60 = vld [vmem:[%s17918_s0 + $0x88] sm:$0xff]  ;;  %vm2870_vm4 = vcmask 261120  }
  0x28   :  { %10558 = vmatmul.mubr.msk.f32.gmra.mxu0 %vm491_vm1, %v8558_v28  ;;  %v8565_v49 = vadd.f32 -1.0, %v198_v47  ;;  %v8566_v52 = vadd.f32 -1.0, %v199_v50  ;;  %v201_v56 = vmul.f32 0.007843138, %v56_v54  ;;  %v202_v59 = vmul.f32 0.007843138, %v57_v57 }
  0x29   :  { %10560 = vmatprep.mubr.msk.f32.mxu0 %vm12694_vm0, %v12693_v2  ;;  %v8567_v55 = vadd.f32 -1.0, %v200_v53  ;;  %v203_v62 = vmul.f32 0.007843138, %v58_v60  ;;  %v59_v63 = vld [vmem:[%s17918_s0 + $0x90] sm:$0xff]  ;;  %v60_v3 = vld [vmem:[%s17918_s0 + $0x98] sm:$0xff]  ;;  %v61_v6 = vld [vmem:[%s17918_s0 + $0xa0] sm:$0xff] }
  0x2a   :  { %v8568_v58 = vadd.f32 -1.0, %v201_v56  ;;  %v8569_v61 = vadd.f32 -1.0, %v202_v59  ;;  %v204_v1 = vmul.f32 0.007843138, %v59_v63  ;;  %v205_v5 = vmul.f32 0.007843138, %v60_v3 }
  0x2b   :  { %v8570_v0 = vadd.f32 -1.0, %v203_v62  ;;  %v206_v8 = vmul.f32 0.007843138, %v61_v6  ;;  %v62_v9 = vld [vmem:[%s17918_s0 + $0xa8] sm:$0xff]  ;;  %v63_v12 = vld [vmem:[%s17918_s0 + $0xb0] sm:$0xff]  ;;  %v64_v15 = vld [vmem:[%s17918_s0 + $0xb8] sm:$0xff] }
  0x2c   :  { %10561 = vmatmul.mubr.msk.f32.gmra.mxu0 %vm491_vm1, %v8559_v31  ;;  %v8571_v4 = vadd.f32 -1.0, %v204_v1  ;;  %v8572_v7 = vadd.f32 -1.0, %v205_v5  ;;  %v207_v11 = vmul.f32 0.007843138, %v62_v9  ;;  %v208_v14 = vmul.f32 0.007843138, %v63_v12 }
  0x2d   :  { %10563 = vmatprep.mubr.msk.f32.mxu0 %vm12694_vm0, %v12693_v2  ;;  %v8573_v10 = vadd.f32 -1.0, %v206_v8  ;;  %v209_v17 = vmul.f32 0.007843138, %v64_v15  ;;  %v65_v18 = vld [vmem:[%s17918_s0 + $0xc0] sm:$0xff]  ;;  %v66_v21 = vld [vmem:[%s17918_s0 + $0xc8] sm:$0xff]  ;;  %v67_v24 = vld [vmem:[%s17918_s0 + $0xd0] sm:$0xff] }
  0x2e   :  { %v8574_v13 = vadd.f32 -1.0, %v207_v11  ;;  %v8575_v16 = vadd.f32 -1.0, %v208_v14  ;;  %v210_v20 = vmul.f32 0.007843138, %v65_v18  ;;  %v211_v23 = vmul.f32 0.007843138, %v66_v21 }
  0x2f   :  { %v8576_v19 = vadd.f32 -1.0, %v209_v17  ;;  %v212_v26 = vmul.f32 0.007843138, %v67_v24  ;;  %v68_v27 = vld [vmem:[%s17918_s0 + $0xd8] sm:$0xff]  ;;  %v69_v30 = vld [vmem:[%s17918_s0 + $0xe0] sm:$0xff]  ;;  %v70_v33 = vld [vmem:[%s17918_s0 + $0xe8] sm:$0xff] }
  0x30   :  { %10564 = vmatmul.mubr.msk.f32.gmra.mxu0 %vm491_vm1, %v8560_v34  ;;  %v8577_v22 = vadd.f32 -1.0, %v210_v20  ;;  %v8578_v25 = vadd.f32 -1.0, %v211_v23  ;;  %v213_v29 = vmul.f32 0.007843138, %v68_v27  ;;  %v214_v32 = vmul.f32 0.007843138, %v69_v30 }
  0x31   :  { %10566 = vmatprep.mubr.msk.f32.mxu0 %vm12694_vm0, %v12693_v2  ;;  %v8579_v28 = vadd.f32 -1.0, %v212_v26  ;;  %v215_v35 = vmul.f32 0.007843138, %v70_v33  ;;  %v71_v36 = vld [vmem:[%s17918_s0 + $0xf0] sm:$0xff]  ;;  %v72_v39 = vld [vmem:[%s17918_s0 + $0xf8] sm:$0xff]  ;;  %v73_v42 = vld [vmem:[%s17918_s0 + $0x100] sm:$0xff] }
  0x32   :  { %v8580_v31 = vadd.f32 -1.0, %v213_v29  ;;  %v8581_v34 = vadd.f32 -1.0, %v214_v32  ;;  %v216_v38 = vmul.f32 0.007843138, %v71_v36  ;;  %v217_v41 = vmul.f32 0.007843138, %v72_v39 }
  0x33   :  { %v218_v44 = vmul.f32 0.007843138, %v73_v42  ;;  %v74_v45 = vld [vmem:[%s17918_s0 + $0x108] sm:$0xff]  ;;  %v75_v48 = vld [vmem:[%s17918_s0 + $0x110] sm:$0xff]  ;;  %v76_v51 = vld [vmem:[%s17918_s0 + $0x118] sm:$0xff]  ;;  %vm8423_vm5 = vcmask 818176  }
  0x34   :  { %10567 = vmatmul.mubr.msk.f32.gmra.mxu0 %vm491_vm1, %v8561_v37  ;;  %v8582_v37 = vadd.f32 -1.0, %v215_v35  ;;  %v219_v47 = vmul.f32 0.007843138, %v74_v45  ;;  %v220_v50 = vmul.f32 0.007843138, %v75_v48  ;;  %v77_v54 = vld [vmem:[%s17918_s0 + $0x120] sm:$0xff] }
  0x35   :  { %10569 = vmatprep.mubr.msk.f32.mxu0 %vm12694_vm0, %v12693_v2  ;;  %v221_v53 = vmul.f32 0.007843138, %v76_v51  ;;  %v222_v56 = vmul.f32 0.007843138, %v77_v54  ;;  %v78_v57 = vld [vmem:[%s17918_s0 + $0x128] sm:$0xff]  ;;  %v79_v60 = vld [vmem:[%s17918_s0 + $0x130] sm:$0xff] }
  0x36   :  { %v223_v59 = vmul.f32 0.007843138, %v78_v57  ;;  %v224_v62 = vmul.f32 0.007843138, %v79_v60  ;;  %v80_v63 = vld [vmem:[%s17918_s0 + $0x138] sm:$0xff]  ;;  %v81_v3 = vld [vmem:[%s17918_s0 + $0x140] sm:$0xff] }
  0x37   :  { %v225_v1 = vmul.f32 0.007843138, %v80_v63  ;;  %v226_v5 = vmul.f32 0.007843138, %v81_v3  ;;  %v82_v6 = vld [vmem:[%s17918_s0 + $0x148] sm:$0xff]  ;;  %v83_v9 = vld [vmem:[%s17918_s0 + $0x150] sm:$0xff] }
  0x38   :  { %10570 = vmatmul.mubr.msk.f32.gmra.mxu0 %vm491_vm1, %v8562_v40  ;;  %v8583_v40 = vadd.f32 -1.0, %v216_v38  ;;  %v227_v8 = vmul.f32 0.007843138, %v82_v6  ;;  %v228_v11 = vmul.f32 0.007843138, %v83_v9  ;;  %v84_v12 = vld [vmem:[%s17918_s0 + $0x158] sm:$0xff] }
  0x39   :  { %10572 = vmatprep.mubr.msk.f32.mxu0 %vm12694_vm0, %v12693_v2  ;;  %v229_v14 = vmul.f32 0.007843138, %v84_v12  ;;  %v85_v15 = vld [vmem:[%s17918_s0 + $0x160] sm:$0xff]  ;;  %v86_v18 = vld [vmem:[%s17918_s0 + $0x168] sm:$0xff]  ;;  %v87_v21 = vld [vmem:[%s17918_s0 + $0x170] sm:$0xff]  ;;  %vm8500_vm6 = vcmask 27648  }
  0x3a   :  { %v230_v17 = vmul.f32 0.007843138, %v85_v15  ;;  %v231_v20 = vmul.f32 0.007843138, %v86_v18  ;;  %v232_v23 = vmul.f32 0.007843138, %v87_v21 }
  0x3b   :  { %v88_v24 = vld [vmem:[%s17918_s0 + $0x178] sm:$0xff]  ;;  %v89_v27 = vld [vmem:[%s17918_s0 + $0x180] sm:$0xff]  ;;  %v90_v30 = vld [vmem:[%s17918_s0 + $0x188] sm:$0xff]  ;;  %s12695_s14 = smov [#allocation3]  }
  0x3c   :  { %10573 = vmatmul.mubr.msk.f32.gmra.mxu0 %vm491_vm1, %v8563_v43  ;;  %v8584_v43 = vadd.f32 -1.0, %v217_v41  ;;  %v233_v26 = vmul.f32 0.007843138, %v88_v24  ;;  %v234_v29 = vmul.f32 0.007843138, %v89_v27  ;;  %v91_v33 = vld [vmem:[%s17918_s0 + $0x190] sm:$0xff] }
  0x3d   :  { %10575 = vmatprep.mubr.msk.f32.mxu0 %vm12694_vm0, %v12693_v2  ;;  %v235_v32 = vmul.f32 0.007843138, %v90_v30  ;;  %v236_v36 = vmul.f32 0.007843138, %v91_v33  ;;  %v93_v42 = vld [vmem:[%s17918_s0 + $0x1a0] sm:$0xff]  ;;  %v96_v57 = vld [vmem:[%s17918_s0 + $0x1b8] sm:$0xff] }
  0x3e   :  { %v99_v9 = vld [vmem:[%s17918_s0 + $0x1d0] sm:$0xff]  ;;  %v102_v24 = vld [vmem:[%s17918_s0 + $0x1e8] sm:$0xff]  ;;  %s8531_s15 = sshll.u32 %s12695_s14, 4  ;;  %s8532_s15 = int_to_ptr.vmem [resolvable:$true] %s8531_s15 }
  0x3f   :  { %v8602_v35 = vadd.f32 -1.0, %v235_v32  ;;  %p12654_p1 = scmp.lt.s32.totalorder %s8532_s15, %s8532_s15 }
  0x40   :  { %10576 = vmatmul.mubr.msk.f32.gmra.mxu0 %vm491_vm1, %v8564_v46  ;;  %v8585_v46 = vadd.f32 -1.0, %v218_v44 }
  0x41   :  { %10578 = vmatprep.mubr.msk.f32.mxu0 %vm12694_vm0, %v12693_v2 }
  0x44   :  { %10579 = vmatmul.mubr.msk.f32.gmra.mxu0 %vm491_vm1, %v8565_v49  ;;  %v8586_v49 = vadd.f32 -1.0, %v219_v47  ;;  %v94_v47 = vld [vmem:[%s17918_s0 + $0x1a8] sm:$0xff] }
  0x45   :  { %10581 = vmatprep.mubr.msk.f32.mxu0 %vm12694_vm0, %v12693_v2  ;;  %v239_v51 = vmul.f32 0.007843138, %v94_v47  ;;  %v106_v47 = vld [vmem:[%s17918_s0 + $0x208] sm:$0xff] }
  0x48   :  { %10582 = vmatmul.mubr.msk.f32.gmra.mxu0 %vm491_vm1, %v8566_v52  ;;  %v8587_v52 = vadd.f32 -1.0, %v220_v50 }
  0x49   :  { %10584 = vmatprep.mubr.msk.f32.mxu0 %vm12694_vm0, %v12693_v2 }
  0x4c   :  { %10585 = vmatmul.mubr.msk.f32.gmra.mxu0 %vm491_vm1, %v8567_v55  ;;  %v8588_v55 = vadd.f32 -1.0, %v221_v53 }
  0x4d   :  { %10587 = vmatprep.mubr.msk.f32.mxu0 %vm12694_vm0, %v12693_v2 }
  0x50   :  { %10588 = vmatmul.mubr.msk.f32.gmra.mxu0 %vm491_vm1, %v8568_v58  ;;  %v8589_v58 = vadd.f32 -1.0, %v222_v56 }
  0x51   :  { %10590 = vmatprep.mubr.msk.f32.mxu0 %vm12694_vm0, %v12693_v2 }
  0x54   :  { %10591 = vmatmul.mubr.msk.f32.gmra.mxu0 %vm491_vm1, %v8569_v61  ;;  %v8590_v61 = vadd.f32 -1.0, %v223_v59 }
  0x55   :  { %10593 = vmatprep.mubr.msk.f32.mxu0 %vm12694_vm0, %v12693_v2 }
  0x58   :  { %10594 = vmatmul.mubr.msk.f32.gmra.mxu0 %vm491_vm1, %v8570_v0  ;;  %v8591_v0 = vadd.f32 -1.0, %v224_v62  ;;  %v97_v62 = vld [vmem:[%s17918_s0 + $0x1c0] sm:$0xff] }
  0x59   :  { %10596 = vmatprep.mubr.msk.f32.mxu0 %vm12694_vm0, %v12693_v2  ;;  %v242_v3 = vmul.f32 0.007843138, %v97_v62 }
  0x5c   :  { %10597 = vmatmul.mubr.msk.f32.gmra.mxu0 %vm491_vm1, %v8571_v4  ;;  %v8592_v4 = vadd.f32 -1.0, %v225_v1 }
  0x5d   :  { %10599 = vmatprep.mubr.msk.f32.mxu0 %vm12694_vm0, %v12693_v2 }
  0x60   :  { %10600 = vmatmul.mubr.msk.f32.gmra.mxu0 %vm491_vm1, %v8572_v7  ;;  %v8593_v7 = vadd.f32 -1.0, %v226_v5 }
  0x61   :  { %10602 = vmatprep.mubr.msk.f32.mxu0 %vm12694_vm0, %v12693_v2 }
  0x64   :  { %10603 = vmatmul.mubr.msk.f32.gmra.mxu0 %vm491_vm1, %v8573_v10  ;;  %v8594_v10 = vadd.f32 -1.0, %v227_v8 }
  0x65   :  { %10605 = vmatprep.mubr.msk.f32.mxu0 %vm12694_vm0, %v12693_v2 }
  0x68   :  { %10606 = vmatmul.mubr.msk.f32.gmra.mxu0 %vm491_vm1, %v8574_v13  ;;  %v8595_v13 = vadd.f32 -1.0, %v228_v11 }
  0x69   :  { %10608 = vmatprep.mubr.msk.f32.mxu0 %vm12694_vm0, %v12693_v2 }
  0x6c   :  { %10609 = vmatmul.mubr.msk.f32.gmra.mxu0 %vm491_vm1, %v8575_v16  ;;  %v8596_v16 = vadd.f32 -1.0, %v229_v14  ;;  %v100_v14 = vld [vmem:[%s17918_s0 + $0x1d8] sm:$0xff] }
  0x6d   :  { %10611 = vmatprep.mubr.msk.f32.mxu0 %vm12694_vm0, %v12693_v2  ;;  %v245_v18 = vmul.f32 0.007843138, %v100_v14 }
  0x70   :  { %10612 = vmatmul.mubr.msk.f32.gmra.mxu0 %vm491_vm1, %v8576_v19  ;;  %v8597_v19 = vadd.f32 -1.0, %v230_v17 }
  0x71   :  { %10614 = vmatprep.mubr.msk.f32.mxu0 %vm12694_vm0, %v12693_v2 }
  0x74   :  { %10615 = vmatmul.mubr.msk.f32.gmra.mxu0 %vm491_vm1, %v8577_v22  ;;  %v8598_v22 = vadd.f32 -1.0, %v231_v20 }
  0x75   :  { %10617 = vmatprep.mubr.msk.f32.mxu0 %vm12694_vm0, %v12693_v2 }
  0x78   :  { %10618 = vmatmul.mubr.msk.f32.gmra.mxu0 %vm491_vm1, %v8578_v25  ;;  %v8599_v25 = vadd.f32 -1.0, %v232_v23 }
  0x79   :  { %10620 = vmatprep.mubr.msk.f32.mxu0 %vm12694_vm0, %v12693_v2 }
  0x7c   :  { %10621 = vmatmul.mubr.msk.f32.gmra.mxu0 %vm491_vm1, %v8579_v28  ;;  %v8600_v28 = vadd.f32 -1.0, %v233_v26 }
  0x7d   :  { %10623 = vmatprep.mubr.msk.f32.mxu0 %vm12694_vm0, %v12693_v2 }
  0x80   :  { %10624 = vmatmul.mubr.msk.f32.gmra.mxu0 %vm491_vm1, %v8580_v31  ;;  %v8601_v31 = vadd.f32 -1.0, %v234_v29  ;;  %v103_v29 = vld [vmem:[%s17918_s0 + $0x1f0] sm:$0xff] }
  0x81   :  { %10626 = vmatprep.mubr.msk.f32.mxu0 %vm12694_vm0, %v12693_v2  ;;  %v248_v33 = vmul.f32 0.007843138, %v103_v29 }
  0x84   :  { %10627 = vmatmul.mubr.msk.f32.gmra.mxu0 %vm491_vm1, %v8581_v34 }
  0x85   :  { %10629 = vmatprep.mubr.msk.f32.mxu0 %vm12694_vm0, %v12693_v2 }
  0x88   :  { %10630 = vmatmul.mubr.msk.f32.gmra.mxu0 %vm491_vm1, %v8582_v37  ;;  %v92_v37 = vld [vmem:[%s17918_s0 + $0x198] sm:$0xff] }
  0x89   :  { %10632 = vmatprep.mubr.msk.f32.mxu0 %vm12694_vm0, %v12693_v2  ;;  %v237_v41 = vmul.f32 0.007843138, %v92_v37 }
  0x8b   :  { %v8604_v45 = vadd.f32 -1.0, %v237_v41  ;;  %v105_v41 = vld [vmem:[%s17918_s0 + $0x200] sm:$0xff] }
  0x8c   :  { %10633 = vmatmul.mubr.msk.f32.gmra.mxu0 %vm491_vm1, %v8583_v40  ;;  %v8603_v40 = vadd.f32 -1.0, %v236_v36 }
  0x8d   :  { %10635 = vmatprep.mubr.msk.f32.mxu0 %vm12694_vm0, %v12693_v2 }
  0x90   :  { %10636 = vmatmul.mubr.msk.f32.gmra.mxu0 %vm491_vm1, %v8584_v43 }
  0x91   :  { %10638 = vmatprep.mubr.msk.f32.mxu0 %vm12694_vm0, %v12693_v2 }
  0x94   :  { %10639 = vmatmul.mubr.msk.f32.gmra.mxu0 %vm491_vm1, %v8585_v46  ;;  %v238_v46 = vmul.f32 0.007843138, %v93_v42 }
  0x95   :  { %10641 = vmatprep.mubr.msk.f32.mxu0 %vm12694_vm0, %v12693_v2 }
  0x96   :  { %v8605_v50 = vadd.f32 -1.0, %v238_v46  ;;  %v250_v46 = vmul.f32 0.007843138, %v105_v41 }
  0x98   :  { %10642 = vmatmul.mubr.msk.f32.gmra.mxu0 %vm491_vm1, %v8586_v49 }
  0x99   :  { %10644 = vmatprep.mubr.msk.f32.mxu0 %vm12694_vm0, %v12693_v2 }
  0x9c   :  { %10645 = vmatmul.mubr.msk.f32.gmra.mxu0 %vm491_vm1, %v8587_v52  ;;  %v95_v52 = vld [vmem:[%s17918_s0 + $0x1b0] sm:$0xff] }
  0x9d   :  { %10647 = vmatprep.mubr.msk.f32.mxu0 %vm12694_vm0, %v12693_v2  ;;  %v240_v56 = vmul.f32 0.007843138, %v95_v52  ;;  %v251_v52 = vmul.f32 0.007843138, %v106_v47 }
  0x9f   :  { %v8607_v60 = vadd.f32 -1.0, %v240_v56 }
  0xa0   :  { %10648 = vmatmul.mubr.msk.f32.gmra.mxu0 %vm491_vm1, %v8588_v55  ;;  %v8606_v55 = vadd.f32 -1.0, %v239_v51  ;;  %v8617_v51 = vadd.f32 -1.0, %v250_v46 }
  0xa1   :  { %10650 = vmatprep.mubr.msk.f32.mxu0 %vm12694_vm0, %v12693_v2 }
  0xa4   :  { %10651 = vmatmul.mubr.msk.f32.gmra.mxu0 %vm491_vm1, %v8589_v58 }
  0xa5   :  { %10653 = vmatprep.mubr.msk.f32.mxu0 %vm12694_vm0, %v12693_v2 }
  0xa8   :  { %10654 = vmatmul.mubr.msk.f32.gmra.mxu0 %vm491_vm1, %v8590_v61  ;;  %v241_v61 = vmul.f32 0.007843138, %v96_v57  ;;  %v8618_v57 = vadd.f32 -1.0, %v251_v52 }
  0xa9   :  { %10656 = vmatprep.mubr.msk.f32.mxu0 %vm12694_vm0, %v12693_v2 }
  0xaa   :  { %v8608_v1 = vadd.f32 -1.0, %v241_v61 }
  0xac   :  { %10657 = vmatmul.mubr.msk.f32.gmra.mxu0 %vm491_vm1, %v8591_v0 }
  0xad   :  { %10659 = vmatprep.mubr.msk.f32.mxu0 %vm12694_vm0, %v12693_v2 }
  0xb0   :  { %10660 = vmatmul.mubr.msk.f32.gmra.mxu0 %vm491_vm1, %v8592_v4  ;;  %v98_v4 = vld [vmem:[%s17918_s0 + $0x1c8] sm:$0xff] }
  0xb1   :  { %10662 = vmatprep.mubr.msk.f32.mxu0 %vm12694_vm0, %v12693_v2  ;;  %v243_v8 = vmul.f32 0.007843138, %v98_v4 }
  0xb3   :  { %v8610_v12 = vadd.f32 -1.0, %v243_v8 }
  0xb4   :  { %10663 = vmatmul.mubr.msk.f32.gmra.mxu0 %vm491_vm1, %v8593_v7  ;;  %v8609_v7 = vadd.f32 -1.0, %v242_v3  ;;  %v109_v3 = vld [vmem:[%s17918_s0 + $0x220] sm:$0xff] }
  0xb5   :  { %10665 = vmatprep.mubr.msk.f32.mxu0 %vm12694_vm0, %v12693_v2  ;;  %v254_v8 = vmul.f32 0.007843138, %v109_v3  ;;  %v118_v3 = vld [vmem:[%s17918_s0 + $0x268] sm:$0xff] }
  0xb8   :  { %10666 = vmatmul.mubr.msk.f32.gmra.mxu0 %vm491_vm1, %v8594_v10 }
  0xb9   :  { %10668 = vmatprep.mubr.msk.f32.mxu0 %vm12694_vm0, %v12693_v2 }
  0xbc   :  { %10669 = vmatmul.mubr.msk.f32.gmra.mxu0 %vm491_vm1, %v8595_v13  ;;  %v244_v13 = vmul.f32 0.007843138, %v99_v9  ;;  %v110_v9 = vld [vmem:[%s17918_s0 + $0x228] sm:$0xff] }
  0xbd   :  { %10671 = vmatprep.mubr.msk.f32.mxu0 %vm12694_vm0, %v12693_v2  ;;  %v255_v14 = vmul.f32 0.007843138, %v110_v9  ;;  %v263_v9 = vmul.f32 0.007843138, %v118_v3 }
  0xbe   :  { %v8611_v17 = vadd.f32 -1.0, %v244_v13  ;;  %v8621_v13 = vadd.f32 -1.0, %v254_v8 }
  0xc0   :  { %10672 = vmatmul.mubr.msk.f32.gmra.mxu0 %vm491_vm1, %v8596_v16 }
  0xc1   :  { %10674 = vmatprep.mubr.msk.f32.mxu0 %vm12694_vm0, %v12693_v2 }
  0xc4   :  { %10675 = vmatmul.mubr.msk.f32.gmra.mxu0 %vm491_vm1, %v8597_v19  ;;  %v101_v19 = vld [vmem:[%s17918_s0 + $0x1e0] sm:$0xff] }
  0xc5   :  { %10677 = vmatprep.mubr.msk.f32.mxu0 %vm12694_vm0, %v12693_v2  ;;  %v246_v23 = vmul.f32 0.007843138, %v101_v19  ;;  %v8622_v19 = vadd.f32 -1.0, %v255_v14 }
  0xc7   :  { %v8613_v27 = vadd.f32 -1.0, %v246_v23 }
  0xc8   :  { %10678 = vmatmul.mubr.msk.f32.gmra.mxu0 %vm491_vm1, %v8598_v22  ;;  %v8612_v22 = vadd.f32 -1.0, %v245_v18 }
  0xc9   :  { %10680 = vmatprep.mubr.msk.f32.mxu0 %vm12694_vm0, %v12693_v2 }
  0xcc   :  { %10681 = vmatmul.mubr.msk.f32.gmra.mxu0 %vm491_vm1, %v8599_v25 }
  0xcd   :  { %10683 = vmatprep.mubr.msk.f32.mxu0 %vm12694_vm0, %v12693_v2 }
  0xd0   :  { %10684 = vmatmul.mubr.msk.f32.gmra.mxu0 %vm491_vm1, %v8600_v28  ;;  %v247_v28 = vmul.f32 0.007843138, %v102_v24 }
  0xd1   :  { %10686 = vmatprep.mubr.msk.f32.mxu0 %vm12694_vm0, %v12693_v2 }
  0xd2   :  { %v8614_v32 = vadd.f32 -1.0, %v247_v28  ;;  %v113_v28 = vld [vmem:[%s17918_s0 + $0x240] sm:$0xff] }
  0xd4   :  { %v13092_v34 = vpop.f32.mrf.mxu0  ;;  %10687 = vmatmul.mubr.msk.f32.gmra.mxu0 %vm491_vm1, %v8601_v31 }
  0xd5   :  { %10689 = vmatprep.mubr.msk.f32.mxu0 %vm12694_vm0, %v12693_v2 }
  0xd6   :  { %v10544_v38 = vpop.f32.mrf.mxu0 }
  0xd7   :  { %v8615_v38 = vadd.f32 -1.0, %v248_v33  ;;  %v258_v33 = vmul.f32 0.007843138, %v113_v28 }
  0xd8   :  { %v13100_v39 = vpop.f32.mrf.mxu0  ;;  %10690 = vmatmul.mubr.msk.f32.gmra.mxu0 %vm491_vm1, %v8602_v35  ;;  %v104_v35 = vld [vmem:[%s17918_s0 + $0x1f8] sm:$0xff] }
  0xd9   :  { %10692 = vmatprep.mubr.msk.f32.mxu0 %vm12694_vm0, %v12693_v2 }
  0xda   :  { %v10547_v43 = vpop.f32.mrf.mxu0 }
  0xdc   :  { %v13108_v44 = vpop.f32.mrf.mxu0  ;;  %10693 = vmatmul.mubr.msk.f32.gmra.mxu0 %vm491_vm1, %v8603_v40  ;;  %v249_v40 = vmul.f32 0.007843138, %v104_v35  ;;  %v114_v35 = vld [vmem:[%s17918_s0 + $0x248] sm:$0xff] }
  0xdd   :  { %10695 = vmatprep.mubr.msk.f32.mxu0 %vm12694_vm0, %v12693_v2  ;;  %v259_v41 = vmul.f32 0.007843138, %v114_v35  ;;  %v122_v35 = vld [vmem:[%s17918_s0 + $0x288] sm:$0xff] }
  0xde   :  { %v10550_v48 = vpop.f32.mrf.mxu0 }
  0xdf   :  { %v8626_v47 = vadd.f32 -1.0, %v259_v41 }
  0xe0   :  { %v13116_v49 = vpop.f32.mrf.mxu0  ;;  %10696 = vmatmul.mubr.msk.f32.gmra.mxu0 %vm491_vm1, %v8604_v45  ;;  %v8616_v45 = vadd.f32 -1.0, %v249_v40  ;;  %v8625_v40 = vadd.f32 -1.0, %v258_v33 }
  0xe1   :  { %10698 = vmatprep.mubr.msk.f32.mxu0 %vm12694_vm0, %v12693_v2 }
  0xe2   :  { %v10553_v53 = vpop.f32.mrf.mxu0 }
  0xe3   :  { %v107_v53 = vld [vmem:[%s17918_s0 + $0x210] sm:$0xff] }
  0xe4   :  { %v13124_v54 = vpop.f32.mrf.mxu0  ;;  %10699 = vmatmul.mubr.msk.f32.gmra.mxu0 %vm491_vm1, %v8605_v50 }
  0xe5   :  { %10701 = vmatprep.mubr.msk.f32.mxu0 %vm12694_vm0, %v12693_v2 }
  0xe6   :  { %v10556_v58 = vpop.f32.mrf.mxu0 }
  0xe7   :  { %v252_v58 = vmul.f32 0.007843138, %v107_v53 }
  0xe8   :  { %v13132_v59 = vpop.f32.mrf.mxu0  ;;  %10702 = vmatmul.mubr.msk.f32.gmra.mxu0 %vm491_vm1, %v8606_v55 }
  0xe9   :  { %10704 = vmatprep.mubr.msk.f32.mxu0 %vm12694_vm0, %v12693_v2 }
  0xea   :  { %v10559_v63 = vpop.f32.mrf.mxu0 }
  0xeb   :  { %v8619_v63 = vadd.f32 -1.0, %v252_v58  ;;  %v117_v58 = vld [vmem:[%s17918_s0 + $0x260] sm:$0xff] }
  0xec   :  { %v13140_v0 = vpop.f32.mrf.mxu0  ;;  %10705 = vmatmul.mubr.msk.f32.gmra.mxu0 %vm491_vm1, %v8607_v60  ;;  %v108_v60 = vld [vmem:[%s17918_s0 + $0x218] sm:$0xff] }
  0xed   :  { %10707 = vmatprep.mubr.msk.f32.mxu0 %vm12694_vm0, %v12693_v2 }
  0xee   :  { %v10562_v5 = vpop.f32.mrf.mxu0 }
  0xf0   :  { %v13148_v6 = vpop.f32.mrf.mxu0  ;;  %10708 = vmatmul.mubr.msk.f32.gmra.mxu0 %vm491_vm1, %v8608_v1  ;;  %v253_v1 = vmul.f32 0.007843138, %v108_v60 }
  0xf1   :  { %10710 = vmatprep.mubr.msk.f32.mxu0 %vm12694_vm0, %v12693_v2 }
  0xf2   :  { %v10565_v10 = vpop.f32.mrf.mxu0 }
  0xf4   :  { %v13156_v11 = vpop.f32.mrf.mxu0  ;;  %10711 = vmatmul.mubr.msk.f32.gmra.mxu0 %vm491_vm1, %v8609_v7  ;;  %v8620_v7 = vadd.f32 -1.0, %v253_v1  ;;  %v262_v1 = vmul.f32 0.007843138, %v117_v58 }
  0xf5   :  { %10713 = vmatprep.mubr.msk.f32.mxu0 %vm12694_vm0, %v12693_v2 }
  0xf6   :  { %v10568_v15 = vpop.f32.mrf.mxu0  ;;  %v8629_v8 = vadd.f32 -1.0, %v262_v1 }
  0xf7   :  { %v111_v15 = vld [vmem:[%s17918_s0 + $0x230] sm:$0xff] }
  0xf8   :  { %v13164_v16 = vpop.f32.mrf.mxu0  ;;  %10714 = vmatmul.mubr.msk.f32.gmra.mxu0 %vm491_vm1, %v8610_v12 }
  0xf9   :  { %10716 = vmatprep.mubr.msk.f32.mxu0 %vm12694_vm0, %v12693_v2 }
  0xfa   :  { %v10571_v20 = vpop.f32.mrf.mxu0 }
  0xfb   :  { %v256_v20 = vmul.f32 0.007843138, %v111_v15  ;;  %v8630_v15 = vadd.f32 -1.0, %v263_v9 }
  0xfc   :  { %v13172_v21 = vpop.f32.mrf.mxu0  ;;  %10717 = vmatmul.mubr.msk.f32.gmra.mxu0 %vm491_vm1, %v8611_v17 }
  0xfd   :  { %10719 = vmatprep.mubr.msk.f32.mxu0 %vm12694_vm0, %v12693_v2 }
  0xfe   :  { %v10574_v25 = vpop.f32.mrf.mxu0 }
  0xff   :  { %v8623_v25 = vadd.f32 -1.0, %v256_v20 }
 0x100   :  { %v13180_v26 = vpop.f32.mrf.mxu0  ;;  %10720 = vmatmul.mubr.msk.f32.gmra.mxu0 %vm491_vm1, %v8612_v22  ;;  %v112_v22 = vld [vmem:[%s17918_s0 + $0x238] sm:$0xff] }
 0x101   :  { %10722 = vmatprep.mubr.msk.f32.mxu0 %vm12694_vm0, %v12693_v2 }
 0x102   :  { %v10577_v30 = vpop.f32.mrf.mxu0 }
 0x104   :  { %v13188_v31 = vpop.f32.mrf.mxu0  ;;  %10723 = vmatmul.mubr.msk.f32.gmra.mxu0 %vm491_vm1, %v8613_v27  ;;  %v257_v27 = vmul.f32 0.007843138, %v112_v22 }
 0x105   :  { %10725 = vmatprep.mubr.msk.f32.mxu0 %vm12694_vm0, %v12693_v2 }
 0x106   :  { %v10580_v36 = vpop.f32.mrf.mxu0 }
 0x108   :  { %v13196_v37 = vpop.f32.mrf.mxu0  ;;  %10726 = vmatmul.mubr.msk.f32.gmra.mxu0 %vm491_vm1, %v8614_v32  ;;  %v8624_v32 = vadd.f32 -1.0, %v257_v27  ;;  %v121_v27 = vld [vmem:[%s17918_s0 + $0x280] sm:$0xff] }
 0x109   :  { %10728 = vmatprep.mubr.msk.f32.mxu0 %vm12694_vm0, %v12693_v2  ;;  %v266_v33 = vmul.f32 0.007843138, %v121_v27 }
 0x10a   :  { %v10583_v42 = vpop.f32.mrf.mxu0 }
 0x10b   :  { %v115_v42 = vld [vmem:[%s17918_s0 + $0x250] sm:$0xff] }
 0x10c   :  { %v13204_v43 = vpop.f32.mrf.mxu0  ;;  %10729 = vmatmul.mubr.msk.f32.gmra.mxu0 %vm491_vm1, %v8615_v38 }
 0x10d   :  { %10731 = vmatprep.mubr.msk.f32.mxu0 %vm12694_vm0, %v12693_v2 }
 0x10e   :  { %v10586_v48 = vpop.f32.mrf.mxu0 }
 0x10f   :  { %v260_v48 = vmul.f32 0.007843138, %v115_v42 }
 0x110   :  { %v13212_v50 = vpop.f32.mrf.mxu0  ;;  %10732 = vmatmul.mubr.msk.f32.gmra.mxu0 %vm491_vm1, %v8616_v45 }
 0x111   :  { %10734 = vmatprep.mubr.msk.f32.mxu0 %vm12694_vm0, %v12693_v2 }
 0x112   :  { %v10589_v55 = vpop.f32.mrf.mxu0 }
 0x113   :  { %v8627_v55 = vadd.f32 -1.0, %v260_v48 }
 0x114   :  { %v13220_v56 = vpop.f32.mrf.mxu0  ;;  %10735 = vmatmul.mubr.msk.f32.gmra.mxu0 %vm491_vm1, %v8617_v51  ;;  %v116_v51 = vld [vmem:[%s17918_s0 + $0x258] sm:$0xff] }
 0x115   :  { %10737 = vmatprep.mubr.msk.f32.mxu0 %vm12694_vm0, %v12693_v2 }
 0x116   :  { %v10592_v61 = vpop.f32.mrf.mxu0 }
 0x118   :  { %v13228_v62 = vpop.f32.mrf.mxu0  ;;  %10738 = vmatmul.mubr.msk.f32.gmra.mxu0 %vm491_vm1, %v8618_v57  ;;  %v261_v57 = vmul.f32 0.007843138, %v116_v51 }
 0x119   :  { %10740 = vmatprep.mubr.msk.f32.mxu0 %vm12694_vm0, %v12693_v2 }
 0x11a   :  { %v10595_v4 = vpop.f32.mrf.mxu0 }
 0x11c   :  { %v13236_v5 = vpop.f32.mrf.mxu0  ;;  %10741 = vmatmul.mubr.msk.f32.gmra.mxu0 %vm491_vm1, %v8619_v63  ;;  %v8628_v63 = vadd.f32 -1.0, %v261_v57 }
 0x11d   :  { %10743 = vmatprep.mubr.msk.f32.mxu0 %vm12694_vm0, %v12693_v2 }
 0x11e   :  { %v10598_v10 = vpop.f32.mrf.mxu0 }
 0x11f   :  { %v119_v10 = vld [vmem:[%s17918_s0 + $0x270] sm:$0xff] }
 0x120   :  { %v13244_v12 = vpop.f32.mrf.mxu0  ;;  %10744 = vmatmul.mubr.msk.f32.gmra.mxu0 %vm491_vm1, %v8620_v7 }
 0x121   :  { %10746 = vmatprep.mubr.msk.f32.mxu0 %vm12694_vm0, %v12693_v2 }
 0x122   :  { %v10601_v17 = vpop.f32.mrf.mxu0 }
 0x123   :  { %v264_v17 = vmul.f32 0.007843138, %v119_v10 }
 0x124   :  { %v13252_v18 = vpop.f32.mrf.mxu0  ;;  %10747 = vmatmul.mubr.msk.f32.gmra.mxu0 %vm491_vm1, %v8621_v13 }
 0x125   :  { %10749 = vmatprep.mubr.msk.f32.mxu0 %vm12694_vm0, %v12693_v2 }
 0x126   :  { %v10604_v23 = vpop.f32.mrf.mxu0 }
 0x127   :  { %v8631_v23 = vadd.f32 -1.0, %v264_v17 }
 0x128   :  { %v13260_v24 = vpop.f32.mrf.mxu0  ;;  %10750 = vmatmul.mubr.msk.f32.gmra.mxu0 %vm491_vm1, %v8622_v19  ;;  %v120_v19 = vld [vmem:[%s17918_s0 + $0x278] sm:$0xff] }
 0x129   :  { %10752 = vmatprep.mubr.msk.f32.mxu0 %vm12694_vm0, %v12693_v2 }
 0x12a   :  { %v10607_v29 = vpop.f32.mrf.mxu0 }
 0x12c   :  { %v13268_v30 = vpop.f32.mrf.mxu0  ;;  %10753 = vmatmul.mubr.msk.f32.gmra.mxu0 %vm491_vm1, %v8623_v25  ;;  %v265_v25 = vmul.f32 0.007843138, %v120_v19 }
 0x12d   :  { %10755 = vmatprep.mubr.msk.f32.mxu0 %vm12694_vm0, %v12693_v2 }
 0x12e   :  { %v10610_v36 = vpop.f32.mrf.mxu0 }
 0x130   :  { %v13276_v38 = vpop.f32.mrf.mxu0  ;;  %10756 = vmatmul.mubr.msk.f32.gmra.mxu0 %vm491_vm1, %v8624_v32  ;;  %v8632_v32 = vadd.f32 -1.0, %v265_v25 }
 0x131   :  { %10758 = vmatprep.mubr.msk.f32.mxu0 %vm12694_vm0, %v12693_v2 }
 0x132   :  { %v10613_v45 = vpop.f32.mrf.mxu0 }
 0x133   :  { %v8633_v45 = vadd.f32 -1.0, %v266_v33 }
 0x134   :  { %v13284_v46 = vpop.f32.mrf.mxu0  ;;  %10759 = vmatmul.mubr.msk.f32.gmra.mxu0 %vm491_vm1, %v8625_v40  ;;  %v13335_v40 = vld [vmem:[%s17920_s2] ss:$0 sm:$0xff] }
 0x135   :  { %10761 = vmatprep.mubr.msk.f32.mxu0 %vm12694_vm0, %v12693_v2  ;;  %v1069_v41 = vadd.f32 %v13335_v40, %v13212_v50  ;;  %v1054_v10 = vadd.f32 %v13335_v40, %v13188_v31 }
 0x136   :  { %v10616_v52 = vpop.f32.mrf.mxu0 }
 0x137   :  { %v123_v52 = vld [vmem:[%s17918_s0 + $0x290] sm:$0xff] }
 0x138   :  { %v13292_v53 = vpop.f32.mrf.mxu0  ;;  %10762 = vmatmul.mubr.msk.f32.gmra.mxu0 %vm491_vm1, %v8626_v47  ;;  %v267_v47 = vmul.f32 0.007843138, %v122_v35 }
 0x139   :  { %10764 = vmatprep.mubr.msk.f32.mxu0 %vm12694_vm0, %v12693_v2 }
 0x13a   :  { %v10619_v60 = vpop.f32.mrf.mxu0  ;;  %v8634_v3 = vadd.f32 -1.0, %v267_v47 }
 0x13b   :  { %v1059_v60 = vadd.f32 %v13335_v40, %v13196_v37  ;;  %v124_v37 = vld [vmem:[%s17918_s0 + $0x298] sm:$0xff] }
 0x13c   :  { %v13300_v61 = vpop.f32.mrf.mxu0  ;;  %10765 = vmatmul.mubr.msk.f32.gmra.mxu0 %vm491_vm1, %v8627_v55  ;;  %v1064_v55 = vadd.f32 %v13335_v40, %v13204_v43  ;;  %v269_v25 = vmul.f32 0.007843138, %v124_v37 }
 0x13d   :  { %10767 = vmatprep.mubr.msk.f32.mxu0 %vm12694_vm0, %v12693_v2  ;;  %v1124_v31 = vadd.f32 %v13335_v40, %v13300_v61  ;;  %v1039_v61 = vadd.f32 %v13335_v40, %v13164_v16  ;;  %v126_v16 = vld [vmem:[%s17918_s0 + $0x2a8] sm:$0xff] }
 0x13e   :  { %v10622_v4 = vpop.f32.mrf.mxu0 }
 0x13f   :  { %v268_v4 = vmul.f32 0.007843138, %v123_v52 }
 0x140   :  { %v1128_v7 = vpop.f32.mrf.mxu0  ;;  %10768 = vmatmul.mubr.msk.f32.gmra.mxu0 %vm491_vm1, %v8628_v63  ;;  %v1732_v63 = vmax.f32 %v1069_v41, 0.0  ;;  %v8636_v41 = vadd.f32 -1.0, %v269_v25 }
 0x141   :  { %10770 = vmatprep.mubr.msk.f32.mxu0 %vm12694_vm0, %v12693_v2  ;;  %v1129_v17 = vadd.f32 %v13335_v40, %v1128_v7  ;;  %v1044_v7 = vadd.f32 %v13335_v40, %v13172_v21  ;;  %v1114_v21 = vadd.f32 %v13335_v40, %v13284_v46  ;;  %v1029_v46 = vadd.f32 %v13335_v40, %v13148_v6  ;;  %v127_v6 = vld [vmem:[%s17918_s0 + $0x2b0] sm:$0xff] }
 0x142   :  { %v10625_v13 = vpop.f32.mrf.mxu0 }
 0x143   :  { %v1731_v13 = vmax.f32 %v1064_v55, 0.0  ;;  %v1744_v33 = vmax.f32 %v1129_v17, 0.0  ;;  %v1727_v47 = vmax.f32 %v1044_v7, 0.0  ;;  %v1726_v55 = vmax.f32 %v1039_v61, 0.0 }
 0x144   :  { %v1133_v14 = vpop.f32.mrf.mxu0  ;;  %10771 = vmatmul.mubr.msk.f32.gmra.mxu0 %vm491_vm1, %v8629_v8  ;;  %v1863_v8 = vld [vmem:[%s17921_s3 + $0x8] sm:$0xff] }
 0x145   :  { %10773 = vmatprep.mubr.msk.f32.mxu0 %vm12694_vm0, %v12693_v2  ;;  %v1134_v43 = vadd.f32 %v13335_v40, %v1133_v14  ;;  %2035 = vmatprep.mubr.f32.mxu1 %v1863_v8  ;;  %v1049_v14 = vadd.f32 %v13335_v40, %v13180_v26  ;;  %v125_v26 = vld [vmem:[%s17918_s0 + $0x2a0] sm:$0xff] }
 0x146   :  { %v10628_v20 = vpop.f32.mrf.mxu0 }
 0x147   :  { %v1730_v20 = vmax.f32 %v1059_v60, 0.0  ;;  %v1745_v27 = vmax.f32 %v1134_v43, 0.0  ;;  %v1728_v35 = vmax.f32 %v1049_v14, 0.0  ;;  %v1741_v60 = vmax.f32 %v1114_v21, 0.0 }
 0x148   :  { %v1138_v22 = vpop.f32.mrf.mxu0  ;;  %10774 = vmatmul.mubr.msk.f32.gmra.mxu0 %vm491_vm1, %v8630_v15  ;;  %v1724_v43 = vmax.f32 %v1029_v46, 0.0  ;;  %v1862_v46 = vld [vmem:[%s17921_s3] sm:$0xff] }
 0x149   :  { %10776 = vmatprep.mubr.msk.f32.mxu0 %vm12694_vm0, %v12693_v2  ;;  %v1139_v57 = vadd.f32 %v13335_v40, %v1138_v22 }
 0x14a   :  { %v10631_v28 = vpop.f32.mrf.mxu0 }
 0x14b   :  { %v1746_v19 = vmax.f32 %v1139_v57, 0.0  ;;  %v1729_v28 = vmax.f32 %v1054_v10, 0.0  ;;  %v272_v10 = vmul.f32 0.007843138, %v127_v6 }
 0x14c   :  { %v1143_v29 = vpop.f32.mrf.mxu0  ;;  %10777 = vmatmul.mubr.msk.f32.gmra.mxu0 %vm491_vm1, %v8631_v23  ;;  %v8635_v23 = vadd.f32 -1.0, %v268_v4  ;;  %v1099_v4 = vadd.f32 %v13335_v40, %v13260_v24  ;;  %v1014_v24 = vadd.f32 %v13335_v40, %v13124_v54  ;;  %v1084_v54 = vadd.f32 %v13335_v40, %v13236_v5 }
 0x14d   :  { %10779 = vmatprep.mubr.msk.f32.mxu0 %vm12694_vm0, %v12693_v2  ;;  %v1144_v48 = vadd.f32 %v13335_v40, %v1143_v29  ;;  %v8639_v25 = vadd.f32 -1.0, %v272_v10  ;;  %v999_v5 = vadd.f32 %v13335_v40, %v13100_v39  ;;  %v130_v39 = vld [vmem:[%s17918_s0 + $0x2c8] sm:$0xff] }
 0x14e   :  { %v10634_v36 = vpop.f32.mrf.mxu0  ;;  %v1738_v14 = vmax.f32 %v1099_v4, 0.0 }
 0x14f   :  { %v1747_v9 = vmax.f32 %v1144_v48, 0.0 }
 0x150   :  { %v1148_v42 = vpop.f32.mrf.mxu0  ;;  %10780 = vmatmul.mubr.msk.f32.gmra.mxu0 %vm491_vm1, %v8632_v32  ;;  %v1119_v32 = vadd.f32 %v13335_v40, %v13292_v53  ;;  %v1034_v53 = vadd.f32 %v13335_v40, %v13156_v11  ;;  %v1104_v11 = vadd.f32 %v13335_v40, %v13268_v30  ;;  %v1019_v30 = vadd.f32 %v13335_v40, %v13132_v59  ;;  %v128_v59 = vld [vmem:[%s17918_s0 + $0x2b8] sm:$0xff] }
 0x151   :  { %10782 = vmatprep.mubr.msk.f32.mxu0 %vm12694_vm0, %v12693_v2  ;;  %v1149_v51 = vadd.f32 %v13335_v40, %v1148_v42  ;;  %v270_v42 = vmul.f32 0.007843138, %v125_v26  ;;  %v1721_v26 = vmax.f32 %v1014_v24, 0.0  ;;  %v135_v24 = vld [vmem:[%s17918_s0 + $0x2f0] sm:$0xff] }
 0x152   :  { %v10637_v50 = vpop.f32.mrf.mxu0  ;;  %v1742_v52 = vmax.f32 %v1119_v32, 0.0 }
 0x153   :  { %v1748_v58 = vmax.f32 %v1149_v51, 0.0  ;;  %v1109_v51 = vadd.f32 %v13335_v40, %v13276_v38  ;;  %v8637_v57 = vadd.f32 -1.0, %v270_v42  ;;  %v1024_v38 = vadd.f32 %v13335_v40, %v13140_v0 }
 0x154   :  { %v13352_v1 = vpop.f32.mrf.mxu0  ;;  %10783 = vmatmul.mubr.msk.f32.gmra.mxu0 %vm491_vm1, %v8633_v45  ;;  %v1743_v45 = vmax.f32 %v1124_v31, 0.0  ;;  %v1094_v0 = vadd.f32 %v13335_v40, %v13252_v18  ;;  %v1009_v18 = vadd.f32 %v13335_v40, %v13116_v49  ;;  %v273_v31 = vmul.f32 0.007843138, %v128_v59  ;;  %v129_v49 = vld [vmem:[%s17918_s0 + $0x2c0] sm:$0xff] }
 0x155   :  { %9680 = vmatprep.subr.mxu1 %v1748_v58  ;;  %10785 = vmatprep.mubr.msk.f32.mxu0 %vm12694_vm0, %v12693_v2  ;;  %v271_v58 = vmul.f32 0.007843138, %v126_v16  ;;  %v1740_v8 = vmax.f32 %v1109_v51, 0.0  ;;  %v1718_v16 = vmax.f32 %v999_v5, 0.0 }
 0x156   :  { %v10640_v15 = vpop.f32.mrf.mxu0  ;;  %9681 = vmatpush3.msra.mxu1 %v1732_v63  ;;  %v1725_v63 = vmax.f32 %v1034_v53, 0.0  ;;  %v1720_v32 = vmax.f32 %v1009_v18, 0.0  ;;  %v8640_v61 = vadd.f32 -1.0, %v273_v31  ;;  %v136_v18 = vld [vmem:[%s17918_s0 + $0x2f8] sm:$0xff] }
 0x157   :  { %9682 = vmatprep.subr.mxu1 %v1747_v9  ;;  %v8638_v37 = vadd.f32 -1.0, %v271_v58  ;;  %v1723_v15 = vmax.f32 %v1024_v38, 0.0 }
 0x158   :  { %v13369_v22 = vpop.f32.mrf.mxu0  ;;  %10786 = vmatmul.mubr.msk.f32.gmra.mxu0 %vm491_vm1, %v8634_v3  ;;  %9683 = vmatpush3.msra.mxu1 %v1731_v13  ;;  %v1739_v13 = vmax.f32 %v1104_v11, 0.0  ;;  %v132_v11 = vld [vmem:[%s17918_s0 + $0x2d8] sm:$0xff] }
 0x159   :  { %9684 = vmatprep.subr.mxu1 %v1746_v19  ;;  %10788 = vmatprep.mubr.msk.f32.mxu0 %vm12694_vm0, %v12693_v2  ;;  %v1089_v19 = vadd.f32 %v13335_v40, %v13244_v12  ;;  %v1004_v12 = vadd.f32 %v13335_v40, %v13108_v44  ;;  %v1074_v44 = vadd.f32 %v13335_v40, %v13220_v56 }
 0x15a   :  { %v10643_v29 = vpop.f32.mrf.mxu0  ;;  %9685 = vmatpush3.msra.mxu1 %v1730_v20  ;;  %v1722_v20 = vmax.f32 %v1019_v30, 0.0 }
 0x15b   :  { %9686 = vmatprep.subr.mxu1 %v1745_v27  ;;  %v1737_v27 = vmax.f32 %v1094_v0, 0.0  ;;  %v1736_v29 = vmax.f32 %v1089_v19, 0.0  ;;  %v1719_v42 = vmax.f32 %v1004_v12, 0.0 }
 0x15c   :  { %v13385_v36 = vpop.f32.mrf.mxu0  ;;  %10789 = vmatmul.mubr.msk.f32.gmra.mxu0 %vm491_vm1, %v8635_v23  ;;  %9687 = vmatpush3.msra.mxu1 %v1729_v28  ;;  %v1079_v28 = vadd.f32 %v13335_v40, %v13228_v62  ;;  %v994_v62 = vadd.f32 %v13335_v40, %v13092_v34  ;;  %v131_v34 = vld [vmem:[%s17918_s0 + $0x2d0] sm:$0xff] }
 0x15d   :  { %9688 = vmatprep.subr.mxu1 %v1744_v33  ;;  %10791 = vmatprep.mubr.msk.f32.mxu0 %vm12694_vm0, %v12693_v2  ;;  %v276_v58 = vmul.f32 0.007843138, %v131_v34 }
 0x15e   :  { %v10646_v48 = vpop.f32.mrf.mxu0  ;;  %9689 = vmatpush3.msra.mxu1 %v1728_v35  ;;  %v274_v35 = vmul.f32 0.007843138, %v129_v49  ;;  %v1717_v51 = vmax.f32 %v994_v62, 0.0 }
 0x15f   :  { %9690 = vmatprep.subr.mxu1 %v1743_v45  ;;  %v1734_v45 = vmax.f32 %v1079_v28, 0.0  ;;  %v1733_v48 = vmax.f32 %v1074_v44, 0.0  ;;  %v8643_v38 = vadd.f32 -1.0, %v276_v58  ;;  %v138_v28 = vld [vmem:[%s17918_s0 + $0x308] sm:$0xff] }
 0x160   :  { %v13401_v50 = vpop.f32.mrf.mxu0  ;;  %10792 = vmatmul.mubr.msk.f32.gmra.mxu0 %vm491_vm1, %v8636_v41  ;;  %9691 = vmatpush3.msra.mxu1 %v1727_v47  ;;  %v1735_v41 = vmax.f32 %v1084_v54, 0.0  ;;  %v8641_v56 = vadd.f32 -1.0, %v274_v35  ;;  %v275_v47 = vmul.f32 0.007843138, %v130_v39  ;;  %v281_v54 = vmul.f32 0.007843138, %v136_v18 }
 0x161   :  { %9692 = vmatprep.subr.mxu1 %v1742_v52  ;;  %10794 = vmatprep.mubr.msk.f32.mxu0 %vm12694_vm0, %v12693_v2  ;;  %v139_v35 = vld [vmem:[%s17918_s0 + $0x310] sm:$0xff] }
 0x162   :  { %v10649_v3 = vpop.f32.mrf.mxu0  ;;  %9693 = vmatpush3.msra.mxu1 %v1726_v55  ;;  %v284_v62 = vmul.f32 0.007843138, %v139_v35 }
 0x163   :  { %9694 = vmatprep.subr.mxu1 %v1741_v60  ;;  %v133_v3 = vld [vmem:[%s17918_s0 + $0x2e0] sm:$0xff] }
 0x164   :  { %v13417_v9 = vpop.f32.mrf.mxu0  ;;  %10795 = vmatmul.mubr.msk.f32.gmra.mxu0 %vm491_vm1, %v8637_v57  ;;  %9695 = vmatpush3.msra.mxu1 %v1725_v63  ;;  %v8642_v57 = vadd.f32 -1.0, %v275_v47  ;;  %v277_v63 = vmul.f32 0.007843138, %v132_v11  ;;  %v141_v47 = vld [vmem:[%s17918_s0 + $0x320] sm:$0xff] }
 0x165   :  { %9696 = vmatprep.subr.mxu1 %v1740_v8  ;;  %10797 = vmatprep.mubr.msk.f32.mxu0 %vm12694_vm0, %v12693_v2 }
 0x166   :  { %v10652_v17 = vpop.f32.mrf.mxu0  ;;  %9697 = vmatpush3.msra.mxu1 %v1724_v43  ;;  %v8644_v30 = vadd.f32 -1.0, %v277_v63  ;;  %v278_v43 = vmul.f32 0.007843138, %v133_v3 }
 0x167   :  { %9698 = vmatprep.subr.mxu1 %v1739_v13 }
 0x168   :  { %v13433_v23 = vpop.f32.mrf.mxu0  ;;  %10798 = vmatmul.mubr.msk.f32.gmra.mxu0 %vm491_vm1, %v8638_v37  ;;  %9699 = vmatpush3.msra.mxu1 %v1723_v15  ;;  %v134_v37 = vld [vmem:[%s17918_s0 + $0x2e8] sm:$0xff]  ;;  %v8645_v13 = vadd.f32 -1.0, %v278_v43  ;;  %v144_v43 = vld [vmem:[%s17918_s0 + $0x338] sm:$0xff] }
 0x169   :  { %9700 = vmatprep.subr.mxu1 %v1738_v14  ;;  %10800 = vmatprep.mubr.msk.f32.mxu0 %vm12694_vm0, %v12693_v2  ;;  %v279_v59 = vmul.f32 0.007843138, %v134_v37  ;;  %v280_v14 = vmul.f32 0.007843138, %v135_v24  ;;  %v145_v24 = vld [vmem:[%s17918_s0 + $0x340] sm:$0xff] }
 0x16a   :  { %v10655_v7 = vpop.f32.mrf.mxu0  ;;  %9701 = vmatpush3.msra.mxu1 %v1722_v20  ;;  %v290_v18 = vmul.f32 0.007843138, %v145_v24 }
 0x16b   :  { %9702 = vmatprep.subr.mxu1 %v1737_v27  ;;  %v8646_v19 = vadd.f32 -1.0, %v279_v59  ;;  %v8647_v31 = vadd.f32 -1.0, %v280_v14  ;;  %v137_v27 = vld [vmem:[%s17918_s0 + $0x300] sm:$0xff]  ;;  %v289_v59 = vmul.f32 0.007843138, %v144_v43  ;;  %v1892_v43 = vld [vmem:[%s17921_s3 + $0xf0] sm:$0xff] }
 0x16c   :  { %v13449_v33 = vpop.f32.mrf.mxu0  ;;  %10801 = vmatmul.mubr.msk.f32.gmra.mxu0 %vm491_vm1, %v8639_v25  ;;  %9703 = vmatpush3.msra.mxu1 %v1721_v26  ;;  %v8648_v26 = vadd.f32 -1.0, %v281_v54  ;;  %v282_v7 = vmul.f32 0.007843138, %v137_v27  ;;  %v8657_v27 = vadd.f32 -1.0, %v290_v18  ;;  %v1902_v18 = vld [vmem:[%s17921_s3 + $0x140] sm:$0xff] }
 0x16d   :  { %9704 = vmatprep.subr.mxu1 %v1736_v29  ;;  %10803 = vmatprep.mubr.msk.f32.mxu0 %vm12694_vm0, %v12693_v2  ;;  %v8656_v14 = vadd.f32 -1.0, %v289_v59 }
 0x16e   :  { %v10658_v21 = vpop.f32.mrf.mxu0  ;;  %9705 = vmatpush3.msra.mxu1 %v1720_v32  ;;  %v8649_v32 = vadd.f32 -1.0, %v282_v7 }
 0x16f   :  { %9706 = vmatprep.subr.mxu1 %v1735_v41 }
 0x170   :  { %v13461_v53 = vpop.f32.mrf.mxu0  ;;  %10804 = vmatmul.mubr.msk.f32.gmra.mxu0 %vm491_vm1, %v8640_v61  ;;  %9707 = vmatpush3.msra.mxu1 %v1719_v42  ;;  %v283_v61 = vmul.f32 0.007843138, %v138_v28  ;;  %v140_v42 = vld [vmem:[%s17918_s0 + $0x318] sm:$0xff] }
 0x171   :  { %9708 = vmatprep.subr.mxu1 %v1734_v45  ;;  %10806 = vmatprep.mubr.msk.f32.mxu0 %vm12694_vm0, %v12693_v2 }
 0x172   :  { %v10661_v52 = vpop.f32.mrf.mxu0  ;;  %9709 = vmatpush3.msra.mxu1 %v1718_v16  ;;  %v8650_v39 = vadd.f32 -1.0, %v283_v61  ;;  %v8651_v16 = vadd.f32 -1.0, %v284_v62  ;;  %v148_v61 = vld [vmem:[%s17918_s0 + $0x358] sm:$0xff] }
 0x173   :  { %9710 = vmatprep.subr.mxu1 %v1733_v48  ;;  %v286_v52 = vmul.f32 0.007843138, %v141_v47  ;;  %v293_v62 = vmul.f32 0.007843138, %v148_v61 }
 0x174   :  { %v13472_v55 = vpop.f32.mrf.mxu0  ;;  %10807 = vmatmul.mubr.msk.f32.gmra.mxu0 %vm491_vm1, %v8641_v56  ;;  %9711 = vmatpush3.msra.mxu1 %v1717_v51  ;;  %v285_v56 = vmul.f32 0.007843138, %v140_v42  ;;  %v1873_v42 = vld [vmem:[%s17921_s3 + $0x58] sm:$0xff] }
 0x175   :  { %10809 = vmatprep.mubr.msk.f32.mxu0 %vm12694_vm0, %v12693_v2  ;;  %2036 = vmatmul.mubr.f32.vlgmr.msra.gmra.mxu1 %v1862_v46  ;;  %v142_v46 = vld [vmem:[%s17918_s0 + $0x328] sm:$0xff]  ;;  %v8653_v11 = vadd.f32 -1.0, %v286_v52 }
 0x176   :  { %v10664_v60 = vpop.f32.mrf.mxu0  ;;  %v8652_v51 = vadd.f32 -1.0, %v285_v56  ;;  %2040 = vmatprep.mubr.f32.mxu1 %v1873_v42  ;;  %v1883_v52 = vld [vmem:[%s17921_s3 + $0xa8] sm:$0xff] }
 0x177   :  { %v287_v60 = vmul.f32 0.007843138, %v142_v46  ;;  %v150_v46 = vld [vmem:[%s17918_s0 + $0x368] sm:$0xff] }
 0x178   :  { %v13480_v6 = vpop.f32.mrf.mxu0  ;;  %10810 = vmatmul.mubr.msk.f32.gmra.mxu0 %vm491_vm1, %v8642_v57  ;;  %v154_v42 = vld [vmem:[%s17918_s0 + $0x388] sm:$0xff] }
 0x179   :  { %10812 = vmatprep.mubr.msk.f32.mxu0 %vm12694_vm0, %v12693_v2 }
 0x17a   :  { %v10667_v4 = vpop.f32.mrf.mxu0 }
 0x17b   :  { %v8654_v4 = vadd.f32 -1.0, %v287_v60 }
 0x17c   :  { %v13488_v8 = vpop.f32.mrf.mxu0  ;;  %10813 = vmatmul.mubr.msk.f32.gmra.mxu0 %vm491_vm1, %v8643_v38  ;;  %v143_v38 = vld [vmem:[%s17918_s0 + $0x330] sm:$0xff] }
 0x17d   :  { %10815 = vmatprep.mubr.msk.f32.mxu0 %vm12694_vm0, %v12693_v2 }
 0x17e   :  { %v10670_v10 = vpop.f32.mrf.mxu0 }
 0x180   :  { %v13496_v0 = vpop.f32.mrf.mxu0  ;;  %10816 = vmatmul.mubr.msk.f32.gmra.mxu0 %vm491_vm1, %v8644_v30  ;;  %v288_v30 = vmul.f32 0.007843138, %v143_v38 }
 0x181   :  { %10818 = vmatprep.mubr.msk.f32.mxu0 %vm12694_vm0, %v12693_v2 }
 0x182   :  { %v10673_v15 = vpop.f32.mrf.mxu0 }
 0x184   :  { %v13504_v17 = vpop.f32.mrf.mxu0  ;;  %10819 = vmatmul.mubr.msk.f32.gmra.mxu0 %vm491_vm1, %v8645_v13  ;;  %v8655_v13 = vadd.f32 -1.0, %v288_v30  ;;  %v151_v30 = vld [vmem:[%s17918_s0 + $0x370] sm:$0xff] }
 0x185   :  { %10821 = vmatprep.mubr.msk.f32.mxu0 %vm12694_vm0, %v12693_v2  ;;  %v296_v24 = vmul.f32 0.007843138, %v151_v30 }
 0x186   :  { %v10676_v20 = vpop.f32.mrf.mxu0 }
 0x187   :  { %v146_v20 = vld [vmem:[%s17918_s0 + $0x348] sm:$0xff] }
 0x188   :  { %v13512_v25 = vpop.f32.mrf.mxu0  ;;  %10822 = vmatmul.mubr.msk.f32.gmra.mxu0 %vm491_vm1, %v8646_v19 }
 0x189   :  { %10824 = vmatprep.mubr.msk.f32.mxu0 %vm12694_vm0, %v12693_v2 }
 0x18a   :  { %v10679_v49 = vpop.f32.mrf.mxu0 }
 0x18b   :  { %v291_v49 = vmul.f32 0.007843138, %v146_v20 }
 0x18c   :  { %v13520_v12 = vpop.f32.mrf.mxu0  ;;  %10825 = vmatmul.mubr.msk.f32.gmra.mxu0 %vm491_vm1, %v8647_v31 }
 0x18d   :  { %10827 = vmatprep.mubr.msk.f32.mxu0 %vm12694_vm0, %v12693_v2 }
 0x18e   :  { %v10682_v29 = vpop.f32.mrf.mxu0 }
 0x18f   :  { %v8658_v29 = vadd.f32 -1.0, %v291_v49 }
 0x190   :  { %v13528_v5 = vpop.f32.mrf.mxu0  ;;  %10828 = vmatmul.mubr.msk.f32.gmra.mxu0 %vm491_vm1, %v8648_v26  ;;  %v147_v26 = vld [vmem:[%s17918_s0 + $0x350] sm:$0xff] }
 0x191   :  { %10830 = vmatprep.mubr.msk.f32.mxu0 %vm12694_vm0, %v12693_v2 }
 0x192   :  { %v10685_v44 = vpop.f32.mrf.mxu0 }
 0x194   :  { %v13536_v41 = vpop.f32.mrf.mxu0  ;;  %10831 = vmatmul.mubr.msk.f32.gmra.mxu0 %vm491_vm1, %v8649_v32  ;;  %v292_v32 = vmul.f32 0.007843138, %v147_v26  ;;  %v1913_v26 = vld [vmem:[%s17921_s3 + $0x198] sm:$0xff] }
 0x195   :  { %10833 = vmatprep.mubr.msk.f32.mxu0 %vm12694_vm0, %v12693_v2 }
 0x196   :  { %v10688_v21 = vpop.f32.mrf.mxu0 }
 0x197   :  { %v149_v21 = vld [vmem:[%s17918_s0 + $0x360] sm:$0xff] }
 0x198   :  { %v13544_v45 = vpop.f32.mrf.mxu0  ;;  %10834 = vmatmul.mubr.msk.f32.gmra.mxu0 %vm491_vm1, %v8650_v39  ;;  %v8659_v39 = vadd.f32 -1.0, %v292_v32 }
 0x199   :  { %10836 = vmatprep.mubr.msk.f32.mxu0 %vm12694_vm0, %v12693_v2 }
 0x19a   :  { %v10691_v48 = vpop.f32.mrf.mxu0 }
 0x19b   :  { %v8660_v48 = vadd.f32 -1.0, %v293_v62  ;;  %v1923_v62 = vld [vmem:[%s17921_s3 + $0x1e8] sm:$0xff] }
 0x19c   :  { %v13552_v34 = vpop.f32.mrf.mxu0  ;;  %10837 = vmatmul.mubr.msk.f32.gmra.mxu0 %vm491_vm1, %v8651_v16  ;;  %v1872_v16 = vld [vmem:[%s17921_s3 + $0x50] sm:$0xff] }
 0x19d   :  { %10839 = vmatprep.mubr.msk.f32.mxu0 %vm12694_vm0, %v12693_v2  ;;  %2041 = vmatmul.mubr.f32.gmra.mxu1 %v1872_v16 }
 0x19e   :  { %v10694_v57 = vpop.f32.mrf.mxu0  ;;  %2045 = vmatprep.mubr.f32.mxu1 %v1883_v52  ;;  %v299_v52 = vmul.f32 0.007843138, %v154_v42 }
 0x19f   :  { %v1882_v57 = vld [vmem:[%s17921_s3 + $0xa0] sm:$0xff] }
 0x1a0   :  { %v13560_v58 = vpop.f32.mrf.mxu0  ;;  %10840 = vmatmul.mubr.msk.f32.gmra.mxu0 %vm491_vm1, %v8652_v51  ;;  %v294_v51 = vmul.f32 0.007843138, %v149_v21  ;;  %v1922_v21 = vld [vmem:[%s17921_s3 + $0x1e0] sm:$0xff] }
 0x1a1   :  { %10842 = vmatprep.mubr.msk.f32.mxu0 %vm12694_vm0, %v12693_v2  ;;  %2046 = vmatmul.mubr.f32.gmra.mxu1 %v1882_v57 }
 0x1a2   :  { %v10697_v63 = vpop.f32.mrf.mxu0  ;;  %v8661_v38 = vadd.f32 -1.0, %v294_v51 }
 0x1a3   :  { %v295_v63 = vmul.f32 0.007843138, %v150_v46  ;;  %v1933_v46 = vld [vmem:[%s17921_s3 + $0x238] sm:$0xff] }
 0x1a4   :  { %v13568_v3 = vpop.f32.mrf.mxu0  ;;  %10843 = vmatmul.mubr.msk.f32.gmra.mxu0 %vm491_vm1, %v8653_v11 }
 0x1a5   :  { %10845 = vmatprep.mubr.msk.f32.mxu0 %vm12694_vm0, %v12693_v2  ;;  %v8662_v59 = vadd.f32 -1.0, %v295_v63  ;;  %v1224_v63 = vadd.f32 %v13335_v40, %v13520_v12 }
 0x1a6   :  { %v10700_v37 = vpop.f32.mrf.mxu0 }
 0x1a8   :  { %v13576_v10 = vpop.f32.mrf.mxu0  ;;  %10846 = vmatmul.mubr.msk.f32.gmra.mxu0 %vm491_vm1, %v8654_v4  ;;  %v1893_v4 = vld [vmem:[%s17921_s3 + $0xf8] sm:$0xff] }
 0x1a9   :  { %10848 = vmatprep.mubr.msk.f32.mxu0 %vm12694_vm0, %v12693_v2  ;;  %2050 = vmatprep.mubr.f32.mxu1 %v1893_v4 }
 0x1aa   :  { %v10703_v15 = vpop.f32.mrf.mxu0  ;;  %2051 = vmatmul.mubr.f32.gmra.mxu1 %v1892_v43 }
 0x1ab   :  { %v1903_v15 = vld [vmem:[%s17921_s3 + $0x148] sm:$0xff] }
 0x1ac   :  { %v13584_v19 = vpop.f32.mrf.mxu0  ;;  %10849 = vmatmul.mubr.msk.f32.gmra.mxu0 %vm491_vm1, %v8655_v13  ;;  %2055 = vmatprep.mubr.f32.mxu1 %v1903_v15  ;;  %v8666_v15 = vadd.f32 -1.0, %v299_v52 }
 0x1ad   :  { %10851 = vmatprep.mubr.msk.f32.mxu0 %vm12694_vm0, %v12693_v2 }
 0x1ae   :  { %v10706_v31 = vpop.f32.mrf.mxu0  ;;  %2056 = vmatmul.mubr.f32.gmra.mxu1 %v1902_v18  ;;  %v1865_v18 = vld [vmem:[%s17921_s3 + $0x18] sm:$0xff] }
 0x1af   :  { %2060 = vmatprep.mubr.f32.mxu1 %v1913_v26 }
 0x1b0   :  { %v13592_v54 = vpop.f32.mrf.mxu0  ;;  %10852 = vmatmul.mubr.msk.f32.gmra.mxu0 %vm491_vm1, %v8656_v14  ;;  %v152_v14 = vld [vmem:[%s17918_s0 + $0x378] sm:$0xff] }
 0x1b1   :  { %10854 = vmatprep.mubr.msk.f32.mxu0 %vm12694_vm0, %v12693_v2  ;;  %v297_v49 = vmul.f32 0.007843138, %v152_v14 }
 0x1b2   :  { %v10709_v7 = vpop.f32.mrf.mxu0 }
 0x1b3   :  { %v153_v7 = vld [vmem:[%s17918_s0 + $0x380] sm:$0xff] }
 0x1b4   :  { %v13600_v28 = vpop.f32.mrf.mxu0  ;;  %10855 = vmatmul.mubr.msk.f32.gmra.mxu0 %vm491_vm1, %v8657_v27  ;;  %v8663_v27 = vadd.f32 -1.0, %v296_v24 }
 0x1b5   :  { %10857 = vmatprep.mubr.msk.f32.mxu0 %vm12694_vm0, %v12693_v2 }
 0x1b6   :  { %v10712_v35 = vpop.f32.mrf.mxu0 }
 0x1b7   :  { %v8664_v35 = vadd.f32 -1.0, %v297_v49 }
 0x1b8   :  { %v13608_v44 = vpop.f32.mrf.mxu0  ;;  %10858 = vmatmul.mubr.msk.f32.gmra.mxu0 %vm491_vm1, %v8658_v29  ;;  %v1912_v29 = vld [vmem:[%s17921_s3 + $0x190] sm:$0xff] }
 0x1b9   :  { %10860 = vmatprep.mubr.msk.f32.mxu0 %vm12694_vm0, %v12693_v2  ;;  %2061 = vmatmul.mubr.f32.gmra.mxu1 %v1912_v29 }
 0x1ba   :  { %v10715_v56 = vpop.f32.mrf.mxu0  ;;  %2065 = vmatprep.mubr.f32.mxu1 %v1923_v62 }
 0x1bb   :  { %v1229_v56 = vadd.f32 %v13335_v40, %v13528_v5  ;;  %v155_v5 = vld [vmem:[%s17918_s0 + $0x390] sm:$0xff] }
 0x1bc   :  { %v13622_v47 = vpop.f32.mrf.mxu0  ;;  %10861 = vmatmul.mubr.msk.f32.gmra.mxu0 %vm491_vm1, %v8659_v39  ;;  %v298_v39 = vmul.f32 0.007843138, %v153_v7  ;;  %v300_v14 = vmul.f32 0.007843138, %v155_v5  ;;  %v1209_v7 = vadd.f32 %v13335_v40, %v13496_v0  ;;  %v157_v0 = vld [vmem:[%s17918_s0 + $0x3a0] sm:$0xff]  ;;  %v1269_v5 = vadd.f32 %v13335_v40, %v13592_v54 }
 0x1bd   :  { %10863 = vmatprep.mubr.msk.f32.mxu0 %vm12694_vm0, %v12693_v2  ;;  %2066 = vmatmul.mubr.f32.gmra.mxu1 %v1922_v21  ;;  %v1279_v21 = vadd.f32 %v13335_v40, %v13608_v44  ;;  %v302_v52 = vmul.f32 0.007843138, %v157_v0  ;;  %v1194_v44 = vadd.f32 %v13335_v40, %v13472_v55  ;;  %v1264_v55 = vadd.f32 %v13335_v40, %v13584_v19 }
 0x1be   :  { %v10718_v11 = vpop.f32.mrf.mxu0  ;;  %v8665_v51 = vadd.f32 -1.0, %v298_v39  ;;  %2070 = vmatprep.mubr.f32.mxu1 %v1933_v46  ;;  %v1184_v54 = vadd.f32 %v13335_v40, %v13449_v33  ;;  %v1179_v19 = vadd.f32 %v13335_v40, %v13433_v23  ;;  %v1254_v33 = vadd.f32 %v13335_v40, %v13568_v3  ;;  %v160_v23 = vld [vmem:[%s17918_s0 + $0x3b8] sm:$0xff] }
 0x1bf   :  { %v1169_v3 = vadd.f32 %v13335_v40, %v13401_v50  ;;  %v161_v50 = vld [vmem:[%s17918_s0 + $0x3c0] sm:$0xff] }
 0x1c0   :  { %v13636_v60 = vpop.f32.mrf.mxu0  ;;  %10864 = vmatmul.mubr.msk.f32.gmra.mxu0 %vm491_vm1, %v8660_v48 }
 0x1c1   :  { %10866 = vmatprep.mubr.msk.f32.mxu0 %vm12694_vm0, %v12693_v2  ;;  %v1289_v26 = vadd.f32 %v13335_v40, %v13636_v60  ;;  %v1204_v60 = vadd.f32 %v13335_v40, %v13488_v8  ;;  %v1274_v8 = vadd.f32 %v13335_v40, %v13600_v28  ;;  %v1189_v28 = vadd.f32 %v13335_v40, %v13461_v53  ;;  %v159_v53 = vld [vmem:[%s17918_s0 + $0x3b0] sm:$0xff] }
 0x1c2   :  { %v10721_v37 = vpop.f32.mrf.mxu0 }
 0x1c3   :  { %v1219_v37 = vadd.f32 %v13335_v40, %v13512_v25  ;;  %v156_v25 = vld [vmem:[%s17918_s0 + $0x398] sm:$0xff] }
 0x1c4   :  { %v1293_v13 = vpop.f32.mrf.mxu0  ;;  %10867 = vmatmul.mubr.msk.f32.gmra.mxu0 %vm491_vm1, %v8661_v38  ;;  %v1932_v38 = vld [vmem:[%s17921_s3 + $0x230] sm:$0xff] }
 0x1c5   :  { %10869 = vmatprep.mubr.msk.f32.mxu0 %vm12694_vm0, %v12693_v2  ;;  %2071 = vmatmul.mubr.f32.gmra.mxu1 %v1932_v38  ;;  %v1294_v12 = vadd.f32 %v13335_v40, %v1293_v13  ;;  %v1762_v29 = vmax.f32 %v1219_v37, 0.0  ;;  %v1774_v38 = vmax.f32 %v1279_v21, 0.0  ;;  %v1773_v37 = vmax.f32 %v1274_v8, 0.0 }
 0x1c6   :  { %v10724_v20 = vpop.f32.mrf.mxu0  ;;  %2140 = vmatprep.mubr.f32.mxu1 %v1865_v18  ;;  %v1772_v18 = vmax.f32 %v1269_v5, 0.0  ;;  %v1752_v21 = vmax.f32 %v1169_v3, 0.0 }
 0x1c7   :  { %v1777_v39 = vmax.f32 %v1294_v12, 0.0  ;;  %v1756_v12 = vmax.f32 %v1189_v28, 0.0 }
 0x1c8   :  { %v1298_v31 = vpop.f32.mrf.mxu0  ;;  %10870 = vmatmul.mubr.msk.f32.gmra.mxu0 %vm491_vm1, %v8662_v59  ;;  %v1764_v59 = vmax.f32 %v1229_v56, 0.0  ;;  %v1760_v56 = vmax.f32 %v1209_v7, 0.0 }
 0x1c9   :  { %10872 = vmatprep.mubr.msk.f32.mxu0 %vm12694_vm0, %v12693_v2  ;;  %v1299_v30 = vadd.f32 %v13335_v40, %v1298_v31  ;;  %v1214_v31 = vadd.f32 %v13335_v40, %v13504_v17  ;;  %v301_v17 = vmul.f32 0.007843138, %v156_v25 }
 0x1ca   :  { %v10727_v32 = vpop.f32.mrf.mxu0 }
 0x1cb   :  { %v1778_v13 = vmax.f32 %v1299_v30, 0.0  ;;  %v1761_v62 = vmax.f32 %v1214_v31, 0.0  ;;  %v8669_v30 = vadd.f32 -1.0, %v302_v52  ;;  %v304_v31 = vmul.f32 0.007843138, %v159_v53 }
 0x1cc   :  { %v1303_v61 = vpop.f32.mrf.mxu0  ;;  %10873 = vmatmul.mubr.msk.f32.gmra.mxu0 %vm491_vm1, %v8663_v27  ;;  %v1763_v27 = vmax.f32 %v1224_v63, 0.0 }
 0x1cd   :  { %10875 = vmatprep.mubr.msk.f32.mxu0 %vm12694_vm0, %v12693_v2  ;;  %v1304_v57 = vadd.f32 %v13335_v40, %v1303_v61  ;;  %v8667_v61 = vadd.f32 -1.0, %v300_v14  ;;  %v1259_v14 = vadd.f32 %v13335_v40, %v13576_v10  ;;  %v1174_v10 = vadd.f32 %v13335_v40, %v13417_v9 }
 0x1ce   :  { %v10730_v16 = vpop.f32.mrf.mxu0  ;;  %v1244_v9 = vadd.f32 %v13335_v40, %v13552_v34  ;;  %v1159_v34 = vadd.f32 %v13335_v40, %v13369_v22  ;;  %v162_v22 = vld [vmem:[%s17918_s0 + $0x3c8] sm:$0xff] }
 0x1cf   :  { %v1779_v20 = vmax.f32 %v1304_v57, 0.0  ;;  %v1776_v16 = vmax.f32 %v1289_v26, 0.0  ;;  %v1759_v57 = vmax.f32 %v1204_v60, 0.0  ;;  %v1770_v7 = vmax.f32 %v1259_v14, 0.0 }
 0x1d0   :  { %v1308_v48 = vpop.f32.mrf.mxu0  ;;  %10876 = vmatmul.mubr.msk.f32.gmra.mxu0 %vm491_vm1, %v8664_v35  ;;  %v1284_v35 = vadd.f32 %v13335_v40, %v13622_v47  ;;  %v1199_v47 = vadd.f32 %v13335_v40, %v13480_v6  ;;  %v158_v6 = vld [vmem:[%s17918_s0 + $0x3a8] sm:$0xff]  ;;  %v1753_v0 = vmax.f32 %v1174_v10, 0.0 }
 0x1d1   :  { %v1309_v11 = vadd.f32 %v13335_v40, %v1308_v48  ;;  %10878 = vmatprep.mubr.msk.f32.mxu0 %vm12694_vm0, %v12693_v2 }
 0x1d2   :  { %v10733_v4 = vpop.f32.mrf.mxu0  ;;  %v1775_v46 = vmax.f32 %v1284_v35, 0.0  ;;  %v1758_v63 = vmax.f32 %v1199_v47, 0.0  ;;  %v305_v35 = vmul.f32 0.007843138, %v160_v23  ;;  %v167_v23 = vld [vmem:[%s17918_s0 + $0x3f0] sm:$0xff] }
 0x1d3   :  { %v1780_v43 = vmax.f32 %v1309_v11, 0.0 }
 0x1d4   :  { %v13707_v24 = vpop.f32.mrf.mxu0  ;;  %10879 = vmatmul.mubr.msk.f32.gmra.mxu0 %vm491_vm1, %v8665_v51  ;;  %v8668_v51 = vadd.f32 -1.0, %v301_v17  ;;  %v8671_v17 = vadd.f32 -1.0, %v304_v31  ;;  %v8672_v47 = vadd.f32 -1.0, %v305_v35 }
 0x1d5   :  { %9736 = vmatprep.subr.mxu1 %v1780_v43  ;;  %10881 = vmatprep.mubr.msk.f32.mxu0 %vm12694_vm0, %v12693_v2  ;;  %v303_v43 = vmul.f32 0.007843138, %v158_v6  ;;  %v1750_v6 = vmax.f32 %v1159_v34, 0.0 }
 0x1d6   :  { %v10736_v49 = vpop.f32.mrf.mxu0  ;;  %9737 = vmatpush3.msra.mxu1 %v1764_v59  ;;  %v1757_v59 = vmax.f32 %v1194_v44, 0.0 }
 0x1d7   :  { %9738 = vmatprep.subr.mxu1 %v1779_v20  ;;  %v8670_v25 = vadd.f32 -1.0, %v303_v43  ;;  %v1755_v49 = vmax.f32 %v1184_v54, 0.0  ;;  %v164_v43 = vld [vmem:[%s17918_s0 + $0x3d8] sm:$0xff] }
 0x1d8   :  { %v13725_v32 = vpop.f32.mrf.mxu0  ;;  %10882 = vmatmul.mubr.msk.f32.gmra.mxu0 %vm491_vm1, %v8666_v15  ;;  %9739 = vmatpush3.msra.mxu1 %v1763_v27  ;;  %v1771_v27 = vmax.f32 %v1264_v55, 0.0  ;;  %v309_v54 = vmul.f32 0.007843138, %v164_v43  ;;  %v174_v43 = vld [vmem:[%s17918_s0 + $0x428] sm:$0xff] }
 0x1d9   :  { %9740 = vmatprep.subr.mxu1 %v1778_v13  ;;  %10884 = vmatprep.mubr.msk.f32.mxu0 %vm12694_vm0, %v12693_v2  ;;  %v1249_v13 = vadd.f32 %v13335_v40, %v13560_v58  ;;  %v1164_v58 = vadd.f32 %v13335_v40, %v13385_v36  ;;  %v1234_v36 = vadd.f32 %v13335_v40, %v13536_v41 }
 0x1da   :  { %v10739_v42 = vpop.f32.mrf.mxu0  ;;  %9741 = vmatpush3.msra.mxu1 %v1762_v29  ;;  %v1754_v29 = vmax.f32 %v1179_v19, 0.0 }
 0x1db   :  { %9742 = vmatprep.subr.mxu1 %v1777_v39  ;;  %v1769_v39 = vmax.f32 %v1254_v33, 0.0  ;;  %v1768_v42 = vmax.f32 %v1249_v13, 0.0  ;;  %v1751_v52 = vmax.f32 %v1164_v58, 0.0  ;;  %v312_v13 = vmul.f32 0.007843138, %v167_v23 }
 0x1dc   :  { %v13741_v48 = vpop.f32.mrf.mxu0  ;;  %10885 = vmatmul.mubr.msk.f32.gmra.mxu0 %vm491_vm1, %v8667_v61  ;;  %9743 = vmatpush3.msra.mxu1 %v1761_v62  ;;  %v1239_v62 = vadd.f32 %v13335_v40, %v13544_v45  ;;  %v1154_v45 = vadd.f32 %v13335_v40, %v13352_v1  ;;  %v163_v40 = vld [vmem:[%s17918_s0 + $0x3d0] sm:$0xff] }
 0x1dd   :  { %9744 = vmatprep.subr.mxu1 %v1776_v16  ;;  %10887 = vmatprep.mubr.msk.f32.mxu0 %vm12694_vm0, %v12693_v2 }
 0x1de   :  { %v10742_v11 = vpop.f32.mrf.mxu0  ;;  %9745 = vmatpush3.msra.mxu1 %v1760_v56  ;;  %v306_v56 = vmul.f32 0.007843138, %v161_v50  ;;  %v1749_v1 = vmax.f32 %v1154_v45, 0.0  ;;  %v172_v45 = vld [vmem:[%s17918_s0 + $0x418] sm:$0xff] }
 0x1df   :  { %9746 = vmatprep.subr.mxu1 %v1775_v46  ;;  %v1766_v46 = vmax.f32 %v1239_v62, 0.0  ;;  %v1765_v11 = vmax.f32 %v1234_v36, 0.0 }
 0x1e0   :  { %v13757_v4 = vpop.f32.mrf.mxu0  ;;  %10888 = vmatmul.mubr.msk.f32.gmra.mxu0 %vm491_vm1, %v8668_v51  ;;  %9747 = vmatpush3.msra.mxu1 %v1759_v57  ;;  %v1767_v51 = vmax.f32 %v1244_v9, 0.0  ;;  %v8673_v41 = vadd.f32 -1.0, %v306_v56  ;;  %v307_v57 = vmul.f32 0.007843138, %v162_v22  ;;  %v169_v9 = vld [vmem:[%s17918_s0 + $0x400] sm:$0xff] }
 0x1e1   :  { %9748 = vmatprep.subr.mxu1 %v1774_v38  ;;  %10890 = vmatprep.mubr.msk.f32.mxu0 %vm12694_vm0, %v12693_v2  ;;  %v1864_v38 = vld [vmem:[%s17921_s3 + $0x10] sm:$0xff] }
 0x1e2   :  { %v10745_v15 = vpop.f32.mrf.mxu0  ;;  %9749 = vmatpush3.msra.mxu1 %v1758_v63  ;;  %v8674_v63 = vadd.f32 -1.0, %v307_v57  ;;  %v1874_v57 = vld [vmem:[%s17921_s3 + $0x60] sm:$0xff] }
 0x1e3   :  { %9750 = vmatprep.subr.mxu1 %v1773_v37 }
 0x1e4   :  { %v13773_v20 = vpop.f32.mrf.mxu0  ;;  %10891 = vmatmul.mubr.msk.f32.gmra.mxu0 %vm491_vm1, %v8669_v30  ;;  %9751 = vmatpush3.msra.mxu1 %v1757_v59  ;;  %v308_v30 = vmul.f32 0.007843138, %v163_v40  ;;  %v165_v59 = vld [vmem:[%s17918_s0 + $0x3e0] sm:$0xff] }
 0x1e5   :  { %9752 = vmatprep.subr.mxu1 %v1772_v18  ;;  %10893 = vmatprep.mubr.msk.f32.mxu0 %vm12694_vm0, %v12693_v2  ;;  %v8676_v18 = vadd.f32 -1.0, %v309_v54  ;;  %v310_v19 = vmul.f32 0.007843138, %v165_v59 }
 0x1e6   :  { %v10748_v26 = vpop.f32.mrf.mxu0  ;;  %9753 = vmatpush3.msra.mxu1 %v1756_v12  ;;  %v8675_v53 = vadd.f32 -1.0, %v308_v30  ;;  %v166_v12 = vld [vmem:[%s17918_s0 + $0x3e8] sm:$0xff]  ;;  %v1884_v30 = vld [vmem:[%s17921_s3 + $0xb0] sm:$0xff] }
 0x1e7   :  { %9754 = vmatprep.subr.mxu1 %v1771_v27  ;;  %v8677_v33 = vadd.f32 -1.0, %v310_v19  ;;  %v311_v27 = vmul.f32 0.007843138, %v166_v12  ;;  %v175_v19 = vld [vmem:[%s17918_s0 + $0x430] sm:$0xff] }
 0x1e8   :  { %v13789_v61 = vpop.f32.mrf.mxu0  ;;  %10894 = vmatmul.mubr.msk.f32.gmra.mxu0 %vm491_vm1, %v8670_v25  ;;  %9755 = vmatpush3.msra.mxu1 %v1755_v49  ;;  %v320_v23 = vmul.f32 0.007843138, %v175_v19 }
 0x1e9   :  { %9756 = vmatprep.subr.mxu1 %v1770_v7  ;;  %10896 = vmatprep.mubr.msk.f32.mxu0 %vm12694_vm0, %v12693_v2  ;;  %v8678_v26 = vadd.f32 -1.0, %v311_v27  ;;  %v168_v7 = vld [vmem:[%s17918_s0 + $0x3f8] sm:$0xff] }
 0x1ea   :  { %v10751_v60 = vpop.f32.mrf.mxu0  ;;  %9757 = vmatpush3.msra.mxu1 %v1754_v29  ;;  %v313_v35 = vmul.f32 0.007843138, %v168_v7  ;;  %v1915_v7 = vld [vmem:[%s17921_s3 + $0x1a8] sm:$0xff] }
 0x1eb   :  { %9758 = vmatprep.subr.mxu1 %v1769_v39  ;;  %v170_v60 = vld [vmem:[%s17918_s0 + $0x408] sm:$0xff] }
 0x1ec   :  { %v13805_v16 = vpop.f32.mrf.mxu0  ;;  %10897 = vmatmul.mubr.msk.f32.gmra.mxu0 %vm491_vm1, %v8671_v17  ;;  %9759 = vmatpush3.msra.mxu1 %v1753_v0  ;;  %v8679_v17 = vadd.f32 -1.0, %v312_v13  ;;  %v8680_v58 = vadd.f32 -1.0, %v313_v35  ;;  %v314_v0 = vmul.f32 0.007843138, %v169_v9  ;;  %v1914_v9 = vld [vmem:[%s17921_s3 + $0x1a0] sm:$0xff] }
 0x1ed   :  { %9760 = vmatprep.subr.mxu1 %v1768_v42  ;;  %10899 = vmatprep.mubr.msk.f32.mxu0 %vm12694_vm0, %v12693_v2 }
 0x1ee   :  { %v10754_v8 = vpop.f32.mrf.mxu0  ;;  %9761 = vmatpush3.msra.mxu1 %v1752_v21  ;;  %v8681_v34 = vadd.f32 -1.0, %v314_v0  ;;  %v315_v21 = vmul.f32 0.007843138, %v170_v60  ;;  %v1925_v0 = vld [vmem:[%s17921_s3 + $0x1f8] sm:$0xff] }
 0x1ef   :  { %9762 = vmatprep.subr.mxu1 %v1767_v51  ;;  %v1875_v8 = vld [vmem:[%s17921_s3 + $0x68] sm:$0xff] }
 0x1f0   :  { %v13817_v44 = vpop.f32.mrf.mxu0  ;;  %10900 = vmatmul.mubr.msk.f32.gmra.mxu0 %vm491_vm1, %v8672_v47  ;;  %9763 = vmatpush3.msra.mxu1 %v1751_v52  ;;  %v171_v47 = vld [vmem:[%s17918_s0 + $0x410] sm:$0xff]  ;;  %v8682_v51 = vadd.f32 -1.0, %v315_v21 }
 0x1f1   :  { %9764 = vmatprep.subr.mxu1 %v1766_v46  ;;  %10902 = vmatprep.mubr.msk.f32.mxu0 %vm12694_vm0, %v12693_v2  ;;  %v316_v22 = vmul.f32 0.007843138, %v171_v47  ;;  %v1924_v21 = vld [vmem:[%s17921_s3 + $0x1f0] sm:$0xff]  ;;  %v178_v47 = vld [vmem:[%s17918_s0 + $0x448] sm:$0xff] }
 0x1f2   :  { %v10757_v5 = vpop.f32.mrf.mxu0  ;;  %9765 = vmatpush3.msra.mxu1 %v1750_v6 }
 0x1f3   :  { %9766 = vmatprep.subr.mxu1 %v1765_v11  ;;  %v8683_v6 = vadd.f32 -1.0, %v316_v22  ;;  %v173_v11 = vld [vmem:[%s17918_s0 + $0x420] sm:$0xff] }
 0x1f4   :  { %v13828_v28 = vpop.f32.mrf.mxu0  ;;  %10903 = vmatmul.mubr.msk.f32.gmra.mxu0 %vm491_vm1, %v8673_v41  ;;  %9767 = vmatpush3.msra.mxu1 %v1749_v1  ;;  %v317_v41 = vmul.f32 0.007843138, %v172_v45  ;;  %v1885_v1 = vld [vmem:[%s17921_s3 + $0xb8] sm:$0xff] }
 0x1f5   :  { %10905 = vmatprep.mubr.msk.f32.mxu0 %vm12694_vm0, %v12693_v2  ;;  %2141 = vmatmul.mubr.f32.vlgmr.msra.gmra.mxu1 %v1864_v38 }
 0x1f6   :  { %v10760_v55 = vpop.f32.mrf.mxu0  ;;  %2145 = vmatprep.mubr.f32.mxu1 %v1875_v8  ;;  %v8684_v38 = vadd.f32 -1.0, %v317_v41  ;;  %v1934_v8 = vld [vmem:[%s17921_s3 + $0x240] sm:$0xff] }
 0x1f8   :  { %v13836_v37 = vpop.f32.mrf.mxu0  ;;  %10906 = vmatmul.mubr.msk.f32.gmra.mxu0 %vm491_vm1, %v8674_v63  ;;  %v318_v63 = vmul.f32 0.007843138, %v173_v11 }
 0x1f9   :  { %10908 = vmatprep.mubr.msk.f32.mxu0 %vm12694_vm0, %v12693_v2  ;;  %2146 = vmatmul.mubr.f32.gmra.mxu1 %v1874_v57  ;;  %v1867_v57 = vld [vmem:[%s17921_s3 + $0x28] sm:$0xff] }
 0x1fa   :  { %v10763_v15 = vpop.f32.mrf.mxu0  ;;  %2150 = vmatprep.mubr.f32.mxu1 %v1885_v1  ;;  %v8685_v59 = vadd.f32 -1.0, %v318_v63 }
 0x1fb   :  { %v319_v15 = vmul.f32 0.007843138, %v174_v43 }
 0x1fc   :  { %v13844_v14 = vpop.f32.mrf.mxu0  ;;  %10909 = vmatmul.mubr.msk.f32.gmra.mxu0 %vm491_vm1, %v8675_v53  ;;  %v1895_v53 = vld [vmem:[%s17921_s3 + $0x108] sm:$0xff] }
 0x1fd   :  { %10911 = vmatprep.mubr.msk.f32.mxu0 %vm12694_vm0, %v12693_v2  ;;  %2151 = vmatmul.mubr.f32.gmra.mxu1 %v1884_v30  ;;  %v8686_v27 = vadd.f32 -1.0, %v319_v15 }
 0x1fe   :  { %v10766_v25 = vpop.f32.mrf.mxu0  ;;  %2155 = vmatprep.mubr.f32.mxu1 %v1895_v53  ;;  %v181_v53 = vld [vmem:[%s17918_s0 + $0x460] sm:$0xff] }
 0x1ff   :  { %v1905_v25 = vld [vmem:[%s17921_s3 + $0x158] sm:$0xff]  ;;  %v326_v19 = vmul.f32 0.007843138, %v181_v53 }
 0x200   :  { %v13852_v31 = vpop.f32.mrf.mxu0  ;;  %10912 = vmatmul.mubr.msk.f32.gmra.mxu0 %vm491_vm1, %v8676_v18  ;;  %v1894_v18 = vld [vmem:[%s17921_s3 + $0x100] sm:$0xff] }
 0x201   :  { %10914 = vmatprep.mubr.msk.f32.mxu0 %vm12694_vm0, %v12693_v2  ;;  %2156 = vmatmul.mubr.f32.gmra.mxu1 %v1894_v18 }
 0x202   :  { %v10769_v10 = vpop.f32.mrf.mxu0  ;;  %2160 = vmatprep.mubr.f32.mxu1 %v1905_v25 }
 0x203   :  { %v1904_v10 = vld [vmem:[%s17921_s3 + $0x150] sm:$0xff] }
 0x204   :  { %v13860_v49 = vpop.f32.mrf.mxu0  ;;  %10915 = vmatmul.mubr.msk.f32.gmra.mxu0 %vm491_vm1, %v8677_v33 }
 0x205   :  { %10917 = vmatprep.mubr.msk.f32.mxu0 %vm12694_vm0, %v12693_v2  ;;  %2161 = vmatmul.mubr.f32.gmra.mxu1 %v1904_v10 }
 0x206   :  { %v10772_v3 = vpop.f32.mrf.mxu0  ;;  %2165 = vmatprep.mubr.f32.mxu1 %v1915_v7 }
 0x208   :  { %v13868_v29 = vpop.f32.mrf.mxu0  ;;  %10918 = vmatmul.mubr.msk.f32.gmra.mxu0 %vm491_vm1, %v8678_v26  ;;  %v176_v26 = vld [vmem:[%s17918_s0 + $0x438] sm:$0xff] }
 0x209   :  { %10920 = vmatprep.mubr.msk.f32.mxu0 %vm12694_vm0, %v12693_v2  ;;  %v321_v35 = vmul.f32 0.007843138, %v176_v26  ;;  %2166 = vmatmul.mubr.f32.gmra.mxu1 %v1914_v9  ;;  %v183_v26 = vld [vmem:[%s17918_s0 + $0x470] sm:$0xff]  ;;  %v184_v9 = vld [vmem:[%s17918_s0 + $0x478] sm:$0xff] }
 0x20a   :  { %v10775_v39 = vpop.f32.mrf.mxu0  ;;  %2170 = vmatprep.mubr.f32.mxu1 %v1925_v0 }
 0x20b   :  { %v177_v39 = vld [vmem:[%s17918_s0 + $0x440] sm:$0xff] }
 0x20c   :  { %v13876_v50 = vpop.f32.mrf.mxu0  ;;  %10921 = vmatmul.mubr.msk.f32.gmra.mxu0 %vm491_vm1, %v8679_v17  ;;  %v8687_v17 = vadd.f32 -1.0, %v320_v23  ;;  %v8693_v23 = vadd.f32 -1.0, %v326_v19 }
 0x20d   :  { %10923 = vmatprep.mubr.msk.f32.mxu0 %vm12694_vm0, %v12693_v2  ;;  %2171 = vmatmul.mubr.f32.gmra.mxu1 %v1924_v21 }
 0x20e   :  { %v10778_v62 = vpop.f32.mrf.mxu0 }
 0x20f   :  { %v8688_v62 = vadd.f32 -1.0, %v321_v35  ;;  %v328_v35 = vmul.f32 0.007843138, %v183_v26 }
 0x210   :  { %v13884_v42 = vpop.f32.mrf.mxu0  ;;  %10924 = vmatmul.mubr.msk.f32.gmra.mxu0 %vm491_vm1, %v8680_v58 }
 0x211   :  { %10926 = vmatprep.mubr.msk.f32.mxu0 %vm12694_vm0, %v12693_v2  ;;  %v8695_v0 = vadd.f32 -1.0, %v328_v35 }
 0x212   :  { %v10781_v56 = vpop.f32.mrf.mxu0 }
 0x214   :  { %v13892_v36 = vpop.f32.mrf.mxu0  ;;  %10927 = vmatmul.mubr.msk.f32.gmra.mxu0 %vm491_vm1, %v8681_v34  ;;  %v322_v34 = vmul.f32 0.007843138, %v177_v39 }
 0x215   :  { %10929 = vmatprep.mubr.msk.f32.mxu0 %vm12694_vm0, %v12693_v2 }
 0x216   :  { %v10784_v52 = vpop.f32.mrf.mxu0  ;;  %v8689_v45 = vadd.f32 -1.0, %v322_v34  ;;  %v185_v34 = vld [vmem:[%s17918_s0 + $0x480] sm:$0xf] }
 0x217   :  { %v323_v52 = vmul.f32 0.007843138, %v178_v47 }
 0x218   :  { %v13903_v46 = vpop.f32.mrf.mxu0  ;;  %10930 = vmatmul.mubr.msk.f32.gmra.mxu0 %vm491_vm1, %v8682_v51  ;;  %v1935_v51 = vld [vmem:[%s17921_s3 + $0x248] sm:$0xff] }
 0x219   :  { %10932 = vmatprep.mubr.msk.f32.mxu0 %vm12694_vm0, %v12693_v2  ;;  %2175 = vmatprep.mubr.f32.mxu1 %v1935_v51  ;;  %v330_v51 = vmul.f32 0.007843138, %v185_v34 }
 0x21a   :  { %v10787_v40 = vpop.f32.mrf.mxu0  ;;  %2176 = vmatmul.mubr.f32.gmra.mxu1 %v1934_v8 }
 0x21b   :  { %v8690_v40 = vadd.f32 -1.0, %v323_v52  ;;  %2245 = vmatprep.mubr.f32.mxu1 %v1867_v57  ;;  %v14049_v52 = vld [vmem:[%s17920_s2] ss:$0 sm:$0xff] }
 0x21c   :  { %v13917_v5 = vpop.f32.mrf.mxu0  ;;  %10933 = vmatmul.mubr.msk.f32.gmra.mxu0 %vm491_vm1, %v8683_v6  ;;  %v179_v6 = vld [vmem:[%s17918_s0 + $0x450] sm:$0xff]  ;;  %v1389_v8 = vadd.f32 %v14049_v52, %v13884_v42  ;;  %v1379_v42 = vadd.f32 %v14049_v52, %v13868_v29 }
 0x21d   :  { %10935 = vmatprep.mubr.msk.f32.mxu0 %vm12694_vm0, %v12693_v2  ;;  %v324_v1 = vmul.f32 0.007843138, %v179_v6 }
 0x21e   :  { %v10790_v55 = vpop.f32.mrf.mxu0 }
 0x21f   :  { %v8691_v43 = vadd.f32 -1.0, %v324_v1  ;;  %v1384_v1 = vadd.f32 %v14049_v52, %v13876_v50  ;;  %v1374_v50 = vadd.f32 %v14049_v52, %v13860_v49  ;;  %v1364_v49 = vadd.f32 %v14049_v52, %v13844_v14 }
 0x220   :  { %v13931_v54 = vpop.f32.mrf.mxu0  ;;  %10936 = vmatmul.mubr.msk.f32.gmra.mxu0 %vm491_vm1, %v8684_v38  ;;  %v180_v38 = vld [vmem:[%s17918_s0 + $0x458] sm:$0xff]  ;;  %v1354_v14 = vadd.f32 %v14049_v52, %v13828_v28  ;;  %v1344_v28 = vadd.f32 %v14049_v52, %v13805_v16  ;;  %v1334_v16 = vadd.f32 %v14049_v52, %v13773_v20  ;;  %v1324_v20 = vadd.f32 %v14049_v52, %v13741_v48 }
 0x221   :  { %10938 = vmatprep.mubr.msk.f32.mxu0 %vm12694_vm0, %v12693_v2  ;;  %v325_v55 = vmul.f32 0.007843138, %v180_v38  ;;  %v1795_v19 = vmax.f32 %v1384_v1, 0.0  ;;  %v1314_v48 = vadd.f32 %v14049_v52, %v13707_v24  ;;  %v1877_v24 = vld [vmem:[%s17921_s3 + $0x78] sm:$0xff] }
 0x222   :  { %v10793_v12 = vpop.f32.mrf.mxu0  ;;  %v1787_v1 = vmax.f32 %v1344_v28, 0.0 }
 0x223   :  { %v8692_v18 = vadd.f32 -1.0, %v325_v55  ;;  %v182_v12 = vld [vmem:[%s17918_s0 + $0x468] sm:$0xff]  ;;  %v1796_v55 = vmax.f32 %v1389_v8, 0.0 }
 0x224   :  { %v13945_v33 = vpop.f32.mrf.mxu0  ;;  %10939 = vmatmul.mubr.msk.f32.gmra.mxu0 %vm491_vm1, %v8685_v59  ;;  %v327_v10 = vmul.f32 0.007843138, %v182_v12 }
 0x225   :  { %10941 = vmatprep.mubr.msk.f32.mxu0 %vm12694_vm0, %v12693_v2 }
 0x226   :  { %v10796_v13 = vpop.f32.mrf.mxu0 }
 0x228   :  { %v13959_v3 = vpop.f32.mrf.mxu0  ;;  %10942 = vmatmul.mubr.msk.f32.gmra.mxu0 %vm491_vm1, %v8686_v27 }
 0x229   :  { %10944 = vmatprep.mubr.msk.f32.mxu0 %vm12694_vm0, %v12693_v2 }
 0x22a   :  { %v10799_v58 = vpop.f32.mrf.mxu0 }
 0x22c   :  { %v13973_v60 = vpop.f32.mrf.mxu0  ;;  %10945 = vmatmul.mubr.msk.f32.gmra.mxu0 %vm491_vm1, %v8687_v17  ;;  %v8694_v17 = vadd.f32 -1.0, %v327_v10  ;;  %v1794_v10 = vmax.f32 %v1379_v42, 0.0 }
 0x22d   :  { %10947 = vmatprep.mubr.msk.f32.mxu0 %vm12694_vm0, %v12693_v2 }
 0x22e   :  { %v10802_v56 = vpop.f32.mrf.mxu0 }
 0x230   :  { %v13987_v22 = vpop.f32.mrf.mxu0  ;;  %10948 = vmatmul.mubr.msk.f32.gmra.mxu0 %vm491_vm1, %v8688_v62  ;;  %v329_v62 = vmul.f32 0.007843138, %v184_v9 }
 0x231   :  { %10950 = vmatprep.mubr.msk.f32.mxu0 %vm12694_vm0, %v12693_v2 }
 0x232   :  { %v10805_v41 = vpop.f32.mrf.mxu0  ;;  %v8696_v56 = vadd.f32 -1.0, %v329_v62  ;;  %v1791_v62 = vmax.f32 %v1364_v49, 0.0 }
 0x233   :  { %v8697_v41 = vadd.f32 -1.0, %v330_v51 }
 0x234   :  { %v14001_v11 = vpop.f32.mrf.mxu0  ;;  %10951 = vmatmul.mubr.msk.f32.gmra.mxu0 %vm491_vm1, %v8689_v45 }
 0x235   :  { %10953 = vmatprep.mubr.msk.f32.mxu0 %vm12694_vm0, %v12693_v2 }
 0x236   :  { %v10808_v63 = vpop.f32.mrf.mxu0 }
 0x238   :  { %v14009_v30 = vpop.f32.mrf.mxu0  ;;  %10954 = vmatmul.mubr.msk.f32.gmra.mxu0 %vm491_vm1, %v8690_v40 }
 0x239   :  { %10956 = vmatprep.mubr.msk.f32.mxu0 %vm12694_vm0, %v12693_v2 }
 0x23a   :  { %v10811_v59 = vpop.f32.mrf.mxu0 }
 0x23c   :  { %v14017_v15 = vpop.f32.mrf.mxu0  ;;  %10957 = vmatmul.mubr.msk.f32.gmra.mxu0 %vm491_vm1, %v8691_v43 }
 0x23d   :  { %10959 = vmatprep.mubr.msk.f32.mxu0 %vm12694_vm0, %v12693_v2 }
 0x23e   :  { %v10814_v25 = vpop.f32.mrf.mxu0 }
 0x240   :  { %v1448_v27 = vpop.f32.mrf.mxu0  ;;  %10960 = vmatmul.mubr.msk.f32.gmra.mxu0 %vm491_vm1, %v8692_v18 }
 0x241   :  { %10962 = vmatprep.mubr.msk.f32.mxu0 %vm12694_vm0, %v12693_v2  ;;  %v1449_v29 = vadd.f32 %v14049_v52, %v1448_v27  ;;  %v1439_v27 = vadd.f32 %v14049_v52, %v14009_v30  ;;  %v1429_v30 = vadd.f32 %v14049_v52, %v13987_v22  ;;  %v1419_v22 = vadd.f32 %v14049_v52, %v13959_v3 }
 0x242   :  { %v10817_v13 = vpop.f32.mrf.mxu0  ;;  %v1409_v3 = vadd.f32 %v14049_v52, %v13931_v54  ;;  %v1399_v54 = vadd.f32 %v14049_v52, %v13903_v46 }
 0x243   :  { %v1444_v13 = vadd.f32 %v14049_v52, %v14017_v15  ;;  %v1808_v9 = vmax.f32 %v1449_v29, 0.0  ;;  %v1434_v15 = vadd.f32 %v14049_v52, %v14001_v11  ;;  %v1424_v11 = vadd.f32 %v14049_v52, %v13973_v60 }
 0x244   :  { %v1453_v7 = vpop.f32.mrf.mxu0  ;;  %10963 = vmatmul.mubr.msk.f32.gmra.mxu0 %vm491_vm1, %v8693_v23  ;;  %v1369_v23 = vadd.f32 %v14049_v52, %v13852_v31  ;;  %v1359_v31 = vadd.f32 %v14049_v52, %v13836_v37  ;;  %v1349_v37 = vadd.f32 %v14049_v52, %v13817_v44  ;;  %v1339_v44 = vadd.f32 %v14049_v52, %v13789_v61 }
 0x245   :  { %10965 = vmatprep.mubr.msk.f32.mxu0 %vm12694_vm0, %v12693_v2  ;;  %v1454_v59 = vadd.f32 %v14049_v52, %v1453_v7  ;;  %v1805_v51 = vmax.f32 %v1434_v15, 0.0  ;;  %v1414_v60 = vadd.f32 %v14049_v52, %v13945_v33  ;;  %v1329_v61 = vadd.f32 %v14049_v52, %v13757_v4  ;;  %v1886_v15 = vld [vmem:[%s17921_s3 + $0xc0] sm:$0xff] }
 0x246   :  { %v10820_v39 = vpop.f32.mrf.mxu0  ;;  %v1404_v33 = vadd.f32 %v14049_v52, %v13917_v5  ;;  %v1319_v4 = vadd.f32 %v14049_v52, %v13725_v32  ;;  %v1394_v5 = vadd.f32 %v14049_v52, %v13892_v36  ;;  %v1798_v46 = vmax.f32 %v1399_v54, 0.0  ;;  %v1866_v36 = vld [vmem:[%s17921_s3 + $0x20] sm:$0xff] }
 0x247   :  { %v1809_v7 = vmax.f32 %v1454_v59, 0.0  ;;  %v1792_v39 = vmax.f32 %v1369_v23, 0.0  ;;  %v1785_v59 = vmax.f32 %v1334_v16, 0.0  ;;  %v1936_v16 = vld [vmem:[%s17921_s3 + $0x250] sm:$0xff] }
 0x248   :  { %v1458_v58 = vpop.f32.mrf.mxu0  ;;  %10966 = vmatmul.mubr.msk.f32.gmra.mxu0 %vm491_vm1, %v8694_v17  ;;  %v1793_v17 = vmax.f32 %v1374_v50, 0.0  ;;  %v1800_v50 = vmax.f32 %v1409_v3, 0.0  ;;  %v1799_v29 = vmax.f32 %v1404_v33, 0.0  ;;  %v1797_v32 = vmax.f32 %v1394_v5, 0.0 }
 0x249   :  { %10968 = vmatprep.mubr.msk.f32.mxu0 %vm12694_vm0, %v12693_v2  ;;  %v1459_v63 = vadd.f32 %v14049_v52, %v1458_v58 }
 0x24a   :  { %v10823_v21 = vpop.f32.mrf.mxu0 }
 0x24b   :  { %v1810_v25 = vmax.f32 %v1459_v63, 0.0  ;;  %v1806_v21 = vmax.f32 %v1439_v27, 0.0  ;;  %v1802_v63 = vmax.f32 %v1419_v22, 0.0  ;;  %v1876_v27 = vld [vmem:[%s17921_s3 + $0x70] sm:$0xff] }
 0x24c   :  { %v1463_v47 = vpop.f32.mrf.mxu0  ;;  %10969 = vmatmul.mubr.msk.f32.gmra.mxu0 %vm491_vm1, %v8695_v0  ;;  %v1807_v0 = vmax.f32 %v1444_v13, 0.0 }
 0x24d   :  { %10971 = vmatprep.mubr.msk.f32.mxu0 %vm12694_vm0, %v12693_v2  ;;  %v1464_v57 = vadd.f32 %v14049_v52, %v1463_v47  ;;  %v1790_v47 = vmax.f32 %v1359_v31, 0.0 }
 0x24e   :  { %v10826_v45 = vpop.f32.mrf.mxu0 }
 0x24f   :  { %v1811_v18 = vmax.f32 %v1464_v57, 0.0  ;;  %v1789_v45 = vmax.f32 %v1354_v14, 0.0 }
 0x250   :  { %v1468_v6 = vpop.f32.mrf.mxu0  ;;  %10972 = vmatmul.mubr.msk.f32.gmra.mxu0 %vm491_vm1, %v8696_v56 }
 0x251   :  { %v1469_v40 = vadd.f32 %v14049_v52, %v1468_v6  ;;  %10974 = vmatprep.mubr.msk.f32.mxu0 %vm12694_vm0, %v12693_v2  ;;  %v1804_v6 = vmax.f32 %v1429_v30, 0.0  ;;  %v1907_v30 = vld [vmem:[%s17921_s3 + $0x168] sm:$0xff] }
 0x252   :  { %v10829_v38 = vpop.f32.mrf.mxu0 }
 0x253   :  { %v1812_v43 = vmax.f32 %v1469_v40, 0.0  ;;  %v1803_v40 = vmax.f32 %v1424_v11, 0.0  ;;  %v1917_v11 = vld [vmem:[%s17921_s3 + $0x1b8] sm:$0xff] }
 0x254   :  { %v14063_v53 = vpop.f32.mrf.mxu0  ;;  %10975 = vmatmul.mubr.msk.f32.gmra.mxu0 %vm491_vm1, %v8697_v41  ;;  %v1788_v41 = vmax.f32 %v1349_v37, 0.0 }
 0x255   :  { %9792 = vmatprep.subr.mxu1 %v1812_v43  ;;  %11401 = vmatprep.mubr.msk.f32.mxu0 %vm12694_vm0, %v12693_v2  ;;  %v1786_v43 = vmax.f32 %v1339_v44, 0.0  ;;  %v1926_v44 = vld [vmem:[%s17921_s3 + $0x200] sm:$0xff] }
 0x256   :  { %v10832_v12 = vpop.f32.mrf.mxu0  ;;  %9793 = vmatpush3.msra.mxu1 %v1796_v55  ;;  %v1801_v55 = vmax.f32 %v1414_v60, 0.0 }
 0x257   :  { %9794 = vmatprep.subr.mxu1 %v1811_v18 }
 0x258   :  { %v14074_v26 = vpop.f32.mrf.mxu0  ;;  %9795 = vmatpush3.msra.mxu1 %v1795_v19  ;;  %v1784_v19 = vmax.f32 %v1329_v61, 0.0 }
 0x259   :  { %9796 = vmatprep.subr.mxu1 %v1810_v25  ;;  %v1783_v25 = vmax.f32 %v1324_v20, 0.0 }
 0x25a   :  { %v10835_v35 = vpop.f32.mrf.mxu0  ;;  %9797 = vmatpush3.msra.mxu1 %v1794_v10  ;;  %v1782_v10 = vmax.f32 %v1319_v4, 0.0 }
 0x25b   :  { %9798 = vmatprep.subr.mxu1 %v1809_v7  ;;  %v1781_v7 = vmax.f32 %v1314_v48, 0.0 }
 0x25c   :  { %v14084_v58 = vpop.f32.mrf.mxu0  ;;  %9799 = vmatpush3.msra.mxu1 %v1793_v17 }
 0x25d   :  { %9800 = vmatprep.subr.mxu1 %v1808_v9  ;;  %v1887_v9 = vld [vmem:[%s17921_s3 + $0xc8] sm:$0xff] }
 0x25e   :  { %v10838_v34 = vpop.f32.mrf.mxu0  ;;  %9801 = vmatpush3.msra.mxu1 %v1792_v39 }
 0x25f   :  { %9802 = vmatprep.subr.mxu1 %v1807_v0  ;;  %v1897_v0 = vld [vmem:[%s17921_s3 + $0x118] sm:$0xff]  ;;  %v1896_v34 = vld [vmem:[%s17921_s3 + $0x110] sm:$0xff] }
 0x260   :  { %v14094_v56 = vpop.f32.mrf.mxu0  ;;  %9803 = vmatpush3.msra.mxu1 %v1791_v62 }
 0x261   :  { %9804 = vmatprep.subr.mxu1 %v1806_v21 }
 0x262   :  { %v10841_v8 = vpop.f32.mrf.mxu0  ;;  %9805 = vmatpush3.msra.mxu1 %v1790_v47  ;;  %v1906_v47 = vld [vmem:[%s17921_s3 + $0x160] sm:$0xff] }
 0x263   :  { %9806 = vmatprep.subr.mxu1 %v1805_v51  ;;  %v1927_v8 = vld [vmem:[%s17921_s3 + $0x208] sm:$0xff] }
 0x264   :  { %v14104_v57 = vpop.f32.mrf.mxu0  ;;  %9807 = vmatpush3.msra.mxu1 %v1789_v45  ;;  %v1916_v45 = vld [vmem:[%s17921_s3 + $0x1b0] sm:$0xff] }
 0x265   :  { %9808 = vmatprep.subr.mxu1 %v1804_v6 }
 0x266   :  { %v10844_v38 = vpop.f32.mrf.mxu0  ;;  %9809 = vmatpush3.msra.mxu1 %v1788_v41  ;;  %v1937_v41 = vld [vmem:[%s17921_s3 + $0x258] sm:$0xff] }
 0x267   :  { %9810 = vmatprep.subr.mxu1 %v1803_v40 }
 0x268   :  { %v14114_v42 = vpop.f32.mrf.mxu0  ;;  %9811 = vmatpush3.msra.mxu1 %v1787_v1  ;;  %v1869_v1 = vld [vmem:[%s17921_s3 + $0x38] sm:$0xff] }
 0x269   :  { %9812 = vmatprep.subr.mxu1 %v1802_v63 }
 0x26a   :  { %v10847_v18 = vpop.f32.mrf.mxu0  ;;  %9813 = vmatpush3.msra.mxu1 %v1786_v43 }
 0x26b   :  { %9814 = vmatprep.subr.mxu1 %v1801_v55 }
 0x26c   :  { %v14124_v12 = vpop.f32.mrf.mxu0  ;;  %9815 = vmatpush3.msra.mxu1 %v1785_v59 }
 0x26d   :  { %9816 = vmatprep.subr.mxu1 %v1800_v50 }
 0x26e   :  { %v10850_v23 = vpop.f32.mrf.mxu0  ;;  %9817 = vmatpush3.msra.mxu1 %v1784_v19 }
 0x26f   :  { %9818 = vmatprep.subr.mxu1 %v1799_v29 }
 0x270   :  { %v14130_v13 = vpop.f32.mrf.mxu0  ;;  %9819 = vmatpush3.msra.mxu1 %v1783_v25 }
 0x271   :  { %9820 = vmatprep.subr.mxu1 %v1798_v46  ;;  %v9712_v46 = vpop.f32.mrf.mxu1 }
 0x272   :  { %v10853_v49 = vpop.f32.mrf.mxu0  ;;  %9821 = vmatpush3.msra.mxu1 %v1782_v10 }
 0x273   :  { %9822 = vmatprep.subr.mxu1 %v1797_v32  ;;  %v9713_v32 = vpop.f32.mrf.mxu1 }
 0x274   :  { %v14138_v17 = vpop.f32.mrf.mxu0  ;;  %9823 = vmatpush3.msra.mxu1 %v1781_v7 }
 0x275   :  { %2246 = vmatmul.mubr.f32.vlgmr.msra.gmra.mxu1 %v1866_v36  ;;  %v14212_v49 = vpop.f32.mrf.mxu1 }
 0x276   :  { %v10856_v35 = vpop.f32.mrf.mxu0  ;;  %2250 = vmatprep.mubr.f32.mxu1 %v1877_v24 }
 0x277   :  { %v9716_v24 = vpop.f32.mrf.mxu1 }
 0x278   :  { %v14146_v31 = vpop.f32.mrf.mxu0 }
 0x279   :  { %2251 = vmatmul.mubr.f32.gmra.mxu1 %v1876_v27  ;;  %v14214_v27 = vpop.f32.mrf.mxu1 }
 0x27a   :  { %v10859_v39 = vpop.f32.mrf.mxu0  ;;  %2255 = vmatprep.mubr.f32.mxu1 %v1887_v9 }
 0x27b   :  { %v14216_v39 = vpop.f32.mrf.mxu1 }
 0x27c   :  { %v14154_v14 = vpop.f32.mrf.mxu0 }
 0x27d   :  { %2256 = vmatmul.mubr.f32.gmra.mxu1 %v1886_v15 }
 0x27e   :  { %v10862_v62 = vpop.f32.mrf.mxu0  ;;  %2260 = vmatprep.mubr.f32.mxu1 %v1897_v0  ;;  %v14218_v0 = vpop.f32.mrf.mxu1 }
 0x280   :  { %v14162_v21 = vpop.f32.mrf.mxu0 }
 0x281   :  { %2261 = vmatmul.mubr.f32.gmra.mxu1 %v1896_v34  ;;  %v14220_v34 = vpop.f32.mrf.mxu1 }
 0x282   :  { %v10865_v37 = vpop.f32.mrf.mxu0  ;;  %2265 = vmatprep.mubr.f32.mxu1 %v1907_v30 }
 0x283   :  { %v14222_v37 = vpop.f32.mrf.mxu1 }
 0x284   :  { %v14170_v51 = vpop.f32.mrf.mxu0 }
 0x285   :  { %2266 = vmatmul.mubr.f32.gmra.mxu1 %v1906_v47 }
 0x286   :  { %v10868_v28 = vpop.f32.mrf.mxu0  ;;  %2270 = vmatprep.mubr.f32.mxu1 %v1917_v11  ;;  %v14224_v11 = vpop.f32.mrf.mxu1 }
 0x288   :  { %v14178_v22 = vpop.f32.mrf.mxu0 }
 0x289   :  { %2271 = vmatmul.mubr.f32.gmra.mxu1 %v1916_v45  ;;  %v14226_v45 = vpop.f32.mrf.mxu1 }
 0x28a   :  { %v10871_v6 = vpop.f32.mrf.mxu0  ;;  %2275 = vmatprep.mubr.f32.mxu1 %v1927_v8 }
 0x28b   :  { %v14228_v6 = vpop.f32.mrf.mxu1 }
 0x28c   :  { %v1543_v60 = vpop.f32.mrf.mxu0 }
 0x28d   :  { %2276 = vmatmul.mubr.f32.gmra.mxu1 %v1926_v44 }
 0x28e   :  { %v10874_v40 = vpop.f32.mrf.mxu0  ;;  %2280 = vmatprep.mubr.f32.mxu1 %v1937_v41  ;;  %v14230_v41 = vpop.f32.mrf.mxu1 }
 0x290   :  { %v1548_v38 = vpop.f32.mrf.mxu0 }
 0x291   :  { %2281 = vmatmul.mubr.f32.gmra.mxu1 %v1936_v16  ;;  %v14232_v16 = vpop.f32.mrf.mxu1 }
 0x292   :  { %v10877_v3 = vpop.f32.mrf.mxu0  ;;  %2350 = vmatprep.mubr.f32.mxu1 %v1869_v1  ;;  %v1549_v1 = vadd.f32 %v14049_v52, %v1548_v38 }
 0x294   :  { %v14192_v63 = vpop.f32.mrf.mxu0 }
 0x296   :  { %v10880_v61 = vpop.f32.mrf.mxu0 }
 0x297   :  { %v14235_v61 = vpop.f32.mrf.mxu1 }
 0x298   :  { %v14194_v43 = vpop.f32.mrf.mxu0 }
 0x29a   :  { %v10883_v33 = vpop.f32.mrf.mxu0 }
 0x29c   :  { %v14196_v55 = vpop.f32.mrf.mxu0 }
 0x29e   :  { %v10886_v20 = vpop.f32.mrf.mxu0 }
 0x2a0   :  { %v14198_v59 = vpop.f32.mrf.mxu0 }
 0x2a2   :  { %v10889_v18 = vpop.f32.mrf.mxu0 }
 0x2a3   :  { %v1544_v18 = vadd.f32 %v14049_v52, %v1543_v60  ;;  %v1534_v60 = vadd.f32 %v14049_v52, %v14170_v51 }
 0x2a4   :  { %v14200_v54 = vpop.f32.mrf.mxu0 }
 0x2a6   :  { %v10892_v50 = vpop.f32.mrf.mxu0 }
 0x2a8   :  { %v14202_v4 = vpop.f32.mrf.mxu0 }
 0x2aa   :  { %v10895_v19 = vpop.f32.mrf.mxu0 }
 0x2ab   :  { %v14240_v19 = vpop.f32.mrf.mxu1 }
 0x2ac   :  { %v14204_v5 = vpop.f32.mrf.mxu0 }
 0x2ae   :  { %v10898_v29 = vpop.f32.mrf.mxu0 }
 0x2b0   :  { %v14206_v48 = vpop.f32.mrf.mxu0 }
 0x2b2   :  { %v10901_v25 = vpop.f32.mrf.mxu0 }
 0x2b4   :  { %v14208_v23 = vpop.f32.mrf.mxu0 }
 0x2b6   :  { %v10904_v10 = vpop.f32.mrf.mxu0 }
 0x2b7   :  { %v1539_v10 = vadd.f32 %v14049_v52, %v14178_v22 }
 0x2b8   :  { %v14210_v7 = vpop.f32.mrf.mxu0 }
 0x2ba   :  { %v10907_v36 = vpop.f32.mrf.mxu0 }
 0x2bb   :  { %v1828_v36 = vmax.f32 %v1549_v1, 0.0  ;;  %v1529_v1 = vadd.f32 %v14049_v52, %v14162_v21  ;;  %v1599_v21 = vadd.f32 %v14049_v52, %v14210_v7  ;;  %v1514_v7 = vadd.f32 %v14049_v52, %v14138_v17 }
 0x2bc   :  { %v1603_v35 = vpop.f32.mrf.mxu0 }
 0x2be   :  { %v10910_v9 = vpop.f32.mrf.mxu0 }
 0x2bf   :  { %v9768_v9 = vpop.f32.mrf.mxu1 }
 0x2c0   :  { %v1608_v15 = vpop.f32.mrf.mxu0 }
 0x2c2   :  { %v10913_v62 = vpop.f32.mrf.mxu0 }
 0x2c4   :  { %v1613_v30 = vpop.f32.mrf.mxu0 }
 0x2c5   :  { %v1614_v62 = vadd.f32 %v14049_v52, %v1613_v30 }
 0x2c6   :  { %v10916_v47 = vpop.f32.mrf.mxu0 }
 0x2c8   :  { %v1618_v28 = vpop.f32.mrf.mxu0 }
 0x2c9   :  { %v1619_v29 = vadd.f32 %v14049_v52, %v1618_v28  ;;  %v9769_v28 = vpop.f32.mrf.mxu1 }
 0x2ca   :  { %v10919_v8 = vpop.f32.mrf.mxu0  ;;  %v9770_v22 = vadd.f32 %v9769_v28, %v9768_v9  ;;  %v1824_v9 = vmax.f32 %v1529_v1, 0.0  ;;  %v1838_v28 = vmax.f32 %v1599_v21, 0.0  ;;  %v1584_v1 = vadd.f32 %v14049_v52, %v14204_v5 }
 0x2cb   :  { %v9714_v8 = vadd.f32 %v9713_v32, %v9712_v46  ;;  %v1604_v46 = vadd.f32 %v14049_v52, %v1603_v35  ;;  %v1841_v32 = vmax.f32 %v1614_v62, 0.0  ;;  %v1519_v35 = vadd.f32 %v14049_v52, %v14146_v31 }
 0x2cc   :  { %v1623_v44 = vpop.f32.mrf.mxu0  ;;  %v9720_v31 = vadd.f32 %v14216_v39, %v14214_v27  ;;  %v1574_v21 = vadd.f32 %v14049_v52, %v14200_v54 }
 0x2cd   :  { %v1624_v33 = vadd.f32 %v14049_v52, %v1623_v44  ;;  %v1827_v44 = vmax.f32 %v1544_v18, 0.0  ;;  %v14256_v51 = vadd.f32 %v9770_v22, %v9714_v8  ;;  %v1825_v18 = vmax.f32 %v1534_v60, 0.0 }
 0x2ce   :  { %v10922_v40 = vpop.f32.mrf.mxu0  ;;  %v1839_v8 = vmax.f32 %v1604_v46, 0.0 }
 0x2cf   :  { %v1843_v47 = vmax.f32 %v1624_v33, 0.0  ;;  %v9771_v33 = vpop.f32.mrf.mxu1 }
 0x2d0   :  { %v1628_v3 = vpop.f32.mrf.mxu0 }
 0x2d1   :  { %v1629_v20 = vadd.f32 %v14049_v52, %v1628_v3  ;;  %v1609_v3 = vadd.f32 %v14049_v52, %v1608_v15  ;;  %v1524_v15 = vadd.f32 %v14049_v52, %v14154_v14  ;;  %v1594_v14 = vadd.f32 %v14049_v52, %v14208_v23 }
 0x2d2   :  { %v10925_v50 = vpop.f32.mrf.mxu0 }
 0x2d3   :  { %v1844_v25 = vmax.f32 %v1629_v20, 0.0  ;;  %v1842_v20 = vmax.f32 %v1619_v29, 0.0  ;;  %v1826_v50 = vmax.f32 %v1539_v10, 0.0  ;;  %v1840_v10 = vmax.f32 %v1609_v3, 0.0 }
 0x2d4   :  { %v14245_v38 = vpop.f32.mrf.mxu0  ;;  %v1509_v3 = vadd.f32 %v14049_v52, %v14130_v13  ;;  %v1837_v27 = vmax.f32 %v1594_v14, 0.0  ;;  %v9723_v13 = vadd.f32 %v14220_v34, %v14218_v0  ;;  %v1835_v0 = vmax.f32 %v1584_v1, 0.0 }
 0x2d5   :  { %9848 = vmatprep.subr.mxu1 %v1844_v25  ;;  %v9717_v25 = vadd.f32 %v9716_v24, %v14212_v49  ;;  %v1823_v24 = vmax.f32 %v1524_v15, 0.0  ;;  %v1489_v14 = vadd.f32 %v14049_v52, %v14094_v56  ;;  %v9729_v56 = vadd.f32 %v14228_v6, %v14226_v45 }
 0x2d6   :  { %v10928_v40 = vpop.f32.mrf.mxu0  ;;  %9849 = vmatpush3.msra.mxu1 %v1828_v36  ;;  %v9772_v36 = vpop.f32.mrf.mxu1 }
 0x2d7   :  { %9850 = vmatprep.subr.mxu1 %v1843_v47  ;;  %v9773_v47 = vadd.f32 %v9772_v36, %v9771_v33  ;;  %v1589_v40 = vadd.f32 %v14049_v52, %v14206_v48  ;;  %v1504_v48 = vadd.f32 %v14049_v52, %v14124_v12  ;;  %v1579_v33 = vadd.f32 %v14049_v52, %v14202_v4 }
 0x2d8   :  { %v14253_v30 = vpop.f32.mrf.mxu0  ;;  %9851 = vmatpush3.msra.mxu1 %v1827_v44  ;;  %v9774_v49 = vpop.f32.mrf.mxu1  ;;  %v1494_v4 = vadd.f32 %v14049_v52, %v14104_v57 }
 0x2d9   :  { %9852 = vmatprep.subr.mxu1 %v1842_v20  ;;  %v14273_v44 = vadd.f32 %v9773_v47, %v9717_v25  ;;  %v1822_v20 = vmax.f32 %v1519_v35, 0.0  ;;  %v1836_v15 = vmax.f32 %v1589_v40, 0.0  ;;  %v1834_v47 = vmax.f32 %v1579_v33, 0.0 }
 0x2da   :  { %v10931_v29 = vpop.f32.mrf.mxu0  ;;  %9853 = vmatpush3.msra.mxu1 %v1826_v50  ;;  %v9775_v23 = vpop.f32.mrf.mxu1  ;;  %v1821_v50 = vmax.f32 %v1514_v7, 0.0  ;;  %v1564_v7 = vadd.f32 %v14049_v52, %v14196_v55  ;;  %v1559_v40 = vadd.f32 %v14049_v52, %v14194_v43  ;;  %v1474_v43 = vadd.f32 %v14049_v52, %v14063_v53 }
 0x2db   :  { %9854 = vmatprep.subr.mxu1 %v1841_v32  ;;  %v9776_v17 = vadd.f32 %v9775_v23, %v9774_v49  ;;  %v1820_v29 = vmax.f32 %v1509_v3, 0.0  ;;  %v1479_v23 = vadd.f32 %v14049_v52, %v14074_v26  ;;  %v1816_v3 = vmax.f32 %v1489_v14, 0.0  ;;  %v1898_v14 = vld [vmem:[%s17921_s3 + $0x120] sm:$0xff] }
 0x2dc   :  { %v14265_v62 = vpop.f32.mrf.mxu0  ;;  %9855 = vmatpush3.msra.mxu1 %v1825_v18  ;;  %v9777_v39 = vpop.f32.mrf.mxu1  ;;  %v1499_v18 = vadd.f32 %v14049_v52, %v14114_v42  ;;  %v9726_v42 = vadd.f32 %v14224_v11, %v14222_v37  ;;  %v1833_v37 = vmax.f32 %v1574_v21, 0.0  ;;  %v1831_v45 = vmax.f32 %v1564_v7, 0.0 }
 0x2dd   :  { %9856 = vmatprep.subr.mxu1 %v1840_v10  ;;  %v14287_v32 = vadd.f32 %v9776_v17, %v9720_v31  ;;  %v1819_v10 = vmax.f32 %v1504_v48, 0.0  ;;  %v1554_v17 = vadd.f32 %v14049_v52, %v14192_v63  ;;  %v9732_v26 = vadd.f32 %v14232_v16, %v14230_v41  ;;  %v1868_v41 = vld [vmem:[%s17921_s3 + $0x30] sm:$0xff] }
 0x2de   :  { %v10934_v60 = vpop.f32.mrf.mxu0  ;;  %9857 = vmatpush3.msra.mxu1 %v1824_v9  ;;  %v9778_v5 = vpop.f32.mrf.mxu1  ;;  %v1569_v9 = vadd.f32 %v14049_v52, %v14198_v59  ;;  %v1484_v59 = vadd.f32 %v14049_v52, %v14084_v58  ;;  %v1830_v48 = vmax.f32 %v1559_v40, 0.0  ;;  %v1813_v53 = vmax.f32 %v1474_v43, 0.0 }
 0x2df   :  { %9858 = vmatprep.subr.mxu1 %v1839_v8  ;;  %v9779_v12 = vadd.f32 %v9778_v5, %v9777_v39  ;;  %v1818_v8 = vmax.f32 %v1499_v18, 0.0  ;;  %v1829_v33 = vmax.f32 %v1554_v17, 0.0  ;;  %v9735_v16 = vadd.f32 %v14240_v19, %v14235_v61  ;;  %v1878_v61 = vld [vmem:[%s17921_s3 + $0x80] sm:$0xff] }
 0x2e0   :  { %v14279_v22 = vpop.f32.mrf.mxu0  ;;  %9859 = vmatpush3.msra.mxu1 %v1823_v24  ;;  %v9780_v34 = vpop.f32.mrf.mxu1  ;;  %v1817_v24 = vmax.f32 %v1494_v4, 0.0  ;;  %v1815_v1 = vmax.f32 %v1484_v59, 0.0  ;;  %v1889_v4 = vld [vmem:[%s17921_s3 + $0xd8] sm:$0xff]  ;;  %v1938_v17 = vld [vmem:[%s17921_s3 + $0x260] sm:$0xff] }
 0x2e1   :  { %9860 = vmatprep.subr.mxu1 %v1838_v28  ;;  %v14301_v35 = vadd.f32 %v9779_v12, %v9723_v13  ;;  %v1832_v28 = vmax.f32 %v1569_v9, 0.0  ;;  %v1899_v9 = vld [vmem:[%s17921_s3 + $0x128] sm:$0xff] }
 0x2e2   :  { %v10937_v46 = vpop.f32.mrf.mxu0  ;;  %9861 = vmatpush3.msra.mxu1 %v1822_v20  ;;  %v9781_v54 = vpop.f32.mrf.mxu1 }
 0x2e3   :  { %9862 = vmatprep.subr.mxu1 %v1837_v27  ;;  %v9782_v57 = vadd.f32 %v9781_v54, %v9780_v34  ;;  %v1814_v46 = vmax.f32 %v1479_v23, 0.0  ;;  %v1939_v23 = vld [vmem:[%s17921_s3 + $0x268] sm:$0xff] }
 0x2e4   :  { %v14293_v25 = vpop.f32.mrf.mxu0  ;;  %9863 = vmatpush3.msra.mxu1 %v1821_v50  ;;  %v9783_v11 = vpop.f32.mrf.mxu1 }
 0x2e5   :  { %9864 = vmatprep.subr.mxu1 %v1836_v15  ;;  %v14315_v31 = vadd.f32 %v9782_v57, %v9726_v42  ;;  %v1888_v42 = vld [vmem:[%s17921_s3 + $0xd0] sm:$0xff] }
 0x2e6   :  { %v10940_v36 = vpop.f32.mrf.mxu0  ;;  %9865 = vmatpush3.msra.mxu1 %v1820_v29  ;;  %v9784_v55 = vpop.f32.mrf.mxu1  ;;  %v1879_v29 = vld [vmem:[%s17921_s3 + $0x88] sm:$0xff] }
 0x2e7   :  { %9866 = vmatprep.subr.mxu1 %v1835_v0  ;;  %v9785_v58 = vadd.f32 %v9784_v55, %v9783_v11  ;;  %v1919_v11 = vld [vmem:[%s17921_s3 + $0x1c8] sm:$0xff]  ;;  %v1928_v55 = vld [vmem:[%s17921_s3 + $0x210] sm:$0xff] }
 0x2e8   :  { %v14307_v49 = vpop.f32.mrf.mxu0  ;;  %9867 = vmatpush3.msra.mxu1 %v1819_v10  ;;  %v9786_v6 = vpop.f32.mrf.mxu1 }
 0x2e9   :  { %9868 = vmatprep.subr.mxu1 %v1834_v47  ;;  %v14329_v39 = vadd.f32 %v9785_v58, %v9729_v56  ;;  %v1929_v56 = vld [vmem:[%s17921_s3 + $0x218] sm:$0xff] }
 0x2ea   :  { %v10943_v60 = vpop.f32.mrf.mxu0  ;;  %9869 = vmatpush3.msra.mxu1 %v1818_v8  ;;  %v9787_v50 = vpop.f32.mrf.mxu1  ;;  %v1909_v8 = vld [vmem:[%s17921_s3 + $0x178] sm:$0xff] }
 0x2eb   :  { %9870 = vmatprep.subr.mxu1 %v1833_v37  ;;  %v9788_v63 = vadd.f32 %v9787_v50, %v9786_v6  ;;  %v1908_v37 = vld [vmem:[%s17921_s3 + $0x170] sm:$0xff]  ;;  %v1918_v60 = vld [vmem:[%s17921_s3 + $0x1c0] sm:$0xff] }
 0x2ec   :  { %v14321_v20 = vpop.f32.mrf.mxu0  ;;  %9871 = vmatpush3.msra.mxu1 %v1817_v24  ;;  %v9789_v15 = vpop.f32.mrf.mxu1 }
 0x2ed   :  { %9872 = vmatprep.subr.mxu1 %v1832_v28  ;;  %v14338_v18 = vadd.f32 %v9788_v63, %v9732_v26 }
 0x2ee   :  { %v10946_v27 = vpop.f32.mrf.mxu0  ;;  %9873 = vmatpush3.msra.mxu1 %v1816_v3  ;;  %v9790_v12 = vpop.f32.mrf.mxu1 }
 0x2ef   :  { %9874 = vmatprep.subr.mxu1 %v1831_v45  ;;  %v9791_v0 = vadd.f32 %v9790_v12, %v9789_v15  ;;  %v1871_v45 = vld [vmem:[%s17921_s3 + $0x48] sm:$0xff] }
 0x2f0   :  { %v14331_v13 = vpop.f32.mrf.mxu0  ;;  %9875 = vmatpush3.msra.mxu1 %v1815_v1 }
 0x2f1   :  { %9876 = vmatprep.subr.mxu1 %v1830_v48  ;;  %v14349_v19 = vadd.f32 %v9791_v0, %v9735_v16 }
 0x2f2   :  { %v10949_v5 = vpop.f32.mrf.mxu0  ;;  %9877 = vmatpush3.msra.mxu1 %v1814_v46 }
 0x2f3   :  { %9878 = vmatprep.subr.mxu1 %v1829_v33 }
 0x2f4   :  { %v14343_v21 = vpop.f32.mrf.mxu0  ;;  %9879 = vmatpush3.msra.mxu1 %v1813_v53 }
 0x2f5   :  { %2351 = vmatmul.mubr.f32.vlgmr.msra.gmra.mxu1 %v1868_v41  ;;  %2391 = vmatprep.subr.mxu1 %v12693_v2  ;;  %v1674_v12 = vadd.f32 %v14049_v52, %v14343_v21  ;;  %v1659_v21 = vadd.f32 %v14049_v52, %v14307_v49  ;;  %v1644_v49 = vadd.f32 %v14049_v52, %v14265_v62 }
 0x2f6   :  { %v10952_v34 = vpop.f32.mrf.mxu0  ;;  %2355 = vmatprep.mubr.f32.mxu1 %v1879_v29 }
 0x2f7   :  { %v1669_v34 = vadd.f32 %v14049_v52, %v14331_v13  ;;  %v1654_v13 = vadd.f32 %v14049_v52, %v14293_v25  ;;  %v1639_v25 = vadd.f32 %v14049_v52, %v14253_v30 }
 0x2f8   :  { %v1678_v10 = vpop.f32.mrf.mxu0 }
 0x2f9   :  { %2356 = vmatmul.mubr.f32.gmra.mxu1 %v1878_v61  ;;  %v1679_v16 = vadd.f32 %v14049_v52, %v1678_v10  ;;  %v1853_v10 = vmax.f32 %v1674_v12, 0.0  ;;  %v1846_v62 = vmax.f32 %v1639_v25, 0.0 }
 0x2fa   :  { %v10955_v36 = vpop.f32.mrf.mxu0  ;;  %2360 = vmatprep.mubr.f32.mxu1 %v1889_v4  ;;  %v1664_v4 = vadd.f32 %v14049_v52, %v14321_v20  ;;  %v1649_v20 = vadd.f32 %v14049_v52, %v14279_v22  ;;  %v1634_v22 = vadd.f32 %v14049_v52, %v14245_v38  ;;  %v1870_v38 = vld [vmem:[%s17921_s3 + $0x40] sm:$0xff] }
 0x2fb   :  { %v1854_v61 = vmax.f32 %v1679_v16, 0.0  ;;  %v1852_v36 = vmax.f32 %v1669_v34, 0.0  ;;  %v1941_v16 = vld [vmem:[%s17921_s3 + $0x278] sm:$0xff] }
 0x2fc   :  { %v1683_v47 = vpop.f32.mrf.mxu0 }
 0x2fd   :  { %2361 = vmatmul.mubr.f32.gmra.mxu1 %v1888_v42  ;;  %v1684_v5 = vadd.f32 %v14049_v52, %v1683_v47  ;;  %v1851_v42 = vmax.f32 %v1664_v4, 0.0  ;;  %v1849_v47 = vmax.f32 %v1654_v13, 0.0 }
 0x2fe   :  { %v10958_v54 = vpop.f32.mrf.mxu0  ;;  %2365 = vmatprep.mubr.f32.mxu1 %v1899_v9  ;;  %v1850_v9 = vmax.f32 %v1659_v21, 0.0 }
 0x2ff   :  { %v1855_v0 = vmax.f32 %v1684_v5, 0.0  ;;  %v1848_v54 = vmax.f32 %v1649_v20, 0.0 }
 0x300   :  { %v1688_v57 = vpop.f32.mrf.mxu0 }
 0x301   :  { %2366 = vmatmul.mubr.f32.gmra.mxu1 %v1898_v14  ;;  %v1689_v15 = vadd.f32 %v14049_v52, %v1688_v57  ;;  %v1847_v14 = vmax.f32 %v1644_v49, 0.0  ;;  %v1845_v57 = vmax.f32 %v1634_v22, 0.0 }
 0x302   :  { %v10961_v7 = vpop.f32.mrf.mxu0  ;;  %2370 = vmatprep.mubr.f32.mxu1 %v1909_v8 }
 0x303   :  { %v1856_v29 = vmax.f32 %v1689_v15, 0.0 }
 0x304   :  { %v1693_v59 = vpop.f32.mrf.mxu0 }
 0x305   :  { %2371 = vmatmul.mubr.f32.gmra.mxu1 %v1908_v37  ;;  %v1694_v46 = vadd.f32 %v14049_v52, %v1693_v59  ;;  %v1880_v37 = vld [vmem:[%s17921_s3 + $0x90] sm:$0xff]  ;;  %v1891_v59 = vld [vmem:[%s17921_s3 + $0xe8] sm:$0xff] }
 0x306   :  { %v10964_v24 = vpop.f32.mrf.mxu0  ;;  %2375 = vmatprep.mubr.f32.mxu1 %v1919_v11 }
 0x307   :  { %v1857_v41 = vmax.f32 %v1694_v46, 0.0 }
 0x308   :  { %v1698_v40 = vpop.f32.mrf.mxu0 }
 0x309   :  { %2376 = vmatmul.mubr.f32.gmra.mxu1 %v1918_v60  ;;  %v1699_v26 = vadd.f32 %v14049_v52, %v1698_v40  ;;  %v1890_v40 = vld [vmem:[%s17921_s3 + $0xe0] sm:$0xff] }
 0x30a   :  { %v10967_v28 = vpop.f32.mrf.mxu0  ;;  %2380 = vmatprep.mubr.f32.mxu1 %v1929_v56 }
 0x30b   :  { %v1858_v53 = vmax.f32 %v1699_v26, 0.0  ;;  %v1921_v26 = vld [vmem:[%s17921_s3 + $0x1d8] sm:$0xff] }
 0x30c   :  { %v1703_v3 = vpop.f32.mrf.mxu0 }
 0x30d   :  { %2381 = vmatmul.mubr.f32.gmra.mxu1 %v1928_v55  ;;  %v1704_v43 = vadd.f32 %v14049_v52, %v1703_v3  ;;  %v1901_v55 = vld [vmem:[%s17921_s3 + $0x138] sm:$0xff] }
 0x30e   :  { %v10970_v58 = vpop.f32.mrf.mxu0  ;;  %2385 = vmatprep.mubr.f32.mxu1 %v1939_v23 }
 0x30f   :  { %v1859_v63 = vmax.f32 %v1704_v43, 0.0 }
 0x310   :  { %v1708_v6 = vpop.f32.mrf.mxu0 }
 0x311   :  { %v1709_v1 = vadd.f32 %v14049_v52, %v1708_v6  ;;  %2386 = vmatmul.mubr.f32.gmra.mxu1 %v1938_v17 }
 0x312   :  { %v10973_v27 = vpop.f32.mrf.mxu0  ;;  %8845 = vmatprep.mubr.msk.f32.mxu1 %vm1942_vm2, %v1871_v45  ;;  %v1911_v45 = vld [vmem:[%s17921_s3 + $0x188] sm:$0xff] }
 0x313   :  { %v1860_v48 = vmax.f32 %v1709_v1, 0.0 }
 0x314   :  { %v1713_v50 = vpop.f32.mrf.mxu0 }
 0x315   :  { %2392 = vmatpush1.msra.mxu1 %v1860_v48  ;;  %v1714_v8 = vadd.f32 %v14049_v52, %v1713_v50  ;;  %v1881_v52 = vld [vmem:[%s17921_s3 + $0x98] sm:$0xff] }
 0x316   :  { %2393 = vmatprep.subr.mxu1 %v12693_v2  ;;  %v10976_v33 = vpop.f32.mrf.mxu0 }
 0x317   :  { %2394 = vmatpush1.msra.mxu1 %v1859_v63  ;;  %v1861_v7 = vmax.f32 %v1714_v8, 0.0  ;;  %v1931_v33 = vld [vmem:[%s17921_s3 + $0x228] sm:$0xff] }
 0x318   :  { %2395 = vmatprep.subr.mxu1 %v12693_v2 }
 0x319   :  { %2396 = vmatpush1.msra.mxu1 %v1858_v53 }
 0x31a   :  { %2397 = vmatprep.subr.mxu1 %v12693_v2 }
 0x31b   :  { %2398 = vmatpush1.msra.mxu1 %v1857_v41 }
 0x31c   :  { %2399 = vmatprep.subr.mxu1 %v12693_v2 }
 0x31d   :  { %2400 = vmatpush1.msra.mxu1 %v1856_v29 }
 0x31e   :  { %2401 = vmatprep.subr.mxu1 %v12693_v2 }
 0x31f   :  { %2402 = vmatpush1.msra.mxu1 %v1855_v0 }
 0x320   :  { %2403 = vmatprep.subr.mxu1 %v12693_v2 }
 0x321   :  { %2404 = vmatpush1.msra.mxu1 %v1854_v61 }
 0x322   :  { %2405 = vmatprep.subr.mxu1 %v12693_v2 }
 0x323   :  { %2406 = vmatpush1.msra.mxu1 %v1853_v10 }
 0x324   :  { %2407 = vmatprep.subr.mxu1 %v12693_v2 }
 0x325   :  { %2408 = vmatpush1.msra.mxu1 %v1852_v36 }
 0x326   :  { %2409 = vmatprep.subr.mxu1 %v12693_v2 }
 0x327   :  { %2410 = vmatpush1.msra.mxu1 %v1851_v42 }
 0x328   :  { %2411 = vmatprep.subr.mxu1 %v12693_v2 }
 0x329   :  { %2412 = vmatpush1.msra.mxu1 %v1850_v9 }
 0x32a   :  { %2413 = vmatprep.subr.mxu1 %v12693_v2 }
 0x32b   :  { %2414 = vmatpush1.msra.mxu1 %v1849_v47 }
 0x32c   :  { %2415 = vmatprep.subr.mxu1 %v12693_v2 }
 0x32d   :  { %2416 = vmatpush1.msra.mxu1 %v1848_v54 }
 0x32e   :  { %2417 = vmatprep.subr.mxu1 %v12693_v2 }
 0x32f   :  { %2418 = vmatpush1.msra.mxu1 %v1847_v14 }
 0x330   :  { %2419 = vmatprep.subr.mxu1 %v12693_v2 }
 0x331   :  { %2420 = vmatpush1.msra.mxu1 %v1846_v62 }
 0x332   :  { %2421 = vmatprep.subr.mxu1 %v12693_v2 }
 0x333   :  { %2422 = vmatpush1.msra.mxu1 %v1845_v57 }
 0x334   :  { %2453 = vmatprep.subr.mxu1 %v12693_v2 }
 0x335   :  { %8844 = vmatpush2.msk.msra.mxu1 %vm1967_vm3, %v1861_v7  ;;  %v9824_v30 = vpop.f32.mrf.mxu1 }
 0x336   :  { %2456 = vmatmul.mubr.f32.vlgmr.msra.gmra.mxu1 %v1870_v38  ;;  %10977 = vmatprep.subr.mxu1 %v12693_v2 }
 0x337   :  { %8846 = vmatprep.mubr.msk.f32.mxu1 %vm1942_vm2, %v1881_v52  ;;  %v9825_v11 = vpop.f32.mrf.mxu1 }
 0x338   :  { %v9826_v24 = vadd.f32 %v9825_v11, %v9824_v30 }
 0x339   :  { %v9827_v60 = vpop.f32.mrf.mxu1 }
 0x33a   :  { %2461 = vmatmul.mubr.f32.gmra.mxu1 %v1880_v37  ;;  %v2248_v56 = vadd.f32 %v9826_v24, %v14256_v51  ;;  %v1900_v51 = vld [vmem:[%s17921_s3 + $0x130] sm:$0xff] }
 0x33b   :  { %8847 = vmatprep.mubr.msk.f32.mxu1 %vm1942_vm2, %v1891_v59  ;;  %v9828_v28 = vpop.f32.mrf.mxu1 }
 0x33c   :  { %v9829_v23 = vadd.f32 %v9828_v28, %v9827_v60 }
 0x33d   :  { %v9830_v3 = vpop.f32.mrf.mxu1 }
 0x33e   :  { %2466 = vmatmul.mubr.f32.gmra.mxu1 %v1890_v40  ;;  %v2253_v58 = vadd.f32 %v9829_v23, %v14273_v44  ;;  %v1910_v44 = vld [vmem:[%s17921_s3 + $0x180] sm:$0xff] }
 0x33f   :  { %8848 = vmatprep.mubr.msk.f32.mxu1 %vm1942_vm2, %v1901_v55  ;;  %v9831_v17 = vpop.f32.mrf.mxu1 }
 0x340   :  { %v9832_v6 = vadd.f32 %v9831_v17, %v9830_v3 }
 0x341   :  { %v9833_v43 = vpop.f32.mrf.mxu1 }
 0x342   :  { %2471 = vmatmul.mubr.f32.gmra.mxu1 %v1900_v51  ;;  %v14465_v1 = vadd.f32 %v9832_v6, %v14287_v32  ;;  %v1920_v32 = vld [vmem:[%s17921_s3 + $0x1d0] sm:$0xff] }
 0x343   :  { %8849 = vmatprep.mubr.msk.f32.mxu1 %vm1942_vm2, %v1911_v45  ;;  %v9834_v27 = vpop.f32.mrf.mxu1 }
 0x344   :  { %v9835_v48 = vadd.f32 %v9834_v27, %v9833_v43 }
 0x345   :  { %v9836_v50 = vpop.f32.mrf.mxu1 }
 0x346   :  { %2476 = vmatmul.mubr.f32.gmra.mxu1 %v1910_v44  ;;  %v14475_v46 = vadd.f32 %v9835_v48, %v14301_v35  ;;  %v1930_v35 = vld [vmem:[%s17921_s3 + $0x220] sm:$0xff] }
 0x347   :  { %8850 = vmatprep.mubr.msk.f32.mxu1 %vm1942_vm2, %v1921_v26  ;;  %v9837_v63 = vpop.f32.mrf.mxu1 }
 0x348   :  { %v9838_v15 = vadd.f32 %v9837_v63, %v9836_v50 }
 0x349   :  { %v9839_v53 = vpop.f32.mrf.mxu1 }
 0x34a   :  { %2481 = vmatmul.mubr.f32.gmra.mxu1 %v1920_v32  ;;  %v14485_v5 = vadd.f32 %v9838_v15, %v14315_v31  ;;  %v1940_v31 = vld [vmem:[%s17921_s3 + $0x270] sm:$0xff] }
 0x34b   :  { %8851 = vmatprep.mubr.msk.f32.mxu1 %vm1942_vm2, %v1931_v33  ;;  %v9840_v41 = vpop.f32.mrf.mxu1 }
 0x34c   :  { %v9841_v29 = vadd.f32 %v9840_v41, %v9839_v53 }
 0x34d   :  { %v9842_v12 = vpop.f32.mrf.mxu1 }
 0x34e   :  { %2486 = vmatmul.mubr.f32.gmra.mxu1 %v1930_v35  ;;  %v2273_v0 = vadd.f32 %v9841_v29, %v14329_v39 }
 0x34f   :  { %8852 = vmatprep.mubr.msk.f32.mxu1 %vm1942_vm2, %v1941_v16  ;;  %v9843_v34 = vpop.f32.mrf.mxu1 }
 0x350   :  { %v9844_v61 = vadd.f32 %v9843_v34, %v9842_v12  ;;  %v2496_v34 = vld [vmem:[%s17922_s4] sm:$0xff] }
 0x351   :  { %v9845_v10 = vpop.f32.mrf.mxu1 }
 0x352   :  { %2491 = vmatmul.mubr.f32.gmra.mxu1 %v1940_v31  ;;  %v2278_v4 = vadd.f32 %v9844_v61, %v14338_v18  ;;  %v9008_v61 = vld [vmem:[%s17922_s4 + $0x1a0] sm:$0xff] }
 0x353   :  { %10993 = vmatprep.mubr.msk.f32.mxu1 %vm12694_vm0, %v12693_v2  ;;  %v9846_v21 = vpop.f32.mrf.mxu1 }
 0x3b5   :  { %v9880_v36 = vpop.f32.mrf.mxu1 }
 0x3b7   :  { %v9881_v13 = vpop.f32.mrf.mxu1 }
 0x3b8   :  { %v9882_v42 = vadd.f32 %v9881_v13, %v9880_v36  ;;  %v9010_v36 = vld [vmem:[%s17922_s4 + $0x1b0] sm:$0xff]  ;;  %v2499_v13 = vld [vmem:[%s17922_s4 + $0x18] sm:$0xff] }
 0x3b9   :  { %v9883_v39 = vpop.f32.mrf.mxu1 }
 0x3ba   :  { %v14502_v20 = vadd.f32 %v9882_v42, %v2248_v56  ;;  %v9011_v42 = vld [vmem:[%s17922_s4 + $0x1b8] sm:$0xff] }
 0x3bb   :  { %v9884_v9 = vpop.f32.mrf.mxu1 }
 0x3bc   :  { %v9885_v49 = vadd.f32 %v9884_v9, %v9883_v39  ;;  %v2500_v39 = vld [vmem:[%s17922_s4 + $0x20] sm:$0xff]  ;;  %v2501_v9 = vld [vmem:[%s17922_s4 + $0x28] sm:$0xff] }
 0x3bd   :  { %v9886_v25 = vpop.f32.mrf.mxu1 }
 0x3be   :  { %v14504_v47 = vadd.f32 %v9885_v49, %v2253_v58  ;;  %v9847_v58 = vadd.f32 %v9846_v21, %v9845_v10  ;;  %v9009_v10 = vld [vmem:[%s17922_s4 + $0x1a8] sm:$0xff]  ;;  %v2498_v21 = vld [vmem:[%s17922_s4 + $0x10] sm:$0xff] }
 0x3bf   :  { %v9887_v54 = vpop.f32.mrf.mxu1  ;;  %v9013_v49 = vld [vmem:[%s17922_s4 + $0x1c8] sm:$0xff] }
 0x3c0   :  { %v2283_v6 = vadd.f32 %v9847_v58, %v14349_v19  ;;  %v9888_v19 = vadd.f32 %v9887_v54, %v9886_v25  ;;  %v9014_v25 = vld [vmem:[%s17922_s4 + $0x1d0] sm:$0xff]  ;;  %v2503_v54 = vld [vmem:[%s17922_s4 + $0x38] sm:$0xff] }
 0x3c1   :  { %v9889_v22 = vpop.f32.mrf.mxu1  ;;  %v8871_v58 = vld [vmem:[%s17922_s4 + $0x90] sm:$0xff] }
 0x3c3   :  { %v9890_v14 = vpop.f32.mrf.mxu1 }
 0x3c4   :  { %v9891_v15 = vadd.f32 %v9890_v14, %v9889_v22  ;;  %v9015_v22 = vld [vmem:[%s17922_s4 + $0x1d8] sm:$0xff]  ;;  %v2504_v14 = vld [vmem:[%s17922_s4 + $0x40] sm:$0xff] }
 0x3c5   :  { %v9892_v18 = vpop.f32.mrf.mxu1 }
 0x3c6   :  { %v2368_v29 = vadd.f32 %v9891_v15, %v14475_v46  ;;  %v8895_v15 = vld [vmem:[%s17923_s5 + $0x38] sm:$0xff] }
 0x3c7   :  { %v9893_v8 = vpop.f32.mrf.mxu1 }
 0x3c8   :  { %v9894_v50 = vadd.f32 %v9893_v8, %v9892_v18  ;;  %v9016_v18 = vld [vmem:[%s17922_s4 + $0x1e0] sm:$0xff]  ;;  %v2505_v8 = vld [vmem:[%s17922_s4 + $0x48] sm:$0xff] }
 0x3c9   :  { %v9895_v62 = vpop.f32.mrf.mxu1 }
 0x3ca   :  { %v2373_v41 = vadd.f32 %v9894_v50, %v14485_v5  ;;  %v2363_v5 = vadd.f32 %v9888_v19, %v14465_v1  ;;  %v8876_v50 = vld [vmem:[%s17922_s4 + $0xb8] sm:$0xff]  ;;  %v8878_v19 = vld [vmem:[%s17922_s4 + $0xc8] sm:$0xf] }
 0x3cb   :  { %v9896_v57 = vpop.f32.mrf.mxu1 }
 0x3cc   :  { %v9897_v27 = vadd.f32 %v9896_v57, %v9895_v62  ;;  %v9017_v62 = vld [vmem:[%s17922_s4 + $0x1e8] sm:$0xff]  ;;  %v2506_v57 = vld [vmem:[%s17922_s4 + $0x50] sm:$0xff] }
 0x3cd   :  { %v9898_v7 = vpop.f32.mrf.mxu1 }
 0x3ce   :  { %v2378_v53 = vadd.f32 %v9897_v27, %v2273_v0  ;;  %v9059_v27 = vld [vmem:[%s17922_s4 + $0x248] sm:$0xff] }
 0x3cf   :  { %v9899_v38 = vpop.f32.mrf.mxu1 }
 0x3d0   :  { %v9900_v43 = vadd.f32 %v9899_v38, %v9898_v7  ;;  %v9018_v7 = vld [vmem:[%s17922_s4 + $0x1f0] sm:$0xff]  ;;  %v2507_v38 = vld [vmem:[%s17922_s4 + $0x58] sm:$0xff] }
 0x3d1   :  { %v9901_v52 = vpop.f32.mrf.mxu1 }
 0x3d2   :  { %v2383_v32 = vadd.f32 %v9900_v43, %v2278_v4  ;;  %v2497_v4 = vld [vmem:[%s17922_s4 + $0x8] sm:$0xff]  ;;  %v9058_v43 = vld [vmem:[%s17922_s4 + $0x240] sm:$0xff] }
 0x3d3   :  { %v9902_v30 = vpop.f32.mrf.mxu1 }
 0x3d4   :  { %v9903_v17 = vadd.f32 %v9902_v30, %v9901_v52  ;;  %v9019_v52 = vld [vmem:[%s17922_s4 + $0x1f8] sm:$0xff]  ;;  %v2508_v30 = vld [vmem:[%s17922_s4 + $0x60] sm:$0xf] }
 0x3d6   :  { %v2388_v26 = vadd.f32 %v9903_v17, %v2283_v6  ;;  %v8872_v17 = vld [vmem:[%s17922_s4 + $0x98] sm:$0xff]  ;;  %v8873_v6 = vld [vmem:[%s17922_s4 + $0xa0] sm:$0xff] }
 0x3f6   :  { %v2457_v37 = vpop.f32.mrf.mxu1 }
 0x3f7   :  { %v14550_v31 = vadd.f32 %v2457_v37, %v14502_v20  ;;  %v9012_v20 = vld [vmem:[%s17922_s4 + $0x1c0] sm:$0xff] }
 0x3f8   :  { %v2459_v11 = vpop.f32.mrf.mxu1  ;;  %v9020_v37 = vld [vmem:[%s17922_s4 + $0x200] sm:$0xf] }
 0x3f9   :  { %v8866_v11 = vld [vmem:[%s17922_s4 + $0x68] sm:$0xff] }
 0x3fa   :  { %v2462_v59 = vpop.f32.mrf.mxu1 }
 0x3fb   :  { %v14543_v1 = vadd.f32 %v2462_v59, %v14504_v47  ;;  %v2502_v47 = vld [vmem:[%s17922_s4 + $0x30] sm:$0xff]  ;;  %v9051_v59 = vld [vmem:[%s17922_s4 + $0x208] sm:$0xff] }
 0x3fc   :  { %v2464_v24 = vpop.f32.mrf.mxu1 }
 0x3fd   :  { %v8867_v24 = vld [vmem:[%s17922_s4 + $0x70] sm:$0xff] }
 0x3fe   :  { %v2467_v60 = vpop.f32.mrf.mxu1 }
 0x3ff   :  { %v14536_v46 = vadd.f32 %v2467_v60, %v2363_v5  ;;  %v9052_v60 = vld [vmem:[%s17922_s4 + $0x210] sm:$0xff] }
 0x400   :  { %v2469_v56 = vpop.f32.mrf.mxu1  ;;  %v8894_v5 = vld [vmem:[%s17923_s5 + $0x30] sm:$0xff] }
 0x401   :  { %v8868_v56 = vld [vmem:[%s17922_s4 + $0x78] sm:$0xff] }
 0x402   :  { %v2472_v40 = vpop.f32.mrf.mxu1 }
 0x403   :  { %v14530_v0 = vadd.f32 %v2472_v40, %v2368_v29  ;;  %v9053_v40 = vld [vmem:[%s17922_s4 + $0x218] sm:$0xff]  ;;  %v9094_v29 = vld [vmem:[%s17922_s4 + $0x270] sm:$0xff] }
 0x404   :  { %v2474_v28 = vpop.f32.mrf.mxu1 }
 0x405   :  { %v8869_v28 = vld [vmem:[%s17922_s4 + $0x80] sm:$0xff] }
 0x406   :  { %v2477_v55 = vpop.f32.mrf.mxu1 }
 0x407   :  { %v14523_v12 = vadd.f32 %v2477_v55, %v2373_v41  ;;  %v9054_v55 = vld [vmem:[%s17922_s4 + $0x220] sm:$0xff]  ;;  %v9063_v41 = vld [vmem:[%s17922_s4 + $0x268] sm:$0xf] }
 0x408   :  { %v2479_v23 = vpop.f32.mrf.mxu1 }
 0x409   :  { %v8870_v23 = vld [vmem:[%s17922_s4 + $0x88] sm:$0xff] }
 0x40a   :  { %v2482_v3 = vpop.f32.mrf.mxu1 }
 0x40b   :  { %v14516_v16 = vadd.f32 %v2482_v3, %v2378_v53  ;;  %v9055_v3 = vld [vmem:[%s17922_s4 + $0x228] sm:$0xff]  ;;  %v9062_v53 = vld [vmem:[%s17922_s4 + $0x260] sm:$0xff] }
 0x40c   :  { %v2484_v51 = vpop.f32.mrf.mxu1 }
 0x40d   :  { %v9056_v51 = vld [vmem:[%s17922_s4 + $0x230] sm:$0xff] }
 0x40e   :  { %v2487_v45 = vpop.f32.mrf.mxu1 }
 0x40f   :  { %v14509_v35 = vadd.f32 %v2487_v45, %v2383_v32  ;;  %v9057_v45 = vld [vmem:[%s17922_s4 + $0x238] sm:$0xff] }
 0x410   :  { %v2489_v44 = vpop.f32.mrf.mxu1  ;;  %v9061_v32 = vld [vmem:[%s17922_s4 + $0x258] sm:$0xff] }
 0x411   :  { %v8874_v44 = vld [vmem:[%s17922_s4 + $0xa8] sm:$0xff] }
 0x412   :  { %v2492_v48 = vpop.f32.mrf.mxu1 }
 0x413   :  { %v14507_v63 = vadd.f32 %v2492_v48, %v2388_v26  ;;  %v8875_v26 = vld [vmem:[%s17922_s4 + $0xb0] sm:$0xff] }
 0x414   :  { %v2494_v33 = vpop.f32.mrf.mxu1  ;;  %v9060_v48 = vld [vmem:[%s17922_s4 + $0x250] sm:$0xff] }
 0x415   :  { %10978 = vmatpush3.msra.mxu1 %v14507_v63  ;;  %11386 = vmatpush3.msra.mxu0 %v14507_v63  ;;  %v8877_v33 = vld [vmem:[%s17922_s4 + $0xc0] sm:$0xff] }
 0x416   :  { %10979 = vmatprep.subr.mxu1 %v12693_v2  ;;  %11387 = vmatprep.subr.mxu0 %v12693_v2 }
 0x417   :  { %10980 = vmatpush3.msra.mxu1 %v14509_v35  ;;  %11388 = vmatpush3.msra.mxu0 %v14509_v35 }
 0x418   :  { %10981 = vmatprep.subr.mxu1 %v12693_v2  ;;  %11389 = vmatprep.subr.mxu0 %v12693_v2 }
 0x419   :  { %10982 = vmatpush3.msra.mxu1 %v14516_v16  ;;  %11390 = vmatpush3.msra.mxu0 %v14516_v16 }
 0x41a   :  { %10983 = vmatprep.subr.mxu1 %v12693_v2  ;;  %11391 = vmatprep.subr.mxu0 %v12693_v2 }
 0x41b   :  { %10984 = vmatpush3.msra.mxu1 %v14523_v12  ;;  %11392 = vmatpush3.msra.mxu0 %v14523_v12 }
 0x41c   :  { %10985 = vmatprep.subr.mxu1 %v12693_v2  ;;  %11393 = vmatprep.subr.mxu0 %v12693_v2 }
 0x41d   :  { %10986 = vmatpush3.msra.mxu1 %v14530_v0  ;;  %11394 = vmatpush3.msra.mxu0 %v14530_v0 }
 0x41e   :  { %10987 = vmatprep.subr.mxu1 %v12693_v2  ;;  %11395 = vmatprep.subr.mxu0 %v12693_v2 }
 0x41f   :  { %10988 = vmatpush3.msra.mxu1 %v14536_v46  ;;  %11396 = vmatpush3.msra.mxu0 %v14536_v46 }
 0x420   :  { %10989 = vmatprep.subr.mxu1 %v12693_v2  ;;  %11397 = vmatprep.subr.mxu0 %v12693_v2 }
 0x421   :  { %10990 = vmatpush3.msra.mxu1 %v14543_v1  ;;  %11398 = vmatpush3.msra.mxu0 %v14543_v1 }
 0x422   :  { %10991 = vmatprep.subr.mxu1 %v12693_v2  ;;  %11399 = vmatprep.subr.mxu0 %v12693_v2 }
 0x423   :  { %10992 = vmatpush3.msra.mxu1 %v14550_v31  ;;  %11400 = vmatpush3.msra.mxu0 %v14550_v31 }
 0x424   :  { %10994 = vmatmul.mubr.msk.f32.vlgmr.msra.gmra.mxu1 %vm491_vm1, %v2496_v34  ;;  %11032 = vmatprep.subr.mxu1 %v12693_v2  ;;  %v9095_v34 = vld [vmem:[%s17922_s4 + $0x278] sm:$0xff] }
 0x425   :  { %11402 = vmatmul.mubr.msk.f32.vlgmr.msra.gmra.mxu0 %vm491_vm1, %v9008_v61  ;;  %11487 = vmatprep.subr.mxu0 %v12693_v2  ;;  %v9096_v61 = vld [vmem:[%s17922_s4 + $0x280] sm:$0xff] }
 0x426   :  { %11033 = vmatpush3.msra.mxu1 %v14507_v63  ;;  %11488 = vmatpush3.msra.mxu0 %v14507_v63 }
 0x427   :  { %11034 = vmatprep.subr.mxu1 %v12693_v2  ;;  %11489 = vmatprep.subr.mxu0 %v12693_v2 }
 0x428   :  { %10996 = vmatprep.mubr.msk.f32.mxu1 %vm12694_vm0, %v12693_v2  ;;  %11035 = vmatpush3.msra.mxu1 %v14509_v35 }
 0x429   :  { %11404 = vmatprep.mubr.msk.f32.mxu0 %vm12694_vm0, %v12693_v2  ;;  %11490 = vmatpush3.msra.mxu0 %v14509_v35 }
 0x42a   :  { %10997 = vmatmul.mubr.msk.f32.gmra.mxu1 %vm491_vm1, %v2497_v4  ;;  %11036 = vmatprep.subr.mxu1 %v12693_v2  ;;  %v9097_v4 = vld [vmem:[%s17922_s4 + $0x288] sm:$0xff] }
 0x42b   :  { %11405 = vmatmul.mubr.msk.f32.gmra.mxu0 %vm491_vm1, %v9009_v10  ;;  %11491 = vmatprep.subr.mxu0 %v12693_v2  ;;  %v8893_v10 = vld [vmem:[%s17923_s5 + $0x28] sm:$0xff] }
 0x42c   :  { %11037 = vmatpush3.msra.mxu1 %v14516_v16  ;;  %11492 = vmatpush3.msra.mxu0 %v14516_v16 }
 0x42d   :  { %11038 = vmatprep.subr.mxu1 %v12693_v2  ;;  %11493 = vmatprep.subr.mxu0 %v12693_v2 }
 0x42e   :  { %10999 = vmatprep.mubr.msk.f32.mxu1 %vm12694_vm0, %v12693_v2  ;;  %11039 = vmatpush3.msra.mxu1 %v14523_v12 }
 0x42f   :  { %11407 = vmatprep.mubr.msk.f32.mxu0 %vm12694_vm0, %v12693_v2  ;;  %11494 = vmatpush3.msra.mxu0 %v14523_v12 }
 0x430   :  { %11000 = vmatmul.mubr.msk.f32.gmra.mxu1 %vm491_vm1, %v2498_v21  ;;  %11040 = vmatprep.subr.mxu1 %v12693_v2  ;;  %v8892_v21 = vld [vmem:[%s17923_s5 + $0x20] sm:$0xff] }
 0x431   :  { %11408 = vmatmul.mubr.msk.f32.gmra.mxu0 %vm491_vm1, %v9010_v36  ;;  %11495 = vmatprep.subr.mxu0 %v12693_v2  ;;  %v9098_v36 = vld [vmem:[%s17922_s4 + $0x290] sm:$0xff] }
 0x432   :  { %11041 = vmatpush3.msra.mxu1 %v14530_v0  ;;  %11496 = vmatpush3.msra.mxu0 %v14530_v0 }
 0x433   :  { %11042 = vmatprep.subr.mxu1 %v12693_v2  ;;  %11497 = vmatprep.subr.mxu0 %v12693_v2 }
 0x434   :  { %11002 = vmatprep.mubr.msk.f32.mxu1 %vm12694_vm0, %v12693_v2  ;;  %11043 = vmatpush3.msra.mxu1 %v14536_v46 }
 0x435   :  { %11410 = vmatprep.mubr.msk.f32.mxu0 %vm12694_vm0, %v12693_v2  ;;  %11498 = vmatpush3.msra.mxu0 %v14536_v46 }
 0x436   :  { %11003 = vmatmul.mubr.msk.f32.gmra.mxu1 %vm491_vm1, %v2499_v13  ;;  %11044 = vmatprep.subr.mxu1 %v12693_v2  ;;  %v9099_v13 = vld [vmem:[%s17922_s4 + $0x298] sm:$0xff] }
 0x437   :  { %11411 = vmatmul.mubr.msk.f32.gmra.mxu0 %vm491_vm1, %v9011_v42  ;;  %11499 = vmatprep.subr.mxu0 %v12693_v2  ;;  %v9100_v42 = vld [vmem:[%s17922_s4 + $0x2a0] sm:$0xff] }
 0x438   :  { %11045 = vmatpush3.msra.mxu1 %v14543_v1  ;;  %11500 = vmatpush3.msra.mxu0 %v14543_v1 }
 0x439   :  { %11046 = vmatprep.subr.mxu1 %v12693_v2  ;;  %11501 = vmatprep.subr.mxu0 %v12693_v2 }
 0x43a   :  { %11005 = vmatprep.mubr.msk.f32.mxu1 %vm12694_vm0, %v12693_v2  ;;  %11047 = vmatpush3.msra.mxu1 %v14550_v31 }
 0x43b   :  { %11413 = vmatprep.mubr.msk.f32.mxu0 %vm12694_vm0, %v12693_v2  ;;  %11502 = vmatpush3.msra.mxu0 %v14550_v31 }
 0x43c   :  { %11006 = vmatmul.mubr.msk.f32.gmra.mxu1 %vm491_vm1, %v2500_v39  ;;  %11414 = vmatmul.mubr.msk.f32.gmra.mxu0 %vm491_vm1, %v9012_v20  ;;  %v9101_v39 = vld [vmem:[%s17922_s4 + $0x2a8] sm:$0xff]  ;;  %v9102_v20 = vld [vmem:[%s17922_s4 + $0x2b0] sm:$0xff] }
 0x43d   :  { %11008 = vmatprep.mubr.msk.f32.mxu1 %vm12694_vm0, %v12693_v2  ;;  %11416 = vmatprep.mubr.msk.f32.mxu0 %vm12694_vm0, %v12693_v2 }
 0x43e   :  { %11589 = vmatprep.subr.mxu0 %v12693_v2  ;;  %11087 = vmatprep.subr.mxu1 %v12693_v2 }
 0x440   :  { %11009 = vmatmul.mubr.msk.f32.gmra.mxu1 %vm491_vm1, %v2501_v9  ;;  %11417 = vmatmul.mubr.msk.f32.gmra.mxu0 %vm491_vm1, %v9013_v49  ;;  %v9103_v9 = vld [vmem:[%s17922_s4 + $0x2b8] sm:$0xff]  ;;  %v9104_v49 = vld [vmem:[%s17922_s4 + $0x2c0] sm:$0xff] }
 0x441   :  { %11011 = vmatprep.mubr.msk.f32.mxu1 %vm12694_vm0, %v12693_v2  ;;  %11419 = vmatprep.mubr.msk.f32.mxu0 %vm12694_vm0, %v12693_v2 }
 0x444   :  { %11012 = vmatmul.mubr.msk.f32.gmra.mxu1 %vm491_vm1, %v2502_v47  ;;  %11420 = vmatmul.mubr.msk.f32.gmra.mxu0 %vm491_vm1, %v9014_v25  ;;  %v9105_v47 = vld [vmem:[%s17922_s4 + $0x2c8] sm:$0xff]  ;;  %v9106_v25 = vld [vmem:[%s17922_s4 + $0x2d0] sm:$0xf] }
 0x445   :  { %11014 = vmatprep.mubr.msk.f32.mxu1 %vm12694_vm0, %v12693_v2  ;;  %11422 = vmatprep.mubr.msk.f32.mxu0 %vm12694_vm0, %v12693_v2 }
 0x448   :  { %11015 = vmatmul.mubr.msk.f32.gmra.mxu1 %vm491_vm1, %v2503_v54  ;;  %11423 = vmatmul.mubr.msk.f32.gmra.mxu0 %vm491_vm1, %v9015_v22  ;;  %v9137_v54 = vld [vmem:[%s17922_s4 + $0x2d8] sm:$0xff]  ;;  %v9138_v22 = vld [vmem:[%s17922_s4 + $0x2e0] sm:$0xff] }
 0x449   :  { %11017 = vmatprep.mubr.msk.f32.mxu1 %vm12694_vm0, %v12693_v2  ;;  %11425 = vmatprep.mubr.msk.f32.mxu0 %vm12694_vm0, %v12693_v2 }
 0x44c   :  { %11018 = vmatmul.mubr.msk.f32.gmra.mxu1 %vm491_vm1, %v2504_v14  ;;  %11426 = vmatmul.mubr.msk.f32.gmra.mxu0 %vm491_vm1, %v9016_v18  ;;  %v9139_v14 = vld [vmem:[%s17922_s4 + $0x2e8] sm:$0xff]  ;;  %v9140_v18 = vld [vmem:[%s17922_s4 + $0x2f0] sm:$0xff] }
 0x44d   :  { %11020 = vmatprep.mubr.msk.f32.mxu1 %vm12694_vm0, %v12693_v2  ;;  %11428 = vmatprep.mubr.msk.f32.mxu0 %vm12694_vm0, %v12693_v2 }
 0x450   :  { %11021 = vmatmul.mubr.msk.f32.gmra.mxu1 %vm491_vm1, %v2505_v8  ;;  %11429 = vmatmul.mubr.msk.f32.gmra.mxu0 %vm491_vm1, %v9017_v62  ;;  %v9141_v8 = vld [vmem:[%s17922_s4 + $0x2f8] sm:$0xff]  ;;  %v9142_v62 = vld [vmem:[%s17922_s4 + $0x300] sm:$0xff] }
 0x451   :  { %11023 = vmatprep.mubr.msk.f32.mxu1 %vm12694_vm0, %v12693_v2  ;;  %11431 = vmatprep.mubr.msk.f32.mxu0 %vm12694_vm0, %v12693_v2 }
 0x454   :  { %11024 = vmatmul.mubr.msk.f32.gmra.mxu1 %vm491_vm1, %v2506_v57  ;;  %11432 = vmatmul.mubr.msk.f32.gmra.mxu0 %vm491_vm1, %v9018_v7  ;;  %v9143_v57 = vld [vmem:[%s17922_s4 + $0x308] sm:$0xff]  ;;  %v9144_v7 = vld [vmem:[%s17922_s4 + $0x310] sm:$0xff] }
 0x455   :  { %11026 = vmatprep.mubr.msk.f32.mxu1 %vm12694_vm0, %v12693_v2  ;;  %11434 = vmatprep.mubr.msk.f32.mxu0 %vm12694_vm0, %v12693_v2 }
 0x458   :  { %11027 = vmatmul.mubr.msk.f32.gmra.mxu1 %vm491_vm1, %v2507_v38  ;;  %11435 = vmatmul.mubr.msk.f32.gmra.mxu0 %vm491_vm1, %v9019_v52 }
 0x459   :  { %11029 = vmatprep.mubr.msk.f32.mxu1 %vm12694_vm0, %v12693_v2  ;;  %11437 = vmatprep.mubr.msk.f32.mxu0 %vm12694_vm0, %v12693_v2 }
 0x45c   :  { %11030 = vmatmul.mubr.msk.f32.gmra.mxu1 %vm491_vm1, %v2508_v30  ;;  %11438 = vmatmul.mubr.msk.f32.gmra.mxu0 %vm491_vm1, %v9020_v37  ;;  %v9145_v30 = vld [vmem:[%s17922_s4 + $0x318] sm:$0xff] }
 0x45d   :  { %11048 = vmatprep.mubr.msk.f32.mxu1 %vm12694_vm0, %v12693_v2  ;;  %11503 = vmatprep.mubr.msk.f32.mxu0 %vm12694_vm0, %v12693_v2 }
 0x460   :  { %11049 = vmatmul.mubr.msk.f32.vlgmr.msra.gmra.mxu1 %vm491_vm1, %v8866_v11  ;;  %11504 = vmatmul.mubr.msk.f32.vlgmr.msra.gmra.mxu0 %vm491_vm1, %v9051_v59  ;;  %v9146_v59 = vld [vmem:[%s17922_s4 + $0x320] sm:$0xff] }
 0x461   :  { %11590 = vmatpush3.msra.mxu0 %v14507_v63  ;;  %11051 = vmatprep.mubr.msk.f32.mxu1 %vm12694_vm0, %v12693_v2 }
 0x462   :  { %11591 = vmatprep.subr.mxu0 %v12693_v2  ;;  %11506 = vmatprep.mubr.msk.f32.mxu0 %vm12694_vm0, %v12693_v2 }
 0x463   :  { %11592 = vmatpush3.msra.mxu0 %v14509_v35  ;;  %11088 = vmatpush3.msra.mxu1 %v8895_v15 }
 0x464   :  { %11593 = vmatprep.subr.mxu0 %v12693_v2  ;;  %11052 = vmatmul.mubr.msk.f32.gmra.mxu1 %vm491_vm1, %v8867_v24 }
 0x465   :  { %11507 = vmatmul.mubr.msk.f32.gmra.mxu0 %vm491_vm1, %v9052_v60  ;;  %11054 = vmatprep.mubr.msk.f32.mxu1 %vm12694_vm0, %v12693_v2 }
 0x466   :  { %11594 = vmatpush3.msra.mxu0 %v14516_v16  ;;  %11509 = vmatprep.mubr.msk.f32.mxu0 %vm12694_vm0, %v12693_v2 }
 0x467   :  { %11595 = vmatprep.subr.mxu0 %v12693_v2  ;;  %11089 = vmatprep.subr.mxu1 %v12693_v2 }
 0x468   :  { %11596 = vmatpush3.msra.mxu0 %v14523_v12  ;;  %11055 = vmatmul.mubr.msk.f32.gmra.mxu1 %vm491_vm1, %v8868_v56 }
 0x469   :  { %11597 = vmatprep.subr.mxu0 %v12693_v2  ;;  %11510 = vmatmul.mubr.msk.f32.gmra.mxu0 %vm491_vm1, %v9053_v40 }
 0x46a   :  { %11598 = vmatpush3.msra.mxu0 %v14530_v0  ;;  %11057 = vmatprep.mubr.msk.f32.mxu1 %vm12694_vm0, %v12693_v2 }
 0x46b   :  { %11599 = vmatprep.subr.mxu0 %v12693_v2  ;;  %11512 = vmatprep.mubr.msk.f32.mxu0 %vm12694_vm0, %v12693_v2 }
 0x46c   :  { %11600 = vmatpush3.msra.mxu0 %v14536_v46  ;;  %11058 = vmatmul.mubr.msk.f32.gmra.mxu1 %vm491_vm1, %v8869_v28  ;;  %v9147_v28 = vld [vmem:[%s17922_s4 + $0x328] sm:$0xff] }
 0x46d   :  { %11601 = vmatprep.subr.mxu0 %v12693_v2  ;;  %11513 = vmatmul.mubr.msk.f32.gmra.mxu0 %vm491_vm1, %v9054_v55 }
 0x46e   :  { %11602 = vmatpush3.msra.mxu0 %v14543_v1  ;;  %11060 = vmatprep.mubr.msk.f32.mxu1 %vm12694_vm0, %v12693_v2 }
 0x46f   :  { %11603 = vmatprep.subr.mxu0 %v12693_v2  ;;  %11515 = vmatprep.mubr.msk.f32.mxu0 %vm12694_vm0, %v12693_v2 }
 0x470   :  { %11604 = vmatpush3.msra.mxu0 %v14550_v31  ;;  %11061 = vmatmul.mubr.msk.f32.gmra.mxu1 %vm491_vm1, %v8870_v23 }
 0x471   :  { %11516 = vmatmul.mubr.msk.f32.gmra.mxu0 %vm491_vm1, %v9055_v3  ;;  %11063 = vmatprep.mubr.msk.f32.mxu1 %vm12694_vm0, %v12693_v2  ;;  %v9148_v3 = vld [vmem:[%s17922_s4 + $0x330] sm:$0xff] }
 0x472   :  { %11518 = vmatprep.mubr.msk.f32.mxu0 %vm12694_vm0, %v12693_v2  ;;  %11691 = vmatprep.subr.mxu0 %v12693_v2 }
 0x473   :  { %11090 = vmatpush3.msra.mxu1 %v8894_v5 }
 0x474   :  { %11064 = vmatmul.mubr.msk.f32.gmra.mxu1 %vm491_vm1, %v8871_v58  ;;  %11091 = vmatprep.subr.mxu1 %v12693_v2 }
 0x475   :  { %11519 = vmatmul.mubr.msk.f32.gmra.mxu0 %vm491_vm1, %v9056_v51  ;;  %11066 = vmatprep.mubr.msk.f32.mxu1 %vm12694_vm0, %v12693_v2 }
 0x476   :  { %11521 = vmatprep.mubr.msk.f32.mxu0 %vm12694_vm0, %v12693_v2  ;;  %11092 = vmatpush3.msra.mxu1 %v8893_v10 }
 0x477   :  { %11093 = vmatprep.subr.mxu1 %v12693_v2 }
 0x478   :  { %11067 = vmatmul.mubr.msk.f32.gmra.mxu1 %vm491_vm1, %v8872_v17 }
 0x479   :  { %11522 = vmatmul.mubr.msk.f32.gmra.mxu0 %vm491_vm1, %v9057_v45  ;;  %11069 = vmatprep.mubr.msk.f32.mxu1 %vm12694_vm0, %v12693_v2  ;;  %v9149_v45 = vld [vmem:[%s17922_s4 + $0x338] sm:$0xf] }
 0x47a   :  { %11524 = vmatprep.mubr.msk.f32.mxu0 %vm12694_vm0, %v12693_v2  ;;  %11094 = vmatpush3.msra.mxu1 %v8892_v21 }
 0x47b   :  { %11134 = vmatprep.subr.mxu1 %v12693_v2 }
 0x47c   :  { %11070 = vmatmul.mubr.msk.f32.gmra.mxu1 %vm491_vm1, %v8873_v6 }
 0x47d   :  { %11525 = vmatmul.mubr.msk.f32.gmra.mxu0 %vm491_vm1, %v9058_v43  ;;  %11072 = vmatprep.mubr.msk.f32.mxu1 %vm12694_vm0, %v12693_v2 }
 0x47e   :  { %11527 = vmatprep.mubr.msk.f32.mxu0 %vm12694_vm0, %v12693_v2 }
 0x480   :  { %11073 = vmatmul.mubr.msk.f32.gmra.mxu1 %vm491_vm1, %v8874_v44 }
 0x481   :  { %11528 = vmatmul.mubr.msk.f32.gmra.mxu0 %vm491_vm1, %v9059_v27  ;;  %11075 = vmatprep.mubr.msk.f32.mxu1 %vm12694_vm0, %v12693_v2  ;;  %v9180_v27 = vld [vmem:[%s17922_s4 + $0x340] sm:$0xff] }
 0x482   :  { %11530 = vmatprep.mubr.msk.f32.mxu0 %vm12694_vm0, %v12693_v2 }
 0x484   :  { %11076 = vmatmul.mubr.msk.f32.gmra.mxu1 %vm491_vm1, %v8875_v26 }
 0x485   :  { %11531 = vmatmul.mubr.msk.f32.gmra.mxu0 %vm491_vm1, %v9060_v48  ;;  %11078 = vmatprep.mubr.msk.f32.mxu1 %vm12694_vm0, %v12693_v2 }
 0x486   :  { %11533 = vmatprep.mubr.msk.f32.mxu0 %vm12694_vm0, %v12693_v2 }
 0x488   :  { %11079 = vmatmul.mubr.msk.f32.gmra.mxu1 %vm491_vm1, %v8876_v50 }
 0x489   :  { %11534 = vmatmul.mubr.msk.f32.gmra.mxu0 %vm491_vm1, %v9061_v32  ;;  %11081 = vmatprep.mubr.msk.f32.mxu1 %vm12694_vm0, %v12693_v2  ;;  %v9181_v32 = vld [vmem:[%s17922_s4 + $0x348] sm:$0xff] }
 0x48a   :  { %11536 = vmatprep.mubr.msk.f32.mxu0 %vm12694_vm0, %v12693_v2 }
 0x48c   :  { %11082 = vmatmul.mubr.msk.f32.gmra.mxu1 %vm491_vm1, %v8877_v33 }
 0x48d   :  { %11537 = vmatmul.mubr.msk.f32.gmra.mxu0 %vm491_vm1, %v9062_v53  ;;  %11084 = vmatprep.mubr.msk.f32.mxu1 %vm12694_vm0, %v12693_v2 }
 0x48e   :  { %11539 = vmatprep.mubr.msk.f32.mxu0 %vm12694_vm0, %v12693_v2 }
 0x490   :  { %11085 = vmatmul.mubr.msk.f32.gmra.mxu1 %vm491_vm1, %v8878_v19 }
 0x491   :  { %11540 = vmatmul.mubr.msk.f32.gmra.mxu0 %vm491_vm1, %v9063_v41  ;;  %11095 = vmatprep.mubr.msk.f32.mxu1 %vm12694_vm0, %v12693_v2  ;;  %v9182_v41 = vld [vmem:[%s17922_s4 + $0x350] sm:$0xff] }
 0x492   :  { %11605 = vmatprep.mubr.msk.f32.mxu0 %vm12694_vm0, %v12693_v2 }
 0x495   :  { %11606 = vmatmul.mubr.msk.f32.vlgmr.msra.gmra.mxu0 %vm491_vm1, %v9094_v29 }
 0x496   :  { %11692 = vmatpush3.msra.mxu0 %v14507_v63  ;;  %11608 = vmatprep.mubr.msk.f32.mxu0 %vm12694_vm0, %v12693_v2 }
 0x497   :  { %11693 = vmatprep.subr.mxu0 %v12693_v2 }
 0x498   :  { %11694 = vmatpush3.msra.mxu0 %v14509_v35 }
 0x499   :  { %11695 = vmatprep.subr.mxu0 %v12693_v2  ;;  %11609 = vmatmul.mubr.msk.f32.gmra.mxu0 %vm491_vm1, %v9095_v34 }
 0x49a   :  { %11696 = vmatpush3.msra.mxu0 %v14516_v16  ;;  %11611 = vmatprep.mubr.msk.f32.mxu0 %vm12694_vm0, %v12693_v2 }
 0x49b   :  { %11697 = vmatprep.subr.mxu0 %v12693_v2 }
 0x49c   :  { %11698 = vmatpush3.msra.mxu0 %v14523_v12 }
 0x49d   :  { %11699 = vmatprep.subr.mxu0 %v12693_v2  ;;  %11612 = vmatmul.mubr.msk.f32.gmra.mxu0 %vm491_vm1, %v9096_v61 }
 0x49e   :  { %11700 = vmatpush3.msra.mxu0 %v14530_v0  ;;  %11614 = vmatprep.mubr.msk.f32.mxu0 %vm12694_vm0, %v12693_v2 }
 0x49f   :  { %11701 = vmatprep.subr.mxu0 %v12693_v2 }
 0x4a0   :  { %11702 = vmatpush3.msra.mxu0 %v14536_v46 }
 0x4a1   :  { %11703 = vmatprep.subr.mxu0 %v12693_v2  ;;  %11615 = vmatmul.mubr.msk.f32.gmra.mxu0 %vm491_vm1, %v9097_v4  ;;  %v9183_v4 = vld [vmem:[%s17922_s4 + $0x358] sm:$0xff] }
 0x4a2   :  { %11704 = vmatpush3.msra.mxu0 %v14543_v1  ;;  %11617 = vmatprep.mubr.msk.f32.mxu0 %vm12694_vm0, %v12693_v2 }
 0x4a3   :  { %11705 = vmatprep.subr.mxu0 %v12693_v2 }
 0x4a4   :  { %11706 = vmatpush3.msra.mxu0 %v14550_v31 }
 0x4a5   :  { %11618 = vmatmul.mubr.msk.f32.gmra.mxu0 %vm491_vm1, %v9098_v36  ;;  %11793 = vmatprep.subr.mxu0 %v12693_v2 }
 0x4a6   :  { %11620 = vmatprep.mubr.msk.f32.mxu0 %vm12694_vm0, %v12693_v2 }
 0x4a9   :  { %11621 = vmatmul.mubr.msk.f32.gmra.mxu0 %vm491_vm1, %v9099_v13 }
 0x4aa   :  { %11623 = vmatprep.mubr.msk.f32.mxu0 %vm12694_vm0, %v12693_v2 }
 0x4ad   :  { %11624 = vmatmul.mubr.msk.f32.gmra.mxu0 %vm491_vm1, %v9100_v42  ;;  %v9184_v42 = vld [vmem:[%s17922_s4 + $0x360] sm:$0xff] }
 0x4ae   :  { %11626 = vmatprep.mubr.msk.f32.mxu0 %vm12694_vm0, %v12693_v2 }
 0x4b1   :  { %11627 = vmatmul.mubr.msk.f32.gmra.mxu0 %vm491_vm1, %v9101_v39 }
 0x4b2   :  { %11629 = vmatprep.mubr.msk.f32.mxu0 %vm12694_vm0, %v12693_v2 }
 0x4b5   :  { %11630 = vmatmul.mubr.msk.f32.gmra.mxu0 %vm491_vm1, %v9102_v20 }
 0x4b6   :  { %11632 = vmatprep.mubr.msk.f32.mxu0 %vm12694_vm0, %v12693_v2 }
 0x4b9   :  { %11633 = vmatmul.mubr.msk.f32.gmra.mxu0 %vm491_vm1, %v9103_v9 }
 0x4ba   :  { %11635 = vmatprep.mubr.msk.f32.mxu0 %vm12694_vm0, %v12693_v2 }
 0x4bd   :  { %11636 = vmatmul.mubr.msk.f32.gmra.mxu0 %vm491_vm1, %v9104_v49 }
 0x4be   :  { %11638 = vmatprep.mubr.msk.f32.mxu0 %vm12694_vm0, %v12693_v2 }
 0x4c1   :  { %11639 = vmatmul.mubr.msk.f32.gmra.mxu0 %vm491_vm1, %v9105_v47  ;;  %v9185_v47 = vld [vmem:[%s17922_s4 + $0x368] sm:$0xff] }
 0x4c2   :  { %11641 = vmatprep.mubr.msk.f32.mxu0 %vm12694_vm0, %v12693_v2 }
 0x4c5   :  { %11642 = vmatmul.mubr.msk.f32.gmra.mxu0 %vm491_vm1, %v9106_v25 }
 0x4c6   :  { %11707 = vmatprep.mubr.msk.f32.mxu0 %vm12694_vm0, %v12693_v2 }
 0x4c9   :  { %11708 = vmatmul.mubr.msk.f32.vlgmr.msra.gmra.mxu0 %vm491_vm1, %v9137_v54 }
 0x4ca   :  { %11794 = vmatpush3.msra.mxu0 %v14507_v63  ;;  %11710 = vmatprep.mubr.msk.f32.mxu0 %vm12694_vm0, %v12693_v2 }
 0x4cb   :  { %11795 = vmatprep.subr.mxu0 %v12693_v2 }
 0x4cc   :  { %11796 = vmatpush3.msra.mxu0 %v14509_v35 }
 0x4cd   :  { %11797 = vmatprep.subr.mxu0 %v12693_v2  ;;  %11711 = vmatmul.mubr.msk.f32.gmra.mxu0 %vm491_vm1, %v9138_v22 }
 0x4ce   :  { %11798 = vmatpush3.msra.mxu0 %v14516_v16  ;;  %11713 = vmatprep.mubr.msk.f32.mxu0 %vm12694_vm0, %v12693_v2 }
 0x4cf   :  { %11799 = vmatprep.subr.mxu0 %v12693_v2 }
 0x4d0   :  { %11800 = vmatpush3.msra.mxu0 %v14523_v12 }
 0x4d1   :  { %11801 = vmatprep.subr.mxu0 %v12693_v2  ;;  %11714 = vmatmul.mubr.msk.f32.gmra.mxu0 %vm491_vm1, %v9139_v14 }
 0x4d2   :  { %11802 = vmatpush3.msra.mxu0 %v14530_v0  ;;  %11716 = vmatprep.mubr.msk.f32.mxu0 %vm12694_vm0, %v12693_v2 }
 0x4d3   :  { %11803 = vmatprep.subr.mxu0 %v12693_v2 }
 0x4d4   :  { %11804 = vmatpush3.msra.mxu0 %v14536_v46 }
 0x4d5   :  { %11805 = vmatprep.subr.mxu0 %v12693_v2  ;;  %11717 = vmatmul.mubr.msk.f32.gmra.mxu0 %vm491_vm1, %v9140_v18  ;;  %v9186_v18 = vld [vmem:[%s17922_s4 + $0x370] sm:$0xff] }
 0x4d6   :  { %11806 = vmatpush3.msra.mxu0 %v14543_v1  ;;  %11719 = vmatprep.mubr.msk.f32.mxu0 %vm12694_vm0, %v12693_v2 }
 0x4d7   :  { %11807 = vmatprep.subr.mxu0 %v12693_v2 }
 0x4d8   :  { %11808 = vmatpush3.msra.mxu0 %v14550_v31 }
 0x4d9   :  { %11720 = vmatmul.mubr.msk.f32.gmra.mxu0 %vm491_vm1, %v9141_v8  ;;  %11895 = vmatprep.subr.mxu0 %v12693_v2 }
 0x4da   :  { %11722 = vmatprep.mubr.msk.f32.mxu0 %vm12694_vm0, %v12693_v2 }
 0x4dd   :  { %11723 = vmatmul.mubr.msk.f32.gmra.mxu0 %vm491_vm1, %v9142_v62 }
 0x4de   :  { %11725 = vmatprep.mubr.msk.f32.mxu0 %vm12694_vm0, %v12693_v2 }
 0x4e1   :  { %11726 = vmatmul.mubr.msk.f32.gmra.mxu0 %vm491_vm1, %v9143_v57 }
 0x4e2   :  { %11728 = vmatprep.mubr.msk.f32.mxu0 %vm12694_vm0, %v12693_v2 }
 0x4e4   :  { %v15091_v38 = vpop.f32.mrf.mxu1 }
 0x4e5   :  { %11729 = vmatmul.mubr.msk.f32.gmra.mxu0 %vm491_vm1, %v9144_v7  ;;  %v15094_v52 = vpop.f32.mrf.mxu0 }
 0x4e6   :  { %11731 = vmatprep.mubr.msk.f32.mxu0 %vm12694_vm0, %v12693_v2  ;;  %v10995_v37 = vpop.f32.mrf.mxu1 }
 0x4e7   :  { %v11403_v11 = vpop.f32.mrf.mxu0 }
 0x4e9   :  { %11732 = vmatmul.mubr.msk.f32.gmra.mxu0 %vm491_vm1, %v9145_v30  ;;  %v9187_v30 = vld [vmem:[%s17922_s4 + $0x378] sm:$0xff] }
 0x4ea   :  { %11734 = vmatprep.mubr.msk.f32.mxu0 %vm12694_vm0, %v12693_v2  ;;  %v15107_v24 = vpop.f32.mrf.mxu1 }
 0x4eb   :  { %v15109_v60 = vpop.f32.mrf.mxu0 }
 0x4ec   :  { %v10998_v56 = vpop.f32.mrf.mxu1 }
 0x4ed   :  { %11735 = vmatmul.mubr.msk.f32.gmra.mxu0 %vm491_vm1, %v9146_v59  ;;  %v11406_v40 = vpop.f32.mrf.mxu0 }
 0x4ee   :  { %11737 = vmatprep.mubr.msk.f32.mxu0 %vm12694_vm0, %v12693_v2  ;;  %v9188_v40 = vld [vmem:[%s17922_s4 + $0x380] sm:$0xff] }
 0x4f0   :  { %v15117_v55 = vpop.f32.mrf.mxu1 }
 0x4f1   :  { %11738 = vmatmul.mubr.msk.f32.gmra.mxu0 %vm491_vm1, %v9147_v28  ;;  %v15120_v23 = vpop.f32.mrf.mxu0 }
 0x4f2   :  { %11740 = vmatprep.mubr.msk.f32.mxu0 %vm12694_vm0, %v12693_v2  ;;  %v11001_v58 = vpop.f32.mrf.mxu1 }
 0x4f3   :  { %v11409_v51 = vpop.f32.mrf.mxu0 }
 0x4f5   :  { %11741 = vmatmul.mubr.msk.f32.gmra.mxu0 %vm491_vm1, %v9148_v3 }
 0x4f6   :  { %11743 = vmatprep.mubr.msk.f32.mxu0 %vm12694_vm0, %v12693_v2  ;;  %v15130_v17 = vpop.f32.mrf.mxu1 }
 0x4f7   :  { %v15135_v6 = vpop.f32.mrf.mxu0 }
 0x4f8   :  { %v11004_v43 = vpop.f32.mrf.mxu1 }
 0x4f9   :  { %11744 = vmatmul.mubr.msk.f32.gmra.mxu0 %vm491_vm1, %v9149_v45  ;;  %v11412_v44 = vpop.f32.mrf.mxu0  ;;  %v9189_v45 = vld [vmem:[%s17922_s4 + $0x388] sm:$0xff] }
 0x4fa   :  { %11809 = vmatprep.mubr.msk.f32.mxu0 %vm12694_vm0, %v12693_v2 }
 0x4fc   :  { %v15143_v26 = vpop.f32.mrf.mxu1  ;;  %v15145_v48 = vpop.f32.mrf.mxu0 }
 0x4fd   :  { %11810 = vmatmul.mubr.msk.f32.vlgmr.msra.gmra.mxu0 %vm491_vm1, %v9180_v27  ;;  %v2681_v27 = vld [vmem:[%s17923_s5 + $0x18] sm:$0xff] }
 0x4fe   :  { %11896 = vmatpush3.msra.mxu0 %v14507_v63  ;;  %v11007_v50 = vpop.f32.mrf.mxu1  ;;  %11812 = vmatprep.mubr.msk.f32.mxu0 %vm12694_vm0, %v12693_v2  ;;  %v11415_v33 = vpop.f32.mrf.mxu0 }
 0x4ff   :  { %11897 = vmatprep.subr.mxu0 %v12693_v2  ;;  %v9190_v33 = vld [vmem:[%s17922_s4 + $0x390] sm:$0xff] }
 0x500   :  { %11898 = vmatpush3.msra.mxu0 %v14509_v35  ;;  %v15156_v15 = vpop.f32.mrf.mxu1  ;;  %v15158_v53 = vpop.f32.mrf.mxu0 }
 0x501   :  { %11899 = vmatprep.subr.mxu0 %v12693_v2  ;;  %11813 = vmatmul.mubr.msk.f32.gmra.mxu0 %vm491_vm1, %v9181_v32 }
 0x502   :  { %11900 = vmatpush3.msra.mxu0 %v14516_v16  ;;  %v11010_v19 = vpop.f32.mrf.mxu1  ;;  %11815 = vmatprep.mubr.msk.f32.mxu0 %vm12694_vm0, %v12693_v2  ;;  %v11418_v29 = vpop.f32.mrf.mxu0 }
 0x503   :  { %11901 = vmatprep.subr.mxu0 %v12693_v2  ;;  %v2680_v29 = vld [vmem:[%s17923_s5 + $0x10] sm:$0xff] }
 0x504   :  { %11902 = vmatpush3.msra.mxu0 %v14523_v12  ;;  %v15170_v5 = vpop.f32.mrf.mxu1  ;;  %v15172_v34 = vpop.f32.mrf.mxu0 }
 0x505   :  { %11903 = vmatprep.subr.mxu0 %v12693_v2  ;;  %11816 = vmatmul.mubr.msk.f32.gmra.mxu0 %vm491_vm1, %v9182_v41 }
 0x506   :  { %11904 = vmatpush3.msra.mxu0 %v14530_v0  ;;  %v11013_v61 = vpop.f32.mrf.mxu1  ;;  %11818 = vmatprep.mubr.msk.f32.mxu0 %vm12694_vm0, %v12693_v2  ;;  %v11421_v10 = vpop.f32.mrf.mxu0 }
 0x507   :  { %11905 = vmatprep.subr.mxu0 %v12693_v2  ;;  %v9191_v10 = vld [vmem:[%s17922_s4 + $0x398] sm:$0xff] }
 0x508   :  { %11906 = vmatpush3.msra.mxu0 %v14536_v46  ;;  %v15184_v21 = vpop.f32.mrf.mxu1  ;;  %v15186_v36 = vpop.f32.mrf.mxu0 }
 0x509   :  { %11907 = vmatprep.subr.mxu0 %v12693_v2  ;;  %11819 = vmatmul.mubr.msk.f32.gmra.mxu0 %vm491_vm1, %v9183_v4 }
 0x50a   :  { %11908 = vmatpush3.msra.mxu0 %v14543_v1  ;;  %v11016_v13 = vpop.f32.mrf.mxu1  ;;  %11821 = vmatprep.mubr.msk.f32.mxu0 %vm12694_vm0, %v12693_v2  ;;  %v11424_v39 = vpop.f32.mrf.mxu0 }
 0x50b   :  { %11909 = vmatprep.subr.mxu0 %v12693_v2  ;;  %v2679_v39 = vld [vmem:[%s17923_s5 + $0x8] sm:$0xff] }
 0x50c   :  { %11910 = vmatpush3.msra.mxu0 %v14550_v31  ;;  %v15198_v20 = vpop.f32.mrf.mxu1  ;;  %v15200_v9 = vpop.f32.mrf.mxu0 }
 0x50d   :  { %11822 = vmatmul.mubr.msk.f32.gmra.mxu0 %vm491_vm1, %v9184_v42  ;;  %11997 = vmatprep.subr.mxu0 %v12693_v2 }
 0x50e   :  { %v11019_v49 = vpop.f32.mrf.mxu1  ;;  %11824 = vmatprep.mubr.msk.f32.mxu0 %vm12694_vm0, %v12693_v2  ;;  %v11427_v25 = vpop.f32.mrf.mxu0 }
 0x50f   :  { %v9192_v25 = vld [vmem:[%s17922_s4 + $0x3a0] sm:$0xf] }
 0x510   :  { %v15209_v54 = vpop.f32.mrf.mxu1  ;;  %v15211_v22 = vpop.f32.mrf.mxu0 }
 0x511   :  { %11825 = vmatmul.mubr.msk.f32.gmra.mxu0 %vm491_vm1, %v9185_v47 }
 0x512   :  { %v11022_v14 = vpop.f32.mrf.mxu1  ;;  %11827 = vmatprep.mubr.msk.f32.mxu0 %vm12694_vm0, %v12693_v2  ;;  %v11430_v8 = vpop.f32.mrf.mxu0 }
 0x513   :  { %v2678_v8 = vld [vmem:[%s17923_s5] sm:$0xff] }
 0x514   :  { %v15219_v62 = vpop.f32.mrf.mxu1  ;;  %v15221_v57 = vpop.f32.mrf.mxu0 }
 0x515   :  { %11828 = vmatmul.mubr.msk.f32.gmra.mxu0 %vm491_vm1, %v9186_v18 }
 0x516   :  { %v11025_v7 = vpop.f32.mrf.mxu1  ;;  %11830 = vmatprep.mubr.msk.f32.mxu0 %vm12694_vm0, %v12693_v2  ;;  %v11433_v37 = vpop.f32.mrf.mxu0 }
 0x517   :  { %v9223_v37 = vld [vmem:[%s17922_s4 + $0x3a8] sm:$0xff] }
 0x518   :  { %v15229_v11 = vpop.f32.mrf.mxu1  ;;  %v15231_v59 = vpop.f32.mrf.mxu0 }
 0x519   :  { %11831 = vmatmul.mubr.msk.f32.gmra.mxu0 %vm491_vm1, %v9187_v30 }
 0x51a   :  { %v11028_v56 = vpop.f32.mrf.mxu1  ;;  %11833 = vmatprep.mubr.msk.f32.mxu0 %vm12694_vm0, %v12693_v2  ;;  %v11436_v28 = vpop.f32.mrf.mxu0 }
 0x51c   :  { %v15239_v3 = vpop.f32.mrf.mxu1  ;;  %v15241_v58 = vpop.f32.mrf.mxu0 }
 0x51d   :  { %11834 = vmatmul.mubr.msk.f32.gmra.mxu0 %vm491_vm1, %v9188_v40 }
 0x51e   :  { %v11031_v51 = vpop.f32.mrf.mxu1  ;;  %11836 = vmatprep.mubr.msk.f32.mxu0 %vm12694_vm0, %v12693_v2  ;;  %v11439_v43 = vpop.f32.mrf.mxu0 }
 0x520   :  { %v2801_v44 = vpop.f32.mrf.mxu1  ;;  %v15252_v50 = vpop.f32.mrf.mxu0 }
 0x521   :  { %11837 = vmatmul.mubr.msk.f32.gmra.mxu0 %vm491_vm1, %v9189_v45  ;;  %11096 = vmatmul.mubr.msk.f32.vlgmr.msra.gmra.mxu1 %vm2870_vm4, %v2801_v44  ;;  %v9224_v45 = vld [vmem:[%s17922_s4 + $0x3b0] sm:$0xff] }
 0x522   :  { %v11050_v32 = vpop.f32.mrf.mxu1  ;;  %11839 = vmatprep.mubr.msk.f32.mxu0 %vm12694_vm0, %v12693_v2  ;;  %11098 = vmatprep.mubr.msk.f32.mxu1 %vm12694_vm0, %v12693_v2  ;;  %v11505_v19 = vpop.f32.mrf.mxu0 }
 0x523   :  { %11135 = vmatpush3.msra.mxu1 %v2681_v27 }
 0x524   :  { %v2806_v41 = vpop.f32.mrf.mxu1  ;;  %11136 = vmatprep.subr.mxu1 %v12693_v2 }
 0x525   :  { %11840 = vmatmul.mubr.msk.f32.gmra.mxu0 %vm491_vm1, %v9190_v33  ;;  %11099 = vmatmul.mubr.msk.f32.gmra.mxu1 %vm2870_vm4, %v2806_v41  ;;  %v15269_v61 = vpop.f32.mrf.mxu0  ;;  %v9225_v33 = vld [vmem:[%s17922_s4 + $0x3b8] sm:$0xff] }
 0x526   :  { %v11053_v4 = vpop.f32.mrf.mxu1  ;;  %11842 = vmatprep.mubr.msk.f32.mxu0 %vm12694_vm0, %v12693_v2  ;;  %11101 = vmatprep.mubr.msk.f32.mxu1 %vm12694_vm0, %v12693_v2 }
 0x527   :  { %v11508_v13 = vpop.f32.mrf.mxu0  ;;  %11137 = vmatpush3.msra.mxu1 %v2680_v29 }
 0x528   :  { %v2811_v42 = vpop.f32.mrf.mxu1  ;;  %11138 = vmatprep.subr.mxu1 %v12693_v2 }
 0x529   :  { %11843 = vmatmul.mubr.msk.f32.gmra.mxu0 %vm491_vm1, %v9191_v10  ;;  %11102 = vmatmul.mubr.msk.f32.gmra.mxu1 %vm2870_vm4, %v2811_v42  ;;  %v15284_v49 = vpop.f32.mrf.mxu0  ;;  %v9226_v10 = vld [vmem:[%s17922_s4 + $0x3c0] sm:$0xff] }
 0x52a   :  { %v11056_v47 = vpop.f32.mrf.mxu1  ;;  %11845 = vmatprep.mubr.msk.f32.mxu0 %vm12694_vm0, %v12693_v2  ;;  %11104 = vmatprep.mubr.msk.f32.mxu1 %vm12694_vm0, %v12693_v2 }
 0x52b   :  { %v11511_v14 = vpop.f32.mrf.mxu0  ;;  %11139 = vmatpush3.msra.mxu1 %v2679_v39 }
 0x52c   :  { %v2816_v18 = vpop.f32.mrf.mxu1  ;;  %11140 = vmatprep.subr.mxu1 %v12693_v2 }
 0x52d   :  { %11846 = vmatmul.mubr.msk.f32.gmra.mxu0 %vm491_vm1, %v9192_v25  ;;  %11105 = vmatmul.mubr.msk.f32.gmra.mxu1 %vm2870_vm4, %v2816_v18  ;;  %v15299_v7 = vpop.f32.mrf.mxu0  ;;  %v9227_v25 = vld [vmem:[%s17922_s4 + $0x3c8] sm:$0xff] }
 0x52e   :  { %v11059_v30 = vpop.f32.mrf.mxu1  ;;  %11911 = vmatprep.mubr.msk.f32.mxu0 %vm12694_vm0, %v12693_v2  ;;  %11107 = vmatprep.mubr.msk.f32.mxu1 %vm12694_vm0, %v12693_v2 }
 0x52f   :  { %v11514_v56 = vpop.f32.mrf.mxu0  ;;  %11141 = vmatpush3.msra.mxu1 %v2678_v8 }
 0x530   :  { %v2821_v40 = vpop.f32.mrf.mxu1  ;;  %11181 = vmatprep.subr.mxu1 %v12693_v2 }
 0x531   :  { %11912 = vmatmul.mubr.msk.f32.vlgmr.msra.gmra.mxu0 %vm491_vm1, %v9223_v37  ;;  %11108 = vmatmul.mubr.msk.f32.gmra.mxu1 %vm2870_vm4, %v2821_v40  ;;  %v15311_v28 = vpop.f32.mrf.mxu0  ;;  %v9228_v37 = vld [vmem:[%s17922_s4 + $0x3d0] sm:$0xff] }
 0x532   :  { %11998 = vmatpush3.msra.mxu0 %v14507_v63  ;;  %v11062_v51 = vpop.f32.mrf.mxu1  ;;  %11914 = vmatprep.mubr.msk.f32.mxu0 %vm12694_vm0, %v12693_v2 }
 0x533   :  { %11999 = vmatprep.subr.mxu0 %v12693_v2  ;;  %11110 = vmatprep.mubr.msk.f32.mxu1 %vm12694_vm0, %v12693_v2  ;;  %v11517_v43 = vpop.f32.mrf.mxu0 }
 0x534   :  { %12000 = vmatpush3.msra.mxu0 %v14509_v35  ;;  %v2826_v44 = vpop.f32.mrf.mxu1  ;;  %v9229_v43 = vld [vmem:[%s17922_s4 + $0x3d8] sm:$0xff] }
 0x535   :  { %12001 = vmatprep.subr.mxu0 %v12693_v2  ;;  %11915 = vmatmul.mubr.msk.f32.gmra.mxu0 %vm491_vm1, %v9224_v45  ;;  %v15325_v27 = vpop.f32.mrf.mxu0 }
 0x536   :  { %12002 = vmatpush3.msra.mxu0 %v14516_v16  ;;  %11111 = vmatmul.mubr.msk.f32.gmra.mxu1 %vm2870_vm4, %v2826_v44  ;;  %v11065_v32 = vpop.f32.mrf.mxu1 }
 0x537   :  { %12003 = vmatprep.subr.mxu0 %v12693_v2  ;;  %11917 = vmatprep.mubr.msk.f32.mxu0 %vm12694_vm0, %v12693_v2  ;;  %v11520_v19 = vpop.f32.mrf.mxu0 }
 0x538   :  { %12004 = vmatpush3.msra.mxu0 %v14523_v12  ;;  %v2831_v41 = vpop.f32.mrf.mxu1  ;;  %11113 = vmatprep.mubr.msk.f32.mxu1 %vm12694_vm0, %v12693_v2 }
 0x539   :  { %12005 = vmatprep.subr.mxu0 %v12693_v2  ;;  %11918 = vmatmul.mubr.msk.f32.gmra.mxu0 %vm491_vm1, %v9225_v33  ;;  %v15340_v29 = vpop.f32.mrf.mxu0 }
 0x53a   :  { %12006 = vmatpush3.msra.mxu0 %v14530_v0  ;;  %11114 = vmatmul.mubr.msk.f32.gmra.mxu1 %vm2870_vm4, %v2831_v41  ;;  %v11068_v4 = vpop.f32.mrf.mxu1  ;;  %v9230_v41 = vld [vmem:[%s17922_s4 + $0x3e0] sm:$0xff] }
 0x53b   :  { %12007 = vmatprep.subr.mxu0 %v12693_v2  ;;  %11920 = vmatprep.mubr.msk.f32.mxu0 %vm12694_vm0, %v12693_v2  ;;  %v11523_v13 = vpop.f32.mrf.mxu0 }
 0x53c   :  { %12008 = vmatpush3.msra.mxu0 %v14536_v46  ;;  %v2836_v42 = vpop.f32.mrf.mxu1  ;;  %11116 = vmatprep.mubr.msk.f32.mxu1 %vm12694_vm0, %v12693_v2 }
 0x53d   :  { %12009 = vmatprep.subr.mxu0 %v12693_v2  ;;  %11921 = vmatmul.mubr.msk.f32.gmra.mxu0 %vm491_vm1, %v9226_v10  ;;  %v15355_v39 = vpop.f32.mrf.mxu0 }
 0x53e   :  { %12010 = vmatpush3.msra.mxu0 %v14543_v1  ;;  %11117 = vmatmul.mubr.msk.f32.gmra.mxu1 %vm2870_vm4, %v2836_v42  ;;  %v11071_v47 = vpop.f32.mrf.mxu1 }
 0x53f   :  { %12011 = vmatprep.subr.mxu0 %v12693_v2  ;;  %11923 = vmatprep.mubr.msk.f32.mxu0 %vm12694_vm0, %v12693_v2  ;;  %v11526_v14 = vpop.f32.mrf.mxu0  ;;  %v9231_v47 = vld [vmem:[%s17922_s4 + $0x3e8] sm:$0xff] }
 0x540   :  { %12012 = vmatpush3.msra.mxu0 %v14550_v31  ;;  %v2841_v18 = vpop.f32.mrf.mxu1  ;;  %11119 = vmatprep.mubr.msk.f32.mxu1 %vm12694_vm0, %v12693_v2 }
 0x541   :  { %11924 = vmatmul.mubr.msk.f32.gmra.mxu0 %vm491_vm1, %v9227_v25  ;;  %v15369_v8 = vpop.f32.mrf.mxu0  ;;  %12099 = vmatprep.subr.mxu0 %v12693_v2 }
 0x542   :  { %11120 = vmatmul.mubr.msk.f32.gmra.mxu1 %vm2870_vm4, %v2841_v18  ;;  %v11074_v30 = vpop.f32.mrf.mxu1  ;;  %11926 = vmatprep.mubr.msk.f32.mxu0 %vm12694_vm0, %v12693_v2 }
 0x543   :  { %11122 = vmatprep.mubr.msk.f32.mxu1 %vm12694_vm0, %v12693_v2  ;;  %v11529_v56 = vpop.f32.mrf.mxu0 }
 0x544   :  { %v2846_v40 = vpop.f32.mrf.mxu1 }
 0x545   :  { %11927 = vmatmul.mubr.msk.f32.gmra.mxu0 %vm491_vm1, %v9228_v37  ;;  %v15381_v51 = vpop.f32.mrf.mxu0  ;;  %v9232_v37 = vld [vmem:[%s17922_s4 + $0x3f0] sm:$0xff] }
 0x546   :  { %11123 = vmatmul.mubr.msk.f32.gmra.mxu1 %vm2870_vm4, %v2846_v40  ;;  %v11077_v45 = vpop.f32.mrf.mxu1  ;;  %11929 = vmatprep.mubr.msk.f32.mxu0 %vm12694_vm0, %v12693_v2 }
 0x547   :  { %11125 = vmatprep.mubr.msk.f32.mxu1 %vm12694_vm0, %v12693_v2  ;;  %v11532_v44 = vpop.f32.mrf.mxu0  ;;  %v9233_v45 = vld [vmem:[%s17922_s4 + $0x3f8] sm:$0xff] }
 0x548   :  { %v2851_v32 = vpop.f32.mrf.mxu1  ;;  %v9234_v44 = vld [vmem:[%s17922_s4 + $0x400] sm:$0xff] }
 0x549   :  { %11930 = vmatmul.mubr.msk.f32.gmra.mxu0 %vm491_vm1, %v9229_v43  ;;  %v15392_v33 = vpop.f32.mrf.mxu0 }
 0x54a   :  { %11126 = vmatmul.mubr.msk.f32.gmra.mxu1 %vm2870_vm4, %v2851_v32  ;;  %v11080_v19 = vpop.f32.mrf.mxu1  ;;  %11932 = vmatprep.mubr.msk.f32.mxu0 %vm12694_vm0, %v12693_v2 }
 0x54b   :  { %11128 = vmatprep.mubr.msk.f32.mxu1 %vm12694_vm0, %v12693_v2  ;;  %v11535_v4 = vpop.f32.mrf.mxu0  ;;  %v9235_v19 = vld [vmem:[%s17922_s4 + $0x408] sm:$0xf] }
 0x54c   :  { %v2856_v10 = vpop.f32.mrf.mxu1  ;;  %v9266_v4 = vld [vmem:[%s17922_s4 + $0x410] sm:$0xff] }
 0x54d   :  { %11933 = vmatmul.mubr.msk.f32.gmra.mxu0 %vm491_vm1, %v9230_v41  ;;  %v15403_v13 = vpop.f32.mrf.mxu0 }
 0x54e   :  { %11129 = vmatmul.mubr.msk.f32.gmra.mxu1 %vm2870_vm4, %v2856_v10  ;;  %v11083_v42 = vpop.f32.mrf.mxu1  ;;  %11935 = vmatprep.mubr.msk.f32.mxu0 %vm12694_vm0, %v12693_v2 }
 0x54f   :  { %11131 = vmatprep.mubr.msk.f32.mxu1 %vm12694_vm0, %v12693_v2  ;;  %v11538_v25 = vpop.f32.mrf.mxu0  ;;  %v9267_v42 = vld [vmem:[%s17922_s4 + $0x418] sm:$0xff] }
 0x550   :  { %v2861_v14 = vpop.f32.mrf.mxu1  ;;  %v9268_v25 = vld [vmem:[%s17922_s4 + $0x420] sm:$0xff] }
 0x551   :  { %11936 = vmatmul.mubr.msk.f32.gmra.mxu0 %vm491_vm1, %v9231_v47  ;;  %v15414_v18 = vpop.f32.mrf.mxu0 }
 0x552   :  { %11132 = vmatmul.mubr.msk.f32.gmra.mxu1 %vm2870_vm4, %v2861_v14  ;;  %v11086_v30 = vpop.f32.mrf.mxu1  ;;  %11938 = vmatprep.mubr.msk.f32.mxu0 %vm12694_vm0, %v12693_v2 }
 0x553   :  { %11142 = vmatprep.mubr.msk.f32.mxu1 %vm12694_vm0, %v12693_v2  ;;  %v11541_v56 = vpop.f32.mrf.mxu0  ;;  %v9269_v30 = vld [vmem:[%s17922_s4 + $0x428] sm:$0xff] }
 0x554   :  { %v9270_v56 = vld [vmem:[%s17922_s4 + $0x430] sm:$0xff] }
 0x555   :  { %11939 = vmatmul.mubr.msk.f32.gmra.mxu0 %vm491_vm1, %v9232_v37  ;;  %v15425_v40 = vpop.f32.mrf.mxu0 }
 0x556   :  { %11143 = vmatmul.mubr.msk.f32.vlgmr.msra.gmra.mxu1 %vm2870_vm4, %v15091_v38  ;;  %11941 = vmatprep.mubr.msk.f32.mxu0 %vm12694_vm0, %v12693_v2 }
 0x557   :  { %11182 = vmatpush3.msra.mxu1 %v14507_v63  ;;  %11145 = vmatprep.mubr.msk.f32.mxu1 %vm12694_vm0, %v12693_v2  ;;  %v11607_v43 = vpop.f32.mrf.mxu0 }
 0x558   :  { %11183 = vmatprep.subr.mxu1 %v12693_v2 }
 0x559   :  { %11184 = vmatpush3.msra.mxu1 %v14509_v35  ;;  %11942 = vmatmul.mubr.msk.f32.gmra.mxu0 %vm491_vm1, %v9233_v45  ;;  %v15440_v38 = vpop.f32.mrf.mxu0 }
 0x55a   :  { %11185 = vmatprep.subr.mxu1 %v12693_v2  ;;  %11146 = vmatmul.mubr.msk.f32.gmra.mxu1 %vm2870_vm4, %v15107_v24 }
 0x55b   :  { %11186 = vmatpush3.msra.mxu1 %v14516_v16  ;;  %11944 = vmatprep.mubr.msk.f32.mxu0 %vm12694_vm0, %v12693_v2  ;;  %v11610_v32 = vpop.f32.mrf.mxu0 }
 0x55c   :  { %11187 = vmatprep.subr.mxu1 %v12693_v2  ;;  %11148 = vmatprep.mubr.msk.f32.mxu1 %vm12694_vm0, %v12693_v2 }
 0x55d   :  { %11188 = vmatpush3.msra.mxu1 %v14523_v12  ;;  %11945 = vmatmul.mubr.msk.f32.gmra.mxu0 %vm491_vm1, %v9234_v44  ;;  %v15456_v24 = vpop.f32.mrf.mxu0 }
 0x55e   :  { %11189 = vmatprep.subr.mxu1 %v12693_v2  ;;  %11149 = vmatmul.mubr.msk.f32.gmra.mxu1 %vm2870_vm4, %v15117_v55 }
 0x55f   :  { %11190 = vmatpush3.msra.mxu1 %v14530_v0  ;;  %11947 = vmatprep.mubr.msk.f32.mxu0 %vm12694_vm0, %v12693_v2  ;;  %v11613_v41 = vpop.f32.mrf.mxu0 }
 0x560   :  { %11191 = vmatprep.subr.mxu1 %v12693_v2  ;;  %11151 = vmatprep.mubr.msk.f32.mxu1 %vm12694_vm0, %v12693_v2 }
 0x561   :  { %11192 = vmatpush3.msra.mxu1 %v14536_v46  ;;  %11948 = vmatmul.mubr.msk.f32.gmra.mxu0 %vm491_vm1, %v9235_v19  ;;  %v15472_v55 = vpop.f32.mrf.mxu0 }
 0x562   :  { %11193 = vmatprep.subr.mxu1 %v12693_v2  ;;  %11152 = vmatmul.mubr.msk.f32.gmra.mxu1 %vm2870_vm4, %v15130_v17 }
 0x563   :  { %11194 = vmatpush3.msra.mxu1 %v14543_v1  ;;  %12013 = vmatprep.mubr.msk.f32.mxu0 %vm12694_vm0, %v12693_v2  ;;  %v11616_v10 = vpop.f32.mrf.mxu0 }
 0x564   :  { %11195 = vmatprep.subr.mxu1 %v12693_v2  ;;  %11154 = vmatprep.mubr.msk.f32.mxu1 %vm12694_vm0, %v12693_v2 }
 0x565   :  { %11196 = vmatpush3.msra.mxu1 %v14550_v31  ;;  %12014 = vmatmul.mubr.msk.f32.vlgmr.msra.gmra.mxu0 %vm491_vm1, %v9266_v4  ;;  %v15488_v17 = vpop.f32.mrf.mxu0 }
 0x566   :  { %12100 = vmatpush3.msra.mxu0 %v14507_v63  ;;  %11155 = vmatmul.mubr.msk.f32.gmra.mxu1 %vm2870_vm4, %v15143_v26 }
 0x567   :  { %12101 = vmatprep.subr.mxu0 %v12693_v2  ;;  %12016 = vmatprep.mubr.msk.f32.mxu0 %vm12694_vm0, %v12693_v2  ;;  %v11619_v47 = vpop.f32.mrf.mxu0 }
 0x568   :  { %12102 = vmatpush3.msra.mxu0 %v14509_v35  ;;  %11157 = vmatprep.mubr.msk.f32.mxu1 %vm12694_vm0, %v12693_v2 }
 0x569   :  { %12103 = vmatprep.subr.mxu0 %v12693_v2  ;;  %12017 = vmatmul.mubr.msk.f32.gmra.mxu0 %vm491_vm1, %v9267_v42  ;;  %v15504_v26 = vpop.f32.mrf.mxu0 }
 0x56a   :  { %12104 = vmatpush3.msra.mxu0 %v14516_v16  ;;  %11158 = vmatmul.mubr.msk.f32.gmra.mxu1 %vm2870_vm4, %v15156_v15 }
 0x56b   :  { %12105 = vmatprep.subr.mxu0 %v12693_v2  ;;  %12019 = vmatprep.mubr.msk.f32.mxu0 %vm12694_vm0, %v12693_v2  ;;  %v11622_v14 = vpop.f32.mrf.mxu0 }
 0x56c   :  { %12106 = vmatpush3.msra.mxu0 %v14523_v12  ;;  %11160 = vmatprep.mubr.msk.f32.mxu1 %vm12694_vm0, %v12693_v2 }
 0x56d   :  { %12107 = vmatprep.subr.mxu0 %v12693_v2  ;;  %12020 = vmatmul.mubr.msk.f32.gmra.mxu0 %vm491_vm1, %v9268_v25  ;;  %v15520_v15 = vpop.f32.mrf.mxu0  ;;  %v8922_v25 = vld [vmem:[%s17922_s4 + $0xd0] sm:$0xff] }
 0x56e   :  { %12108 = vmatpush3.msra.mxu0 %v14530_v0  ;;  %11161 = vmatmul.mubr.msk.f32.gmra.mxu1 %vm2870_vm4, %v15170_v5 }
 0x56f   :  { %12109 = vmatprep.subr.mxu0 %v12693_v2  ;;  %12022 = vmatprep.mubr.msk.f32.mxu0 %vm12694_vm0, %v12693_v2  ;;  %v11625_v37 = vpop.f32.mrf.mxu0 }
 0x570   :  { %12110 = vmatpush3.msra.mxu0 %v14536_v46  ;;  %11163 = vmatprep.mubr.msk.f32.mxu1 %vm12694_vm0, %v12693_v2  ;;  %v8923_v37 = vld [vmem:[%s17922_s4 + $0xd8] sm:$0xff] }
 0x571   :  { %12111 = vmatprep.subr.mxu0 %v12693_v2  ;;  %12023 = vmatmul.mubr.msk.f32.gmra.mxu0 %vm491_vm1, %v9269_v30  ;;  %v15536_v5 = vpop.f32.mrf.mxu0 }
 0x572   :  { %17930 = vst [vmem:[#allocation9_spill] sm:$0xff] %v15536_v5  ;;  %12112 = vmatpush3.msra.mxu0 %v14543_v1  ;;  %11164 = vmatmul.mubr.msk.f32.gmra.mxu1 %vm2870_vm4, %v15184_v21  ;;  %v9271_v21 = vld [vmem:[%s17922_s4 + $0x438] sm:$0xff] }
 0x573   :  { %12113 = vmatprep.subr.mxu0 %v12693_v2  ;;  %12025 = vmatprep.mubr.msk.f32.mxu0 %vm12694_vm0, %v12693_v2  ;;  %v11628_v45 = vpop.f32.mrf.mxu0 }
 0x574   :  { %12114 = vmatpush3.msra.mxu0 %v14550_v31  ;;  %11166 = vmatprep.mubr.msk.f32.mxu1 %vm12694_vm0, %v12693_v2 }
 0x575   :  { %12026 = vmatmul.mubr.msk.f32.gmra.mxu0 %vm491_vm1, %v9270_v56  ;;  %v15551_v43 = vpop.f32.mrf.mxu0  ;;  %12201 = vmatprep.subr.mxu0 %v12693_v2 }
 0x576   :  { %17931 = vst [vmem:[#allocation10_spill] sm:$0xff] %v15551_v43  ;;  %11167 = vmatmul.mubr.msk.f32.gmra.mxu1 %vm2870_vm4, %v15198_v20  ;;  %12028 = vmatprep.mubr.msk.f32.mxu0 %vm12694_vm0, %v12693_v2  ;;  %v9272_v20 = vld [vmem:[%s17922_s4 + $0x440] sm:$0xff] }
 0x577   :  { %11169 = vmatprep.mubr.msk.f32.mxu1 %vm12694_vm0, %v12693_v2  ;;  %v11631_v44 = vpop.f32.mrf.mxu0  ;;  %11236 = vmatprep.subr.mxu1 %v12693_v2 }
 0x578   :  { %v8924_v44 = vld [vmem:[%s17922_s4 + $0xe0] sm:$0xff] }
 0x579   :  { %12029 = vmatmul.mubr.msk.f32.gmra.mxu0 %vm491_vm1, %v9271_v21  ;;  %v15565_v32 = vpop.f32.mrf.mxu0  ;;  %v9277_v21 = vld [vmem:[%s17922_s4 + $0x468] sm:$0xff] }
 0x57a   :  { %17932 = vst [vmem:[#allocation11_spill] sm:$0xff] %v15565_v32  ;;  %11170 = vmatmul.mubr.msk.f32.gmra.mxu1 %vm2870_vm4, %v15209_v54  ;;  %12031 = vmatprep.mubr.msk.f32.mxu0 %vm12694_vm0, %v12693_v2  ;;  %v9273_v54 = vld [vmem:[%s17922_s4 + $0x448] sm:$0xff] }
 0x57b   :  { %11172 = vmatprep.mubr.msk.f32.mxu1 %vm12694_vm0, %v12693_v2  ;;  %v11634_v19 = vpop.f32.mrf.mxu0 }
 0x57d   :  { %12032 = vmatmul.mubr.msk.f32.gmra.mxu0 %vm491_vm1, %v9272_v20  ;;  %v15577_v41 = vpop.f32.mrf.mxu0 }
 0x57e   :  { %17933 = vst [vmem:[#allocation12_spill] sm:$0xff] %v15577_v41  ;;  %11173 = vmatmul.mubr.msk.f32.gmra.mxu1 %vm2870_vm4, %v15219_v62  ;;  %12034 = vmatprep.mubr.msk.f32.mxu0 %vm12694_vm0, %v12693_v2  ;;  %v9274_v62 = vld [vmem:[%s17922_s4 + $0x450] sm:$0xff] }
 0x57f   :  { %11175 = vmatprep.mubr.msk.f32.mxu1 %vm12694_vm0, %v12693_v2  ;;  %v11637_v4 = vpop.f32.mrf.mxu0 }
 0x580   :  { %v8925_v4 = vld [vmem:[%s17922_s4 + $0xe8] sm:$0xff] }
 0x581   :  { %12035 = vmatmul.mubr.msk.f32.gmra.mxu0 %vm491_vm1, %v9273_v54  ;;  %v15589_v10 = vpop.f32.mrf.mxu0  ;;  %v9278_v54 = vld [vmem:[%s17922_s4 + $0x470] sm:$0xf] }
 0x582   :  { %17934 = vst [vmem:[#allocation13_spill] sm:$0xff] %v15589_v10  ;;  %11176 = vmatmul.mubr.msk.f32.gmra.mxu1 %vm2870_vm4, %v15229_v11  ;;  %12037 = vmatprep.mubr.msk.f32.mxu0 %vm12694_vm0, %v12693_v2  ;;  %v9275_v11 = vld [vmem:[%s17922_s4 + $0x458] sm:$0xff]  ;;  %v9400_v10 = vld [vmem:[%s17922_s4 + $0x570] sm:$0xff] }
 0x583   :  { %11178 = vmatprep.mubr.msk.f32.mxu1 %vm12694_vm0, %v12693_v2  ;;  %v11640_v42 = vpop.f32.mrf.mxu0 }
 0x585   :  { %12038 = vmatmul.mubr.msk.f32.gmra.mxu0 %vm491_vm1, %v9274_v62  ;;  %v15601_v47 = vpop.f32.mrf.mxu0 }
 0x586   :  { %17935 = vst [vmem:[#allocation14_spill] sm:$0xff] %v15601_v47  ;;  %11179 = vmatmul.mubr.msk.f32.gmra.mxu1 %vm2870_vm4, %v15239_v3  ;;  %12040 = vmatprep.mubr.msk.f32.mxu0 %vm12694_vm0, %v12693_v2  ;;  %v9276_v3 = vld [vmem:[%s17922_s4 + $0x460] sm:$0xff] }
 0x587   :  { %11197 = vmatprep.mubr.msk.f32.mxu1 %vm12694_vm0, %v12693_v2  ;;  %v11643_v14 = vpop.f32.mrf.mxu0 }
 0x589   :  { %12041 = vmatmul.mubr.msk.f32.gmra.mxu0 %vm491_vm1, %v9275_v11  ;;  %v15616_v30 = vpop.f32.mrf.mxu0  ;;  %v9309_v11 = vld [vmem:[%s17922_s4 + $0x478] sm:$0xff] }
 0x58a   :  { %17936 = vst [vmem:[#allocation15_spill] sm:$0xff] %v15616_v30  ;;  %11198 = vmatmul.mubr.msk.f32.vlgmr.msra.gmra.mxu1 %vm491_vm1, %v8922_v25  ;;  %12043 = vmatprep.mubr.msk.f32.mxu0 %vm12694_vm0, %v12693_v2  ;;  %v8926_v25 = vld [vmem:[%s17922_s4 + $0xf0] sm:$0xff] }
 0x58b   :  { %11200 = vmatprep.mubr.msk.f32.mxu1 %vm12694_vm0, %v12693_v2  ;;  %v11709_v56 = vpop.f32.mrf.mxu0 }
 0x58c   :  { %v8927_v56 = vld [vmem:[%s17922_s4 + $0xf8] sm:$0xff] }
 0x58d   :  { %12044 = vmatmul.mubr.msk.f32.gmra.mxu0 %vm491_vm1, %v9276_v3  ;;  %v15630_v45 = vpop.f32.mrf.mxu0 }
 0x58e   :  { %17937 = vst [vmem:[#allocation16_spill] sm:$0xff] %v15630_v45  ;;  %11201 = vmatmul.mubr.msk.f32.gmra.mxu1 %vm491_vm1, %v8923_v37  ;;  %12046 = vmatprep.mubr.msk.f32.mxu0 %vm12694_vm0, %v12693_v2  ;;  %v9310_v37 = vld [vmem:[%s17922_s4 + $0x480] sm:$0xff] }
 0x58f   :  { %11203 = vmatprep.mubr.msk.f32.mxu1 %vm12694_vm0, %v12693_v2  ;;  %v11712_v20 = vpop.f32.mrf.mxu0 }
 0x590   :  { %v9311_v20 = vld [vmem:[%s17922_s4 + $0x488] sm:$0xff] }
 0x591   :  { %12047 = vmatmul.mubr.msk.f32.gmra.mxu0 %vm491_vm1, %v9277_v21  ;;  %v15644_v19 = vpop.f32.mrf.mxu0 }
 0x592   :  { %17938 = vst [vmem:[#allocation17_spill] sm:$0xff] %v15644_v19  ;;  %11204 = vmatmul.mubr.msk.f32.gmra.mxu1 %vm491_vm1, %v8924_v44  ;;  %12049 = vmatprep.mubr.msk.f32.mxu0 %vm12694_vm0, %v12693_v2 }
 0x593   :  { %11206 = vmatprep.mubr.msk.f32.mxu1 %vm12694_vm0, %v12693_v2  ;;  %v11715_v62 = vpop.f32.mrf.mxu0 }
 0x595   :  { %12050 = vmatmul.mubr.msk.f32.gmra.mxu0 %vm491_vm1, %v9278_v54  ;;  %v15658_v42 = vpop.f32.mrf.mxu0  ;;  %v8928_v54 = vld [vmem:[%s17922_s4 + $0x100] sm:$0xff] }
 0x596   :  { %17939 = vst [vmem:[#allocation18_spill] sm:$0xff] %v15658_v42  ;;  %11207 = vmatmul.mubr.msk.f32.gmra.mxu1 %vm491_vm1, %v8925_v4  ;;  %12115 = vmatprep.mubr.msk.f32.mxu0 %vm12694_vm0, %v12693_v2 }
 0x597   :  { %11209 = vmatprep.mubr.msk.f32.mxu1 %vm12694_vm0, %v12693_v2  ;;  %v11718_v14 = vpop.f32.mrf.mxu0 }
 0x599   :  { %12116 = vmatmul.mubr.msk.f32.vlgmr.msra.gmra.mxu0 %vm491_vm1, %v9309_v11  ;;  %v15672_v3 = vpop.f32.mrf.mxu0  ;;  %v9312_v11 = vld [vmem:[%s17922_s4 + $0x490] sm:$0xff] }
 0x59a   :  { %17940 = vst [vmem:[#allocation19_spill] sm:$0xff] %v15672_v3  ;;  %12202 = vmatpush3.msra.mxu0 %v14507_v63  ;;  %11210 = vmatmul.mubr.msk.f32.gmra.mxu1 %vm491_vm1, %v8926_v25  ;;  %v8929_v25 = vld [vmem:[%s17922_s4 + $0x108] sm:$0xff] }
 0x59b   :  { %12203 = vmatprep.subr.mxu0 %v12693_v2  ;;  %12118 = vmatprep.mubr.msk.f32.mxu0 %vm12694_vm0, %v12693_v2  ;;  %v11721_v21 = vpop.f32.mrf.mxu0 }
 0x59c   :  { %12204 = vmatpush3.msra.mxu0 %v14509_v35  ;;  %11212 = vmatprep.mubr.msk.f32.mxu1 %vm12694_vm0, %v12693_v2  ;;  %v8930_v21 = vld [vmem:[%s17922_s4 + $0x110] sm:$0xff] }
 0x59d   :  { %12205 = vmatprep.subr.mxu0 %v12693_v2  ;;  %12119 = vmatmul.mubr.msk.f32.gmra.mxu0 %vm491_vm1, %v9310_v37  ;;  %v15690_v44 = vpop.f32.mrf.mxu0 }
 0x59e   :  { %17941 = vst [vmem:[#allocation20_spill] sm:$0xff] %v15690_v44  ;;  %12206 = vmatpush3.msra.mxu0 %v14516_v16  ;;  %11213 = vmatmul.mubr.msk.f32.gmra.mxu1 %vm491_vm1, %v8927_v56  ;;  %v9313_v56 = vld [vmem:[%s17922_s4 + $0x498] sm:$0xff] }
 0x59f   :  { %12207 = vmatprep.subr.mxu0 %v12693_v2  ;;  %12121 = vmatprep.mubr.msk.f32.mxu0 %vm12694_vm0, %v12693_v2  ;;  %v11724_v4 = vpop.f32.mrf.mxu0 }
 0x5a0   :  { %12208 = vmatpush3.msra.mxu0 %v14523_v12  ;;  %11215 = vmatprep.mubr.msk.f32.mxu1 %vm12694_vm0, %v12693_v2  ;;  %v9314_v4 = vld [vmem:[%s17922_s4 + $0x4a0] sm:$0xff] }
 0x5a1   :  { %12209 = vmatprep.subr.mxu0 %v12693_v2  ;;  %12122 = vmatmul.mubr.msk.f32.gmra.mxu0 %vm491_vm1, %v9311_v20  ;;  %v15708_v62 = vpop.f32.mrf.mxu0 }
 0x5a2   :  { %17942 = vst [vmem:[#allocation21_spill] sm:$0xff] %v15708_v62  ;;  %12210 = vmatpush3.msra.mxu0 %v14530_v0  ;;  %11216 = vmatmul.mubr.msk.f32.gmra.mxu1 %vm491_vm1, %v8928_v54 }
 0x5a3   :  { %12211 = vmatprep.subr.mxu0 %v12693_v2  ;;  %12124 = vmatprep.mubr.msk.f32.mxu0 %vm12694_vm0, %v12693_v2  ;;  %v11727_v14 = vpop.f32.mrf.mxu0 }
 0x5a4   :  { %12212 = vmatpush3.msra.mxu0 %v14536_v46  ;;  %11218 = vmatprep.mubr.msk.f32.mxu1 %vm12694_vm0, %v12693_v2 }
 0x5a5   :  { %12213 = vmatprep.subr.mxu0 %v12693_v2  ;;  %12125 = vmatmul.mubr.msk.f32.gmra.mxu0 %vm491_vm1, %v9312_v11  ;;  %v15726_v37 = vpop.f32.mrf.mxu0  ;;  %v8931_v11 = vld [vmem:[%s17922_s4 + $0x118] sm:$0xff] }
 0x5a6   :  { %17943 = vst [vmem:[#allocation22_spill] sm:$0xff] %v15726_v37  ;;  %12214 = vmatpush3.msra.mxu0 %v14543_v1  ;;  %11219 = vmatmul.mubr.msk.f32.gmra.mxu1 %vm491_vm1, %v8929_v25 }
 0x5a7   :  { %12215 = vmatprep.subr.mxu0 %v12693_v2  ;;  %12127 = vmatprep.mubr.msk.f32.mxu0 %vm12694_vm0, %v12693_v2  ;;  %v11730_v20 = vpop.f32.mrf.mxu0 }
 0x5a8   :  { %12216 = vmatpush3.msra.mxu0 %v14550_v31  ;;  %11221 = vmatprep.mubr.msk.f32.mxu1 %vm12694_vm0, %v12693_v2 }
 0x5a9   :  { %12128 = vmatmul.mubr.msk.f32.gmra.mxu0 %vm491_vm1, %v9313_v56  ;;  %v15743_v54 = vpop.f32.mrf.mxu0  ;;  %12303 = vmatprep.subr.mxu0 %v12693_v2  ;;  %v9315_v56 = vld [vmem:[%s17922_s4 + $0x4a8] sm:$0xff] }
 0x5aa   :  { %17944 = vst [vmem:[#allocation23_spill] sm:$0xff] %v15743_v54  ;;  %11222 = vmatmul.mubr.msk.f32.gmra.mxu1 %vm491_vm1, %v8930_v21  ;;  %12130 = vmatprep.mubr.msk.f32.mxu0 %vm12694_vm0, %v12693_v2  ;;  %v8932_v21 = vld [vmem:[%s17922_s4 + $0x120] sm:$0xff] }
 0x5ab   :  { %11224 = vmatprep.mubr.msk.f32.mxu1 %vm12694_vm0, %v12693_v2  ;;  %v11733_v25 = vpop.f32.mrf.mxu0 }
 0x5ac   :  { %v8933_v25 = vld [vmem:[%s17922_s4 + $0x128] sm:$0xff] }
 0x5ad   :  { %12131 = vmatmul.mubr.msk.f32.gmra.mxu0 %vm491_vm1, %v9314_v4  ;;  %v15758_v14 = vpop.f32.mrf.mxu0 }
 0x5ae   :  { %17945 = vst [vmem:[#allocation24_spill] sm:$0xff] %v15758_v14  ;;  %11225 = vmatmul.mubr.msk.f32.gmra.mxu1 %vm491_vm1, %v8931_v11  ;;  %12133 = vmatprep.mubr.msk.f32.mxu0 %vm12694_vm0, %v12693_v2  ;;  %v9316_v11 = vld [vmem:[%s17922_s4 + $0x4b0] sm:$0xff] }
 0x5af   :  { %11227 = vmatprep.mubr.msk.f32.mxu1 %vm12694_vm0, %v12693_v2  ;;  %v11736_v20 = vpop.f32.mrf.mxu0 }
 0x5b1   :  { %12134 = vmatmul.mubr.msk.f32.gmra.mxu0 %vm491_vm1, %v9315_v56  ;;  %v15772_v4 = vpop.f32.mrf.mxu0  ;;  %v8951_v56 = vld [vmem:[%s17923_s5 + $0x58] sm:$0xff] }
 0x5b2   :  { %17946 = vst [vmem:[#allocation25_spill] sm:$0xff] %v15772_v4  ;;  %11228 = vmatmul.mubr.msk.f32.gmra.mxu1 %vm491_vm1, %v8932_v21  ;;  %12136 = vmatprep.mubr.msk.f32.mxu0 %vm12694_vm0, %v12693_v2 }
 0x5b3   :  { %11230 = vmatprep.mubr.msk.f32.mxu1 %vm12694_vm0, %v12693_v2  ;;  %v11739_v20 = vpop.f32.mrf.mxu0  ;;  %11237 = vmatpush3.msra.mxu1 %v8951_v56 }
 0x5b4   :  { %11238 = vmatprep.subr.mxu1 %v12693_v2  ;;  %v9317_v20 = vld [vmem:[%s17922_s4 + $0x4b8] sm:$0xff] }
 0x5b5   :  { %12137 = vmatmul.mubr.msk.f32.gmra.mxu0 %vm491_vm1, %v9316_v11  ;;  %v15789_v21 = vpop.f32.mrf.mxu0  ;;  %v8934_v11 = vld [vmem:[%s17922_s4 + $0x130] sm:$0xf] }
 0x5b6   :  { %17947 = vst [vmem:[#allocation26_spill] sm:$0xff] %v15789_v21  ;;  %11231 = vmatmul.mubr.msk.f32.gmra.mxu1 %vm491_vm1, %v8933_v25  ;;  %12139 = vmatprep.mubr.msk.f32.mxu0 %vm12694_vm0, %v12693_v2  ;;  %v9318_v25 = vld [vmem:[%s17922_s4 + $0x4c0] sm:$0xff] }
 0x5b7   :  { %11233 = vmatprep.mubr.msk.f32.mxu1 %vm12694_vm0, %v12693_v2  ;;  %v11742_v56 = vpop.f32.mrf.mxu0 }
 0x5b9   :  { %12140 = vmatmul.mubr.msk.f32.gmra.mxu0 %vm491_vm1, %v9317_v20  ;;  %v15804_v21 = vpop.f32.mrf.mxu0  ;;  %v9319_v20 = vld [vmem:[%s17922_s4 + $0x4c8] sm:$0xff] }
 0x5ba   :  { %17948 = vst [vmem:[#allocation27_spill] sm:$0xff] %v15804_v21  ;;  %11234 = vmatmul.mubr.msk.f32.gmra.mxu1 %vm491_vm1, %v8934_v11  ;;  %12142 = vmatprep.mubr.msk.f32.mxu0 %vm12694_vm0, %v12693_v2  ;;  %v8950_v21 = vld [vmem:[%s17923_s5 + $0x50] sm:$0xff] }
 0x5bb   :  { %v11745_v4 = vpop.f32.mrf.mxu0  ;;  %11244 = vmatprep.mubr.msk.f32.mxu1 %vm12694_vm0, %v12693_v2  ;;  %11239 = vmatpush3.msra.mxu1 %v8950_v21  ;;  %v9321_v21 = vld [vmem:[%s17922_s4 + $0x4d8] sm:$0xf] }
 0x5bc   :  { %11240 = vmatprep.subr.mxu1 %v12693_v2 }
 0x5bd   :  { %12143 = vmatmul.mubr.msk.f32.gmra.mxu0 %vm491_vm1, %v9318_v25  ;;  %v15815_v56 = vpop.f32.mrf.mxu0  ;;  %v9320_v25 = vld [vmem:[%s17922_s4 + $0x4d0] sm:$0xff] }
 0x5be   :  { %17949 = vst [vmem:[#allocation28_spill] sm:$0xff] %v15815_v56  ;;  %12145 = vmatprep.mubr.msk.f32.mxu0 %vm12694_vm0, %v12693_v2 }
 0x5bf   :  { %v11811_v11 = vpop.f32.mrf.mxu0 }
 0x5c1   :  { %12146 = vmatmul.mubr.msk.f32.gmra.mxu0 %vm491_vm1, %v9319_v20  ;;  %v15826_v4 = vpop.f32.mrf.mxu0 }
 0x5c2   :  { %17950 = vst [vmem:[#allocation29_spill] sm:$0xff] %v15826_v4  ;;  %12148 = vmatprep.mubr.msk.f32.mxu0 %vm12694_vm0, %v12693_v2  ;;  %v8949_v4 = vld [vmem:[%s17923_s5 + $0x48] sm:$0xff] }
 0x5c3   :  { %v11814_v56 = vpop.f32.mrf.mxu0  ;;  %11241 = vmatpush3.msra.mxu1 %v8949_v4 }
 0x5c4   :  { %v8948_v56 = vld [vmem:[%s17923_s5 + $0x40] sm:$0xff]  ;;  %11242 = vmatprep.subr.mxu1 %v12693_v2 }
 0x5c5   :  { %12149 = vmatmul.mubr.msk.f32.gmra.mxu0 %vm491_vm1, %v9320_v25  ;;  %v15835_v11 = vpop.f32.mrf.mxu0  ;;  %11243 = vmatpush3.msra.mxu1 %v8948_v56  ;;  %v9354_v56 = vld [vmem:[%s17922_s4 + $0x4f0] sm:$0xff] }
 0x5c6   :  { %17951 = vst [vmem:[#allocation30_spill] sm:$0xff] %v15835_v11  ;;  %12151 = vmatprep.mubr.msk.f32.mxu0 %vm12694_vm0, %v12693_v2  ;;  %11283 = vmatprep.subr.mxu1 %v12693_v2 }
 0x5c7   :  { %v11817_v20 = vpop.f32.mrf.mxu0 }
 0x5c8   :  { %v9352_v20 = vld [vmem:[%s17922_s4 + $0x4e0] sm:$0xff] }
 0x5c9   :  { %12152 = vmatmul.mubr.msk.f32.gmra.mxu0 %vm491_vm1, %v9321_v21  ;;  %v15849_v25 = vpop.f32.mrf.mxu0  ;;  %v9353_v21 = vld [vmem:[%s17922_s4 + $0x4e8] sm:$0xff] }
 0x5ca   :  { %17952 = vst [vmem:[#allocation31_spill] sm:$0xff] %v15849_v25  ;;  %12217 = vmatprep.mubr.msk.f32.mxu0 %vm12694_vm0, %v12693_v2 }
 0x5cb   :  { %v11820_v11 = vpop.f32.mrf.mxu0 }
 0x5cd   :  { %12218 = vmatmul.mubr.msk.f32.vlgmr.msra.gmra.mxu0 %vm491_vm1, %v9352_v20  ;;  %v15859_v4 = vpop.f32.mrf.mxu0 }
 0x5ce   :  { %17953 = vst [vmem:[#allocation32_spill] sm:$0xff] %v15859_v4  ;;  %12304 = vmatpush3.msra.mxu0 %v14507_v63  ;;  %12220 = vmatprep.mubr.msk.f32.mxu0 %vm12694_vm0, %v12693_v2 }
 0x5cf   :  { %12305 = vmatprep.subr.mxu0 %v12693_v2  ;;  %v11823_v25 = vpop.f32.mrf.mxu0 }
 0x5d0   :  { %12306 = vmatpush3.msra.mxu0 %v14509_v35 }
 0x5d1   :  { %12307 = vmatprep.subr.mxu0 %v12693_v2  ;;  %12221 = vmatmul.mubr.msk.f32.gmra.mxu0 %vm491_vm1, %v9353_v21  ;;  %v15871_v11 = vpop.f32.mrf.mxu0  ;;  %v9355_v21 = vld [vmem:[%s17922_s4 + $0x4f8] sm:$0xff] }
 0x5d2   :  { %17954 = vst [vmem:[#allocation33_spill] sm:$0xff] %v15871_v11  ;;  %12308 = vmatpush3.msra.mxu0 %v14516_v16  ;;  %12223 = vmatprep.mubr.msk.f32.mxu0 %vm12694_vm0, %v12693_v2 }
 0x5d3   :  { %12309 = vmatprep.subr.mxu0 %v12693_v2  ;;  %v11826_v25 = vpop.f32.mrf.mxu0 }
 0x5d4   :  { %12310 = vmatpush3.msra.mxu0 %v14523_v12 }
 0x5d5   :  { %12311 = vmatprep.subr.mxu0 %v12693_v2  ;;  %12224 = vmatmul.mubr.msk.f32.gmra.mxu0 %vm491_vm1, %v9354_v56  ;;  %v15883_v20 = vpop.f32.mrf.mxu0 }
 0x5d6   :  { %17955 = vst [vmem:[#allocation34_spill] sm:$0xff] %v15883_v20  ;;  %12312 = vmatpush3.msra.mxu0 %v14530_v0  ;;  %12226 = vmatprep.mubr.msk.f32.mxu0 %vm12694_vm0, %v12693_v2  ;;  %v9356_v20 = vld [vmem:[%s17922_s4 + $0x500] sm:$0xff] }
 0x5d7   :  { %12313 = vmatprep.subr.mxu0 %v12693_v2  ;;  %v11829_v25 = vpop.f32.mrf.mxu0 }
 0x5d8   :  { %12314 = vmatpush3.msra.mxu0 %v14536_v46 }
 0x5d9   :  { %12315 = vmatprep.subr.mxu0 %v12693_v2  ;;  %12227 = vmatmul.mubr.msk.f32.gmra.mxu0 %vm491_vm1, %v9355_v21  ;;  %v15895_v56 = vpop.f32.mrf.mxu0  ;;  %v9357_v21 = vld [vmem:[%s17922_s4 + $0x508] sm:$0xff] }
 0x5da   :  { %17956 = vst [vmem:[#allocation35_spill] sm:$0xff] %v15895_v56  ;;  %12316 = vmatpush3.msra.mxu0 %v14543_v1  ;;  %12229 = vmatprep.mubr.msk.f32.mxu0 %vm12694_vm0, %v12693_v2 }
 0x5db   :  { %12317 = vmatprep.subr.mxu0 %v12693_v2  ;;  %v11832_v25 = vpop.f32.mrf.mxu0 }
 0x5dc   :  { %12318 = vmatpush3.msra.mxu0 %v14550_v31 }
 0x5dd   :  { %12230 = vmatmul.mubr.msk.f32.gmra.mxu0 %vm491_vm1, %v9356_v20  ;;  %v15906_v11 = vpop.f32.mrf.mxu0  ;;  %12405 = vmatprep.subr.mxu0 %v12693_v2  ;;  %v9358_v20 = vld [vmem:[%s17922_s4 + $0x510] sm:$0xff] }
 0x5de   :  { %17957 = vst [vmem:[#allocation36_spill] sm:$0xff] %v15906_v11  ;;  %12232 = vmatprep.mubr.msk.f32.mxu0 %vm12694_vm0, %v12693_v2 }
 0x5df   :  { %v11835_v56 = vpop.f32.mrf.mxu0 }
 0x5e1   :  { %12233 = vmatmul.mubr.msk.f32.gmra.mxu0 %vm491_vm1, %v9357_v21  ;;  %v15915_v4 = vpop.f32.mrf.mxu1  ;;  %v15917_v25 = vpop.f32.mrf.mxu0  ;;  %v9359_v21 = vld [vmem:[%s17922_s4 + $0x518] sm:$0xff] }
 0x5e2   :  { %17958 = vst [vmem:[#allocation37_spill] sm:$0xff] %v15917_v25  ;;  %12235 = vmatprep.mubr.msk.f32.mxu0 %vm12694_vm0, %v12693_v2 }
 0x5e3   :  { %v11097_v11 = vpop.f32.mrf.mxu1  ;;  %v11838_v14 = vpop.f32.mrf.mxu0 }
 0x5e4   :  { %v9360_v11 = vld [vmem:[%s17922_s4 + $0x520] sm:$0xff] }
 0x5e5   :  { %12236 = vmatmul.mubr.msk.f32.gmra.mxu0 %vm491_vm1, %v9358_v20  ;;  %v15925_v54 = vpop.f32.mrf.mxu1  ;;  %v15927_v56 = vpop.f32.mrf.mxu0 }
 0x5e6   :  { %17959 = vst [vmem:[#allocation38_spill] sm:$0xff] %v15927_v56  ;;  %12238 = vmatprep.mubr.msk.f32.mxu0 %vm12694_vm0, %v12693_v2 }
 0x5e7   :  { %v11100_v25 = vpop.f32.mrf.mxu1  ;;  %v11841_v37 = vpop.f32.mrf.mxu0 }
 0x5e8   :  { %v9361_v25 = vld [vmem:[%s17922_s4 + $0x528] sm:$0xff] }
 0x5e9   :  { %12239 = vmatmul.mubr.msk.f32.gmra.mxu0 %vm491_vm1, %v9359_v21  ;;  %v15935_v62 = vpop.f32.mrf.mxu1  ;;  %v15937_v14 = vpop.f32.mrf.mxu0 }
 0x5ea   :  { %17960 = vst [vmem:[#allocation39_spill] sm:$0xff] %v15937_v14  ;;  %12241 = vmatprep.mubr.msk.f32.mxu0 %vm12694_vm0, %v12693_v2 }
 0x5eb   :  { %v11103_v20 = vpop.f32.mrf.mxu1  ;;  %v11844_v56 = vpop.f32.mrf.mxu0 }
 0x5ed   :  { %12242 = vmatmul.mubr.msk.f32.gmra.mxu0 %vm491_vm1, %v9360_v11  ;;  %v15945_v44 = vpop.f32.mrf.mxu1  ;;  %v15947_v37 = vpop.f32.mrf.mxu0  ;;  %v9362_v11 = vld [vmem:[%s17922_s4 + $0x530] sm:$0xff] }
 0x5ee   :  { %17961 = vst [vmem:[#allocation40_spill] sm:$0xff] %v15947_v37  ;;  %12244 = vmatprep.mubr.msk.f32.mxu0 %vm12694_vm0, %v12693_v2 }
 0x5ef   :  { %v11106_v21 = vpop.f32.mrf.mxu1  ;;  %v11847_v14 = vpop.f32.mrf.mxu0 }
 0x5f1   :  { %12245 = vmatmul.mubr.msk.f32.gmra.mxu0 %vm491_vm1, %v9361_v25  ;;  %v15955_v3 = vpop.f32.mrf.mxu1  ;;  %v15957_v56 = vpop.f32.mrf.mxu0  ;;  %v9363_v25 = vld [vmem:[%s17922_s4 + $0x538] sm:$0xff] }
 0x5f2   :  { %17962 = vst [vmem:[#allocation41_spill] sm:$0xff] %v15957_v56  ;;  %12247 = vmatprep.mubr.msk.f32.mxu0 %vm12694_vm0, %v12693_v2 }
 0x5f3   :  { %v11109_v20 = vpop.f32.mrf.mxu1  ;;  %v11913_v37 = vpop.f32.mrf.mxu0 }
 0x5f5   :  { %12248 = vmatmul.mubr.msk.f32.gmra.mxu0 %vm491_vm1, %v9362_v11  ;;  %v15965_v42 = vpop.f32.mrf.mxu0  ;;  %v9364_v11 = vld [vmem:[%s17922_s4 + $0x540] sm:$0xf] }
 0x5f6   :  { %17963 = vst [vmem:[#allocation42_spill] sm:$0xff] %v15965_v42  ;;  %v15967_v14 = vpop.f32.mrf.mxu1  ;;  %12250 = vmatprep.mubr.msk.f32.mxu0 %vm12694_vm0, %v12693_v2 }
 0x5f7   :  { %v11916_v21 = vpop.f32.mrf.mxu0 }
 0x5f8   :  { %v11112_v56 = vpop.f32.mrf.mxu1 }
 0x5f9   :  { %12251 = vmatmul.mubr.msk.f32.gmra.mxu0 %vm491_vm1, %v9363_v25  ;;  %v15975_v19 = vpop.f32.mrf.mxu0  ;;  %v9395_v25 = vld [vmem:[%s17922_s4 + $0x548] sm:$0xff] }
 0x5fa   :  { %17964 = vst [vmem:[#allocation43_spill] sm:$0xff] %v15975_v19  ;;  %v15977_v37 = vpop.f32.mrf.mxu1  ;;  %12253 = vmatprep.mubr.msk.f32.mxu0 %vm12694_vm0, %v12693_v2 }
 0x5fb   :  { %v11919_v20 = vpop.f32.mrf.mxu0 }
 0x5fc   :  { %v11115_v42 = vpop.f32.mrf.mxu1 }
 0x5fd   :  { %12254 = vmatmul.mubr.msk.f32.gmra.mxu0 %vm491_vm1, %v9364_v11  ;;  %v15985_v45 = vpop.f32.mrf.mxu0  ;;  %v9396_v11 = vld [vmem:[%s17922_s4 + $0x550] sm:$0xff] }
 0x5fe   :  { %17965 = vst [vmem:[#allocation44_spill] sm:$0xff] %v15985_v45  ;;  %v15987_v56 = vpop.f32.mrf.mxu1  ;;  %12319 = vmatprep.mubr.msk.f32.mxu0 %vm12694_vm0, %v12693_v2 }
 0x5ff   :  { %v11922_v21 = vpop.f32.mrf.mxu0 }
 0x600   :  { %v11118_v19 = vpop.f32.mrf.mxu1 }
 0x601   :  { %12320 = vmatmul.mubr.msk.f32.vlgmr.msra.gmra.mxu0 %vm491_vm1, %v9395_v25  ;;  %v15995_v30 = vpop.f32.mrf.mxu0 }
 0x602   :  { %17966 = vst [vmem:[#allocation45_spill] sm:$0xff] %v15995_v30  ;;  %12406 = vmatpush3.msra.mxu0 %v14507_v63  ;;  %v15998_v42 = vpop.f32.mrf.mxu1  ;;  %12322 = vmatprep.mubr.msk.f32.mxu0 %vm12694_vm0, %v12693_v2 }
 0x603   :  { %12407 = vmatprep.subr.mxu0 %v12693_v2  ;;  %v11925_v20 = vpop.f32.mrf.mxu0 }
 0x604   :  { %12408 = vmatpush3.msra.mxu0 %v14509_v35  ;;  %v11121_v19 = vpop.f32.mrf.mxu1  ;;  %v9397_v20 = vld [vmem:[%s17922_s4 + $0x558] sm:$0xff] }
 0x605   :  { %12409 = vmatprep.subr.mxu0 %v12693_v2  ;;  %12323 = vmatmul.mubr.msk.f32.gmra.mxu0 %vm491_vm1, %v9396_v11  ;;  %v16009_v25 = vpop.f32.mrf.mxu0 }
 0x606   :  { %17967 = vst [vmem:[#allocation46_spill] sm:$0xff] %v16009_v25  ;;  %12410 = vmatpush3.msra.mxu0 %v14516_v16  ;;  %v16012_v21 = vpop.f32.mrf.mxu1  ;;  %12325 = vmatprep.mubr.msk.f32.mxu0 %vm12694_vm0, %v12693_v2 }
 0x607   :  { %12411 = vmatprep.subr.mxu0 %v12693_v2  ;;  %v11928_v19 = vpop.f32.mrf.mxu0 }
 0x608   :  { %12412 = vmatpush3.msra.mxu0 %v14523_v12  ;;  %v11124_v30 = vpop.f32.mrf.mxu1  ;;  %v9398_v19 = vld [vmem:[%s17922_s4 + $0x560] sm:$0xff] }
 0x609   :  { %12413 = vmatprep.subr.mxu0 %v12693_v2  ;;  %12326 = vmatmul.mubr.msk.f32.gmra.mxu0 %vm491_vm1, %v9397_v20  ;;  %v16023_v11 = vpop.f32.mrf.mxu0 }
 0x60a   :  { %17968 = vst [vmem:[#allocation47_spill] sm:$0xff] %v16023_v11  ;;  %12414 = vmatpush3.msra.mxu0 %v14530_v0  ;;  %v16026_v25 = vpop.f32.mrf.mxu1  ;;  %12328 = vmatprep.mubr.msk.f32.mxu0 %vm12694_vm0, %v12693_v2 }
 0x60b   :  { %12415 = vmatprep.subr.mxu0 %v12693_v2  ;;  %v11931_v30 = vpop.f32.mrf.mxu0 }
 0x60c   :  { %12416 = vmatpush3.msra.mxu0 %v14536_v46  ;;  %v11127_v45 = vpop.f32.mrf.mxu1  ;;  %v9399_v30 = vld [vmem:[%s17922_s4 + $0x568] sm:$0xff] }
 0x60d   :  { %12417 = vmatprep.subr.mxu0 %v12693_v2  ;;  %12329 = vmatmul.mubr.msk.f32.gmra.mxu0 %vm491_vm1, %v9398_v19  ;;  %v16037_v20 = vpop.f32.mrf.mxu0 }
 0x60e   :  { %17969 = vst [vmem:[#allocation48_spill] sm:$0xff] %v16037_v20  ;;  %12418 = vmatpush3.msra.mxu0 %v14543_v1  ;;  %v16040_v11 = vpop.f32.mrf.mxu1  ;;  %12331 = vmatprep.mubr.msk.f32.mxu0 %vm12694_vm0, %v12693_v2 }
 0x60f   :  { %12419 = vmatprep.subr.mxu0 %v12693_v2  ;;  %v11934_v45 = vpop.f32.mrf.mxu0 }
 0x610   :  { %12420 = vmatpush3.msra.mxu0 %v14550_v31  ;;  %v11130_v47 = vpop.f32.mrf.mxu1 }
 0x611   :  { %12332 = vmatmul.mubr.msk.f32.gmra.mxu0 %vm491_vm1, %v9399_v30  ;;  %v16050_v19 = vpop.f32.mrf.mxu0  ;;  %12507 = vmatprep.subr.mxu0 %v12693_v2 }
 0x612   :  { %17970 = vst [vmem:[#allocation49_spill] sm:$0xff] %v16050_v19  ;;  %v16053_v20 = vpop.f32.mrf.mxu1  ;;  %12334 = vmatprep.mubr.msk.f32.mxu0 %vm12694_vm0, %v12693_v2  ;;  %v9401_v19 = vld [vmem:[%s17922_s4 + $0x578] sm:$0xff] }
 0x613   :  { %v11937_v41 = vpop.f32.mrf.mxu0 }
 0x614   :  { %v11133_v45 = vpop.f32.mrf.mxu1 }
 0x615   :  { %12335 = vmatmul.mubr.msk.f32.gmra.mxu0 %vm491_vm1, %v9400_v10  ;;  %v16061_v47 = vpop.f32.mrf.mxu0  ;;  %v9402_v10 = vld [vmem:[%s17922_s4 + $0x580] sm:$0xff] }
 0x616   :  { %17971 = vst [vmem:[#allocation50_spill] sm:$0xff] %v16061_v47  ;;  %v3145_v30 = vpop.f32.mrf.mxu1  ;;  %12337 = vmatprep.mubr.msk.f32.mxu0 %vm12694_vm0, %v12693_v2 }
 0x617   :  { %v16069_v32 = vadd.f32 %v3145_v30, %v15915_v4  ;;  %v11940_v43 = vpop.f32.mrf.mxu0 }
 0x618   :  { %v11144_v5 = vpop.f32.mrf.mxu1 }
 0x619   :  { %12338 = vmatmul.mubr.msk.f32.gmra.mxu0 %vm491_vm1, %v9401_v19  ;;  %v9403_v5 = vld [vmem:[%s17922_s4 + $0x588] sm:$0xff] }
 0x61a   :  { %v3150_v41 = vpop.f32.mrf.mxu1  ;;  %12340 = vmatprep.mubr.msk.f32.mxu0 %vm12694_vm0, %v12693_v2 }
 0x61b   :  { %v16078_v45 = vadd.f32 %v3150_v41, %v15925_v54  ;;  %v9404_v54 = vld [vmem:[%s17922_s4 + $0x590] sm:$0xff] }
 0x61c   :  { %v11147_v47 = vpop.f32.mrf.mxu1 }
 0x61d   :  { %12341 = vmatmul.mubr.msk.f32.gmra.mxu0 %vm491_vm1, %v9402_v10 }
 0x61e   :  { %v3155_v4 = vpop.f32.mrf.mxu1  ;;  %12343 = vmatprep.mubr.msk.f32.mxu0 %vm12694_vm0, %v12693_v2 }
 0x61f   :  { %v16087_v43 = vadd.f32 %v3155_v4, %v15935_v62  ;;  %v9405_v62 = vld [vmem:[%s17922_s4 + $0x598] sm:$0xff] }
 0x620   :  { %v11150_v19 = vpop.f32.mrf.mxu1 }
 0x621   :  { %12344 = vmatmul.mubr.msk.f32.gmra.mxu0 %vm491_vm1, %v9403_v5 }
 0x622   :  { %v3160_v30 = vpop.f32.mrf.mxu1  ;;  %12346 = vmatprep.mubr.msk.f32.mxu0 %vm12694_vm0, %v12693_v2 }
 0x623   :  { %v16096_v47 = vadd.f32 %v3160_v30, %v15945_v44  ;;  %v9406_v44 = vld [vmem:[%s17922_s4 + $0x5a0] sm:$0xff] }
 0x624   :  { %v11153_v41 = vpop.f32.mrf.mxu1 }
 0x625   :  { %12347 = vmatmul.mubr.msk.f32.gmra.mxu0 %vm491_vm1, %v9404_v54 }
 0x626   :  { %v3165_v10 = vpop.f32.mrf.mxu1  ;;  %12349 = vmatprep.mubr.msk.f32.mxu0 %vm12694_vm0, %v12693_v2 }
 0x627   :  { %v16105_v4 = vadd.f32 %v3165_v10, %v15955_v3  ;;  %v9407_v3 = vld [vmem:[%s17922_s4 + $0x5a8] sm:$0xf] }
 0x628   :  { %v11156_v5 = vpop.f32.mrf.mxu1 }
 0x629   :  { %12350 = vmatmul.mubr.msk.f32.gmra.mxu0 %vm491_vm1, %v9405_v62 }
 0x62a   :  { %v3170_v19 = vpop.f32.mrf.mxu1  ;;  %12352 = vmatprep.mubr.msk.f32.mxu0 %vm12694_vm0, %v12693_v2 }
 0x62b   :  { %v16114_v30 = vadd.f32 %v3170_v19, %v15967_v14  ;;  %v9438_v14 = vld [vmem:[%s17922_s4 + $0x5b0] sm:$0xff] }
 0x62c   :  { %v11159_v54 = vpop.f32.mrf.mxu1 }
 0x62d   :  { %12353 = vmatmul.mubr.msk.f32.gmra.mxu0 %vm491_vm1, %v9406_v44 }
 0x62e   :  { %v3175_v41 = vpop.f32.mrf.mxu1  ;;  %12355 = vmatprep.mubr.msk.f32.mxu0 %vm12694_vm0, %v12693_v2 }
 0x62f   :  { %v16123_v10 = vadd.f32 %v3175_v41, %v15977_v37 }
 0x630   :  { %v11162_v62 = vpop.f32.mrf.mxu1 }
 0x631   :  { %12356 = vmatmul.mubr.msk.f32.gmra.mxu0 %vm491_vm1, %v9407_v3 }
 0x632   :  { %v3180_v5 = vpop.f32.mrf.mxu1  ;;  %12421 = vmatprep.mubr.msk.f32.mxu0 %vm12694_vm0, %v12693_v2 }
 0x633   :  { %v16132_v19 = vadd.f32 %v3180_v5, %v15987_v56 }
 0x634   :  { %v11165_v44 = vpop.f32.mrf.mxu1 }
 0x635   :  { %12422 = vmatmul.mubr.msk.f32.vlgmr.msra.gmra.mxu0 %vm491_vm1, %v9438_v14 }
 0x636   :  { %12508 = vmatpush3.msra.mxu0 %v14507_v63  ;;  %v3185_v37 = vpop.f32.mrf.mxu1  ;;  %12424 = vmatprep.mubr.msk.f32.mxu0 %vm12694_vm0, %v12693_v2 }
 0x637   :  { %v16139_v54 = vadd.f32 %v3185_v37, %v15998_v42  ;;  %12509 = vmatprep.subr.mxu0 %v12693_v2 }
 0x638   :  { %12510 = vmatpush3.msra.mxu0 %v14509_v35  ;;  %v11168_v41 = vpop.f32.mrf.mxu1 }
 0x639   :  { %12511 = vmatprep.subr.mxu0 %v12693_v2 }
 0x63a   :  { %12512 = vmatpush3.msra.mxu0 %v14516_v16  ;;  %v3190_v56 = vpop.f32.mrf.mxu1 }
 0x63b   :  { %v16146_v3 = vadd.f32 %v3190_v56, %v16012_v21  ;;  %12513 = vmatprep.subr.mxu0 %v12693_v2 }
 0x63c   :  { %12514 = vmatpush3.msra.mxu0 %v14523_v12  ;;  %v11171_v62 = vpop.f32.mrf.mxu1 }
 0x63d   :  { %12515 = vmatprep.subr.mxu0 %v12693_v2 }
 0x63e   :  { %12516 = vmatpush3.msra.mxu0 %v14530_v0  ;;  %v3195_v42 = vpop.f32.mrf.mxu1 }
 0x63f   :  { %v16153_v5 = vadd.f32 %v3195_v42, %v16026_v25  ;;  %12517 = vmatprep.subr.mxu0 %v12693_v2 }
 0x640   :  { %12518 = vmatpush3.msra.mxu0 %v14536_v46  ;;  %v11174_v14 = vpop.f32.mrf.mxu1 }
 0x641   :  { %12519 = vmatprep.subr.mxu0 %v12693_v2 }
 0x642   :  { %12520 = vmatpush3.msra.mxu0 %v14543_v1  ;;  %v3200_v21 = vpop.f32.mrf.mxu1 }
 0x643   :  { %v16160_v44 = vadd.f32 %v3200_v21, %v16040_v11  ;;  %12521 = vmatprep.subr.mxu0 %v12693_v2 }
 0x644   :  { %12522 = vmatpush3.msra.mxu0 %v14550_v31  ;;  %v11177_v37 = vpop.f32.mrf.mxu1 }
 0x645   :  { %12609 = vmatprep.subr.mxu0 %v12693_v2 }
 0x646   :  { %v3205_v25 = vpop.f32.mrf.mxu1 }
 0x647   :  { %v16166_v41 = vadd.f32 %v3205_v25, %v16053_v20 }
 0x648   :  { %v11180_v56 = vpop.f32.mrf.mxu1 }
 0x64a   :  { %v3328_v62 = vpop.f32.mrf.mxu1 }
 0x64b   :  { %11245 = vmatmul.mubr.msk.f32.vlgmr.msra.gmra.mxu1 %vm2870_vm4, %v3328_v62 }
 0x64c   :  { %11284 = vmatpush3.msra.mxu1 %v14507_v63  ;;  %v11199_v42 = vpop.f32.mrf.mxu1  ;;  %11247 = vmatprep.mubr.msk.f32.mxu1 %vm12694_vm0, %v12693_v2 }
 0x64d   :  { %11285 = vmatprep.subr.mxu1 %v12693_v2 }
 0x64e   :  { %11286 = vmatpush3.msra.mxu1 %v14509_v35  ;;  %v3333_v11 = vpop.f32.mrf.mxu1 }
 0x64f   :  { %11287 = vmatprep.subr.mxu1 %v12693_v2  ;;  %11248 = vmatmul.mubr.msk.f32.gmra.mxu1 %vm2870_vm4, %v3333_v11 }
 0x650   :  { %11288 = vmatpush3.msra.mxu1 %v14516_v16  ;;  %v11202_v20 = vpop.f32.mrf.mxu1  ;;  %11250 = vmatprep.mubr.msk.f32.mxu1 %vm12694_vm0, %v12693_v2 }
 0x651   :  { %11289 = vmatprep.subr.mxu1 %v12693_v2 }
 0x652   :  { %11290 = vmatpush3.msra.mxu1 %v14523_v12  ;;  %v3338_v63 = vpop.f32.mrf.mxu1 }
 0x653   :  { %11291 = vmatprep.subr.mxu1 %v12693_v2  ;;  %11251 = vmatmul.mubr.msk.f32.gmra.mxu1 %vm2870_vm4, %v3338_v63 }
 0x654   :  { %11292 = vmatpush3.msra.mxu1 %v14530_v0  ;;  %v11205_v35 = vpop.f32.mrf.mxu1  ;;  %11253 = vmatprep.mubr.msk.f32.mxu1 %vm12694_vm0, %v12693_v2 }
 0x655   :  { %11293 = vmatprep.subr.mxu1 %v12693_v2 }
 0x656   :  { %11294 = vmatpush3.msra.mxu1 %v14536_v46  ;;  %v3343_v16 = vpop.f32.mrf.mxu1 }
 0x657   :  { %11295 = vmatprep.subr.mxu1 %v12693_v2  ;;  %11254 = vmatmul.mubr.msk.f32.gmra.mxu1 %vm2870_vm4, %v3343_v16 }
 0x658   :  { %11296 = vmatpush3.msra.mxu1 %v14543_v1  ;;  %v11208_v12 = vpop.f32.mrf.mxu1  ;;  %11256 = vmatprep.mubr.msk.f32.mxu1 %vm12694_vm0, %v12693_v2 }
 0x659   :  { %11297 = vmatprep.subr.mxu1 %v12693_v2 }
 0x65a   :  { %11298 = vmatpush3.msra.mxu1 %v14550_v31  ;;  %v3348_v0 = vpop.f32.mrf.mxu1 }
 0x65b   :  { %11257 = vmatmul.mubr.msk.f32.gmra.mxu1 %vm2870_vm4, %v3348_v0  ;;  %11338 = vmatprep.subr.mxu1 %v12693_v2 }
 0x65c   :  { %v11211_v46 = vpop.f32.mrf.mxu1  ;;  %11259 = vmatprep.mubr.msk.f32.mxu1 %vm12694_vm0, %v12693_v2 }
 0x65d   :  { %v8965_v46 = vld [vmem:[%s17922_s4 + $0x138] sm:$0xff] }
 0x65e   :  { %v3353_v14 = vpop.f32.mrf.mxu1 }
 0x65f   :  { %11260 = vmatmul.mubr.msk.f32.gmra.mxu1 %vm2870_vm4, %v3353_v14  ;;  %v8966_v14 = vld [vmem:[%s17922_s4 + $0x140] sm:$0xff] }
 0x660   :  { %v11214_v1 = vpop.f32.mrf.mxu1  ;;  %11262 = vmatprep.mubr.msk.f32.mxu1 %vm12694_vm0, %v12693_v2 }
 0x661   :  { %v8967_v1 = vld [vmem:[%s17922_s4 + $0x148] sm:$0xff] }
 0x662   :  { %v3358_v21 = vpop.f32.mrf.mxu1 }
 0x663   :  { %11263 = vmatmul.mubr.msk.f32.gmra.mxu1 %vm2870_vm4, %v3358_v21  ;;  %v8968_v21 = vld [vmem:[%s17922_s4 + $0x150] sm:$0xff] }
 0x664   :  { %v11217_v31 = vpop.f32.mrf.mxu1  ;;  %11265 = vmatprep.mubr.msk.f32.mxu1 %vm12694_vm0, %v12693_v2 }
 0x665   :  { %v8969_v31 = vld [vmem:[%s17922_s4 + $0x158] sm:$0xff] }
 0x666   :  { %v3363_v37 = vpop.f32.mrf.mxu1 }
 0x667   :  { %11266 = vmatmul.mubr.msk.f32.gmra.mxu1 %vm2870_vm4, %v3363_v37  ;;  %v8970_v37 = vld [vmem:[%s17922_s4 + $0x160] sm:$0xff] }
 0x668   :  { %v11220_v25 = vpop.f32.mrf.mxu1  ;;  %11268 = vmatprep.mubr.msk.f32.mxu1 %vm12694_vm0, %v12693_v2 }
 0x669   :  { %v8971_v25 = vld [vmem:[%s17922_s4 + $0x168] sm:$0xff] }
 0x66a   :  { %v3368_v56 = vpop.f32.mrf.mxu1 }
 0x66b   :  { %11269 = vmatmul.mubr.msk.f32.gmra.mxu1 %vm2870_vm4, %v3368_v56  ;;  %v8972_v56 = vld [vmem:[%s17922_s4 + $0x170] sm:$0xff] }
 0x66c   :  { %v11223_v62 = vpop.f32.mrf.mxu1  ;;  %11271 = vmatprep.mubr.msk.f32.mxu1 %vm12694_vm0, %v12693_v2 }
 0x66d   :  { %v8973_v62 = vld [vmem:[%s17922_s4 + $0x178] sm:$0xff] }
 0x66e   :  { %v3373_v42 = vpop.f32.mrf.mxu1 }
 0x66f   :  { %11272 = vmatmul.mubr.msk.f32.gmra.mxu1 %vm2870_vm4, %v3373_v42  ;;  %v8974_v42 = vld [vmem:[%s17922_s4 + $0x180] sm:$0xff] }
 0x670   :  { %v11226_v11 = vpop.f32.mrf.mxu1  ;;  %11274 = vmatprep.mubr.msk.f32.mxu1 %vm12694_vm0, %v12693_v2 }
 0x671   :  { %v8975_v11 = vld [vmem:[%s17922_s4 + $0x188] sm:$0xff] }
 0x672   :  { %v3378_v20 = vpop.f32.mrf.mxu1 }
 0x673   :  { %11275 = vmatmul.mubr.msk.f32.gmra.mxu1 %vm2870_vm4, %v3378_v20  ;;  %v8976_v20 = vld [vmem:[%s17922_s4 + $0x190] sm:$0xff] }
 0x674   :  { %v11229_v63 = vpop.f32.mrf.mxu1  ;;  %11277 = vmatprep.mubr.msk.f32.mxu1 %vm12694_vm0, %v12693_v2 }
 0x675   :  { %v8994_v63 = vld [vmem:[%s17923_s5 + $0x78] sm:$0xff] }
 0x676   :  { %v3383_v35 = vpop.f32.mrf.mxu1 }
 0x677   :  { %11278 = vmatmul.mubr.msk.f32.gmra.mxu1 %vm2870_vm4, %v3383_v35  ;;  %v8977_v35 = vld [vmem:[%s17922_s4 + $0x198] sm:$0xf] }
 0x678   :  { %v11232_v16 = vpop.f32.mrf.mxu1  ;;  %11280 = vmatprep.mubr.msk.f32.mxu1 %vm12694_vm0, %v12693_v2 }
 0x679   :  { %v8993_v16 = vld [vmem:[%s17923_s5 + $0x70] sm:$0xff] }
 0x67a   :  { %v3388_v12 = vpop.f32.mrf.mxu1 }
 0x67b   :  { %11281 = vmatmul.mubr.msk.f32.gmra.mxu1 %vm2870_vm4, %v3388_v12  ;;  %v8992_v12 = vld [vmem:[%s17923_s5 + $0x68] sm:$0xff] }
 0x67c   :  { %v11235_v0 = vpop.f32.mrf.mxu1  ;;  %11299 = vmatprep.mubr.msk.f32.mxu1 %vm12694_vm0, %v12693_v2 }
 0x67d   :  { %v8991_v0 = vld [vmem:[%s17923_s5 + $0x60] sm:$0xff] }
 0x67f   :  { %11300 = vmatmul.mubr.msk.f32.vlgmr.msra.gmra.mxu1 %vm491_vm1, %v8965_v46 }
 0x680   :  { %11302 = vmatprep.mubr.msk.f32.mxu1 %vm12694_vm0, %v12693_v2  ;;  %11339 = vmatpush3.msra.mxu1 %v8994_v63 }
 0x681   :  { %11340 = vmatprep.subr.mxu1 %v12693_v2 }
 0x682   :  { %11341 = vmatpush3.msra.mxu1 %v8993_v16 }
 0x683   :  { %11303 = vmatmul.mubr.msk.f32.gmra.mxu1 %vm491_vm1, %v8966_v14  ;;  %11342 = vmatprep.subr.mxu1 %v12693_v2 }
 0x684   :  { %11305 = vmatprep.mubr.msk.f32.mxu1 %vm12694_vm0, %v12693_v2  ;;  %11343 = vmatpush3.msra.mxu1 %v8992_v12 }
 0x685   :  { %11344 = vmatprep.subr.mxu1 %v12693_v2 }
 0x686   :  { %11345 = vmatpush3.msra.mxu1 %v8991_v0 }
 0x687   :  { %11306 = vmatmul.mubr.msk.f32.gmra.mxu1 %vm491_vm1, %v8967_v1  ;;  %11440 = vmatprep.subr.mxu1 %v12693_v2 }
 0x688   :  { %11308 = vmatprep.mubr.msk.f32.mxu1 %vm12694_vm0, %v12693_v2 }
 0x68b   :  { %11309 = vmatmul.mubr.msk.f32.gmra.mxu1 %vm491_vm1, %v8968_v21 }
 0x68c   :  { %11311 = vmatprep.mubr.msk.f32.mxu1 %vm12694_vm0, %v12693_v2 }
 0x68f   :  { %11312 = vmatmul.mubr.msk.f32.gmra.mxu1 %vm491_vm1, %v8969_v31 }
 0x690   :  { %11314 = vmatprep.mubr.msk.f32.mxu1 %vm12694_vm0, %v12693_v2 }
 0x693   :  { %11315 = vmatmul.mubr.msk.f32.gmra.mxu1 %vm491_vm1, %v8970_v37 }
 0x694   :  { %11317 = vmatprep.mubr.msk.f32.mxu1 %vm12694_vm0, %v12693_v2 }
 0x697   :  { %11318 = vmatmul.mubr.msk.f32.gmra.mxu1 %vm491_vm1, %v8971_v25 }
 0x698   :  { %11320 = vmatprep.mubr.msk.f32.mxu1 %vm12694_vm0, %v12693_v2 }
 0x69b   :  { %11321 = vmatmul.mubr.msk.f32.gmra.mxu1 %vm491_vm1, %v8972_v56 }
 0x69c   :  { %11323 = vmatprep.mubr.msk.f32.mxu1 %vm12694_vm0, %v12693_v2 }
 0x69f   :  { %11324 = vmatmul.mubr.msk.f32.gmra.mxu1 %vm491_vm1, %v8973_v62 }
 0x6a0   :  { %11326 = vmatprep.mubr.msk.f32.mxu1 %vm12694_vm0, %v12693_v2 }
 0x6a3   :  { %11327 = vmatmul.mubr.msk.f32.gmra.mxu1 %vm491_vm1, %v8974_v42 }
 0x6a4   :  { %11329 = vmatprep.mubr.msk.f32.mxu1 %vm12694_vm0, %v12693_v2 }
 0x6a7   :  { %11330 = vmatmul.mubr.msk.f32.gmra.mxu1 %vm491_vm1, %v8975_v11 }
 0x6a8   :  { %11332 = vmatprep.mubr.msk.f32.mxu1 %vm12694_vm0, %v12693_v2 }
 0x6ab   :  { %11333 = vmatmul.mubr.msk.f32.gmra.mxu1 %vm491_vm1, %v8976_v20 }
 0x6ac   :  { %11335 = vmatprep.mubr.msk.f32.mxu1 %vm12694_vm0, %v12693_v2 }
 0x6af   :  { %11336 = vmatmul.mubr.msk.f32.gmra.mxu1 %vm491_vm1, %v8977_v35 }
 0x6b0   :  { %11346 = vmatprep.mubr.msk.f32.mxu1 %vm12694_vm0, %v12693_v2 }
 0x70b   :  { %v3502_v46 = vpop.f32.mrf.mxu1 }
 0x70c   :  { %v16318_v14 = vadd.f32 %v3502_v46, %v16069_v32 }
 0x70d   :  { %v11246_v1 = vpop.f32.mrf.mxu1 }
 0x70f   :  { %v3507_v21 = vpop.f32.mrf.mxu1 }
 0x710   :  { %v16321_v31 = vadd.f32 %v3507_v21, %v16078_v45 }
 0x711   :  { %v11249_v37 = vpop.f32.mrf.mxu1 }
 0x713   :  { %v3512_v25 = vpop.f32.mrf.mxu1 }
 0x714   :  { %v16324_v56 = vadd.f32 %v3512_v25, %v16087_v43 }
 0x715   :  { %v11252_v62 = vpop.f32.mrf.mxu1 }
 0x717   :  { %v3517_v42 = vpop.f32.mrf.mxu1 }
 0x718   :  { %v16327_v11 = vadd.f32 %v3517_v42, %v16096_v47 }
 0x719   :  { %v11255_v20 = vpop.f32.mrf.mxu1 }
 0x71b   :  { %v3522_v63 = vpop.f32.mrf.mxu1 }
 0x71c   :  { %v16330_v32 = vadd.f32 %v3522_v63, %v16105_v4 }
 0x71d   :  { %v11258_v35 = vpop.f32.mrf.mxu1 }
 0x71f   :  { %v3527_v16 = vpop.f32.mrf.mxu1 }
 0x720   :  { %v16333_v45 = vadd.f32 %v3527_v16, %v16114_v30 }
 0x721   :  { %v11261_v12 = vpop.f32.mrf.mxu1 }
 0x723   :  { %v3532_v0 = vpop.f32.mrf.mxu1 }
 0x724   :  { %v16336_v43 = vadd.f32 %v3532_v0, %v16123_v10 }
 0x725   :  { %v11264_v46 = vpop.f32.mrf.mxu1 }
 0x727   :  { %v3537_v1 = vpop.f32.mrf.mxu1 }
 0x728   :  { %v16339_v47 = vadd.f32 %v3537_v1, %v16132_v19 }
 0x729   :  { %v11267_v21 = vpop.f32.mrf.mxu1 }
 0x72a   :  { %v9034_v21 = vld [vmem:[%s17923_s5 + $0x80] sm:$0xff] }
 0x72b   :  { %v3542_v37 = vpop.f32.mrf.mxu1 }
 0x72c   :  { %v16342_v4 = vadd.f32 %v3542_v37, %v16139_v54 }
 0x72d   :  { %v11270_v25 = vpop.f32.mrf.mxu1 }
 0x72f   :  { %v3547_v62 = vpop.f32.mrf.mxu1 }
 0x730   :  { %v16345_v30 = vadd.f32 %v3547_v62, %v16146_v3  ;;  %v9037_v3 = vld [vmem:[%s17923_s5 + $0x98] sm:$0xff] }
 0x731   :  { %v11273_v42 = vpop.f32.mrf.mxu1 }
 0x733   :  { %v3552_v20 = vpop.f32.mrf.mxu1 }
 0x734   :  { %v16348_v10 = vadd.f32 %v3552_v20, %v16153_v5  ;;  %v9036_v5 = vld [vmem:[%s17923_s5 + $0x90] sm:$0xff] }
 0x735   :  { %v11276_v63 = vpop.f32.mrf.mxu1 }
 0x737   :  { %v3557_v35 = vpop.f32.mrf.mxu1 }
 0x738   :  { %v16351_v19 = vadd.f32 %v3557_v35, %v16160_v44  ;;  %v9035_v44 = vld [vmem:[%s17923_s5 + $0x88] sm:$0xff] }
 0x739   :  { %v11279_v16 = vpop.f32.mrf.mxu1 }
 0x73b   :  { %v3562_v12 = vpop.f32.mrf.mxu1 }
 0x73c   :  { %v16354_v54 = vadd.f32 %v3562_v12, %v16166_v41 }
 0x73d   :  { %v11282_v0 = vpop.f32.mrf.mxu1 }
 0x73f   :  { %v3698_v46 = vpop.f32.mrf.mxu1 }
 0x740   :  { %11347 = vmatmul.mubr.msk.f32.vlgmr.msra.gmra.mxu1 %vm2870_vm4, %v3698_v46 }
 0x741   :  { %v11301_v1 = vpop.f32.mrf.mxu1  ;;  %11349 = vmatprep.mubr.msk.f32.mxu1 %vm12694_vm0, %v12693_v2  ;;  %11441 = vmatpush3.msra.mxu1 %v9037_v3 }
 0x742   :  { %11442 = vmatprep.subr.mxu1 %v12693_v2 }
 0x743   :  { %v3703_v41 = vpop.f32.mrf.mxu1  ;;  %11443 = vmatpush3.msra.mxu1 %v9036_v5 }
 0x744   :  { %11350 = vmatmul.mubr.msk.f32.gmra.mxu1 %vm2870_vm4, %v3703_v41  ;;  %11444 = vmatprep.subr.mxu1 %v12693_v2 }
 0x745   :  { %v11304_v37 = vpop.f32.mrf.mxu1  ;;  %11352 = vmatprep.mubr.msk.f32.mxu1 %vm12694_vm0, %v12693_v2  ;;  %11445 = vmatpush3.msra.mxu1 %v9035_v44 }
 0x746   :  { %11446 = vmatprep.subr.mxu1 %v12693_v2 }
 0x747   :  { %v3708_v25 = vpop.f32.mrf.mxu1  ;;  %11447 = vmatpush3.msra.mxu1 %v9034_v21 }
 0x748   :  { %11353 = vmatmul.mubr.msk.f32.gmra.mxu1 %vm2870_vm4, %v3708_v25  ;;  %11542 = vmatprep.subr.mxu1 %v12693_v2 }
 0x749   :  { %v11307_v62 = vpop.f32.mrf.mxu1  ;;  %11355 = vmatprep.mubr.msk.f32.mxu1 %vm12694_vm0, %v12693_v2 }
 0x74b   :  { %v3713_v42 = vpop.f32.mrf.mxu1 }
 0x74c   :  { %11356 = vmatmul.mubr.msk.f32.gmra.mxu1 %vm2870_vm4, %v3713_v42 }
 0x74d   :  { %v11310_v20 = vpop.f32.mrf.mxu1  ;;  %11358 = vmatprep.mubr.msk.f32.mxu1 %vm12694_vm0, %v12693_v2 }
 0x74f   :  { %v3718_v63 = vpop.f32.mrf.mxu1 }
 0x750   :  { %11359 = vmatmul.mubr.msk.f32.gmra.mxu1 %vm2870_vm4, %v3718_v63 }
 0x751   :  { %v11313_v35 = vpop.f32.mrf.mxu1  ;;  %11361 = vmatprep.mubr.msk.f32.mxu1 %vm12694_vm0, %v12693_v2 }
 0x752   :  { %v9080_v35 = vld [vmem:[%s17923_s5 + $0xb8] sm:$0xff] }
 0x753   :  { %v3723_v16 = vpop.f32.mrf.mxu1 }
 0x754   :  { %11362 = vmatmul.mubr.msk.f32.gmra.mxu1 %vm2870_vm4, %v3723_v16  ;;  %v9079_v16 = vld [vmem:[%s17923_s5 + $0xb0] sm:$0xff] }
 0x755   :  { %v11316_v12 = vpop.f32.mrf.mxu1  ;;  %11364 = vmatprep.mubr.msk.f32.mxu1 %vm12694_vm0, %v12693_v2 }
 0x756   :  { %v9078_v12 = vld [vmem:[%s17923_s5 + $0xa8] sm:$0xff] }
 0x757   :  { %v3728_v0 = vpop.f32.mrf.mxu1 }
 0x758   :  { %11365 = vmatmul.mubr.msk.f32.gmra.mxu1 %vm2870_vm4, %v3728_v0 }
 0x759   :  { %v11319_v3 = vpop.f32.mrf.mxu1  ;;  %11367 = vmatprep.mubr.msk.f32.mxu1 %vm12694_vm0, %v12693_v2 }
 0x75b   :  { %v3733_v46 = vpop.f32.mrf.mxu1 }
 0x75c   :  { %11368 = vmatmul.mubr.msk.f32.gmra.mxu1 %vm2870_vm4, %v3733_v46  ;;  %v17980_v46 = vld [vmem:[#allocation17_spill] sm:$0xff] }
 0x75d   :  { %v11322_v5 = vpop.f32.mrf.mxu1  ;;  %11370 = vmatprep.mubr.msk.f32.mxu1 %vm12694_vm0, %v12693_v2 }
 0x75f   :  { %v3738_v1 = vpop.f32.mrf.mxu1 }
 0x760   :  { %11371 = vmatmul.mubr.msk.f32.gmra.mxu1 %vm2870_vm4, %v3738_v1 }
 0x761   :  { %v11325_v44 = vpop.f32.mrf.mxu1  ;;  %11373 = vmatprep.mubr.msk.f32.mxu1 %vm12694_vm0, %v12693_v2 }
 0x762   :  { %v17981_v44 = vld [vmem:[#allocation18_spill] sm:$0xff] }
 0x763   :  { %v3743_v41 = vpop.f32.mrf.mxu1 }
 0x764   :  { %11374 = vmatmul.mubr.msk.f32.gmra.mxu1 %vm2870_vm4, %v3743_v41 }
 0x765   :  { %v11328_v21 = vpop.f32.mrf.mxu1  ;;  %11376 = vmatprep.mubr.msk.f32.mxu1 %vm12694_vm0, %v12693_v2 }
 0x766   :  { %v16671_v21 = vpop.f32.mrf.mxu0 }
 0x767   :  { %v3748_v37 = vpop.f32.mrf.mxu1 }
 0x768   :  { %11377 = vmatmul.mubr.msk.f32.gmra.mxu1 %vm2870_vm4, %v3748_v37 }
 0x769   :  { %v11331_v25 = vpop.f32.mrf.mxu1  ;;  %11379 = vmatprep.mubr.msk.f32.mxu1 %vm12694_vm0, %v12693_v2 }
 0x76a   :  { %v11943_v25 = vpop.f32.mrf.mxu0 }
 0x76b   :  { %v3753_v62 = vpop.f32.mrf.mxu1 }
 0x76c   :  { %11380 = vmatmul.mubr.msk.f32.gmra.mxu1 %vm2870_vm4, %v3753_v62  ;;  %v17982_v62 = vld [vmem:[#allocation19_spill] sm:$0xff] }
 0x76d   :  { %v11334_v42 = vpop.f32.mrf.mxu1  ;;  %11382 = vmatprep.mubr.msk.f32.mxu1 %vm12694_vm0, %v12693_v2 }
 0x76f   :  { %v3758_v20 = vpop.f32.mrf.mxu1 }
 0x770   :  { %11383 = vmatmul.mubr.msk.f32.gmra.mxu1 %vm2870_vm4, %v3758_v20  ;;  %v16680_v20 = vpop.f32.mrf.mxu0 }
 0x771   :  { %v11337_v63 = vpop.f32.mrf.mxu1  ;;  %11448 = vmatprep.mubr.msk.f32.mxu1 %vm12694_vm0, %v12693_v2 }
 0x772   :  { %v11946_v63 = vpop.f32.mrf.mxu0 }
 0x774   :  { %11449 = vmatmul.mubr.msk.f32.vlgmr.msra.gmra.mxu1 %vm2870_vm4, %v15094_v52  ;;  %v9077_v52 = vld [vmem:[%s17923_s5 + $0xa0] sm:$0xff] }
 0x775   :  { %11451 = vmatprep.mubr.msk.f32.mxu1 %vm12694_vm0, %v12693_v2  ;;  %11543 = vmatpush3.msra.mxu1 %v9080_v35 }
 0x776   :  { %11544 = vmatprep.subr.mxu1 %v12693_v2 }
 0x777   :  { %11545 = vmatpush3.msra.mxu1 %v9079_v16  ;;  %v17983_v16 = vld [vmem:[#allocation20_spill] sm:$0xff] }
 0x778   :  { %11452 = vmatmul.mubr.msk.f32.gmra.mxu1 %vm2870_vm4, %v15109_v60  ;;  %11546 = vmatprep.subr.mxu1 %v12693_v2  ;;  %v9123_v60 = vld [vmem:[%s17923_s5 + $0xd8] sm:$0xff] }
 0x779   :  { %11454 = vmatprep.mubr.msk.f32.mxu1 %vm12694_vm0, %v12693_v2  ;;  %11547 = vmatpush3.msra.mxu1 %v9078_v12 }
 0x77a   :  { %11548 = vmatprep.subr.mxu1 %v12693_v2 }
 0x77b   :  { %11549 = vmatpush3.msra.mxu1 %v9077_v52  ;;  %v16689_v52 = vpop.f32.mrf.mxu0 }
 0x77c   :  { %11455 = vmatmul.mubr.msk.f32.gmra.mxu1 %vm2870_vm4, %v15120_v23  ;;  %11644 = vmatprep.subr.mxu1 %v12693_v2  ;;  %v9122_v23 = vld [vmem:[%s17923_s5 + $0xd0] sm:$0xff] }
 0x77d   :  { %11457 = vmatprep.mubr.msk.f32.mxu1 %vm12694_vm0, %v12693_v2 }
 0x780   :  { %11458 = vmatmul.mubr.msk.f32.gmra.mxu1 %vm2870_vm4, %v15135_v6  ;;  %v9121_v6 = vld [vmem:[%s17923_s5 + $0xc8] sm:$0xff] }
 0x781   :  { %11460 = vmatprep.mubr.msk.f32.mxu1 %vm12694_vm0, %v12693_v2 }
 0x784   :  { %11461 = vmatmul.mubr.msk.f32.gmra.mxu1 %vm2870_vm4, %v15145_v48  ;;  %v9120_v48 = vld [vmem:[%s17923_s5 + $0xc0] sm:$0xff] }
 0x785   :  { %11463 = vmatprep.mubr.msk.f32.mxu1 %vm12694_vm0, %v12693_v2 }
 0x788   :  { %11464 = vmatmul.mubr.msk.f32.gmra.mxu1 %vm2870_vm4, %v15158_v53  ;;  %v9166_v53 = vld [vmem:[%s17923_s5 + $0xf8] sm:$0xff] }
 0x789   :  { %11466 = vmatprep.mubr.msk.f32.mxu1 %vm12694_vm0, %v12693_v2 }
 0x78c   :  { %11467 = vmatmul.mubr.msk.f32.gmra.mxu1 %vm2870_vm4, %v15172_v34  ;;  %v9165_v34 = vld [vmem:[%s17923_s5 + $0xf0] sm:$0xff] }
 0x78d   :  { %11469 = vmatprep.mubr.msk.f32.mxu1 %vm12694_vm0, %v12693_v2 }
 0x790   :  { %11470 = vmatmul.mubr.msk.f32.gmra.mxu1 %vm2870_vm4, %v15186_v36  ;;  %v9164_v36 = vld [vmem:[%s17923_s5 + $0xe8] sm:$0xff] }
 0x791   :  { %11472 = vmatprep.mubr.msk.f32.mxu1 %vm12694_vm0, %v12693_v2 }
 0x794   :  { %11473 = vmatmul.mubr.msk.f32.gmra.mxu1 %vm2870_vm4, %v15200_v9  ;;  %v9163_v9 = vld [vmem:[%s17923_s5 + $0xe0] sm:$0xff] }
 0x795   :  { %11475 = vmatprep.mubr.msk.f32.mxu1 %vm12694_vm0, %v12693_v2 }
 0x798   :  { %11476 = vmatmul.mubr.msk.f32.gmra.mxu1 %vm2870_vm4, %v15211_v22  ;;  %v17972_v22 = vld [vmem:[#allocation9_spill] sm:$0xff] }
 0x799   :  { %11478 = vmatprep.mubr.msk.f32.mxu1 %vm12694_vm0, %v12693_v2 }
 0x79c   :  { %11479 = vmatmul.mubr.msk.f32.gmra.mxu1 %vm2870_vm4, %v15221_v57  ;;  %v17973_v57 = vld [vmem:[#allocation10_spill] sm:$0xff] }
 0x79d   :  { %11481 = vmatprep.mubr.msk.f32.mxu1 %vm12694_vm0, %v12693_v2 }
 0x7a0   :  { %11482 = vmatmul.mubr.msk.f32.gmra.mxu1 %vm2870_vm4, %v15231_v59 }
 0x7a1   :  { %11484 = vmatprep.mubr.msk.f32.mxu1 %vm12694_vm0, %v12693_v2 }
 0x7a4   :  { %11485 = vmatmul.mubr.msk.f32.gmra.mxu1 %vm2870_vm4, %v15241_v58  ;;  %v17974_v58 = vld [vmem:[#allocation11_spill] sm:$0xff] }
 0x7a5   :  { %11550 = vmatprep.mubr.msk.f32.mxu1 %vm12694_vm0, %v12693_v2 }
 0x7a8   :  { %11551 = vmatmul.mubr.msk.f32.vlgmr.msra.gmra.mxu1 %vm2870_vm4, %v15252_v50 }
 0x7a9   :  { %11553 = vmatprep.mubr.msk.f32.mxu1 %vm12694_vm0, %v12693_v2  ;;  %11645 = vmatpush3.msra.mxu1 %v9123_v60  ;;  %v11949_v60 = vpop.f32.mrf.mxu0 }
 0x7aa   :  { %11646 = vmatprep.subr.mxu1 %v12693_v2 }
 0x7ab   :  { %11647 = vmatpush3.msra.mxu1 %v9122_v23 }
 0x7ac   :  { %11554 = vmatmul.mubr.msk.f32.gmra.mxu1 %vm2870_vm4, %v15269_v61  ;;  %11648 = vmatprep.subr.mxu1 %v12693_v2 }
 0x7ad   :  { %11556 = vmatprep.mubr.msk.f32.mxu1 %vm12694_vm0, %v12693_v2  ;;  %11649 = vmatpush3.msra.mxu1 %v9121_v6  ;;  %v17984_v6 = vld [vmem:[#allocation21_spill] sm:$0xff] }
 0x7ae   :  { %11650 = vmatprep.subr.mxu1 %v12693_v2 }
 0x7af   :  { %11651 = vmatpush3.msra.mxu1 %v9120_v48 }
 0x7b0   :  { %11557 = vmatmul.mubr.msk.f32.gmra.mxu1 %vm2870_vm4, %v15284_v49  ;;  %11746 = vmatprep.subr.mxu1 %v12693_v2 }
 0x7b1   :  { %11559 = vmatprep.mubr.msk.f32.mxu1 %vm12694_vm0, %v12693_v2 }
 0x7b4   :  { %11560 = vmatmul.mubr.msk.f32.gmra.mxu1 %vm2870_vm4, %v15299_v7  ;;  %v17975_v7 = vld [vmem:[#allocation12_spill] sm:$0xff] }
 0x7b5   :  { %11562 = vmatprep.mubr.msk.f32.mxu1 %vm12694_vm0, %v12693_v2 }
 0x7b8   :  { %11563 = vmatmul.mubr.msk.f32.gmra.mxu1 %vm2870_vm4, %v15311_v28 }
 0x7b9   :  { %11565 = vmatprep.mubr.msk.f32.mxu1 %vm12694_vm0, %v12693_v2 }
 0x7bc   :  { %11566 = vmatmul.mubr.msk.f32.gmra.mxu1 %vm2870_vm4, %v15325_v27 }
 0x7bd   :  { %11568 = vmatprep.mubr.msk.f32.mxu1 %vm12694_vm0, %v12693_v2 }
 0x7c0   :  { %11569 = vmatmul.mubr.msk.f32.gmra.mxu1 %vm2870_vm4, %v15340_v29 }
 0x7c1   :  { %11571 = vmatprep.mubr.msk.f32.mxu1 %vm12694_vm0, %v12693_v2 }
 0x7c4   :  { %11572 = vmatmul.mubr.msk.f32.gmra.mxu1 %vm2870_vm4, %v15355_v39  ;;  %v17976_v39 = vld [vmem:[#allocation13_spill] sm:$0xff] }
 0x7c5   :  { %11574 = vmatprep.mubr.msk.f32.mxu1 %vm12694_vm0, %v12693_v2 }
 0x7c8   :  { %11575 = vmatmul.mubr.msk.f32.gmra.mxu1 %vm2870_vm4, %v15369_v8 }
 0x7c9   :  { %11577 = vmatprep.mubr.msk.f32.mxu1 %vm12694_vm0, %v12693_v2 }
 0x7cc   :  { %11578 = vmatmul.mubr.msk.f32.gmra.mxu1 %vm2870_vm4, %v15381_v51 }
 0x7cd   :  { %11580 = vmatprep.mubr.msk.f32.mxu1 %vm12694_vm0, %v12693_v2 }
 0x7d0   :  { %11581 = vmatmul.mubr.msk.f32.gmra.mxu1 %vm2870_vm4, %v15392_v33 }
 0x7d1   :  { %11583 = vmatprep.mubr.msk.f32.mxu1 %vm12694_vm0, %v12693_v2 }
 0x7d4   :  { %11584 = vmatmul.mubr.msk.f32.gmra.mxu1 %vm2870_vm4, %v15403_v13  ;;  %v17977_v13 = vld [vmem:[#allocation14_spill] sm:$0xff] }
 0x7d5   :  { %11586 = vmatprep.mubr.msk.f32.mxu1 %vm12694_vm0, %v12693_v2 }
 0x7d8   :  { %11587 = vmatmul.mubr.msk.f32.gmra.mxu1 %vm2870_vm4, %v15414_v18 }
 0x7d9   :  { %11652 = vmatprep.mubr.msk.f32.mxu1 %vm12694_vm0, %v12693_v2 }
 0x7dc   :  { %11653 = vmatmul.mubr.msk.f32.vlgmr.msra.gmra.mxu1 %vm2870_vm4, %v15425_v40 }
 0x7dd   :  { %11655 = vmatprep.mubr.msk.f32.mxu1 %vm12694_vm0, %v12693_v2  ;;  %11747 = vmatpush3.msra.mxu1 %v9166_v53  ;;  %v16698_v53 = vpop.f32.mrf.mxu0 }
 0x7de   :  { %11748 = vmatprep.subr.mxu1 %v12693_v2 }
 0x7df   :  { %11749 = vmatpush3.msra.mxu1 %v9165_v34  ;;  %v12015_v34 = vpop.f32.mrf.mxu0 }
 0x7e0   :  { %11656 = vmatmul.mubr.msk.f32.gmra.mxu1 %vm2870_vm4, %v15440_v38  ;;  %11750 = vmatprep.subr.mxu1 %v12693_v2  ;;  %v9209_v38 = vld [vmem:[%s17923_s5 + $0x118] sm:$0xff] }
 0x7e1   :  { %11658 = vmatprep.mubr.msk.f32.mxu1 %vm12694_vm0, %v12693_v2  ;;  %11751 = vmatpush3.msra.mxu1 %v9164_v36 }
 0x7e2   :  { %11752 = vmatprep.subr.mxu1 %v12693_v2 }
 0x7e3   :  { %11753 = vmatpush3.msra.mxu1 %v9163_v9  ;;  %v17985_v9 = vld [vmem:[#allocation22_spill] sm:$0xff] }
 0x7e4   :  { %11659 = vmatmul.mubr.msk.f32.gmra.mxu1 %vm2870_vm4, %v15456_v24  ;;  %11848 = vmatprep.subr.mxu1 %v12693_v2 }
 0x7e5   :  { %11661 = vmatprep.mubr.msk.f32.mxu1 %vm12694_vm0, %v12693_v2 }
 0x7e8   :  { %11662 = vmatmul.mubr.msk.f32.gmra.mxu1 %vm2870_vm4, %v15472_v55  ;;  %v17978_v55 = vld [vmem:[#allocation15_spill] sm:$0xff] }
 0x7e9   :  { %11664 = vmatprep.mubr.msk.f32.mxu1 %vm12694_vm0, %v12693_v2 }
 0x7ec   :  { %11665 = vmatmul.mubr.msk.f32.gmra.mxu1 %vm2870_vm4, %v15488_v17  ;;  %v9208_v17 = vld [vmem:[%s17923_s5 + $0x110] sm:$0xff] }
 0x7ed   :  { %11667 = vmatprep.mubr.msk.f32.mxu1 %vm12694_vm0, %v12693_v2 }
 0x7f0   :  { %11668 = vmatmul.mubr.msk.f32.gmra.mxu1 %vm2870_vm4, %v15504_v26 }
 0x7f1   :  { %11670 = vmatprep.mubr.msk.f32.mxu1 %vm12694_vm0, %v12693_v2 }
 0x7f4   :  { %11671 = vmatmul.mubr.msk.f32.gmra.mxu1 %vm2870_vm4, %v15520_v15 }
 0x7f5   :  { %11673 = vmatprep.mubr.msk.f32.mxu1 %vm12694_vm0, %v12693_v2 }
 0x7f8   :  { %11674 = vmatmul.mubr.msk.f32.gmra.mxu1 %vm2870_vm4, %v17972_v22 }
 0x7f9   :  { %11676 = vmatprep.mubr.msk.f32.mxu1 %vm12694_vm0, %v12693_v2 }
 0x7fc   :  { %11677 = vmatmul.mubr.msk.f32.gmra.mxu1 %vm2870_vm4, %v17973_v57  ;;  %v16707_v57 = vpop.f32.mrf.mxu0 }
 0x7fd   :  { %11679 = vmatprep.mubr.msk.f32.mxu1 %vm12694_vm0, %v12693_v2 }
 0x800   :  { %v3872_v59 = vpop.f32.mrf.mxu1  ;;  %11680 = vmatmul.mubr.msk.f32.gmra.mxu1 %vm2870_vm4, %v17974_v58 }
 0x801   :  { %v16602_v50 = vadd.f32 %v3872_v59, %v16318_v14  ;;  %11682 = vmatprep.mubr.msk.f32.mxu1 %vm12694_vm0, %v12693_v2  ;;  %v9207_v14 = vld [vmem:[%s17923_s5 + $0x108] sm:$0xff]  ;;  %v12018_v59 = vpop.f32.mrf.mxu0 }
 0x802   :  { %v11348_v61 = vpop.f32.mrf.mxu1  ;;  %v17993_v59 = vld [vmem:[#allocation30_spill] sm:$0xff] }
 0x803   :  { %v17986_v61 = vld [vmem:[#allocation23_spill] sm:$0xff] }
 0x804   :  { %v3877_v49 = vpop.f32.mrf.mxu1  ;;  %11683 = vmatmul.mubr.msk.f32.gmra.mxu1 %vm2870_vm4, %v17975_v7  ;;  %v16716_v7 = vpop.f32.mrf.mxu0 }
 0x805   :  { %v16609_v28 = vadd.f32 %v3877_v49, %v16321_v31  ;;  %11685 = vmatprep.mubr.msk.f32.mxu1 %vm12694_vm0, %v12693_v2 }
 0x806   :  { %v11351_v27 = vpop.f32.mrf.mxu1 }
 0x807   :  { %v12021_v27 = vpop.f32.mrf.mxu0 }
 0x808   :  { %v3882_v29 = vpop.f32.mrf.mxu1  ;;  %11686 = vmatmul.mubr.msk.f32.gmra.mxu1 %vm2870_vm4, %v17976_v39  ;;  %v17987_v39 = vld [vmem:[#allocation24_spill] sm:$0xff] }
 0x809   :  { %v16616_v8 = vadd.f32 %v3882_v29, %v16324_v56  ;;  %11688 = vmatprep.mubr.msk.f32.mxu1 %vm12694_vm0, %v12693_v2  ;;  %v17979_v56 = vld [vmem:[#allocation16_spill] sm:$0xff] }
 0x80a   :  { %v11354_v51 = vpop.f32.mrf.mxu1 }
 0x80c   :  { %v3887_v33 = vpop.f32.mrf.mxu1  ;;  %11689 = vmatmul.mubr.msk.f32.gmra.mxu1 %vm2870_vm4, %v17977_v13 }
 0x80d   :  { %v16623_v18 = vadd.f32 %v3887_v33, %v16327_v11  ;;  %11754 = vmatprep.mubr.msk.f32.mxu1 %vm12694_vm0, %v12693_v2  ;;  %v9206_v11 = vld [vmem:[%s17923_s5 + $0x100] sm:$0xff]  ;;  %v16725_v33 = vpop.f32.mrf.mxu0 }
 0x80e   :  { %v11357_v40 = vpop.f32.mrf.mxu1 }
 0x80f   :  { %v12024_v13 = vpop.f32.mrf.mxu0 }
 0x810   :  { %v3892_v24 = vpop.f32.mrf.mxu1  ;;  %11755 = vmatmul.mubr.msk.f32.vlgmr.msra.gmra.mxu1 %vm2870_vm4, %v17978_v55 }
 0x811   :  { %v16636_v26 = vadd.f32 %v3892_v24, %v16330_v32  ;;  %11757 = vmatprep.mubr.msk.f32.mxu1 %vm12694_vm0, %v12693_v2  ;;  %11849 = vmatpush3.msra.mxu1 %v9209_v38  ;;  %v17988_v38 = vld [vmem:[#allocation25_spill] sm:$0xff]  ;;  %v16734_v55 = vpop.f32.mrf.mxu0 }
 0x812   :  { %v11360_v15 = vpop.f32.mrf.mxu1  ;;  %11850 = vmatprep.subr.mxu1 %v12693_v2 }
 0x813   :  { %11851 = vmatpush3.msra.mxu1 %v9208_v17  ;;  %v12027_v17 = vpop.f32.mrf.mxu0 }
 0x814   :  { %v3897_v31 = vpop.f32.mrf.mxu1  ;;  %11758 = vmatmul.mubr.msk.f32.gmra.mxu1 %vm2870_vm4, %v17979_v56  ;;  %11852 = vmatprep.subr.mxu1 %v12693_v2 }
 0x815   :  { %v16651_v32 = vadd.f32 %v3897_v31, %v16333_v45  ;;  %11760 = vmatprep.mubr.msk.f32.mxu1 %vm12694_vm0, %v12693_v2  ;;  %11853 = vmatpush3.msra.mxu1 %v9207_v14  ;;  %v17989_v14 = vld [vmem:[#allocation26_spill] sm:$0xff]  ;;  %v16743_v56 = vpop.f32.mrf.mxu0 }
 0x816   :  { %v11363_v0 = vpop.f32.mrf.mxu1  ;;  %11854 = vmatprep.subr.mxu1 %v12693_v2 }
 0x817   :  { %11855 = vmatpush3.msra.mxu1 %v9206_v11  ;;  %v12030_v0 = vpop.f32.mrf.mxu0 }
 0x818   :  { %v3902_v3 = vpop.f32.mrf.mxu1  ;;  %11761 = vmatmul.mubr.msk.f32.gmra.mxu1 %vm2870_vm4, %v17980_v46  ;;  %11950 = vmatprep.subr.mxu1 %v12693_v2  ;;  %v17990_v46 = vld [vmem:[#allocation27_spill] sm:$0xff] }
 0x819   :  { %v16660_v5 = vadd.f32 %v3902_v3, %v16336_v43  ;;  %11763 = vmatprep.mubr.msk.f32.mxu1 %vm12694_vm0, %v12693_v2 }
 0x81a   :  { %v11366_v45 = vpop.f32.mrf.mxu1 }
 0x81b   :  { %v16758_v45 = vpop.f32.mrf.mxu0 }
 0x81c   :  { %v3907_v1 = vpop.f32.mrf.mxu1  ;;  %11764 = vmatmul.mubr.msk.f32.gmra.mxu1 %vm2870_vm4, %v17981_v44 }
 0x81d   :  { %v16667_v41 = vadd.f32 %v3907_v1, %v16339_v47  ;;  %11766 = vmatprep.mubr.msk.f32.mxu1 %vm12694_vm0, %v12693_v2  ;;  %v9440_v1 = vld [vmem:[%s17922_s4 + $0x5c0] sm:$0xff]  ;;  %v12033_v25 = vpop.f32.mrf.mxu0 }
 0x81e   :  { %v11369_v37 = vpop.f32.mrf.mxu1 }
 0x81f   :  { %v9252_v37 = vld [vmem:[%s17923_s5 + $0x138] sm:$0xff]  ;;  %v16779_v63 = vpop.f32.mrf.mxu0 }
 0x820   :  { %v3912_v43 = vpop.f32.mrf.mxu1  ;;  %11767 = vmatmul.mubr.msk.f32.gmra.mxu1 %vm2870_vm4, %v17982_v62  ;;  %v9251_v62 = vld [vmem:[%s17923_s5 + $0x130] sm:$0xff] }
 0x821   :  { %v16676_v42 = vadd.f32 %v3912_v43, %v16342_v4  ;;  %11769 = vmatprep.mubr.msk.f32.mxu1 %vm12694_vm0, %v12693_v2  ;;  %v17991_v43 = vld [vmem:[#allocation28_spill] sm:$0xff] }
 0x822   :  { %v11372_v47 = vpop.f32.mrf.mxu1 }
 0x824   :  { %v3917_v35 = vpop.f32.mrf.mxu1  ;;  %11770 = vmatmul.mubr.msk.f32.gmra.mxu1 %vm2870_vm4, %v17983_v16 }
 0x825   :  { %v16685_v12 = vadd.f32 %v3917_v35, %v16345_v30  ;;  %11772 = vmatprep.mubr.msk.f32.mxu1 %vm12694_vm0, %v12693_v2  ;;  %v9441_v35 = vld [vmem:[%s17922_s4 + $0x5c8] sm:$0xff] }
 0x826   :  { %v11375_v4 = vpop.f32.mrf.mxu1 }
 0x827   :  { %v9250_v4 = vld [vmem:[%s17923_s5 + $0x128] sm:$0xff] }
 0x828   :  { %v3922_v23 = vpop.f32.mrf.mxu1  ;;  %11773 = vmatmul.mubr.msk.f32.gmra.mxu1 %vm2870_vm4, %v17984_v6  ;;  %v9249_v6 = vld [vmem:[%s17923_s5 + $0x120] sm:$0xff] }
 0x829   :  { %v16694_v48 = vadd.f32 %v3922_v23, %v16348_v10  ;;  %11775 = vmatprep.mubr.msk.f32.mxu1 %vm12694_vm0, %v12693_v2  ;;  %v17992_v23 = vld [vmem:[#allocation29_spill] sm:$0xff] }
 0x82a   :  { %v11378_v30 = vpop.f32.mrf.mxu1 }
 0x82c   :  { %v3927_v36 = vpop.f32.mrf.mxu1  ;;  %11776 = vmatmul.mubr.msk.f32.gmra.mxu1 %vm2870_vm4, %v17985_v9 }
 0x82d   :  { %v16703_v22 = vadd.f32 %v3927_v36, %v16351_v19  ;;  %11778 = vmatprep.mubr.msk.f32.mxu1 %vm12694_vm0, %v12693_v2  ;;  %v9442_v36 = vld [vmem:[%s17922_s4 + $0x5d0] sm:$0xff] }
 0x82e   :  { %v11381_v10 = vpop.f32.mrf.mxu1 }
 0x830   :  { %v3932_v58 = vpop.f32.mrf.mxu1  ;;  %11779 = vmatmul.mubr.msk.f32.gmra.mxu1 %vm2870_vm4, %v17986_v61 }
 0x831   :  { %v16712_v49 = vadd.f32 %v3932_v58, %v16354_v54  ;;  %11781 = vmatprep.mubr.msk.f32.mxu1 %vm12694_vm0, %v12693_v2 }
 0x832   :  { %v11384_v19 = vpop.f32.mrf.mxu1 }
 0x833   :  { %v9443_v19 = vld [vmem:[%s17922_s4 + $0x5d8] sm:$0xff] }
 0x834   :  { %v4242_v29 = vpop.f32.mrf.mxu1  ;;  %11782 = vmatmul.mubr.msk.f32.gmra.mxu1 %vm2870_vm4, %v17987_v39 }
 0x835   :  { %v16721_v51 = vadd.f32 %v4242_v29, %v16602_v50  ;;  %11784 = vmatprep.mubr.msk.f32.mxu1 %vm12694_vm0, %v12693_v2 }
 0x836   :  { %v11450_v54 = vpop.f32.mrf.mxu1 }
 0x837   :  { %v17994_v54 = vld [vmem:[#allocation31_spill] sm:$0xff] }
 0x838   :  { %v4247_v40 = vpop.f32.mrf.mxu1  ;;  %11785 = vmatmul.mubr.msk.f32.gmra.mxu1 %vm2870_vm4, %v17988_v38 }
 0x839   :  { %v16730_v24 = vadd.f32 %v4247_v40, %v16609_v28  ;;  %11787 = vmatprep.mubr.msk.f32.mxu1 %vm12694_vm0, %v12693_v2  ;;  %v9439_v28 = vld [vmem:[%s17922_s4 + $0x5b8] sm:$0xff]  ;;  %v9444_v40 = vld [vmem:[%s17922_s4 + $0x5e0] sm:$0xff] }
 0x83a   :  { %v11453_v50 = vpop.f32.mrf.mxu1  ;;  %12425 = vmatmul.mubr.msk.f32.gmra.mxu0 %vm491_vm1, %v9439_v28  ;;  %v9445_v28 = vld [vmem:[%s17922_s4 + $0x5e8] sm:$0xff] }
 0x83b   :  { %12427 = vmatprep.mubr.msk.f32.mxu0 %vm12694_vm0, %v12693_v2 }
 0x83c   :  { %v4252_v15 = vpop.f32.mrf.mxu1  ;;  %11788 = vmatmul.mubr.msk.f32.gmra.mxu1 %vm2870_vm4, %v17989_v14 }
 0x83d   :  { %v16739_v31 = vadd.f32 %v4252_v15, %v16616_v8  ;;  %11790 = vmatprep.mubr.msk.f32.mxu1 %vm12694_vm0, %v12693_v2  ;;  %v17995_v15 = vld [vmem:[#allocation32_spill] sm:$0xff] }
 0x83e   :  { %v11456_v11 = vpop.f32.mrf.mxu1  ;;  %12428 = vmatmul.mubr.msk.f32.gmra.mxu0 %vm491_vm1, %v9440_v1 }
 0x83f   :  { %12430 = vmatprep.mubr.msk.f32.mxu0 %vm12694_vm0, %v12693_v2 }
 0x840   :  { %v4257_v3 = vpop.f32.mrf.mxu1  ;;  %11791 = vmatmul.mubr.msk.f32.gmra.mxu1 %vm2870_vm4, %v17990_v46  ;;  %v17996_v46 = vld [vmem:[#allocation33_spill] sm:$0xff] }
 0x841   :  { %v16754_v8 = vadd.f32 %v4257_v3, %v16623_v18  ;;  %11856 = vmatprep.mubr.msk.f32.mxu1 %vm12694_vm0, %v12693_v2 }
 0x842   :  { %v11459_v44 = vpop.f32.mrf.mxu1  ;;  %12431 = vmatmul.mubr.msk.f32.gmra.mxu0 %vm491_vm1, %v9441_v35  ;;  %v9447_v35 = vld [vmem:[%s17922_s4 + $0x5f8] sm:$0xff] }
 0x843   :  { %12433 = vmatprep.mubr.msk.f32.mxu0 %vm12694_vm0, %v12693_v2  ;;  %v9446_v44 = vld [vmem:[%s17922_s4 + $0x5f0] sm:$0xff] }
 0x844   :  { %v4262_v18 = vpop.f32.mrf.mxu1  ;;  %11857 = vmatmul.mubr.msk.f32.vlgmr.msra.gmra.mxu1 %vm2870_vm4, %v17991_v43  ;;  %v17997_v43 = vld [vmem:[#allocation34_spill] sm:$0xff] }
 0x845   :  { %v16775_v47 = vadd.f32 %v4262_v18, %v16636_v26  ;;  %11859 = vmatprep.mubr.msk.f32.mxu1 %vm12694_vm0, %v12693_v2  ;;  %11951 = vmatpush3.msra.mxu1 %v9252_v37  ;;  %v12036_v26 = vpop.f32.mrf.mxu0 }
 0x846   :  { %v11462_v16 = vpop.f32.mrf.mxu1  ;;  %11952 = vmatprep.subr.mxu1 %v12693_v2  ;;  %12434 = vmatmul.mubr.msk.f32.gmra.mxu0 %vm491_vm1, %v9442_v36 }
 0x847   :  { %11953 = vmatpush3.msra.mxu1 %v9251_v62  ;;  %v16802_v34 = vpop.f32.mrf.mxu0  ;;  %12436 = vmatprep.mubr.msk.f32.mxu0 %vm12694_vm0, %v12693_v2 }
 0x848   :  { %v4267_v60 = vpop.f32.mrf.mxu1  ;;  %11860 = vmatmul.mubr.msk.f32.gmra.mxu1 %vm2870_vm4, %v17992_v23  ;;  %11954 = vmatprep.subr.mxu1 %v12693_v2 }
 0x849   :  { %v16798_v30 = vadd.f32 %v4267_v60, %v16651_v32  ;;  %11862 = vmatprep.mubr.msk.f32.mxu1 %vm12694_vm0, %v12693_v2  ;;  %11955 = vmatpush3.msra.mxu1 %v9250_v4  ;;  %v12039_v10 = vpop.f32.mrf.mxu0  ;;  %v17998_v60 = vld [vmem:[#allocation35_spill] sm:$0xff] }
 0x84a   :  { %v11465_v9 = vpop.f32.mrf.mxu1  ;;  %11956 = vmatprep.subr.mxu1 %v12693_v2  ;;  %12437 = vmatmul.mubr.msk.f32.gmra.mxu0 %vm491_vm1, %v9443_v19  ;;  %v9449_v19 = vld [vmem:[%s17922_s4 + $0x608] sm:$0xff] }
 0x84b   :  { %11957 = vmatpush3.msra.mxu1 %v9249_v6  ;;  %v16819_v61 = vpop.f32.mrf.mxu0  ;;  %12439 = vmatprep.mubr.msk.f32.mxu0 %vm12694_vm0, %v12693_v2  ;;  %v9448_v6 = vld [vmem:[%s17922_s4 + $0x600] sm:$0xff] }
 0x84c   :  { %v4272_v32 = vpop.f32.mrf.mxu1  ;;  %11863 = vmatmul.mubr.msk.f32.gmra.mxu1 %vm2870_vm4, %v17993_v59  ;;  %12052 = vmatprep.subr.mxu1 %v12693_v2 }
 0x84d   :  { %v16815_v58 = vadd.f32 %v4272_v32, %v16660_v5  ;;  %11865 = vmatprep.mubr.msk.f32.mxu1 %vm12694_vm0, %v12693_v2  ;;  %v12042_v29 = vpop.f32.mrf.mxu0  ;;  %v17999_v32 = vld [vmem:[#allocation36_spill] sm:$0xff] }
 0x84e   :  { %v11468_v27 = vpop.f32.mrf.mxu1  ;;  %12440 = vmatmul.mubr.msk.f32.gmra.mxu0 %vm491_vm1, %v9444_v40 }
 0x84f   :  { %v16834_v13 = vpop.f32.mrf.mxu0  ;;  %12442 = vmatprep.mubr.msk.f32.mxu0 %vm12694_vm0, %v12693_v2 }
 0x850   :  { %v4277_v39 = vpop.f32.mrf.mxu1  ;;  %11866 = vmatmul.mubr.msk.f32.gmra.mxu1 %vm2870_vm4, %v17994_v54  ;;  %v18000_v54 = vld [vmem:[#allocation37_spill] sm:$0xff] }
 0x851   :  { %v16830_v5 = vadd.f32 %v4277_v39, %v16667_v41  ;;  %11868 = vmatprep.mubr.msk.f32.mxu1 %vm12694_vm0, %v12693_v2  ;;  %v12045_v50 = vpop.f32.mrf.mxu0 }
 0x852   :  { %v11471_v38 = vpop.f32.mrf.mxu1  ;;  %12443 = vmatmul.mubr.msk.f32.gmra.mxu0 %vm491_vm1, %v9445_v28  ;;  %v18001_v28 = vld [vmem:[#allocation38_spill] sm:$0xff] }
 0x853   :  { %v16849_v14 = vpop.f32.mrf.mxu0  ;;  %12445 = vmatprep.mubr.msk.f32.mxu0 %vm12694_vm0, %v12693_v2  ;;  %v9450_v38 = vld [vmem:[%s17922_s4 + $0x610] sm:$0xf] }
 0x854   :  { %v4282_v17 = vpop.f32.mrf.mxu1  ;;  %11869 = vmatmul.mubr.msk.f32.gmra.mxu1 %vm2870_vm4, %v17995_v15 }
 0x855   :  { %v16845_v41 = vadd.f32 %v4282_v17, %v16676_v42  ;;  %11871 = vmatprep.mubr.msk.f32.mxu1 %vm12694_vm0, %v12693_v2  ;;  %v12048_v0 = vpop.f32.mrf.mxu0 }
 0x856   :  { %v11474_v11 = vpop.f32.mrf.mxu1  ;;  %12446 = vmatmul.mubr.msk.f32.gmra.mxu0 %vm491_vm1, %v9446_v44  ;;  %v9481_v0 = vld [vmem:[%s17922_s4 + $0x618] sm:$0xff] }
 0x857   :  { %v16864_v1 = vpop.f32.mrf.mxu0  ;;  %12448 = vmatprep.mubr.msk.f32.mxu0 %vm12694_vm0, %v12693_v2 }
 0x858   :  { %v4287_v3 = vpop.f32.mrf.mxu1  ;;  %11872 = vmatmul.mubr.msk.f32.gmra.mxu1 %vm2870_vm4, %v17996_v46 }
 0x859   :  { %v16860_v42 = vadd.f32 %v4287_v3, %v16685_v12  ;;  %11874 = vmatprep.mubr.msk.f32.mxu1 %vm12694_vm0, %v12693_v2  ;;  %v12051_v25 = vpop.f32.mrf.mxu0 }
 0x85a   :  { %v11477_v37 = vpop.f32.mrf.mxu1  ;;  %12449 = vmatmul.mubr.msk.f32.gmra.mxu0 %vm491_vm1, %v9447_v35 }
 0x85b   :  { %v16879_v62 = vpop.f32.mrf.mxu0  ;;  %12451 = vmatprep.mubr.msk.f32.mxu0 %vm12694_vm0, %v12693_v2  ;;  %v18002_v37 = vld [vmem:[#allocation39_spill] sm:$0xff] }
 0x85c   :  { %v4292_v18 = vpop.f32.mrf.mxu1  ;;  %11875 = vmatmul.mubr.msk.f32.gmra.mxu1 %vm2870_vm4, %v17997_v43 }
 0x85d   :  { %v16875_v12 = vadd.f32 %v4292_v18, %v16694_v48  ;;  %11877 = vmatprep.mubr.msk.f32.mxu1 %vm12694_vm0, %v12693_v2  ;;  %v12117_v4 = vpop.f32.mrf.mxu0  ;;  %v9482_v18 = vld [vmem:[%s17922_s4 + $0x620] sm:$0xff] }
 0x85e   :  { %v11480_v16 = vpop.f32.mrf.mxu1  ;;  %12452 = vmatmul.mubr.msk.f32.gmra.mxu0 %vm491_vm1, %v9448_v6  ;;  %v18003_v4 = vld [vmem:[#allocation40_spill] sm:$0xff] }
 0x85f   :  { %v16894_v23 = vpop.f32.mrf.mxu0  ;;  %12454 = vmatprep.mubr.msk.f32.mxu0 %vm12694_vm0, %v12693_v2 }
 0x860   :  { %v4297_v26 = vpop.f32.mrf.mxu1  ;;  %11878 = vmatmul.mubr.msk.f32.gmra.mxu1 %vm2870_vm4, %v17998_v60  ;;  %v9483_v60 = vld [vmem:[%s17922_s4 + $0x628] sm:$0xff] }
 0x861   :  { %v16890_v48 = vadd.f32 %v4297_v26, %v16703_v22  ;;  %11880 = vmatprep.mubr.msk.f32.mxu1 %vm12694_vm0, %v12693_v2  ;;  %v12120_v9 = vpop.f32.mrf.mxu0 }
 0x862   :  { %v11483_v36 = vpop.f32.mrf.mxu1  ;;  %12455 = vmatmul.mubr.msk.f32.gmra.mxu0 %vm491_vm1, %v9449_v19 }
 0x863   :  { %v16909_v59 = vpop.f32.mrf.mxu0  ;;  %12457 = vmatprep.mubr.msk.f32.mxu0 %vm12694_vm0, %v12693_v2  ;;  %v9295_v36 = vld [vmem:[%s17923_s5 + $0x158] sm:$0xff] }
 0x864   :  { %v4302_v10 = vpop.f32.mrf.mxu1  ;;  %11881 = vmatmul.mubr.msk.f32.gmra.mxu1 %vm2870_vm4, %v17999_v32  ;;  %v9294_v32 = vld [vmem:[%s17923_s5 + $0x150] sm:$0xff] }
 0x865   :  { %v16905_v22 = vadd.f32 %v4302_v10, %v16712_v49  ;;  %11883 = vmatprep.mubr.msk.f32.mxu1 %vm12694_vm0, %v12693_v2  ;;  %v12123_v29 = vpop.f32.mrf.mxu0  ;;  %v18004_v10 = vld [vmem:[#allocation41_spill] sm:$0xff] }
 0x866   :  { %v11486_v27 = vpop.f32.mrf.mxu1  ;;  %12458 = vmatmul.mubr.msk.f32.gmra.mxu0 %vm491_vm1, %v9450_v38  ;;  %v9484_v29 = vld [vmem:[%s17922_s4 + $0x630] sm:$0xff] }
 0x867   :  { %v16924_v40 = vpop.f32.mrf.mxu0  ;;  %12523 = vmatprep.mubr.msk.f32.mxu0 %vm12694_vm0, %v12693_v2 }
 0x868   :  { %v4612_v39 = vpop.f32.mrf.mxu1  ;;  %11884 = vmatmul.mubr.msk.f32.gmra.mxu1 %vm2870_vm4, %v18000_v54  ;;  %v9293_v54 = vld [vmem:[%s17923_s5 + $0x148] sm:$0xff] }
 0x869   :  { %v16920_v49 = vadd.f32 %v4612_v39, %v16721_v51  ;;  %11886 = vmatprep.mubr.msk.f32.mxu1 %vm12694_vm0, %v12693_v2  ;;  %v12126_v17 = vpop.f32.mrf.mxu0 }
 0x86a   :  { %v11552_v50 = vpop.f32.mrf.mxu1  ;;  %12524 = vmatmul.mubr.msk.f32.vlgmr.msra.gmra.mxu0 %vm491_vm1, %v9481_v0  ;;  %v9292_v17 = vld [vmem:[%s17923_s5 + $0x140] sm:$0xff]  ;;  %v9485_v0 = vld [vmem:[%s17922_s4 + $0x638] sm:$0xff] }
 0x86b   :  { %v16939_v11 = vpop.f32.mrf.mxu0  ;;  %12526 = vmatprep.mubr.msk.f32.mxu0 %vm12694_vm0, %v12693_v2  ;;  %v18005_v50 = vld [vmem:[#allocation42_spill] sm:$0xff] }
 0x86c   :  { %v4617_v15 = vpop.f32.mrf.mxu1  ;;  %11887 = vmatmul.mubr.msk.f32.gmra.mxu1 %vm2870_vm4, %v18001_v28 }
 0x86d   :  { %v16935_v51 = vadd.f32 %v4617_v15, %v16730_v24  ;;  %11889 = vmatprep.mubr.msk.f32.mxu1 %vm12694_vm0, %v12693_v2  ;;  %v12129_v46 = vpop.f32.mrf.mxu0 }
 0x86e   :  { %v11555_v3 = vpop.f32.mrf.mxu1  ;;  %12527 = vmatmul.mubr.msk.f32.gmra.mxu0 %vm491_vm1, %v9482_v18 }
 0x86f   :  { %v16954_v25 = vpop.f32.mrf.mxu0  ;;  %12529 = vmatprep.mubr.msk.f32.mxu0 %vm12694_vm0, %v12693_v2 }
 0x870   :  { %v4622_v44 = vpop.f32.mrf.mxu1  ;;  %11890 = vmatmul.mubr.msk.f32.gmra.mxu1 %vm2870_vm4, %v18002_v37 }
 0x871   :  { %v16950_v24 = vadd.f32 %v4622_v44, %v16739_v31  ;;  %11892 = vmatprep.mubr.msk.f32.mxu1 %vm12694_vm0, %v12693_v2  ;;  %v12132_v35 = vpop.f32.mrf.mxu0  ;;  %v18006_v44 = vld [vmem:[#allocation43_spill] sm:$0xff] }
 0x872   :  { %v11558_v43 = vpop.f32.mrf.mxu1  ;;  %12530 = vmatmul.mubr.msk.f32.gmra.mxu0 %vm491_vm1, %v9483_v60  ;;  %v18007_v60 = vld [vmem:[#allocation44_spill] sm:$0xff] }
 0x873   :  { %v16969_v26 = vpop.f32.mrf.mxu0  ;;  %12532 = vmatprep.mubr.msk.f32.mxu0 %vm12694_vm0, %v12693_v2  ;;  %v9486_v43 = vld [vmem:[%s17922_s4 + $0x640] sm:$0xff] }
 0x874   :  { %v4627_v16 = vpop.f32.mrf.mxu1  ;;  %11893 = vmatmul.mubr.msk.f32.gmra.mxu1 %vm2870_vm4, %v18003_v4 }
 0x875   :  { %v16965_v31 = vadd.f32 %v4627_v16, %v16754_v8  ;;  %11958 = vmatprep.mubr.msk.f32.mxu1 %vm12694_vm0, %v12693_v2  ;;  %v12135_v9 = vpop.f32.mrf.mxu0 }
 0x876   :  { %v11561_v6 = vpop.f32.mrf.mxu1  ;;  %12533 = vmatmul.mubr.msk.f32.gmra.mxu0 %vm491_vm1, %v9484_v29 }
 0x877   :  { %v16990_v27 = vpop.f32.mrf.mxu0  ;;  %12535 = vmatprep.mubr.msk.f32.mxu0 %vm12694_vm0, %v12693_v2 }
 0x878   :  { %v4632_v8 = vpop.f32.mrf.mxu1  ;;  %11959 = vmatmul.mubr.msk.f32.vlgmr.msra.gmra.mxu1 %vm2870_vm4, %v18004_v10 }
 0x879   :  { %v16986_v19 = vadd.f32 %v4632_v8, %v16775_v47  ;;  %11961 = vmatprep.mubr.msk.f32.mxu1 %vm12694_vm0, %v12693_v2  ;;  %12053 = vmatpush3.msra.mxu1 %v9295_v36  ;;  %v12138_v47 = vpop.f32.mrf.mxu0  ;;  %v9487_v36 = vld [vmem:[%s17922_s4 + $0x648] sm:$0xff] }
 0x87a   :  { %v11564_v39 = vpop.f32.mrf.mxu1  ;;  %12054 = vmatprep.subr.mxu1 %v12693_v2  ;;  %12536 = vmatmul.mubr.msk.f32.gmra.mxu0 %vm491_vm1, %v9485_v0  ;;  %v9489_v0 = vld [vmem:[%s17922_s4 + $0x658] sm:$0xff] }
 0x87b   :  { %12055 = vmatpush3.msra.mxu1 %v9294_v32  ;;  %v17013_v28 = vpop.f32.mrf.mxu0  ;;  %12538 = vmatprep.mubr.msk.f32.mxu0 %vm12694_vm0, %v12693_v2  ;;  %v18008_v32 = vld [vmem:[#allocation45_spill] sm:$0xff]  ;;  %v9488_v39 = vld [vmem:[%s17922_s4 + $0x650] sm:$0xff] }
 0x87c   :  { %v4637_v38 = vpop.f32.mrf.mxu1  ;;  %11962 = vmatmul.mubr.msk.f32.gmra.mxu1 %vm2870_vm4, %v18005_v50  ;;  %12056 = vmatprep.subr.mxu1 %v12693_v2  ;;  %v18009_v50 = vld [vmem:[#allocation46_spill] sm:$0xff] }
 0x87d   :  { %v17009_v15 = vadd.f32 %v4637_v38, %v16798_v30  ;;  %11964 = vmatprep.mubr.msk.f32.mxu1 %vm12694_vm0, %v12693_v2  ;;  %12057 = vmatpush3.msra.mxu1 %v9293_v54  ;;  %v12141_v46 = vpop.f32.mrf.mxu0 }
 0x87e   :  { %v11567_v3 = vpop.f32.mrf.mxu1  ;;  %12058 = vmatprep.subr.mxu1 %v12693_v2  ;;  %12539 = vmatmul.mubr.msk.f32.gmra.mxu0 %vm491_vm1, %v9486_v43 }
 0x87f   :  { %12059 = vmatpush3.msra.mxu1 %v9292_v17  ;;  %v17030_v18 = vpop.f32.mrf.mxu0  ;;  %12541 = vmatprep.mubr.msk.f32.mxu0 %vm12694_vm0, %v12693_v2 }
 0x880   :  { %v4642_v30 = vpop.f32.mrf.mxu1  ;;  %11965 = vmatmul.mubr.msk.f32.gmra.mxu1 %vm2870_vm4, %v18006_v44  ;;  %12154 = vmatprep.subr.mxu1 %v12693_v2  ;;  %v18010_v44 = vld [vmem:[#allocation47_spill] sm:$0xff] }
 0x881   :  { %v17026_v37 = vadd.f32 %v4642_v30, %v16815_v58  ;;  %11967 = vmatprep.mubr.msk.f32.mxu1 %vm12694_vm0, %v12693_v2  ;;  %v12144_v16 = vpop.f32.mrf.mxu0 }
 0x882   :  { %v11570_v35 = vpop.f32.mrf.mxu1  ;;  %12542 = vmatmul.mubr.msk.f32.gmra.mxu0 %vm491_vm1, %v9487_v36  ;;  %v18011_v36 = vld [vmem:[#allocation48_spill] sm:$0xff] }
 0x883   :  { %v17045_v6 = vpop.f32.mrf.mxu0  ;;  %12544 = vmatprep.mubr.msk.f32.mxu0 %vm12694_vm0, %v12693_v2  ;;  %v9490_v35 = vld [vmem:[%s17922_s4 + $0x660] sm:$0xff] }
 0x884   :  { %v4647_v4 = vpop.f32.mrf.mxu1  ;;  %11968 = vmatmul.mubr.msk.f32.gmra.mxu1 %vm2870_vm4, %v18007_v60 }
 0x885   :  { %v17041_v58 = vadd.f32 %v4647_v4, %v16830_v5  ;;  %11970 = vmatprep.mubr.msk.f32.mxu1 %vm12694_vm0, %v12693_v2  ;;  %v12147_v8 = vpop.f32.mrf.mxu0 }
 0x886   :  { %v11573_v9 = vpop.f32.mrf.mxu1  ;;  %12545 = vmatmul.mubr.msk.f32.gmra.mxu0 %vm491_vm1, %v9488_v39  ;;  %v9491_v8 = vld [vmem:[%s17922_s4 + $0x668] sm:$0xff] }
 0x887   :  { %v17060_v29 = vpop.f32.mrf.mxu0  ;;  %12547 = vmatprep.mubr.msk.f32.mxu0 %vm12694_vm0, %v12693_v2 }
 0x888   :  { %v4652_v10 = vpop.f32.mrf.mxu1  ;;  %11971 = vmatmul.mubr.msk.f32.gmra.mxu1 %vm2870_vm4, %v18008_v32 }
 0x889   :  { %v17056_v5 = vadd.f32 %v4652_v10, %v16845_v41  ;;  %11973 = vmatprep.mubr.msk.f32.mxu1 %vm12694_vm0, %v12693_v2  ;;  %v12150_v47 = vpop.f32.mrf.mxu0 }
 0x88a   :  { %v11576_v54 = vpop.f32.mrf.mxu1  ;;  %12548 = vmatmul.mubr.msk.f32.gmra.mxu0 %vm491_vm1, %v9489_v0 }
 0x88b   :  { %v17075_v17 = vpop.f32.mrf.mxu0  ;;  %12550 = vmatprep.mubr.msk.f32.mxu0 %vm12694_vm0, %v12693_v2  ;;  %v18012_v54 = vld [vmem:[#allocation49_spill] sm:$0xff] }
 0x88c   :  { %v4657_v38 = vpop.f32.mrf.mxu1  ;;  %11974 = vmatmul.mubr.msk.f32.gmra.mxu1 %vm2870_vm4, %v18009_v50 }
 0x88d   :  { %v17071_v41 = vadd.f32 %v4657_v38, %v16860_v42  ;;  %11976 = vmatprep.mubr.msk.f32.mxu1 %vm12694_vm0, %v12693_v2  ;;  %v12153_v46 = vpop.f32.mrf.mxu0  ;;  %v9492_v38 = vld [vmem:[%s17922_s4 + $0x670] sm:$0xff] }
 0x88e   :  { %v11579_v3 = vpop.f32.mrf.mxu1  ;;  %12551 = vmatmul.mubr.msk.f32.gmra.mxu0 %vm491_vm1, %v9490_v35  ;;  %v18013_v46 = vld [vmem:[#allocation50_spill] sm:$0xff] }
 0x88f   :  { %v17090_v43 = vpop.f32.mrf.mxu0  ;;  %12553 = vmatprep.mubr.msk.f32.mxu0 %vm12694_vm0, %v12693_v2 }
 0x890   :  { %v4662_v30 = vpop.f32.mrf.mxu1  ;;  %11977 = vmatmul.mubr.msk.f32.gmra.mxu1 %vm2870_vm4, %v18010_v44  ;;  %v9493_v44 = vld [vmem:[%s17922_s4 + $0x678] sm:$0xf] }
 0x891   :  { %v17086_v42 = vadd.f32 %v4662_v30, %v16875_v12  ;;  %11979 = vmatprep.mubr.msk.f32.mxu1 %vm12694_vm0, %v12693_v2  ;;  %v12219_v4 = vpop.f32.mrf.mxu0 }
 0x892   :  { %v11582_v16 = vpop.f32.mrf.mxu1  ;;  %12554 = vmatmul.mubr.msk.f32.gmra.mxu0 %vm491_vm1, %v9491_v8 }
 0x893   :  { %v17105_v9 = vpop.f32.mrf.mxu0  ;;  %12556 = vmatprep.mubr.msk.f32.mxu0 %vm12694_vm0, %v12693_v2 }
 0x894   :  { %v4667_v60 = vpop.f32.mrf.mxu1  ;;  %11980 = vmatmul.mubr.msk.f32.gmra.mxu1 %vm2870_vm4, %v18011_v36 }
 0x895   :  { %v17101_v12 = vadd.f32 %v4667_v60, %v16890_v48  ;;  %11982 = vmatprep.mubr.msk.f32.mxu1 %vm12694_vm0, %v12693_v2  ;;  %v12222_v32 = vpop.f32.mrf.mxu0 }
 0x896   :  { %v11585_v10 = vpop.f32.mrf.mxu1  ;;  %12557 = vmatmul.mubr.msk.f32.gmra.mxu0 %vm491_vm1, %v9492_v38 }
 0x897   :  { %v17120_v47 = vpop.f32.mrf.mxu0  ;;  %12559 = vmatprep.mubr.msk.f32.mxu0 %vm12694_vm0, %v12693_v2 }
 0x898   :  { %v4672_v39 = vpop.f32.mrf.mxu1  ;;  %11983 = vmatmul.mubr.msk.f32.gmra.mxu1 %vm2870_vm4, %v18012_v54 }
 0x899   :  { %v17116_v48 = vadd.f32 %v4672_v39, %v16905_v22  ;;  %11985 = vmatprep.mubr.msk.f32.mxu1 %vm12694_vm0, %v12693_v2  ;;  %v12225_v0 = vpop.f32.mrf.mxu0 }
 0x89a   :  { %v11588_v50 = vpop.f32.mrf.mxu1  ;;  %12560 = vmatmul.mubr.msk.f32.gmra.mxu0 %vm491_vm1, %v9493_v44 }
 0x89b   :  { %v17135_v30 = vpop.f32.mrf.mxu0  ;;  %12635 = vmatprep.mubr.msk.f32.mxu0 %vm12694_vm0, %v12693_v2  ;;  %v9338_v50 = vld [vmem:[%s17923_s5 + $0x178] sm:$0xff] }
 0x89c   :  { %v4982_v3 = vpop.f32.mrf.mxu1  ;;  %11986 = vmatmul.mubr.msk.f32.gmra.mxu1 %vm2870_vm4, %v18013_v46 }
 0x89d   :  { %v17131_v22 = vadd.f32 %v4982_v3, %v16920_v49  ;;  %11988 = vmatprep.mubr.msk.f32.mxu1 %vm12694_vm0, %v12693_v2  ;;  %v12228_v16 = vpop.f32.mrf.mxu0 }
 0x89e   :  { %v11654_v35 = vpop.f32.mrf.mxu1 }
 0x89f   :  { %v17150_v60 = vpop.f32.mrf.mxu0 }
 0x8a0   :  { %v4987_v4 = vpop.f32.mrf.mxu1  ;;  %11989 = vmatmul.mubr.msk.f32.gmra.mxu1 %vm2870_vm4, %v16671_v21 }
 0x8a1   :  { %v17146_v49 = vadd.f32 %v4987_v4, %v16935_v51  ;;  %11991 = vmatprep.mubr.msk.f32.mxu1 %vm12694_vm0, %v12693_v2  ;;  %v12231_v8 = vpop.f32.mrf.mxu0 }
 0x8a2   :  { %v11657_v36 = vpop.f32.mrf.mxu1 }
 0x8a3   :  { %v17159_v21 = vpop.f32.mrf.mxu0 }
 0x8a4   :  { %v4992_v10 = vpop.f32.mrf.mxu1  ;;  %11992 = vmatmul.mubr.msk.f32.gmra.mxu1 %vm2870_vm4, %v16680_v20 }
 0x8a5   :  { %v17155_v32 = vadd.f32 %v4992_v10, %v16950_v24  ;;  %11994 = vmatprep.mubr.msk.f32.mxu1 %vm12694_vm0, %v12693_v2  ;;  %v12234_v39 = vpop.f32.mrf.mxu0 }
 0x8a6   :  { %v11660_v51 = vpop.f32.mrf.mxu1 }
 0x8a7   :  { %v17168_v20 = vpop.f32.mrf.mxu0 }
 0x8a8   :  { %v4997_v54 = vpop.f32.mrf.mxu1  ;;  %11995 = vmatmul.mubr.msk.f32.gmra.mxu1 %vm2870_vm4, %v16689_v52  ;;  %v9337_v52 = vld [vmem:[%s17923_s5 + $0x170] sm:$0xff] }
 0x8a9   :  { %v17164_v38 = vadd.f32 %v4997_v54, %v16965_v31  ;;  %12060 = vmatprep.mubr.msk.f32.mxu1 %vm12694_vm0, %v12693_v2  ;;  %v12237_v0 = vpop.f32.mrf.mxu0 }
 0x8aa   :  { %v11663_v24 = vpop.f32.mrf.mxu1 }
 0x8ab   :  { %v17183_v46 = vpop.f32.mrf.mxu0 }
 0x8ac   :  { %v5002_v3 = vpop.f32.mrf.mxu1  ;;  %12061 = vmatmul.mubr.msk.f32.vlgmr.msra.gmra.mxu1 %vm2870_vm4, %v16698_v53  ;;  %v9336_v53 = vld [vmem:[%s17923_s5 + $0x168] sm:$0xff] }
 0x8ad   :  { %v17179_v31 = vadd.f32 %v5002_v3, %v16986_v19  ;;  %12063 = vmatprep.mubr.msk.f32.mxu1 %vm12694_vm0, %v12693_v2  ;;  %12155 = vmatpush3.msra.mxu1 %v9338_v50  ;;  %v12240_v35 = vpop.f32.mrf.mxu0  ;;  %v9335_v19 = vld [vmem:[%s17923_s5 + $0x160] sm:$0xff] }
 0x8ae   :  { %v11666_v44 = vpop.f32.mrf.mxu1  ;;  %12156 = vmatprep.subr.mxu1 %v12693_v2 }
 0x8af   :  { %12157 = vmatpush3.msra.mxu1 %v9337_v52  ;;  %v17200_v36 = vpop.f32.mrf.mxu0 }
 0x8b0   :  { %v5007_v16 = vpop.f32.mrf.mxu1  ;;  %12064 = vmatmul.mubr.msk.f32.gmra.mxu1 %vm2870_vm4, %v16707_v57  ;;  %12158 = vmatprep.subr.mxu1 %v12693_v2 }
 0x8b1   :  { %v17196_v4 = vadd.f32 %v5007_v16, %v17009_v15  ;;  %12066 = vmatprep.mubr.msk.f32.mxu1 %vm12694_vm0, %v12693_v2  ;;  %12159 = vmatpush3.msra.mxu1 %v9336_v53  ;;  %v12243_v57 = vpop.f32.mrf.mxu0 }
 0x8b2   :  { %v11669_v8 = vpop.f32.mrf.mxu1  ;;  %12160 = vmatprep.subr.mxu1 %v12693_v2 }
 0x8b3   :  { %12161 = vmatpush3.msra.mxu1 %v9335_v19  ;;  %v17211_v51 = vpop.f32.mrf.mxu0 }
 0x8b4   :  { %v5012_v10 = vpop.f32.mrf.mxu1  ;;  %12067 = vmatmul.mubr.msk.f32.gmra.mxu1 %vm2870_vm4, %v16716_v7  ;;  %12256 = vmatprep.subr.mxu1 %v12693_v2 }
 0x8b5   :  { %v17207_v15 = vadd.f32 %v5012_v10, %v17026_v37  ;;  %12069 = vmatprep.mubr.msk.f32.mxu1 %vm12694_vm0, %v12693_v2  ;;  %v12246_v54 = vpop.f32.mrf.mxu0 }
 0x8b6   :  { %v11672_v39 = vpop.f32.mrf.mxu1 }
 0x8b7   :  { %v17220_v7 = vpop.f32.mrf.mxu0 }
 0x8b8   :  { %v5017_v24 = vpop.f32.mrf.mxu1  ;;  %12070 = vmatmul.mubr.msk.f32.gmra.mxu1 %vm2870_vm4, %v16725_v33 }
 0x8b9   :  { %v17216_v50 = vadd.f32 %v5017_v24, %v17041_v58  ;;  %12072 = vmatprep.mubr.msk.f32.mxu1 %vm12694_vm0, %v12693_v2  ;;  %v12249_v0 = vpop.f32.mrf.mxu0 }
 0x8ba   :  { %v11675_v37 = vpop.f32.mrf.mxu1 }
 0x8bb   :  { %v17229_v33 = vpop.f32.mrf.mxu0 }
 0x8bc   :  { %v5022_v3 = vpop.f32.mrf.mxu1  ;;  %12073 = vmatmul.mubr.msk.f32.gmra.mxu1 %vm2870_vm4, %v16734_v55 }
 0x8bd   :  { %v17225_v52 = vadd.f32 %v5022_v3, %v17056_v5  ;;  %12075 = vmatprep.mubr.msk.f32.mxu1 %vm12694_vm0, %v12693_v2  ;;  %v12252_v44 = vpop.f32.mrf.mxu0 }
 0x8be   :  { %v11678_v58 = vpop.f32.mrf.mxu1 }
 0x8bf   :  { %v17238_v55 = vpop.f32.mrf.mxu0 }
 0x8c0   :  { %v5027_v53 = vpop.f32.mrf.mxu1  ;;  %12076 = vmatmul.mubr.msk.f32.gmra.mxu1 %vm2870_vm4, %v16743_v56 }
 0x8c1   :  { %v17234_v35 = vadd.f32 %v5027_v53, %v17071_v41  ;;  %12078 = vmatprep.mubr.msk.f32.mxu1 %vm12694_vm0, %v12693_v2  ;;  %v12255_v16 = vpop.f32.mrf.mxu0 }
 0x8c2   :  { %v11681_v5 = vpop.f32.mrf.mxu1 }
 0x8c3   :  { %v17247_v56 = vpop.f32.mrf.mxu0 }
 0x8c4   :  { %v5032_v19 = vpop.f32.mrf.mxu1  ;;  %12079 = vmatmul.mubr.msk.f32.gmra.mxu1 %vm2870_vm4, %v16758_v45 }
 0x8c5   :  { %v17243_v8 = vadd.f32 %v5032_v19, %v17086_v42  ;;  %12081 = vmatprep.mubr.msk.f32.mxu1 %vm12694_vm0, %v12693_v2  ;;  %v12321_v57 = vpop.f32.mrf.mxu0 }
 0x8c6   :  { %v11684_v41 = vpop.f32.mrf.mxu1 }
 0x8c7   :  { %v17256_v45 = vpop.f32.mrf.mxu0 }
 0x8c8   :  { %v5037_v10 = vpop.f32.mrf.mxu1  ;;  %12082 = vmatmul.mubr.msk.f32.gmra.mxu1 %vm2870_vm4, %v16779_v63 }
 0x8c9   :  { %v17252_v39 = vadd.f32 %v5037_v10, %v17101_v12  ;;  %12084 = vmatprep.mubr.msk.f32.mxu1 %vm12694_vm0, %v12693_v2  ;;  %v12324_v54 = vpop.f32.mrf.mxu0 }
 0x8ca   :  { %v11687_v42 = vpop.f32.mrf.mxu1  ;;  %v9381_v54 = vld [vmem:[%s17923_s5 + $0x198] sm:$0xff] }
 0x8cb   :  { %v17265_v63 = vpop.f32.mrf.mxu0 }
 0x8cc   :  { %v5042_v24 = vpop.f32.mrf.mxu1  ;;  %12085 = vmatmul.mubr.msk.f32.gmra.mxu1 %vm2870_vm4, %v16802_v34 }
 0x8cd   :  { %v17261_v37 = vadd.f32 %v5042_v24, %v17116_v48  ;;  %12087 = vmatprep.mubr.msk.f32.mxu1 %vm12694_vm0, %v12693_v2  ;;  %v12327_v0 = vpop.f32.mrf.mxu0 }
 0x8ce   :  { %v11690_v12 = vpop.f32.mrf.mxu1 }
 0x8cf   :  { %v17274_v34 = vpop.f32.mrf.mxu0 }
 0x8d0   :  { %v5352_v3 = vpop.f32.mrf.mxu1  ;;  %12088 = vmatmul.mubr.msk.f32.gmra.mxu1 %vm2870_vm4, %v16819_v61 }
 0x8d1   :  { %v17270_v58 = vadd.f32 %v5352_v3, %v17131_v22  ;;  %12090 = vmatprep.mubr.msk.f32.mxu1 %vm12694_vm0, %v12693_v2  ;;  %v12330_v44 = vpop.f32.mrf.mxu0 }
 0x8d2   :  { %v11756_v48 = vpop.f32.mrf.mxu1 }
 0x8d3   :  { %v17283_v61 = vpop.f32.mrf.mxu0 }
 0x8d4   :  { %v5357_v53 = vpop.f32.mrf.mxu1  ;;  %12091 = vmatmul.mubr.msk.f32.gmra.mxu1 %vm2870_vm4, %v16834_v13 }
 0x8d5   :  { %v17279_v5 = vadd.f32 %v5357_v53, %v17146_v49  ;;  %12093 = vmatprep.mubr.msk.f32.mxu1 %vm12694_vm0, %v12693_v2  ;;  %v12333_v16 = vpop.f32.mrf.mxu0 }
 0x8d6   :  { %v11759_v22 = vpop.f32.mrf.mxu1 }
 0x8d7   :  { %v17292_v13 = vpop.f32.mrf.mxu0 }
 0x8d8   :  { %v5362_v19 = vpop.f32.mrf.mxu1  ;;  %12094 = vmatmul.mubr.msk.f32.gmra.mxu1 %vm2870_vm4, %v16849_v14 }
 0x8d9   :  { %v17288_v41 = vadd.f32 %v5362_v19, %v17155_v32  ;;  %12096 = vmatprep.mubr.msk.f32.mxu1 %vm12694_vm0, %v12693_v2  ;;  %v12336_v57 = vpop.f32.mrf.mxu0 }
 0x8da   :  { %v11762_v49 = vpop.f32.mrf.mxu1 }
 0x8db   :  { %v17301_v14 = vpop.f32.mrf.mxu0 }
 0x8dc   :  { %v5367_v10 = vpop.f32.mrf.mxu1  ;;  %12097 = vmatmul.mubr.msk.f32.gmra.mxu1 %vm2870_vm4, %v16864_v1  ;;  %v9380_v1 = vld [vmem:[%s17923_s5 + $0x190] sm:$0xff] }
 0x8dd   :  { %v17297_v42 = vadd.f32 %v5367_v10, %v17164_v38  ;;  %12162 = vmatprep.mubr.msk.f32.mxu1 %vm12694_vm0, %v12693_v2  ;;  %v12339_v24 = vpop.f32.mrf.mxu0 }
 0x8de   :  { %v11765_v32 = vpop.f32.mrf.mxu1 }
 0x8df   :  { %v17316_v0 = vpop.f32.mrf.mxu0 }
 0x8e0   :  { %v5372_v12 = vpop.f32.mrf.mxu1  ;;  %12163 = vmatmul.mubr.msk.f32.vlgmr.msra.gmra.mxu1 %vm2870_vm4, %v16879_v62  ;;  %v9379_v62 = vld [vmem:[%s17923_s5 + $0x188] sm:$0xff] }
 0x8e1   :  { %v17312_v38 = vadd.f32 %v5372_v12, %v17179_v31  ;;  %12165 = vmatprep.mubr.msk.f32.mxu1 %vm12694_vm0, %v12693_v2  ;;  %12257 = vmatpush3.msra.mxu1 %v9381_v54  ;;  %v12342_v48 = vpop.f32.mrf.mxu0  ;;  %v9378_v31 = vld [vmem:[%s17923_s5 + $0x180] sm:$0xff] }
 0x8e2   :  { %v11768_v3 = vpop.f32.mrf.mxu1  ;;  %12258 = vmatprep.subr.mxu1 %v12693_v2 }
 0x8e3   :  { %12259 = vmatpush3.msra.mxu1 %v9380_v1  ;;  %v17333_v22 = vpop.f32.mrf.mxu0 }
 0x8e4   :  { %v5377_v44 = vpop.f32.mrf.mxu1  ;;  %12166 = vmatmul.mubr.msk.f32.gmra.mxu1 %vm2870_vm4, %v16894_v23  ;;  %12260 = vmatprep.subr.mxu1 %v12693_v2 }
 0x8e5   :  { %v17329_v53 = vadd.f32 %v5377_v44, %v17196_v4  ;;  %12168 = vmatprep.mubr.msk.f32.mxu1 %vm12694_vm0, %v12693_v2  ;;  %12261 = vmatpush3.msra.mxu1 %v9379_v62  ;;  %v12345_v23 = vpop.f32.mrf.mxu0 }
 0x8e6   :  { %v11771_v16 = vpop.f32.mrf.mxu1  ;;  %12262 = vmatprep.subr.mxu1 %v12693_v2 }
 0x8e7   :  { %12263 = vmatpush3.msra.mxu1 %v9378_v31  ;;  %v17344_v49 = vpop.f32.mrf.mxu0 }
 0x8e8   :  { %v5382_v19 = vpop.f32.mrf.mxu1  ;;  %12169 = vmatmul.mubr.msk.f32.gmra.mxu1 %vm2870_vm4, %v16909_v59  ;;  %12358 = vmatprep.subr.mxu1 %v12693_v2 }
 0x8e9   :  { %v17340_v4 = vadd.f32 %v5382_v19, %v17207_v15  ;;  %12171 = vmatprep.mubr.msk.f32.mxu1 %vm12694_vm0, %v12693_v2  ;;  %v12348_v10 = vpop.f32.mrf.mxu0 }
 0x8ea   :  { %v11774_v57 = vpop.f32.mrf.mxu1 }
 0x8eb   :  { %v17353_v59 = vpop.f32.mrf.mxu0 }
 0x8ec   :  { %v5387_v32 = vpop.f32.mrf.mxu1  ;;  %12172 = vmatmul.mubr.msk.f32.gmra.mxu1 %vm2870_vm4, %v16924_v40 }
 0x8ed   :  { %v17349_v54 = vadd.f32 %v5387_v32, %v17216_v50  ;;  %12174 = vmatprep.mubr.msk.f32.mxu1 %vm12694_vm0, %v12693_v2  ;;  %v12351_v24 = vpop.f32.mrf.mxu0 }
 0x8ee   :  { %v11777_v15 = vpop.f32.mrf.mxu1 }
 0x8ef   :  { %v17362_v40 = vpop.f32.mrf.mxu0 }
 0x8f0   :  { %v5392_v12 = vpop.f32.mrf.mxu1  ;;  %12175 = vmatmul.mubr.msk.f32.gmra.mxu1 %vm2870_vm4, %v16939_v11 }
 0x8f1   :  { %v17358_v1 = vadd.f32 %v5392_v12, %v17225_v52  ;;  %12177 = vmatprep.mubr.msk.f32.mxu1 %vm12694_vm0, %v12693_v2  ;;  %v12354_v3 = vpop.f32.mrf.mxu0 }
 0x8f2   :  { %v11780_v50 = vpop.f32.mrf.mxu1 }
 0x8f3   :  { %v17371_v11 = vpop.f32.mrf.mxu0 }
 0x8f4   :  { %v5397_v62 = vpop.f32.mrf.mxu1  ;;  %12178 = vmatmul.mubr.msk.f32.gmra.mxu1 %vm2870_vm4, %v16954_v25 }
 0x8f5   :  { %v17367_v48 = vadd.f32 %v5397_v62, %v17234_v35  ;;  %12180 = vmatprep.mubr.msk.f32.mxu1 %vm12694_vm0, %v12693_v2  ;;  %v12357_v44 = vpop.f32.mrf.mxu0 }
 0x8f6   :  { %v11783_v52 = vpop.f32.mrf.mxu1 }
 0x8f7   :  { %v17380_v25 = vpop.f32.mrf.mxu0 }
 0x8f8   :  { %v5402_v31 = vpop.f32.mrf.mxu1  ;;  %12181 = vmatmul.mubr.msk.f32.gmra.mxu1 %vm2870_vm4, %v16969_v26 }
 0x8f9   :  { %v17376_v16 = vadd.f32 %v5402_v31, %v17243_v8  ;;  %12183 = vmatprep.mubr.msk.f32.mxu1 %vm12694_vm0, %v12693_v2  ;;  %v12423_v23 = vpop.f32.mrf.mxu0 }
 0x8fa   :  { %v11786_v35 = vpop.f32.mrf.mxu1 }
 0x8fb   :  { %v17389_v8 = vpop.f32.mrf.mxu0 }
 0x8fc   :  { %v5407_v19 = vpop.f32.mrf.mxu1  ;;  %12184 = vmatmul.mubr.msk.f32.gmra.mxu1 %vm2870_vm4, %v16990_v27 }
 0x8fd   :  { %v17385_v57 = vadd.f32 %v5407_v19, %v17252_v39  ;;  %12186 = vmatprep.mubr.msk.f32.mxu1 %vm12694_vm0, %v12693_v2  ;;  %v12426_v32 = vpop.f32.mrf.mxu0 }
 0x8fe   :  { %v11789_v26 = vpop.f32.mrf.mxu1 }
 0x8ff   :  { %v17398_v39 = vpop.f32.mrf.mxu0 }
 0x900   :  { %v5412_v10 = vpop.f32.mrf.mxu1  ;;  %12187 = vmatmul.mubr.msk.f32.gmra.mxu1 %vm2870_vm4, %v17013_v28 }
 0x901   :  { %v17394_v15 = vadd.f32 %v5412_v10, %v17261_v37  ;;  %12189 = vmatprep.mubr.msk.f32.mxu1 %vm12694_vm0, %v12693_v2  ;;  %v12429_v12 = vpop.f32.mrf.mxu0 }
 0x902   :  { %v11792_v27 = vpop.f32.mrf.mxu1  ;;  %v9422_v12 = vld [vmem:[%s17923_s5 + $0x1a8] sm:$0xff] }
 0x903   :  { %v17407_v37 = vpop.f32.mrf.mxu0 }
 0x904   :  { %v5722_v24 = vpop.f32.mrf.mxu1  ;;  %12190 = vmatmul.mubr.msk.f32.gmra.mxu1 %vm2870_vm4, %v17030_v18 }
 0x905   :  { %v17403_v50 = vadd.f32 %v5722_v24, %v17270_v58  ;;  %12192 = vmatprep.mubr.msk.f32.mxu1 %vm12694_vm0, %v12693_v2  ;;  %v12432_v62 = vpop.f32.mrf.mxu0 }
 0x906   :  { %v11858_v28 = vpop.f32.mrf.mxu1 }
 0x907   :  { %v17416_v58 = vpop.f32.mrf.mxu0 }
 0x908   :  { %v5727_v3 = vpop.f32.mrf.mxu1  ;;  %12193 = vmatmul.mubr.msk.f32.gmra.mxu1 %vm2870_vm4, %v17045_v6 }
 0x909   :  { %v17412_v52 = vadd.f32 %v5727_v3, %v17279_v5  ;;  %12195 = vmatprep.mubr.msk.f32.mxu1 %vm12694_vm0, %v12693_v2  ;;  %v12435_v31 = vpop.f32.mrf.mxu0 }
 0x90a   :  { %v11861_v18 = vpop.f32.mrf.mxu1 }
 0x90b   :  { %v17425_v5 = vpop.f32.mrf.mxu0 }
 0x90c   :  { %v5732_v44 = vpop.f32.mrf.mxu1  ;;  %12196 = vmatmul.mubr.msk.f32.gmra.mxu1 %vm2870_vm4, %v17060_v29 }
 0x90d   :  { %v17421_v35 = vadd.f32 %v5732_v44, %v17288_v41  ;;  %12198 = vmatprep.mubr.msk.f32.mxu1 %vm12694_vm0, %v12693_v2  ;;  %v12438_v19 = vpop.f32.mrf.mxu0  ;;  %v9424_v41 = vld [vmem:[%s17923_s5 + $0x1b8] sm:$0xff] }
 0x90e   :  { %v11864_v6 = vpop.f32.mrf.mxu1 }
 0x90f   :  { %v17437_v10 = vpop.f32.mrf.mxu0 }
 0x910   :  { %v5737_v23 = vpop.f32.mrf.mxu1  ;;  %12199 = vmatmul.mubr.msk.f32.gmra.mxu1 %vm2870_vm4, %v17075_v17  ;;  %v9423_v17 = vld [vmem:[%s17923_s5 + $0x1b0] sm:$0xff] }
 0x911   :  { %v17430_v26 = vadd.f32 %v5737_v23, %v17297_v42  ;;  %12264 = vmatprep.mubr.msk.f32.mxu1 %vm12694_vm0, %v12693_v2  ;;  %v12441_v42 = vpop.f32.mrf.mxu0 }
 0x912   :  { %v11867_v29 = vpop.f32.mrf.mxu1 }
 0x914   :  { %v5742_v32 = vpop.f32.mrf.mxu1  ;;  %12265 = vmatmul.mubr.msk.f32.vlgmr.msra.gmra.mxu1 %vm2870_vm4, %v17090_v43  ;;  %v17453_v43 = vpop.f32.mrf.mxu0 }
 0x915   :  { %v17445_v27 = vadd.f32 %v5742_v32, %v17312_v38  ;;  %12267 = vmatprep.mubr.msk.f32.mxu1 %vm12694_vm0, %v12693_v2  ;;  %12359 = vmatpush3.msra.mxu1 %v9424_v41  ;;  %v9421_v38 = vld [vmem:[%s17923_s5 + $0x1a0] sm:$0xff] }
 0x916   :  { %v11870_v24 = vpop.f32.mrf.mxu1  ;;  %12360 = vmatprep.subr.mxu1 %v12693_v2  ;;  %v12444_v3 = vpop.f32.mrf.mxu0 }
 0x917   :  { %12361 = vmatpush3.msra.mxu1 %v9423_v17 }
 0x918   :  { %v5747_v28 = vpop.f32.mrf.mxu1  ;;  %12268 = vmatmul.mubr.msk.f32.gmra.mxu1 %vm2870_vm4, %v17105_v9  ;;  %12362 = vmatprep.subr.mxu1 %v12693_v2  ;;  %v17467_v44 = vpop.f32.mrf.mxu0 }
 0x919   :  { %v17462_v62 = vadd.f32 %v5747_v28, %v17329_v53  ;;  %12270 = vmatprep.mubr.msk.f32.mxu1 %vm12694_vm0, %v12693_v2  ;;  %12363 = vmatpush3.msra.mxu1 %v9422_v12 }
 0x91a   :  { %v11873_v18 = vpop.f32.mrf.mxu1  ;;  %12364 = vmatprep.subr.mxu1 %v12693_v2  ;;  %v12447_v31 = vpop.f32.mrf.mxu0 }
 0x91b   :  { %12365 = vmatpush3.msra.mxu1 %v9421_v38 }
 0x91c   :  { %v5752_v9 = vpop.f32.mrf.mxu1  ;;  %12271 = vmatmul.mubr.msk.f32.gmra.mxu1 %vm2870_vm4, %v17120_v47  ;;  %12460 = vmatprep.subr.mxu1 %v12693_v2  ;;  %v17477_v23 = vpop.f32.mrf.mxu0 }
 0x91d   :  { %v17473_v53 = vadd.f32 %v5752_v9, %v17340_v4  ;;  %12273 = vmatprep.mubr.msk.f32.mxu1 %vm12694_vm0, %v12693_v2 }
 0x91e   :  { %v11876_v6 = vpop.f32.mrf.mxu1  ;;  %v12450_v29 = vpop.f32.mrf.mxu0 }
 0x920   :  { %v5757_v19 = vpop.f32.mrf.mxu1  ;;  %12274 = vmatmul.mubr.msk.f32.gmra.mxu1 %vm2870_vm4, %v17135_v30  ;;  %v17486_v4 = vpop.f32.mrf.mxu0 }
 0x921   :  { %v17482_v41 = vadd.f32 %v5757_v19, %v17349_v54  ;;  %12276 = vmatprep.mubr.msk.f32.mxu1 %vm12694_vm0, %v12693_v2 }
 0x922   :  { %v11879_v47 = vpop.f32.mrf.mxu1  ;;  %v12453_v17 = vpop.f32.mrf.mxu0 }
 0x924   :  { %v5762_v32 = vpop.f32.mrf.mxu1  ;;  %12277 = vmatmul.mubr.msk.f32.gmra.mxu1 %vm2870_vm4, %v17150_v60  ;;  %v17495_v54 = vpop.f32.mrf.mxu0 }
 0x925   :  { %v17491_v42 = vadd.f32 %v5762_v32, %v17358_v1  ;;  %12279 = vmatprep.mubr.msk.f32.mxu1 %vm12694_vm0, %v12693_v2 }
 0x926   :  { %v11882_v30 = vpop.f32.mrf.mxu1  ;;  %v12456_v12 = vpop.f32.mrf.mxu0 }
 0x928   :  { %v5767_v24 = vpop.f32.mrf.mxu1  ;;  %12280 = vmatmul.mubr.msk.f32.gmra.mxu1 %vm2870_vm4, %v17159_v21  ;;  %v17504_v1 = vpop.f32.mrf.mxu0 }
 0x929   :  { %v17500_v28 = vadd.f32 %v5767_v24, %v17367_v48  ;;  %12282 = vmatprep.mubr.msk.f32.mxu1 %vm12694_vm0, %v12693_v2 }
 0x92a   :  { %v11885_v60 = vpop.f32.mrf.mxu1  ;;  %v12459_v3 = vpop.f32.mrf.mxu0 }
 0x92c   :  { %v5772_v38 = vpop.f32.mrf.mxu1  ;;  %12283 = vmatmul.mubr.msk.f32.gmra.mxu1 %vm2870_vm4, %v17168_v20  ;;  %v17513_v48 = vpop.f32.mrf.mxu0 }
 0x92d   :  { %v17509_v18 = vadd.f32 %v5772_v38, %v17376_v16  ;;  %12285 = vmatprep.mubr.msk.f32.mxu1 %vm12694_vm0, %v12693_v2 }
 0x92e   :  { %v11888_v21 = vpop.f32.mrf.mxu1  ;;  %v12525_v31 = vpop.f32.mrf.mxu0 }
 0x930   :  { %v5777_v9 = vpop.f32.mrf.mxu1  ;;  %12286 = vmatmul.mubr.msk.f32.gmra.mxu1 %vm2870_vm4, %v17183_v46  ;;  %v17522_v16 = vpop.f32.mrf.mxu0 }
 0x931   :  { %v17518_v6 = vadd.f32 %v5777_v9, %v17385_v57  ;;  %12288 = vmatprep.mubr.msk.f32.mxu1 %vm12694_vm0, %v12693_v2 }
 0x932   :  { %v11891_v20 = vpop.f32.mrf.mxu1  ;;  %v12528_v29 = vpop.f32.mrf.mxu0 }
 0x934   :  { %v5782_v19 = vpop.f32.mrf.mxu1  ;;  %12289 = vmatmul.mubr.msk.f32.gmra.mxu1 %vm2870_vm4, %v17200_v36  ;;  %v17531_v57 = vpop.f32.mrf.mxu0 }
 0x935   :  { %v17527_v47 = vadd.f32 %v5782_v19, %v17394_v15  ;;  %12291 = vmatprep.mubr.msk.f32.mxu1 %vm12694_vm0, %v12693_v2 }
 0x936   :  { %v11894_v46 = vpop.f32.mrf.mxu1  ;;  %v12531_v17 = vpop.f32.mrf.mxu0 }
 0x937   :  { %v9465_v17 = vld [vmem:[%s17923_s5 + $0x1c8] sm:$0xff] }
 0x938   :  { %v6092_v32 = vpop.f32.mrf.mxu1  ;;  %12292 = vmatmul.mubr.msk.f32.gmra.mxu1 %vm2870_vm4, %v17211_v51  ;;  %v17540_v15 = vpop.f32.mrf.mxu0 }
 0x939   :  { %v17536_v30 = vadd.f32 %v6092_v32, %v17403_v50  ;;  %12294 = vmatprep.mubr.msk.f32.mxu1 %vm12694_vm0, %v12693_v2 }
 0x93a   :  { %v11960_v36 = vpop.f32.mrf.mxu1  ;;  %v12534_v12 = vpop.f32.mrf.mxu0 }
 0x93c   :  { %v6097_v24 = vpop.f32.mrf.mxu1  ;;  %12295 = vmatmul.mubr.msk.f32.gmra.mxu1 %vm2870_vm4, %v17220_v7  ;;  %v17549_v50 = vpop.f32.mrf.mxu0 }
 0x93d   :  { %v17545_v60 = vadd.f32 %v6097_v24, %v17412_v52  ;;  %12297 = vmatprep.mubr.msk.f32.mxu1 %vm12694_vm0, %v12693_v2 }
 0x93e   :  { %v11963_v51 = vpop.f32.mrf.mxu1  ;;  %v12537_v3 = vpop.f32.mrf.mxu0 }
 0x940   :  { %v6102_v38 = vpop.f32.mrf.mxu1  ;;  %12298 = vmatmul.mubr.msk.f32.gmra.mxu1 %vm2870_vm4, %v17229_v33  ;;  %v17558_v52 = vpop.f32.mrf.mxu0 }
 0x941   :  { %v17554_v21 = vadd.f32 %v6102_v38, %v17421_v35  ;;  %12300 = vmatprep.mubr.msk.f32.mxu1 %vm12694_vm0, %v12693_v2  ;;  %v9467_v35 = vld [vmem:[%s17923_s5 + $0x1d8] sm:$0xff] }
 0x942   :  { %v11966_v7 = vpop.f32.mrf.mxu1  ;;  %v12540_v31 = vpop.f32.mrf.mxu0 }
 0x944   :  { %v6107_v9 = vpop.f32.mrf.mxu1  ;;  %12301 = vmatmul.mubr.msk.f32.gmra.mxu1 %vm2870_vm4, %v17238_v55  ;;  %v17570_v19 = vpop.f32.mrf.mxu0  ;;  %v9466_v55 = vld [vmem:[%s17923_s5 + $0x1d0] sm:$0xff] }
 0x945   :  { %v17563_v20 = vadd.f32 %v6107_v9, %v17430_v26  ;;  %12366 = vmatprep.mubr.msk.f32.mxu1 %vm12694_vm0, %v12693_v2 }
 0x946   :  { %v11969_v33 = vpop.f32.mrf.mxu1  ;;  %v12543_v26 = vpop.f32.mrf.mxu0 }
 0x948   :  { %v6112_v29 = vpop.f32.mrf.mxu1  ;;  %12367 = vmatmul.mubr.msk.f32.vlgmr.msra.gmra.mxu1 %vm2870_vm4, %v17247_v56  ;;  %v17586_v56 = vpop.f32.mrf.mxu0 }
 0x949   :  { %v17578_v46 = vadd.f32 %v6112_v29, %v17445_v27  ;;  %12369 = vmatprep.mubr.msk.f32.mxu1 %vm12694_vm0, %v12693_v2  ;;  %12461 = vmatpush3.msra.mxu1 %v9467_v35  ;;  %v9464_v27 = vld [vmem:[%s17923_s5 + $0x1c0] sm:$0xff] }
 0x94a   :  { %v11972_v32 = vpop.f32.mrf.mxu1  ;;  %12462 = vmatprep.subr.mxu1 %v12693_v2  ;;  %v12546_v24 = vpop.f32.mrf.mxu0 }
 0x94b   :  { %12463 = vmatpush3.msra.mxu1 %v9466_v55 }
 0x94c   :  { %v6117_v36 = vpop.f32.mrf.mxu1  ;;  %12370 = vmatmul.mubr.msk.f32.gmra.mxu1 %vm2870_vm4, %v17256_v45  ;;  %12464 = vmatprep.subr.mxu1 %v12693_v2  ;;  %v17600_v38 = vpop.f32.mrf.mxu0 }
 0x94d   :  { %v17595_v12 = vadd.f32 %v6117_v36, %v17462_v62  ;;  %12372 = vmatprep.mubr.msk.f32.mxu1 %vm12694_vm0, %v12693_v2  ;;  %12465 = vmatpush3.msra.mxu1 %v9465_v17 }
 0x94e   :  { %v11975_v51 = vpop.f32.mrf.mxu1  ;;  %12466 = vmatprep.subr.mxu1 %v12693_v2  ;;  %v12549_v3 = vpop.f32.mrf.mxu0 }
 0x94f   :  { %12467 = vmatpush3.msra.mxu1 %v9464_v27 }
 0x950   :  { %v6122_v45 = vpop.f32.mrf.mxu1  ;;  %12373 = vmatmul.mubr.msk.f32.gmra.mxu1 %vm2870_vm4, %v17265_v63  ;;  %12562 = vmatprep.subr.mxu1 %v12693_v2  ;;  %v17610_v9 = vpop.f32.mrf.mxu0 }
 0x951   :  { %v17606_v62 = vadd.f32 %v6122_v45, %v17473_v53  ;;  %12375 = vmatprep.mubr.msk.f32.mxu1 %vm12694_vm0, %v12693_v2 }
 0x952   :  { %v11978_v7 = vpop.f32.mrf.mxu1  ;;  %v12552_v33 = vpop.f32.mrf.mxu0 }
 0x954   :  { %v6127_v31 = vpop.f32.mrf.mxu1  ;;  %12376 = vmatmul.mubr.msk.f32.gmra.mxu1 %vm2870_vm4, %v17274_v34  ;;  %v17619_v53 = vpop.f32.mrf.mxu0 }
 0x955   :  { %v17615_v35 = vadd.f32 %v6127_v31, %v17482_v41  ;;  %12378 = vmatprep.mubr.msk.f32.mxu1 %vm12694_vm0, %v12693_v2 }
 0x956   :  { %v11981_v63 = vpop.f32.mrf.mxu1  ;;  %v12555_v55 = vpop.f32.mrf.mxu0 }
 0x957   :  { %v9509_v55 = vld [vmem:[%s17923_s5 + $0x1f0] sm:$0xff] }
 0x958   :  { %v6132_v29 = vpop.f32.mrf.mxu1  ;;  %12379 = vmatmul.mubr.msk.f32.gmra.mxu1 %vm2870_vm4, %v17283_v61  ;;  %v17628_v41 = vpop.f32.mrf.mxu0 }
 0x959   :  { %v17624_v26 = vadd.f32 %v6132_v29, %v17491_v42  ;;  %12381 = vmatprep.mubr.msk.f32.mxu1 %vm12694_vm0, %v12693_v2 }
 0x95a   :  { %v11984_v34 = vpop.f32.mrf.mxu1  ;;  %v12558_v17 = vpop.f32.mrf.mxu0 }
 0x95b   :  { %v9508_v34 = vld [vmem:[%s17923_s5 + $0x1e8] sm:$0xff] }
 0x95c   :  { %v6137_v32 = vpop.f32.mrf.mxu1  ;;  %12382 = vmatmul.mubr.msk.f32.gmra.mxu1 %vm2870_vm4, %v17292_v13  ;;  %v17637_v42 = vpop.f32.mrf.mxu0 }
 0x95d   :  { %v17633_v36 = vadd.f32 %v6137_v32, %v17500_v28  ;;  %12384 = vmatprep.mubr.msk.f32.mxu1 %vm12694_vm0, %v12693_v2 }
 0x95e   :  { %v11987_v61 = vpop.f32.mrf.mxu1  ;;  %v12561_v24 = vpop.f32.mrf.mxu0 }
 0x960   :  { %v6142_v27 = vpop.f32.mrf.mxu1  ;;  %12385 = vmatmul.mubr.msk.f32.gmra.mxu1 %vm2870_vm4, %v17301_v14 }
 0x961   :  { %v17642_v51 = vadd.f32 %v6142_v27, %v17509_v18  ;;  %12387 = vmatprep.mubr.msk.f32.mxu1 %vm12694_vm0, %v12693_v2 }
 0x962   :  { %v11990_v13 = vpop.f32.mrf.mxu1 }
 0x964   :  { %v6147_v28 = vpop.f32.mrf.mxu1  ;;  %12388 = vmatmul.mubr.msk.f32.gmra.mxu1 %vm2870_vm4, %v17316_v0 }
 0x965   :  { %v17649_v45 = vadd.f32 %v6147_v28, %v17518_v6  ;;  %12390 = vmatprep.mubr.msk.f32.mxu1 %vm12694_vm0, %v12693_v2 }
 0x966   :  { %v11993_v3 = vpop.f32.mrf.mxu1 }
 0x968   :  { %v6152_v14 = vpop.f32.mrf.mxu1  ;;  %12391 = vmatmul.mubr.msk.f32.gmra.mxu1 %vm2870_vm4, %v17333_v22 }
 0x969   :  { %v17656_v18 = vadd.f32 %v6152_v14, %v17527_v47  ;;  %12393 = vmatprep.mubr.msk.f32.mxu1 %vm12694_vm0, %v12693_v2 }
 0x96a   :  { %v11996_v7 = vpop.f32.mrf.mxu1 }
 0x96c   :  { %v6462_v31 = vpop.f32.mrf.mxu1  ;;  %12394 = vmatmul.mubr.msk.f32.gmra.mxu1 %vm2870_vm4, %v17344_v49 }
 0x96d   :  { %v17663_v0 = vadd.f32 %v6462_v31, %v17536_v30  ;;  %12396 = vmatprep.mubr.msk.f32.mxu1 %vm12694_vm0, %v12693_v2 }
 0x96e   :  { %v12062_v6 = vpop.f32.mrf.mxu1 }
 0x970   :  { %v6467_v33 = vpop.f32.mrf.mxu1  ;;  %12397 = vmatmul.mubr.msk.f32.gmra.mxu1 %vm2870_vm4, %v17353_v59 }
 0x971   :  { %v17670_v22 = vadd.f32 %v6467_v33, %v17545_v60  ;;  %12399 = vmatprep.mubr.msk.f32.mxu1 %vm12694_vm0, %v12693_v2 }
 0x972   :  { %v12065_v47 = vpop.f32.mrf.mxu1 }
 0x974   :  { %v6472_v63 = vpop.f32.mrf.mxu1  ;;  %12400 = vmatmul.mubr.msk.f32.gmra.mxu1 %vm2870_vm4, %v17362_v40  ;;  %v9510_v40 = vld [vmem:[%s17923_s5 + $0x1f8] sm:$0xff] }
 0x975   :  { %v17677_v49 = vadd.f32 %v6472_v63, %v17554_v21  ;;  %12402 = vmatprep.mubr.msk.f32.mxu1 %vm12694_vm0, %v12693_v2 }
 0x976   :  { %v12068_v30 = vpop.f32.mrf.mxu1 }
 0x978   :  { %v6477_v29 = vpop.f32.mrf.mxu1  ;;  %12403 = vmatmul.mubr.msk.f32.gmra.mxu1 %vm2870_vm4, %v17371_v11 }
 0x979   :  { %v17684_v59 = vadd.f32 %v6477_v29, %v17563_v20  ;;  %12468 = vmatprep.mubr.msk.f32.mxu1 %vm12694_vm0, %v12693_v2 }
 0x97a   :  { %v12071_v60 = vpop.f32.mrf.mxu1 }
 0x97c   :  { %v6482_v21 = vpop.f32.mrf.mxu1  ;;  %12469 = vmatmul.mubr.msk.f32.vlgmr.msra.gmra.mxu1 %vm2870_vm4, %v17380_v25 }
 0x97d   :  { %v17697_v11 = vadd.f32 %v6482_v21, %v17578_v46  ;;  %12471 = vmatprep.mubr.msk.f32.mxu1 %vm12694_vm0, %v12693_v2  ;;  %12563 = vmatpush3.msra.mxu1 %v9510_v40  ;;  %v9507_v46 = vld [vmem:[%s17923_s5 + $0x1e0] sm:$0xff] }
 0x97e   :  { %v12074_v20 = vpop.f32.mrf.mxu1  ;;  %12564 = vmatprep.subr.mxu1 %v12693_v2 }
 0x97f   :  { %12565 = vmatpush3.msra.mxu1 %v9509_v55 }
 0x980   :  { %v6487_v25 = vpop.f32.mrf.mxu1  ;;  %12472 = vmatmul.mubr.msk.f32.gmra.mxu1 %vm2870_vm4, %v17389_v8  ;;  %12566 = vmatprep.subr.mxu1 %v12693_v2 }
 0x981   :  { %v17712_v32 = vadd.f32 %v6487_v25, %v17595_v12  ;;  %12474 = vmatprep.mubr.msk.f32.mxu1 %vm12694_vm0, %v12693_v2  ;;  %12567 = vmatpush3.msra.mxu1 %v9508_v34 }
 0x982   :  { %v12077_v17 = vpop.f32.mrf.mxu1  ;;  %12568 = vmatprep.subr.mxu1 %v12693_v2 }
 0x983   :  { %12569 = vmatpush3.msra.mxu1 %v9507_v46 }
 0x984   :  { %v6492_v61 = vpop.f32.mrf.mxu1  ;;  %12475 = vmatmul.mubr.msk.f32.gmra.mxu1 %vm2870_vm4, %v17398_v39 }
 0x985   :  { %v17720_v8 = vadd.f32 %v6492_v61, %v17606_v62  ;;  %12477 = vmatprep.mubr.msk.f32.mxu1 %vm12694_vm0, %v12693_v2 }
 0x986   :  { %v12080_v12 = vpop.f32.mrf.mxu1 }
 0x988   :  { %v6497_v27 = vpop.f32.mrf.mxu1  ;;  %12478 = vmatmul.mubr.msk.f32.gmra.mxu1 %vm2870_vm4, %v17407_v37 }
 0x989   :  { %v17727_v24 = vadd.f32 %v6497_v27, %v17615_v35  ;;  %12480 = vmatprep.mubr.msk.f32.mxu1 %vm12694_vm0, %v12693_v2 }
 0x98a   :  { %v12083_v13 = vpop.f32.mrf.mxu1 }
 0x98c   :  { %v6502_v28 = vpop.f32.mrf.mxu1  ;;  %12481 = vmatmul.mubr.msk.f32.gmra.mxu1 %vm2870_vm4, %v17416_v58 }
 0x98d   :  { %v17734_v39 = vadd.f32 %v6502_v28, %v17624_v26  ;;  %12483 = vmatprep.mubr.msk.f32.mxu1 %vm12694_vm0, %v12693_v2 }
 0x98e   :  { %v12086_v62 = vpop.f32.mrf.mxu1 }
 0x990   :  { %v6507_v3 = vpop.f32.mrf.mxu1  ;;  %12484 = vmatmul.mubr.msk.f32.gmra.mxu1 %vm2870_vm4, %v17425_v5 }
 0x991   :  { %v17741_v37 = vadd.f32 %v6507_v3, %v17633_v36  ;;  %12486 = vmatprep.mubr.msk.f32.mxu1 %vm12694_vm0, %v12693_v2 }
 0x992   :  { %v12089_v35 = vpop.f32.mrf.mxu1 }
 0x994   :  { %v6512_v14 = vpop.f32.mrf.mxu1  ;;  %12487 = vmatmul.mubr.msk.f32.gmra.mxu1 %vm2870_vm4, %v17437_v10 }
 0x995   :  { %v17748_v58 = vadd.f32 %v6512_v14, %v17642_v51  ;;  %12489 = vmatprep.mubr.msk.f32.mxu1 %vm12694_vm0, %v12693_v2 }
 0x996   :  { %v12092_v26 = vpop.f32.mrf.mxu1 }
 0x998   :  { %v6517_v7 = vpop.f32.mrf.mxu1  ;;  %12490 = vmatmul.mubr.msk.f32.gmra.mxu1 %vm2870_vm4, %v17453_v43 }
 0x999   :  { %v17755_v5 = vadd.f32 %v6517_v7, %v17649_v45  ;;  %12492 = vmatprep.mubr.msk.f32.mxu1 %vm12694_vm0, %v12693_v2 }
 0x99a   :  { %v12095_v36 = vpop.f32.mrf.mxu1 }
 0x99c   :  { %v6522_v31 = vpop.f32.mrf.mxu1  ;;  %12493 = vmatmul.mubr.msk.f32.gmra.mxu1 %vm2870_vm4, %v17467_v44 }
 0x99d   :  { %v17762_v10 = vadd.f32 %v6522_v31, %v17656_v18  ;;  %12495 = vmatprep.mubr.msk.f32.mxu1 %vm12694_vm0, %v12693_v2 }
 0x99e   :  { %v12098_v51 = vpop.f32.mrf.mxu1 }
 0x9a0   :  { %v6832_v6 = vpop.f32.mrf.mxu1  ;;  %12496 = vmatmul.mubr.msk.f32.gmra.mxu1 %vm2870_vm4, %v17477_v23 }
 0x9a1   :  { %v17769_v43 = vadd.f32 %v6832_v6, %v17663_v0  ;;  %12498 = vmatprep.mubr.msk.f32.mxu1 %vm12694_vm0, %v12693_v2 }
 0x9a2   :  { %v12164_v45 = vpop.f32.mrf.mxu1 }
 0x9a4   :  { %v6837_v33 = vpop.f32.mrf.mxu1  ;;  %12499 = vmatmul.mubr.msk.f32.gmra.mxu1 %vm2870_vm4, %v17486_v4 }
 0x9a5   :  { %v17776_v44 = vadd.f32 %v6837_v33, %v17670_v22  ;;  %12501 = vmatprep.mubr.msk.f32.mxu1 %vm12694_vm0, %v12693_v2 }
 0x9a6   :  { %v12167_v18 = vpop.f32.mrf.mxu1 }
 0x9a8   :  { %v6842_v47 = vpop.f32.mrf.mxu1  ;;  %12502 = vmatmul.mubr.msk.f32.gmra.mxu1 %vm2870_vm4, %v17495_v54 }
 0x9a9   :  { %v17783_v23 = vadd.f32 %v6842_v47, %v17677_v49  ;;  %12504 = vmatprep.mubr.msk.f32.mxu1 %vm12694_vm0, %v12693_v2 }
 0x9aa   :  { %v12170_v0 = vpop.f32.mrf.mxu1 }
 0x9ac   :  { %v6847_v63 = vpop.f32.mrf.mxu1  ;;  %12505 = vmatmul.mubr.msk.f32.gmra.mxu1 %vm2870_vm4, %v17504_v1 }
 0x9ad   :  { %v17790_v4 = vadd.f32 %v6847_v63, %v17684_v59  ;;  %12570 = vmatprep.mubr.msk.f32.mxu1 %vm12694_vm0, %v12693_v2 }
 0x9ae   :  { %v12173_v22 = vpop.f32.mrf.mxu1 }
 0x9b0   :  { %v6852_v30 = vpop.f32.mrf.mxu1  ;;  %12571 = vmatmul.mubr.msk.f32.vlgmr.msra.gmra.mxu1 %vm2870_vm4, %v17513_v48 }
 0x9b1   :  { %v17797_v54 = vadd.f32 %v6852_v30, %v17697_v11  ;;  %12573 = vmatprep.mubr.msk.f32.mxu1 %vm12694_vm0, %v12693_v2 }
 0x9b2   :  { %v12176_v49 = vpop.f32.mrf.mxu1 }
 0x9b4   :  { %v6857_v29 = vpop.f32.mrf.mxu1  ;;  %12574 = vmatmul.mubr.msk.f32.gmra.mxu1 %vm2870_vm4, %v17522_v16 }
 0x9b5   :  { %v6901_v1 = vadd.f32 %v6857_v29, %v17712_v32  ;;  %12576 = vmatprep.mubr.msk.f32.mxu1 %vm12694_vm0, %v12693_v2 }
 0x9b6   :  { %v12179_v59 = vpop.f32.mrf.mxu1 }
 0x9b8   :  { %v6862_v60 = vpop.f32.mrf.mxu1  ;;  %12577 = vmatmul.mubr.msk.f32.gmra.mxu1 %vm2870_vm4, %v17531_v57 }
 0x9b9   :  { %v6902_v48 = vadd.f32 %v6862_v60, %v17720_v8  ;;  %12579 = vmatprep.mubr.msk.f32.mxu1 %vm12694_vm0, %v12693_v2 }
 0x9ba   :  { %v12182_v40 = vpop.f32.mrf.mxu1 }
 0x9bc   :  { %v6867_v21 = vpop.f32.mrf.mxu1  ;;  %12580 = vmatmul.mubr.msk.f32.gmra.mxu1 %vm2870_vm4, %v17540_v15 }
 0x9bd   :  { %v6903_v16 = vadd.f32 %v6867_v21, %v17727_v24  ;;  %12582 = vmatprep.mubr.msk.f32.mxu1 %vm12694_vm0, %v12693_v2 }
 0x9be   :  { %v12185_v55 = vpop.f32.mrf.mxu1 }
 0x9c0   :  { %v6872_v11 = vpop.f32.mrf.mxu1  ;;  %12583 = vmatmul.mubr.msk.f32.gmra.mxu1 %vm2870_vm4, %v17549_v50 }
 0x9c1   :  { %v6904_v57 = vadd.f32 %v6872_v11, %v17734_v39  ;;  %12585 = vmatprep.mubr.msk.f32.mxu1 %vm12694_vm0, %v12693_v2 }
 0x9c2   :  { %v12188_v20 = vpop.f32.mrf.mxu1 }
 0x9c4   :  { %v6877_v34 = vpop.f32.mrf.mxu1  ;;  %12586 = vmatmul.mubr.msk.f32.gmra.mxu1 %vm2870_vm4, %v17558_v52 }
 0x9c5   :  { %v6905_v15 = vadd.f32 %v6877_v34, %v17741_v37  ;;  %12588 = vmatprep.mubr.msk.f32.mxu1 %vm12694_vm0, %v12693_v2 }
 0x9c6   :  { %v12191_v25 = vpop.f32.mrf.mxu1 }
 0x9c8   :  { %v6882_v46 = vpop.f32.mrf.mxu1  ;;  %12589 = vmatmul.mubr.msk.f32.gmra.mxu1 %vm2870_vm4, %v17570_v19 }
 0x9c9   :  { %v6906_v50 = vadd.f32 %v6882_v46, %v17748_v58  ;;  %12591 = vmatprep.mubr.msk.f32.mxu1 %vm12694_vm0, %v12693_v2 }
 0x9ca   :  { %v12194_v32 = vpop.f32.mrf.mxu1 }
 0x9cc   :  { %v6887_v17 = vpop.f32.mrf.mxu1  ;;  %12592 = vmatmul.mubr.msk.f32.gmra.mxu1 %vm2870_vm4, %v17586_v56 }
 0x9cd   :  { %v6907_v52 = vadd.f32 %v6887_v17, %v17755_v5  ;;  %12594 = vmatprep.mubr.msk.f32.mxu1 %vm12694_vm0, %v12693_v2 }
 0x9ce   :  { %v12197_v61 = vpop.f32.mrf.mxu1 }
 0x9d0   :  { %v6892_v8 = vpop.f32.mrf.mxu1  ;;  %12595 = vmatmul.mubr.msk.f32.gmra.mxu1 %vm2870_vm4, %v17600_v38 }
 0x9d1   :  { %v6908_v19 = vadd.f32 %v6892_v8, %v17762_v10  ;;  %12597 = vmatprep.mubr.msk.f32.mxu1 %vm12694_vm0, %v12693_v2 }
 0x9d2   :  { %v12200_v12 = vpop.f32.mrf.mxu1 }
 0x9d4   :  { %v7202_v27 = vpop.f32.mrf.mxu1  ;;  %12598 = vmatmul.mubr.msk.f32.gmra.mxu1 %vm2870_vm4, %v17610_v9 }
 0x9d5   :  { %v7266_v56 = vadd.f32 %v7202_v27, %v17769_v43  ;;  %12600 = vmatprep.mubr.msk.f32.mxu1 %vm12694_vm0, %v12693_v2 }
 0x9d6   :  { %v12266_v24 = vpop.f32.mrf.mxu1 }
 0x9d8   :  { %v7207_v13 = vpop.f32.mrf.mxu1  ;;  %12601 = vmatmul.mubr.msk.f32.gmra.mxu1 %vm2870_vm4, %v17619_v53 }
 0x9d9   :  { %v7267_v38 = vadd.f32 %v7207_v13, %v17776_v44  ;;  %12603 = vmatprep.mubr.msk.f32.mxu1 %vm12694_vm0, %v12693_v2 }
 0x9da   :  { %v12269_v28 = vpop.f32.mrf.mxu1 }
 0x9dc   :  { %v7212_v39 = vpop.f32.mrf.mxu1  ;;  %12604 = vmatmul.mubr.msk.f32.gmra.mxu1 %vm2870_vm4, %v17628_v41 }
 0x9dd   :  { %v7268_v9 = vadd.f32 %v7212_v39, %v17783_v23  ;;  %12606 = vmatprep.mubr.msk.f32.mxu1 %vm12694_vm0, %v12693_v2 }
 0x9de   :  { %v12272_v62 = vpop.f32.mrf.mxu1 }
 0x9e0   :  { %v7217_v3 = vpop.f32.mrf.mxu1  ;;  %12607 = vmatmul.mubr.msk.f32.gmra.mxu1 %vm2870_vm4, %v17637_v42 }
 0x9e1   :  { %v7269_v53 = vadd.f32 %v7217_v3, %v17790_v4 }
 0x9e2   :  { %v12275_v37 = vpop.f32.mrf.mxu1 }
 0x9e4   :  { %v7222_v35 = vpop.f32.mrf.mxu1 }
 0x9e5   :  { %v7270_v14 = vadd.f32 %v7222_v35, %v17797_v54 }
 0x9e6   :  { %v12278_v58 = vpop.f32.mrf.mxu1 }
 0x9e8   :  { %v7227_v26 = vpop.f32.mrf.mxu1 }
 0x9e9   :  { %v7271_v7 = vadd.f32 %v7227_v26, %v6901_v1 }
 0x9ea   :  { %v12281_v41 = vpop.f32.mrf.mxu1 }
 0x9ec   :  { %v7232_v5 = vpop.f32.mrf.mxu1 }
 0x9ed   :  { %v7272_v36 = vadd.f32 %v7232_v5, %v6902_v48 }
 0x9ee   :  { %v12284_v31 = vpop.f32.mrf.mxu1 }
 0x9f0   :  { %v7237_v10 = vpop.f32.mrf.mxu1 }
 0x9f1   :  { %v7273_v51 = vadd.f32 %v7237_v10, %v6903_v16 }
 0x9f2   :  { %v12287_v6 = vpop.f32.mrf.mxu1 }
 0x9f4   :  { %v7242_v43 = vpop.f32.mrf.mxu1 }
 0x9f5   :  { %v7274_v45 = vadd.f32 %v7242_v43, %v6904_v57 }
 0x9f6   :  { %v12290_v33 = vpop.f32.mrf.mxu1 }
 0x9f8   :  { %v7247_v42 = vpop.f32.mrf.mxu1 }
 0x9f9   :  { %v7275_v44 = vadd.f32 %v7247_v42, %v6905_v15 }
 0x9fa   :  { %v12293_v18 = vpop.f32.mrf.mxu1 }
 0x9fc   :  { %v7252_v47 = vpop.f32.mrf.mxu1 }
 0x9fd   :  { %v7276_v23 = vadd.f32 %v7252_v47, %v6906_v50 }
 0x9fe   :  { %v12296_v0 = vpop.f32.mrf.mxu1 }
 0xa00   :  { %v7257_v63 = vpop.f32.mrf.mxu1 }
 0xa01   :  { %v7277_v4 = vadd.f32 %v7257_v63, %v6907_v52 }
 0xa02   :  { %v12299_v22 = vpop.f32.mrf.mxu1 }
 0xa04   :  { %v7262_v30 = vpop.f32.mrf.mxu1 }
 0xa05   :  { %v7278_v54 = vadd.f32 %v7262_v30, %v6908_v19 }
 0xa06   :  { %v12302_v49 = vpop.f32.mrf.mxu1 }
 0xa08   :  { %v7572_v29 = vpop.f32.mrf.mxu1 }
 0xa09   :  { %v7636_v1 = vadd.f32 %v7572_v29, %v7266_v56 }
 0xa0a   :  { %v12368_v59 = vpop.f32.mrf.mxu1 }
 0xa0c   :  { %v7577_v60 = vpop.f32.mrf.mxu1 }
 0xa0d   :  { %v7637_v48 = vadd.f32 %v7577_v60, %v7267_v38 }
 0xa0e   :  { %v12371_v40 = vpop.f32.mrf.mxu1 }
 0xa10   :  { %v7582_v21 = vpop.f32.mrf.mxu1 }
 0xa11   :  { %v7638_v16 = vadd.f32 %v7582_v21, %v7268_v9 }
 0xa12   :  { %v12374_v55 = vpop.f32.mrf.mxu1 }
 0xa14   :  { %v7587_v11 = vpop.f32.mrf.mxu1 }
 0xa15   :  { %v7639_v57 = vadd.f32 %v7587_v11, %v7269_v53 }
 0xa16   :  { %v12377_v20 = vpop.f32.mrf.mxu1 }
 0xa18   :  { %v7592_v34 = vpop.f32.mrf.mxu1 }
 0xa19   :  { %v7640_v15 = vadd.f32 %v7592_v34, %v7270_v14 }
 0xa1a   :  { %v12380_v25 = vpop.f32.mrf.mxu1 }
 0xa1c   :  { %v7597_v46 = vpop.f32.mrf.mxu1 }
 0xa1d   :  { %v7641_v50 = vadd.f32 %v7597_v46, %v7271_v7 }
 0xa1e   :  { %v12383_v32 = vpop.f32.mrf.mxu1 }
 0xa20   :  { %v7602_v17 = vpop.f32.mrf.mxu1 }
 0xa21   :  { %v7642_v52 = vadd.f32 %v7602_v17, %v7272_v36 }
 0xa22   :  { %v12386_v61 = vpop.f32.mrf.mxu1 }
 0xa24   :  { %v7607_v8 = vpop.f32.mrf.mxu1 }
 0xa25   :  { %v7643_v19 = vadd.f32 %v7607_v8, %v7273_v51 }
 0xa26   :  { %v12389_v12 = vpop.f32.mrf.mxu1 }
 0xa28   :  { %v7612_v27 = vpop.f32.mrf.mxu1 }
 0xa29   :  { %v7644_v56 = vadd.f32 %v7612_v27, %v7274_v45 }
 0xa2a   :  { %v12392_v24 = vpop.f32.mrf.mxu1 }
 0xa2c   :  { %v7617_v13 = vpop.f32.mrf.mxu1 }
 0xa2d   :  { %v7645_v38 = vadd.f32 %v7617_v13, %v7275_v44 }
 0xa2e   :  { %v12395_v28 = vpop.f32.mrf.mxu1 }
 0xa30   :  { %v7622_v39 = vpop.f32.mrf.mxu1 }
 0xa31   :  { %v17860_v9 = vadd.f32 %v7622_v39, %v7276_v23 }
 0xa32   :  { %v12398_v62 = vpop.f32.mrf.mxu1 }
 0xa34   :  { %v7627_v3 = vpop.f32.mrf.mxu1 }
 0xa35   :  { %v17862_v53 = vadd.f32 %v7627_v3, %v7277_v4 }
 0xa36   :  { %v12401_v37 = vpop.f32.mrf.mxu1 }
 0xa38   :  { %v7632_v35 = vpop.f32.mrf.mxu1 }
 0xa39   :  { %v17864_v14 = vadd.f32 %v7632_v35, %v7278_v54 }
 0xa3a   :  { %v12404_v58 = vpop.f32.mrf.mxu1 }
 0xa3c   :  { %v7942_v26 = vpop.f32.mrf.mxu1 }
 0xa3d   :  { %v8006_v7 = vadd.f32 %v7942_v26, %v7636_v1 }
 0xa3e   :  { %v12470_v41 = vpop.f32.mrf.mxu1 }
 0xa40   :  { %v7947_v5 = vpop.f32.mrf.mxu1 }
 0xa41   :  { %v8007_v36 = vadd.f32 %v7947_v5, %v7637_v48 }
 0xa42   :  { %v12473_v31 = vpop.f32.mrf.mxu1 }
 0xa44   :  { %v7952_v10 = vpop.f32.mrf.mxu1 }
 0xa45   :  { %v17866_v51 = vadd.f32 %v7952_v10, %v7638_v16 }
 0xa46   :  { %v12476_v6 = vpop.f32.mrf.mxu1 }
 0xa48   :  { %v7957_v43 = vpop.f32.mrf.mxu1 }
 0xa49   :  { %v17868_v45 = vadd.f32 %v7957_v43, %v7639_v57 }
 0xa4a   :  { %v12479_v33 = vpop.f32.mrf.mxu1 }
 0xa4b   :  { %v9524_v33 = vld [vmem:[%s17924_s6] ss:$0 sm:$0xff] }
 0xa4c   :  { %v7962_v42 = vpop.f32.mrf.mxu1 }
 0xa4d   :  { %v17870_v44 = vadd.f32 %v7962_v42, %v7640_v15 }
 0xa4e   :  { %v12482_v18 = vpop.f32.mrf.mxu1 }
 0xa50   :  { %v7967_v47 = vpop.f32.mrf.mxu1 }
 0xa51   :  { %v17872_v23 = vadd.f32 %v7967_v47, %v7641_v50 }
 0xa52   :  { %v12485_v0 = vpop.f32.mrf.mxu1 }
 0xa54   :  { %v7972_v63 = vpop.f32.mrf.mxu1 }
 0xa55   :  { %v17874_v4 = vadd.f32 %v7972_v63, %v7642_v52 }
 0xa56   :  { %v12488_v22 = vpop.f32.mrf.mxu1 }
 0xa58   :  { %v7977_v30 = vpop.f32.mrf.mxu1 }
 0xa59   :  { %v8013_v54 = vadd.f32 %v7977_v30, %v7643_v19 }
 0xa5a   :  { %v12491_v49 = vpop.f32.mrf.mxu1 }
 0xa5c   :  { %v7982_v29 = vpop.f32.mrf.mxu1 }
 0xa5d   :  { %v8014_v1 = vadd.f32 %v7982_v29, %v7644_v56 }
 0xa5e   :  { %v12494_v59 = vpop.f32.mrf.mxu1 }
 0xa60   :  { %v7987_v60 = vpop.f32.mrf.mxu1 }
 0xa61   :  { %v8015_v48 = vadd.f32 %v7987_v60, %v7645_v38 }
 0xa62   :  { %v12497_v40 = vpop.f32.mrf.mxu1 }
 0xa64   :  { %v7992_v21 = vpop.f32.mrf.mxu1 }
 0xa65   :  { %v8016_v5 = vadd.f32 %v7992_v21, %v17860_v9 }
 0xa66   :  { %v12500_v16 = vpop.f32.mrf.mxu1 }
 0xa68   :  { %v7997_v55 = vpop.f32.mrf.mxu1 }
 0xa6a   :  { %v12503_v11 = vpop.f32.mrf.mxu1 }
 0xa6c   :  { %v8002_v57 = vpop.f32.mrf.mxu1 }
 0xa6e   :  { %v12506_v20 = vpop.f32.mrf.mxu1 }
 0xa70   :  { %v8312_v34 = vpop.f32.mrf.mxu1 }
 0xa71   :  { %v17876_v15 = vadd.f32 %v8312_v34, %v8006_v7  ;;  %v8017_v7 = vadd.f32 %v7997_v55, %v17862_v53 }
 0xa72   :  { %v12572_v25 = vpop.f32.mrf.mxu1 }
 0xa74   :  { %v8317_v46 = vpop.f32.mrf.mxu1 }
 0xa75   :  { %v17878_v50 = vadd.f32 %v8317_v46, %v8007_v36  ;;  %v8018_v36 = vadd.f32 %v8002_v57, %v17864_v14 }
 0xa76   :  { %v12575_v32 = vpop.f32.mrf.mxu1 }
 0xa78   :  { %v8322_v17 = vpop.f32.mrf.mxu1 }
 0xa7a   :  { %v12578_v52 = vpop.f32.mrf.mxu1 }
 0xa7c   :  { %v8327_v61 = vpop.f32.mrf.mxu1 }
 0xa7e   :  { %v12581_v8 = vpop.f32.mrf.mxu1 }
 0xa80   :  { %v8332_v19 = vpop.f32.mrf.mxu1 }
 0xa82   :  { %v12584_v12 = vpop.f32.mrf.mxu1 }
 0xa84   :  { %v8337_v27 = vpop.f32.mrf.mxu1 }
 0xa85   :  { %v8381_v60 = vadd.f32 %v8337_v27, %v17872_v23  ;;  %v8378_v23 = vadd.f32 %v8322_v17, %v17866_v51  ;;  %v8396_v51 = vadd.f32 %v9524_v33, %v17876_v15  ;;  %v8502_v15 = vld [vmem:[%s17926_s8] sm:$0xf] }
 0xa86   :  { %v12587_v56 = vpop.f32.mrf.mxu1 }
 0xa87   :  { %v8401_v16 = vadd.f32 %v9524_v33, %v8381_v60  ;;  %v8398_v34 = vadd.f32 %v9524_v33, %v8378_v23  ;;  %v8409_v52 = vmax.f32 %v8396_v51, 0.0 }
 0xa88   :  { %v8342_v24 = vpop.f32.mrf.mxu1 }
 0xa89   :  { %v8382_v14 = vadd.f32 %v8342_v24, %v17874_v4  ;;  %v8379_v4 = vadd.f32 %v8327_v61, %v17868_v45  ;;  %v8414_v20 = vmax.f32 %v8401_v16, 0.0  ;;  %v8397_v45 = vadd.f32 %v9524_v33, %v17878_v50  ;;  %v8422_v50 = vld [vmem:[%s17925_s7] sm:$0xf]  ;;  %s12649_s7 = scalar_lea.vmem %s8532_s15, 64 }
 0xa8a   :  { %v12590_v13 = vpop.f32.mrf.mxu1  ;;  %v8411_v32 = vmax.f32 %v8398_v34, 0.0  ;;  %p12650_p0 = scmp.ne.s32.totalorder %s8532_s15, %s12649_s7  ;;  %p12655_p2 = scmp.lt.s32.totalorder %s12649_s7, %s12649_s7 }
 0xa8b   :  { %v8402_v40 = vadd.f32 %v9524_v33, %v8382_v14  ;;  %v8410_v17 = vmax.f32 %v8397_v45, 0.0 }
 0xa8c   :  { %v8347_v38 = vpop.f32.mrf.mxu1  ;;  %p12656_p3 = por %p12655_p2, %p12654_p1 }
 0xa8d   :  { %v8383_v30 = vadd.f32 %v8347_v38, %v8013_v54  ;;  %v8380_v54 = vadd.f32 %v8332_v19, %v17870_v44  ;;  %v8415_v57 = vmax.f32 %v8402_v40, 0.0  ;;  %v8399_v44 = vadd.f32 %v9524_v33, %v8379_v4 }
 0xa8e   :  { %v12593_v28 = vpop.f32.mrf.mxu1  ;;  %p12657_p4 = pnand %p12656_p3, %p12650_p0 }
 0xa8f   :  { %v8400_v11 = vadd.f32 %v9524_v33, %v8380_v54  ;;  %v8412_v46 = vmax.f32 %v8399_v44, 0.0 }
 0xa90   :  { %v8352_v39 = vpop.f32.mrf.mxu1 }
 0xa91   :  { %v8384_v63 = vadd.f32 %v8352_v39, %v8014_v1  ;;  %v8413_v25 = vmax.f32 %v8400_v11, 0.0 }
 0xa92   :  { %v12596_v62 = vpop.f32.mrf.mxu1 }
 0xa93   :  { %v8404_v29 = vadd.f32 %v9524_v33, %v8384_v63 }
 0xa94   :  { %v8357_v3 = vpop.f32.mrf.mxu1 }
 0xa95   :  { %v8385_v18 = vadd.f32 %v8357_v3, %v8015_v48  ;;  %v8403_v48 = vadd.f32 %v9524_v33, %v8383_v30  ;;  %v8417_v21 = vmax.f32 %v8404_v29, 0.0 }
 0xa96   :  { %v12599_v37 = vpop.f32.mrf.mxu1 }
 0xa97   :  { %v8405_v49 = vadd.f32 %v9524_v33, %v8385_v18  ;;  %v8416_v55 = vmax.f32 %v8403_v48, 0.0 }
 0xa98   :  { %v8362_v35 = vpop.f32.mrf.mxu1 }
 0xa99   :  { %v8386_v6 = vadd.f32 %v8362_v35, %v8016_v5  ;;  %v8418_v1 = vmax.f32 %v8405_v49, 0.0 }
 0xa9a   :  { %v12602_v58 = vpop.f32.mrf.mxu1 }
 0xa9b   :  { %v8406_v22 = vadd.f32 %v9524_v33, %v8386_v6 }
 0xa9c   :  { %v8367_v26 = vpop.f32.mrf.mxu1 }
 0xa9d   :  { %v8387_v31 = vadd.f32 %v8367_v26, %v8017_v7  ;;  %v8419_v59 = vmax.f32 %v8406_v22, 0.0 }
 0xa9e   :  { %v12605_v41 = vpop.f32.mrf.mxu1 }
 0xa9f   :  { %v8407_v47 = vadd.f32 %v9524_v33, %v8387_v31 }
 0xaa0   :  { %v8372_v10 = vpop.f32.mrf.mxu1 }
 0xaa1   :  { %v8388_v43 = vadd.f32 %v8372_v10, %v8018_v36  ;;  %v8420_v9 = vmax.f32 %v8407_v47, 0.0 }
 0xaa2   :  { %v12608_v42 = vpop.f32.mrf.mxu1 }
 0xaa3   :  { %v8408_v0 = vadd.f32 %v9524_v33, %v8388_v43 }
 0xaa5   :  { %v8421_v53 = vmax.f32 %v8408_v0, 0.0 }
 0xaa7   :  { %12610 = vmatpush3.msk.msra.mxu0 %vm1967_vm3, %v8421_v53 }
 0xaa8   :  { %12611 = vmatprep.subr.mxu0 %v12693_v2 }
 0xaa9   :  { %12612 = vmatpush3.msra.mxu0 %v8420_v9 }
 0xaaa   :  { %12613 = vmatprep.subr.mxu0 %v12693_v2 }
 0xaab   :  { %12614 = vmatpush3.msra.mxu0 %v8419_v59 }
 0xaac   :  { %12615 = vmatprep.subr.mxu0 %v12693_v2 }
 0xaad   :  { %12616 = vmatpush3.msra.mxu0 %v8418_v1 }
 0xaae   :  { %12617 = vmatprep.subr.mxu0 %v12693_v2 }
 0xaaf   :  { %12618 = vmatpush3.msra.mxu0 %v8417_v21 }
 0xab0   :  { %12619 = vmatprep.subr.mxu0 %v12693_v2 }
 0xab1   :  { %12620 = vmatpush3.msra.mxu0 %v8416_v55 }
 0xab2   :  { %12621 = vmatprep.subr.mxu0 %v12693_v2 }
 0xab3   :  { %12622 = vmatpush3.msra.mxu0 %v8415_v57 }
 0xab4   :  { %12623 = vmatprep.subr.mxu0 %v12693_v2 }
 0xab5   :  { %12624 = vmatpush3.msra.mxu0 %v8414_v20 }
 0xab6   :  { %12625 = vmatprep.subr.mxu0 %v12693_v2 }
 0xab7   :  { %12626 = vmatpush3.msra.mxu0 %v8413_v25 }
 0xab8   :  { %12627 = vmatprep.subr.mxu0 %v12693_v2 }
 0xab9   :  { %12628 = vmatpush3.msra.mxu0 %v8412_v46 }
 0xaba   :  { %12629 = vmatprep.subr.mxu0 %v12693_v2 }
 0xabb   :  { %12630 = vmatpush3.msra.mxu0 %v8411_v32 }
 0xabc   :  { %12631 = vmatprep.subr.mxu0 %v12693_v2 }
 0xabd   :  { %12632 = vmatpush3.msra.mxu0 %v8410_v17 }
 0xabe   :  { %12633 = vmatprep.subr.mxu0 %v12693_v2 }
 0xabf   :  { %12634 = vmatpush3.msra.mxu0 %v8409_v52 }
 0xac0   :  { %12636 = vmatmul.mubr.msk.f32.vlgmr.msra.gmra.mxu0 %vm8423_vm5, %v8422_v50 }
 0xb80   :  { %v8496_v61 = vpop.f32.mrf.mxu0 }
 0xb81   :  { %v8503_v8 = vmul.f32 %v8502_v15, %v8496_v61  ;;  %8501 = vst.msk [vmem:[#allocation3] sm:$0xf] %vm8500_vm6, %v8496_v61 }
 0xb82   :  { %v12637_v19 = vpop.f32.mrf.mxu0 }
 0xb83   :  { %v8504_v12 = vsel %vm8500_vm6, %v8503_v8, 0.0 }
 0xb84   :  { %8505 = vadd.xlane.f32.xlu0 %v8504_v12 }
 0xb85   :  { %12660 = shalt.err (!%p12657_p4)
}
 0xb86   :  { %8534 = dma.vmem_to_hbm [thread:$0]  %s8532_s15, 64, %s17928_s10, [#allocation4]   ;;  %v8514_v39 = vld [vmem:[#allocation2] sm:$0x1]  ;;  %vm8523_vm7 = vcmask 0  }
 0xb87   :  { %s12696_s0 = smov [#allocation5]  }
 0xb88   :  { %s8541_s2 = sshll.u32 %s12696_s0, 4  ;;  %s8542_s2 = int_to_ptr.vmem [resolvable:$true] %s8541_s2 }
 0xb89   :  { %s12669_s10 = scalar_lea.vmem %s8542_s2, 16  ;;  %s12673_s4 = scalar_lea.vmem %s8542_s2, 32 }
 0xb8a   :  { %p12670_p5 = scmp.ne.s32.totalorder %s8542_s2, %s12669_s10  ;;  %p12674_p6 = scmp.lt.s32.totalorder %s8542_s2, %s8542_s2 }
 0xb8b   :  { %p12675_p7 = scmp.lt.s32.totalorder %s12673_s4, %s12669_s10 }
 0xb8d   :  { %p12676_p8 = por %p12675_p7, %p12674_p6 }
 0xb8f   :  { %p12677_p9 = pnand %p12676_p8, %p12670_p5 }
 0xc0d   :  { %v8506_v2 = vpop.xlane.xlu0 %8505 }
 0xc0e   :  { %v8507_v27 = vrot.slane %v8506_v2, 4 }
 0xc10   :  { %v8508_v56 = vadd.f32 %v8507_v27, %v8506_v2 }
 0xc12   :  { %v8509_v24 = vrot.slane %v8508_v56, 2 }
 0xc14   :  { %v8510_v13 = vadd.f32 %v8509_v24, %v8508_v56 }
 0xc16   :  { %v8511_v38 = vrot.slane %v8510_v13, 1 }
 0xc18   :  { %v8512_v28 = vadd.f32 %v8511_v38, %v8510_v13 }
 0xc1a   :  { %12638 = vpush %v8512_v28 }
 0xc4b   :  { %s12639_s8 = spop %12638 }
 0xc4c   :  { %v8515_v62 = vstv %s12639_s8 }
 0xc4d   :  { %v8516_v3 = vadd.f32 %v8515_v62, %v8514_v39 }
 0xc4f   :  { %v8517_v37 = vsub.f32 %v8516_v3, %v8516_v3 }
 0xc51   :  { %v8518_v35 = vmul.f32 1.442695, %v8517_v37 }
 0xc53   :  { %12644 = vpow2.f32 %v8518_v35 }
 0xc60   :  { %v12645_v58 = vpop.eup %12644 }
 0xc61   :  { %12646 = vrcp.f32 %v12645_v58 }
 0xc6e   :  { %v12647_v26 = vpop.eup %12646 }
 0xc6f   :  { %v8522_v7 = vmul.f32 %v12647_v26, %v12645_v58 }
 0xc71   :  { %8524 = vst.msk [vmem:[#allocation5] sm:$0x1] %vm8523_vm7, %v8522_v7 }
 0xc72   :  { %12680 = shalt.err (!%p12677_p9)
}
 0xc73   :  { %8544 = dma.vmem_to_hbm [thread:$0]  %s8542_s2, 16, %s17929_s11, [#allocation6]  }
 0xc74   :  { %12689 = dma.done.wait [#allocation4], 64  }
 0xc75   :  { %12690 = vsyncadd [#allocation4], 4294967232 }
 0xc76   :  { %12691 = dma.done.wait [#allocation6], 16  }
 0xc77   :  { %12692 = vsyncadd [#allocation6], 4294967280 }
 0xc78   :  { %8551 = vsyncpa [#allocation4], 1 }
 0xc79   :  { %8552 = vsyncpa [#allocation6], 1 }

</bundles_post_ra>
